<compile_context>
chip_gen: v6e
topology: v6e:2x2x1
jax: 0.10.0
libtpu: 0.0.40
codegen_flags: <defaults>
</compile_context>

<pallas_src>
import jax
import jax.numpy as jnp
import numpy as np
from jax.experimental import pallas as pl
from jax.experimental.pallas import tpu as pltpu

C_IN = 128          # GLU in/out channels
C_MID = 64          # hidden channels per branch
C2 = 2 * C_MID      # merged (left | right) lane width == 128
KSIZE = 11          # dilated conv kernel size


def _round_up(x, m):
    return (x + m - 1) // m * m


def make_glu_kernel(B, T, dila_rate):
    d = int(dila_rate)
    pad = d * 10 // 2                 # same as np.int(dila_rate * 10 / 2)
    S = _round_up(pad, 8)             # sublane-aligned start of the act rows
    H = S + T + pad                   # scratch height
    base = S - pad                    # scratch row of conceptual padded row 0

    def glu_kernel(x_ref,                               # (B, 128, T)   NCW
                   w_in_ref, b_in_ref, a_in_ref,        # (128,128),(1,128),(1,128)
                   w_tap_ref, b_tap_ref,                # (11,128,128),(1,128)
                   w_out_ref, b_out_ref, a_out_ref,     # (128,128),(128,1),(128,1)
                   o_ref,                               # (B, 128, T)
                   pad_ref):                            # scratch (H, 128) f32
        md = w_in_ref.dtype           # matmul input dtype (f32 by default)

        # Only the pad boundary rows need zeroing; the interior [S, S+T) is
        # fully overwritten for every batch element below.  Unconditional so it
        # stays correct when the parallel grid axis is sharded across cores.
        pad_ref[pl.ds(0, S), :] = jnp.zeros((S, C2), jnp.float32)
        pad_ref[pl.ds(S + T, pad), :] = jnp.zeros((pad, C2), jnp.float32)

        b_in = b_in_ref[...]          # (1, 128)
        a_in = a_in_ref[...]          # (1, 128)
        b_tap = b_tap_ref[...]        # (1, 128)

        for b in range(B):            # static unroll over batch block
            x_ct = x_ref[b]                                   # (128, T) f32
            x_tc = x_ct.T                                     # (T, 128) in-kernel

            # in_conv (1x1) duplicated to both branches + per-branch PReLU.
            h = jnp.dot(x_tc.astype(md), w_in_ref[...],
                        preferred_element_type=jnp.float32) + b_in   # (T, 128)
            act = jnp.where(h > 0, h, a_in * h)               # [act_l | act_r]

            # Zero-padded (in time) activation, sublane-aligned store.
            pad_ref[pl.ds(S, T), :] = act

            # Dilated k=11 conv for BOTH branches: 11 shifted (T,128)@(128,128)
            # matmuls against block-diagonal per-tap weights, f32 accumulation.
            win0 = pad_ref[pl.ds(base, T), :]
            acc = b_tap + jnp.dot(win0.astype(md), w_tap_ref[0],
                                  preferred_element_type=jnp.float32)
            for k in range(1, KSIZE):
                off = base + k * d                            # static offset
                win = pad_ref[pl.ds(off, T), :]
                acc = acc + jnp.dot(win.astype(md), w_tap_ref[k],
                                    preferred_element_type=jnp.float32)

            # GLU gate, lane-dense: roll sigmoid(acc) by 64 lanes so lanes
            # [0,64) of `gate` hold sigmoid(acc_right); the garbage in the
            # upper 64 lanes of the product is killed by the zero rows of the
            # padded out_conv weight.
            gate = pltpu.roll(jax.nn.sigmoid(acc), shift=C_MID, axis=1)
            glu = acc * gate                                  # (T, 128)

            # out_conv (1x1) -> back to channel-major, residual + PReLU(128).
            y_tc = jnp.dot(glu.astype(md), w_out_ref[...],
                           preferred_element_type=jnp.float32)  # (T, 128)
            y_ct = y_tc.T + b_out_ref[...] + x_ct               # (128, T)
            y_ct = jnp.where(y_ct > 0, y_ct, a_out_ref[...] * y_ct)
            o_ref[b] = y_ct.astype(o_ref.dtype)

    return glu_kernel, H


def _fuse_params(params, matmul_dtype):
    """Build merged-lane / block-diagonal weights once at trace time."""
    w_l, w_r = params["w_l"], params["w_r"]
    zeros_k = jnp.zeros((KSIZE, C_MID, C_MID), w_l.dtype)
    w_tap = jnp.concatenate(
        [jnp.concatenate([w_l, zeros_k], axis=2),     # [[w_l, 0],
         jnp.concatenate([zeros_k, w_r], axis=2)],    #  [0, w_r]]
        axis=1)                                       # (K, 128, 128)
    w_out_pad = jnp.concatenate(
        [params["w_out"], jnp.zeros((C_MID, C_IN), params["w_out"].dtype)],
        axis=0)                                       # (128, 128)
    return {
        "w_in": jnp.concatenate([params["w_in"], params["w_in"]],
                                axis=1).astype(matmul_dtype),      # (128,128)
        "b_in": jnp.concatenate([params["b_in"], params["b_in"]], axis=1),
        "a_in": jnp.concatenate([params["a_l"], params["a_r"]], axis=1),
        "w_tap": w_tap.astype(matmul_dtype),
        "b_tap": jnp.concatenate([params["b_l"], params["b_r"]], axis=1),
        "w_out": w_out_pad.astype(matmul_dtype),
        "b_out": params["b_out"].reshape(C_IN, 1),
        "a_out": params["a_out"].reshape(C_IN, 1),
    }


def glu_forward(x_nct, params, dila_rate, *, b_blk=2,
                matmul_dtype=jnp.float32):
    """x_nct: (N, 128, T) float32 (PyTorch NCW).  Returns (N, 128, T).

    matmul_dtype=jnp.bfloat16 enables the bf16-input / f32-accumulate MXU path
    on real v6e/v7x hardware; keep the default f32 on interpret / v5e.
    """
    N, C, T = x_nct.shape
    assert C == C_IN
    assert T % 8 == 0, "time dim must be a multiple of 8 (sublane)"
    B = max(1, min(b_blk, N))
    while N % B:                      # keep the grid exact
        B -= 1

    p = _fuse_params(params, matmul_dtype)
    kernel, H = make_glu_kernel(B, T, dila_rate)

    def full(arr):                    # full-array block, broadcast to all steps
        nd = arr.ndim
        return pl.BlockSpec(arr.shape, lambda i, _nd=nd: (0,) * _nd)

    out = pl.pallas_call(
        kernel,
        out_shape=jax.ShapeDtypeStruct((N, C_IN, T), x_nct.dtype),
        grid=(N // B,),
        in_specs=[
            pl.BlockSpec((B, C_IN, T), lambda i: (i, 0, 0)),      # x (NCW)
            full(p["w_in"]), full(p["b_in"]), full(p["a_in"]),
            full(p["w_tap"]), full(p["b_tap"]),
            full(p["w_out"]), full(p["b_out"]), full(p["a_out"]),
        ],
        out_specs=pl.BlockSpec((B, C_IN, T), lambda i: (i, 0, 0)),
        scratch_shapes=[pltpu.VMEM((H, C2), jnp.float32)],
        compiler_params=pltpu.CompilerParams(
            dimension_semantics=("parallel",)),
    )(x_nct,
      p["w_in"], p["b_in"], p["a_in"],
      p["w_tap"], p["b_tap"],
      p["w_out"], p["b_out"], p["a_out"])
    return out


def ref_forward(x_nct, p, dila_rate):
    """Pure-JAX f32 reference (same math, NTC formulation) for verification."""
    N, C, T = x_nct.shape
    d = int(dila_rate)
    pad = d * 10 // 2
    x = jnp.transpose(x_nct, (0, 2, 1))
    h = jnp.einsum("ntc,cd->ntd", x, p["w_in"]) + p["b_in"]
    act_l = jnp.where(h > 0, h, p["a_l"] * h)
    act_r = jnp.where(h > 0, h, p["a_r"] * h)
    pl_ = jnp.pad(act_l, ((0, 0), (pad, pad), (0, 0)))
    pr_ = jnp.pad(act_r, ((0, 0), (pad, pad), (0, 0)))
    acc_l = jnp.zeros((N, T, C_MID)) + p["b_l"]
    acc_r = jnp.zeros((N, T, C_MID)) + p["b_r"]
    for k in range(KSIZE):
        acc_l = acc_l + jnp.einsum("ntc,cd->ntd",
                                   pl_[:, k * d:k * d + T, :], p["w_l"][k])
        acc_r = acc_r + jnp.einsum("ntc,cd->ntd",
                                   pr_[:, k * d:k * d + T, :], p["w_r"][k])
    glu = acc_l * jax.nn.sigmoid(acc_r)
    y = jnp.einsum("ntc,cd->ntd", glu, p["w_out"]) + p["b_out"] + x
    y = jnp.where(y > 0, y, p["a_out"] * y)
    return jnp.transpose(y, (0, 2, 1))


def init_params(key):
    ks = jax.random.split(key, 8)
    scale = 0.05
    return {
        # 1x1 convs stored as (Cin, Cout); dilated convs as (K, Cin, Cout)
        "w_in":  scale * jax.random.normal(ks[0], (C_IN, C_MID), jnp.float32),
        "b_in":  scale * jax.random.normal(ks[1], (1, C_MID), jnp.float32),
        "a_l":   jnp.full((1, C_MID), 0.25, jnp.float32),   # PReLU init = 0.25
        "a_r":   jnp.full((1, C_MID), 0.25, jnp.float32),
        "w_l":   scale * jax.random.normal(ks[2], (KSIZE, C_MID, C_MID), jnp.float32),
        "b_l":   scale * jax.random.normal(ks[3], (1, C_MID), jnp.float32),
        "w_r":   scale * jax.random.normal(ks[4], (KSIZE, C_MID, C_MID), jnp.float32),
        "b_r":   scale * jax.random.normal(ks[5], (1, C_MID), jnp.float32),
        "w_out": scale * jax.random.normal(ks[6], (C_MID, C_IN), jnp.float32),
        "b_out": scale * jax.random.normal(ks[7], (1, C_IN), jnp.float32),
        "a_out": jnp.full((1, C_IN), 0.25, jnp.float32),
    }


if __name__ == "__main__":
    key = jax.random.PRNGKey(0)
    pkey, xkey = jax.random.split(key)
    params = init_params(pkey)

    N, T = 4, 128
    dila_rate = 2
    x = jax.random.normal(xkey, (N, C_IN, T), jnp.float32)   # NCW, like PyTorch

    ref = jax.block_until_ready(ref_forward(x, params, dila_rate))

    # f32 matmul path only (exact check against the f32 reference).  The bf16
    # MXU path is intentionally not exercised here: the interpreter / CPU dot
    # thunk does not support BF16 x BF16 = F32.  Pass
    # matmul_dtype=jnp.bfloat16 to glu_forward on real v6e/v7x hardware.
    out = jax.block_until_ready(glu_forward(x, params, dila_rate, b_blk=2))
    assert out.shape == (N, C_IN, T)
    np.testing.assert_allclose(np.asarray(out), np.asarray(ref),
                               rtol=1e-4, atol=1e-4)

    print("KERNEL_OK")
</pallas_src>

<mosaic_0001>
module attributes {stable_mosaic.version = 11 : i64} {
  func.func @glu_kernel(%arg0: i32, %arg1: memref<2x128x128xf32, #tpu.memory_space<vmem>>, %arg2: memref<128x128xf32, #tpu.memory_space<vmem>>, %arg3: memref<1x128xf32, #tpu.memory_space<vmem>>, %arg4: memref<1x128xf32, #tpu.memory_space<vmem>>, %arg5: memref<11x128x128xf32, #tpu.memory_space<vmem>>, %arg6: memref<1x128xf32, #tpu.memory_space<vmem>>, %arg7: memref<128x128xf32, #tpu.memory_space<vmem>>, %arg8: memref<128x1xf32, #tpu.memory_space<vmem>>, %arg9: memref<128x1xf32, #tpu.memory_space<vmem>>, %arg10: memref<2x128x128xf32, #tpu.memory_space<vmem>>, %arg11: memref<154x128xf32, #tpu.memory_space<vmem>>) attributes {dimension_semantics = [#tpu.dimension_semantics<parallel>], iteration_bounds = array<i64: 2>, scalar_prefetch = 0 : i64, scratch_operands = 1 : i64, tpu.core_type = #tpu.core_type<tc>, window_params = [{transform_indices = @transform_0, window_bounds = array<i64: 2, 128, 128>}, {pipeline_mode = #tpu.pipeline_mode<synchronous>, transform_indices = @transform_1, window_bounds = array<i64: 128, 128>}, {pipeline_mode = #tpu.pipeline_mode<synchronous>, transform_indices = @transform_2, window_bounds = array<i64: 1, 128>}, {pipeline_mode = #tpu.pipeline_mode<synchronous>, transform_indices = @transform_3, window_bounds = array<i64: 1, 128>}, {pipeline_mode = #tpu.pipeline_mode<synchronous>, transform_indices = @transform_4, window_bounds = array<i64: 11, 128, 128>}, {pipeline_mode = #tpu.pipeline_mode<synchronous>, transform_indices = @transform_5, window_bounds = array<i64: 1, 128>}, {pipeline_mode = #tpu.pipeline_mode<synchronous>, transform_indices = @transform_6, window_bounds = array<i64: 128, 128>}, {pipeline_mode = #tpu.pipeline_mode<synchronous>, transform_indices = @transform_7, window_bounds = array<i64: 128, 1>}, {pipeline_mode = #tpu.pipeline_mode<synchronous>, transform_indices = @transform_8, window_bounds = array<i64: 128, 1>}, {transform_indices = @transform_9, window_bounds = array<i64: 2, 128, 128>}]} {
    %cst = arith.constant 0.000000e+00 : f32
    %0 = vector.broadcast %cst : f32 to vector<16x128xf32>
    %c0 = arith.constant 0 : index
    %c0_0 = arith.constant 0 : index
    %1 = vector.load %arg11[%c0, %c0_0] : memref<154x128xf32, #tpu.memory_space<vmem>>, vector<16x128xf32>
    tpu.vector_store %arg11[%c0, %c0_0], %0 {strides = array<i32>} : memref<154x128xf32, #tpu.memory_space<vmem>>, vector<16x128xf32>,
    %cst_1 = arith.constant 0.000000e+00 : f32
    %2 = vector.broadcast %cst_1 : f32 to vector<10x128xf32>
    %c144 = arith.constant 144 : index
    %c0_2 = arith.constant 0 : index
    %3 = vector.load %arg11[%c144, %c0_2] : memref<154x128xf32, #tpu.memory_space<vmem>>, vector<10x128xf32>
    tpu.vector_store %arg11[%c144, %c0_2], %2 {strides = array<i32>} : memref<154x128xf32, #tpu.memory_space<vmem>>, vector<10x128xf32>,
    %c0_3 = arith.constant 0 : index
    %c0_4 = arith.constant 0 : index
    %4 = vector.load %arg3[%c0_3, %c0_4] : memref<1x128xf32, #tpu.memory_space<vmem>>, vector<1x128xf32>
    %c0_5 = arith.constant 0 : index
    %c0_6 = arith.constant 0 : index
    %5 = vector.load %arg4[%c0_5, %c0_6] : memref<1x128xf32, #tpu.memory_space<vmem>>, vector<1x128xf32>
    %c0_7 = arith.constant 0 : index
    %c0_8 = arith.constant 0 : index
    %6 = vector.load %arg6[%c0_7, %c0_8] : memref<1x128xf32, #tpu.memory_space<vmem>>, vector<1x128xf32>
    %c0_9 = arith.constant 0 : index
    %c0_10 = arith.constant 0 : index
    %c0_11 = arith.constant 0 : index
    %7 = vector.load %arg1[%c0_9, %c0_10, %c0_11] : memref<2x128x128xf32, #tpu.memory_space<vmem>>, vector<1x128x128xf32>
    %8 = vector.shape_cast %7 : vector<1x128x128xf32> to vector<128x128xf32>
    %9 = tpu.transpose %8, [1, 0] : vector<128x128xf32> -> vector<128x128xf32>
    %c0_12 = arith.constant 0 : index
    %c0_13 = arith.constant 0 : index
    %10 = vector.load %arg2[%c0_12, %c0_13] : memref<128x128xf32, #tpu.memory_space<vmem>>, vector<128x128xf32>
    %cst_14 = arith.constant dense<0.000000e+00> : vector<128x128xf32>
    %11 = tpu.matmul %9, %10, %cst_14 {dimension_numbers = #tpu.dot_dimension_numbers<[1], [0], [0], [1], [0, 0, 1, 1], [], []>} : vector<128x128xf32>, vector<128x128xf32>, vector<128x128xf32> -> vector<128x128xf32>
    %12 = vector.broadcast %4 : vector<1x128xf32> to vector<128x128xf32>
    %13 = arith.addf %11, %12 : vector<128x128xf32>
    %cst_15 = arith.constant 0.000000e+00 : f32
    %14 = vector.broadcast %cst_15 : f32 to vector<128x128xf32>
    %15 = arith.cmpf ogt, %13, %14 : vector<128x128xf32>
    %16 = vector.broadcast %5 : vector<1x128xf32> to vector<128x128xf32>
    %17 = arith.mulf %16, %13 : vector<128x128xf32>
    %18 = arith.select %15, %13, %17 : vector<128x128xi1>, vector<128x128xf32>
    %c16 = arith.constant 16 : index
    %c0_16 = arith.constant 0 : index
    %19 = vector.load %arg11[%c16, %c0_16] : memref<154x128xf32, #tpu.memory_space<vmem>>, vector<128x128xf32>
    tpu.vector_store %arg11[%c16, %c0_16], %18 {strides = array<i32>} : memref<154x128xf32, #tpu.memory_space<vmem>>, vector<128x128xf32>,
    %c6 = arith.constant 6 : index
    %c0_17 = arith.constant 0 : index
    %20 = vector.load %arg11[%c6, %c0_17] : memref<154x128xf32, #tpu.memory_space<vmem>>, vector<128x128xf32>
    %c0_18 = arith.constant 0 : index
    %c0_19 = arith.constant 0 : index
    %c0_20 = arith.constant 0 : index
    %21 = vector.load %arg5[%c0_18, %c0_19, %c0_20] : memref<11x128x128xf32, #tpu.memory_space<vmem>>, vector<1x128x128xf32>
    %22 = vector.shape_cast %21 : vector<1x128x128xf32> to vector<128x128xf32>
    %cst_21 = arith.constant dense<0.000000e+00> : vector<128x128xf32>
    %23 = tpu.matmul %20, %22, %cst_21 {dimension_numbers = #tpu.dot_dimension_numbers<[1], [0], [0], [1], [0, 0, 1, 1], [], []>} : vector<128x128xf32>, vector<128x128xf32>, vector<128x128xf32> -> vector<128x128xf32>
    %24 = vector.broadcast %6 : vector<1x128xf32> to vector<128x128xf32>
    %25 = arith.addf %24, %23 : vector<128x128xf32>
    %c8 = arith.constant 8 : index
    %c0_22 = arith.constant 0 : index
    %26 = vector.load %arg11[%c8, %c0_22] : memref<154x128xf32, #tpu.memory_space<vmem>>, vector<128x128xf32>
    %c1 = arith.constant 1 : index
    %c0_23 = arith.constant 0 : index
    %c0_24 = arith.constant 0 : index
    %27 = vector.load %arg5[%c1, %c0_23, %c0_24] : memref<11x128x128xf32, #tpu.memory_space<vmem>>, vector<1x128x128xf32>
    %28 = vector.shape_cast %27 : vector<1x128x128xf32> to vector<128x128xf32>
    %cst_25 = arith.constant dense<0.000000e+00> : vector<128x128xf32>
    %29 = tpu.matmul %26, %28, %cst_25 {dimension_numbers = #tpu.dot_dimension_numbers<[1], [0], [0], [1], [0, 0, 1, 1], [], []>} : vector<128x128xf32>, vector<128x128xf32>, vector<128x128xf32> -> vector<128x128xf32>
    %30 = arith.addf %25, %29 : vector<128x128xf32>
    %c10 = arith.constant 10 : index
    %c0_26 = arith.constant 0 : index
    %31 = vector.load %arg11[%c10, %c0_26] : memref<154x128xf32, #tpu.memory_space<vmem>>, vector<128x128xf32>
    %c2 = arith.constant 2 : index
    %c0_27 = arith.constant 0 : index
    %c0_28 = arith.constant 0 : index
    %32 = vector.load %arg5[%c2, %c0_27, %c0_28] : memref<11x128x128xf32, #tpu.memory_space<vmem>>, vector<1x128x128xf32>
    %33 = vector.shape_cast %32 : vector<1x128x128xf32> to vector<128x128xf32>
    %cst_29 = arith.constant dense<0.000000e+00> : vector<128x128xf32>
    %34 = tpu.matmul %31, %33, %cst_29 {dimension_numbers = #tpu.dot_dimension_numbers<[1], [0], [0], [1], [0, 0, 1, 1], [], []>} : vector<128x128xf32>, vector<128x128xf32>, vector<128x128xf32> -> vector<128x128xf32>
    %35 = arith.addf %30, %34 : vector<128x128xf32>
    %c12 = arith.constant 12 : index
    %c0_30 = arith.constant 0 : index
    %36 = vector.load %arg11[%c12, %c0_30] : memref<154x128xf32, #tpu.memory_space<vmem>>, vector<128x128xf32>
    %c3 = arith.constant 3 : index
    %c0_31 = arith.constant 0 : index
    %c0_32 = arith.constant 0 : index
    %37 = vector.load %arg5[%c3, %c0_31, %c0_32] : memref<11x128x128xf32, #tpu.memory_space<vmem>>, vector<1x128x128xf32>
    %38 = vector.shape_cast %37 : vector<1x128x128xf32> to vector<128x128xf32>
    %cst_33 = arith.constant dense<0.000000e+00> : vector<128x128xf32>
    %39 = tpu.matmul %36, %38, %cst_33 {dimension_numbers = #tpu.dot_dimension_numbers<[1], [0], [0], [1], [0, 0, 1, 1], [], []>} : vector<128x128xf32>, vector<128x128xf32>, vector<128x128xf32> -> vector<128x128xf32>
    %40 = arith.addf %35, %39 : vector<128x128xf32>
    %c14 = arith.constant 14 : index
    %c0_34 = arith.constant 0 : index
    %41 = vector.load %arg11[%c14, %c0_34] : memref<154x128xf32, #tpu.memory_space<vmem>>, vector<128x128xf32>
    %c4 = arith.constant 4 : index
    %c0_35 = arith.constant 0 : index
    %c0_36 = arith.constant 0 : index
    %42 = vector.load %arg5[%c4, %c0_35, %c0_36] : memref<11x128x128xf32, #tpu.memory_space<vmem>>, vector<1x128x128xf32>
    %43 = vector.shape_cast %42 : vector<1x128x128xf32> to vector<128x128xf32>
    %cst_37 = arith.constant dense<0.000000e+00> : vector<128x128xf32>
    %44 = tpu.matmul %41, %43, %cst_37 {dimension_numbers = #tpu.dot_dimension_numbers<[1], [0], [0], [1], [0, 0, 1, 1], [], []>} : vector<128x128xf32>, vector<128x128xf32>, vector<128x128xf32> -> vector<128x128xf32>
    %45 = arith.addf %40, %44 : vector<128x128xf32>
    %c16_38 = arith.constant 16 : index
    %c0_39 = arith.constant 0 : index
    %46 = vector.load %arg11[%c16_38, %c0_39] : memref<154x128xf32, #tpu.memory_space<vmem>>, vector<128x128xf32>
    %c5 = arith.constant 5 : index
    %c0_40 = arith.constant 0 : index
    %c0_41 = arith.constant 0 : index
    %47 = vector.load %arg5[%c5, %c0_40, %c0_41] : memref<11x128x128xf32, #tpu.memory_space<vmem>>, vector<1x128x128xf32>
    %48 = vector.shape_cast %47 : vector<1x128x128xf32> to vector<128x128xf32>
    %cst_42 = arith.constant dense<0.000000e+00> : vector<128x128xf32>
    %49 = tpu.matmul %46, %48, %cst_42 {dimension_numbers = #tpu.dot_dimension_numbers<[1], [0], [0], [1], [0, 0, 1, 1], [], []>} : vector<128x128xf32>, vector<128x128xf32>, vector<128x128xf32> -> vector<128x128xf32>
    %50 = arith.addf %45, %49 : vector<128x128xf32>
    %c18 = arith.constant 18 : index
    %c0_43 = arith.constant 0 : index
    %51 = vector.load %arg11[%c18, %c0_43] : memref<154x128xf32, #tpu.memory_space<vmem>>, vector<128x128xf32>
    %c6_44 = arith.constant 6 : index
    %c0_45 = arith.constant 0 : index
    %c0_46 = arith.constant 0 : index
    %52 = vector.load %arg5[%c6_44, %c0_45, %c0_46] : memref<11x128x128xf32, #tpu.memory_space<vmem>>, vector<1x128x128xf32>
    %53 = vector.shape_cast %52 : vector<1x128x128xf32> to vector<128x128xf32>
    %cst_47 = arith.constant dense<0.000000e+00> : vector<128x128xf32>
    %54 = tpu.matmul %51, %53, %cst_47 {dimension_numbers = #tpu.dot_dimension_numbers<[1], [0], [0], [1], [0, 0, 1, 1], [], []>} : vector<128x128xf32>, vector<128x128xf32>, vector<128x128xf32> -> vector<128x128xf32>
    %55 = arith.addf %50, %54 : vector<128x128xf32>
    %c20 = arith.constant 20 : index
    %c0_48 = arith.constant 0 : index
    %56 = vector.load %arg11[%c20, %c0_48] : memref<154x128xf32, #tpu.memory_space<vmem>>, vector<128x128xf32>
    %c7 = arith.constant 7 : index
    %c0_49 = arith.constant 0 : index
    %c0_50 = arith.constant 0 : index
    %57 = vector.load %arg5[%c7, %c0_49, %c0_50] : memref<11x128x128xf32, #tpu.memory_space<vmem>>, vector<1x128x128xf32>
    %58 = vector.shape_cast %57 : vector<1x128x128xf32> to vector<128x128xf32>
    %cst_51 = arith.constant dense<0.000000e+00> : vector<128x128xf32>
    %59 = tpu.matmul %56, %58, %cst_51 {dimension_numbers = #tpu.dot_dimension_numbers<[1], [0], [0], [1], [0, 0, 1, 1], [], []>} : vector<128x128xf32>, vector<128x128xf32>, vector<128x128xf32> -> vector<128x128xf32>
    %60 = arith.addf %55, %59 : vector<128x128xf32>
    %c22 = arith.constant 22 : index
    %c0_52 = arith.constant 0 : index
    %61 = vector.load %arg11[%c22, %c0_52] : memref<154x128xf32, #tpu.memory_space<vmem>>, vector<128x128xf32>
    %c8_53 = arith.constant 8 : index
    %c0_54 = arith.constant 0 : index
    %c0_55 = arith.constant 0 : index
    %62 = vector.load %arg5[%c8_53, %c0_54, %c0_55] : memref<11x128x128xf32, #tpu.memory_space<vmem>>, vector<1x128x128xf32>
    %63 = vector.shape_cast %62 : vector<1x128x128xf32> to vector<128x128xf32>
    %cst_56 = arith.constant dense<0.000000e+00> : vector<128x128xf32>
    %64 = tpu.matmul %61, %63, %cst_56 {dimension_numbers = #tpu.dot_dimension_numbers<[1], [0], [0], [1], [0, 0, 1, 1], [], []>} : vector<128x128xf32>, vector<128x128xf32>, vector<128x128xf32> -> vector<128x128xf32>
    %65 = arith.addf %60, %64 : vector<128x128xf32>
    %c24 = arith.constant 24 : index
    %c0_57 = arith.constant 0 : index
    %66 = vector.load %arg11[%c24, %c0_57] : memref<154x128xf32, #tpu.memory_space<vmem>>, vector<128x128xf32>
    %c9 = arith.constant 9 : index
    %c0_58 = arith.constant 0 : index
    %c0_59 = arith.constant 0 : index
    %67 = vector.load %arg5[%c9, %c0_58, %c0_59] : memref<11x128x128xf32, #tpu.memory_space<vmem>>, vector<1x128x128xf32>
    %68 = vector.shape_cast %67 : vector<1x128x128xf32> to vector<128x128xf32>
    %cst_60 = arith.constant dense<0.000000e+00> : vector<128x128xf32>
    %69 = tpu.matmul %66, %68, %cst_60 {dimension_numbers = #tpu.dot_dimension_numbers<[1], [0], [0], [1], [0, 0, 1, 1], [], []>} : vector<128x128xf32>, vector<128x128xf32>, vector<128x128xf32> -> vector<128x128xf32>
    %70 = arith.addf %65, %69 : vector<128x128xf32>
    %c26 = arith.constant 26 : index
    %c0_61 = arith.constant 0 : index
    %71 = vector.load %arg11[%c26, %c0_61] : memref<154x128xf32, #tpu.memory_space<vmem>>, vector<128x128xf32>
    %c10_62 = arith.constant 10 : index
    %c0_63 = arith.constant 0 : index
    %c0_64 = arith.constant 0 : index
    %72 = vector.load %arg5[%c10_62, %c0_63, %c0_64] : memref<11x128x128xf32, #tpu.memory_space<vmem>>, vector<1x128x128xf32>
    %73 = vector.shape_cast %72 : vector<1x128x128xf32> to vector<128x128xf32>
    %cst_65 = arith.constant dense<0.000000e+00> : vector<128x128xf32>
    %74 = tpu.matmul %71, %73, %cst_65 {dimension_numbers = #tpu.dot_dimension_numbers<[1], [0], [0], [1], [0, 0, 1, 1], [], []>} : vector<128x128xf32>, vector<128x128xf32>, vector<128x128xf32> -> vector<128x128xf32>
    %75 = arith.addf %70, %74 : vector<128x128xf32>
    %76 = arith.negf %75 : vector<128x128xf32>
    %77 = math.exp %76 : vector<128x128xf32>
    %cst_66 = arith.constant 1.000000e+00 : f32
    %78 = vector.broadcast %cst_66 : f32 to vector<128x128xf32>
    %79 = arith.addf %78, %77 : vector<128x128xf32>
    %80 = arith.divf %78, %79 : vector<128x128xf32>
    %c64_i32 = arith.constant 64 : i32
    %81 = tpu.dynamic_rotate %80 by %c64_i32 dim 1 : vector<128x128xf32>, i32 -> vector<128x128xf32>
    %82 = arith.mulf %75, %81 : vector<128x128xf32>
    %c0_67 = arith.constant 0 : index
    %c0_68 = arith.constant 0 : index
    %83 = vector.load %arg7[%c0_67, %c0_68] : memref<128x128xf32, #tpu.memory_space<vmem>>, vector<128x128xf32>
    %cst_69 = arith.constant dense<0.000000e+00> : vector<128x128xf32>
    %84 = tpu.matmul %82, %83, %cst_69 {dimension_numbers = #tpu.dot_dimension_numbers<[1], [0], [0], [1], [0, 0, 1, 1], [], []>} : vector<128x128xf32>, vector<128x128xf32>, vector<128x128xf32> -> vector<128x128xf32>
    %85 = tpu.transpose %84, [1, 0] : vector<128x128xf32> -> vector<128x128xf32>
    %c0_70 = arith.constant 0 : index
    %c0_71 = arith.constant 0 : index
    %86 = vector.load %arg8[%c0_70, %c0_71] : memref<128x1xf32, #tpu.memory_space<vmem>>, vector<128x1xf32>
    %87 = vector.broadcast %86 : vector<128x1xf32> to vector<128x128xf32>
    %88 = arith.addf %85, %87 : vector<128x128xf32>
    %89 = arith.addf %88, %8 : vector<128x128xf32>
    %cst_72 = arith.constant 0.000000e+00 : f32
    %90 = vector.broadcast %cst_72 : f32 to vector<128x128xf32>
    %91 = arith.cmpf ogt, %89, %90 : vector<128x128xf32>
    %c0_73 = arith.constant 0 : index
    %c0_74 = arith.constant 0 : index
    %92 = vector.load %arg9[%c0_73, %c0_74] : memref<128x1xf32, #tpu.memory_space<vmem>>, vector<128x1xf32>
    %93 = vector.broadcast %92 : vector<128x1xf32> to vector<128x128xf32>
    %94 = arith.mulf %93, %89 : vector<128x128xf32>
    %95 = arith.select %91, %89, %94 : vector<128x128xi1>, vector<128x128xf32>
    %c0_75 = arith.constant 0 : index
    %c0_76 = arith.constant 0 : index
    %c0_77 = arith.constant 0 : index
    %96 = vector.load %arg10[%c0_75, %c0_76, %c0_77] : memref<2x128x128xf32, #tpu.memory_space<vmem>>, vector<1x128x128xf32>
    %97 = vector.shape_cast %96 : vector<1x128x128xf32> to vector<128x128xf32>
    %98 = vector.shape_cast %95 : vector<128x128xf32> to vector<1x128x128xf32>
    tpu.vector_store %arg10[%c0_75, %c0_76, %c0_77], %98 {strides = array<i32>} : memref<2x128x128xf32, #tpu.memory_space<vmem>>, vector<1x128x128xf32>,
    %c1_78 = arith.constant 1 : index
    %c0_79 = arith.constant 0 : index
    %c0_80 = arith.constant 0 : index
    %99 = vector.load %arg1[%c1_78, %c0_79, %c0_80] : memref<2x128x128xf32, #tpu.memory_space<vmem>>, vector<1x128x128xf32>
    %100 = vector.shape_cast %99 : vector<1x128x128xf32> to vector<128x128xf32>
    %101 = tpu.transpose %100, [1, 0] : vector<128x128xf32> -> vector<128x128xf32>
    %c0_81 = arith.constant 0 : index
    %c0_82 = arith.constant 0 : index
    %102 = vector.load %arg2[%c0_81, %c0_82] : memref<128x128xf32, #tpu.memory_space<vmem>>, vector<128x128xf32>
    %cst_83 = arith.constant dense<0.000000e+00> : vector<128x128xf32>
    %103 = tpu.matmul %101, %102, %cst_83 {dimension_numbers = #tpu.dot_dimension_numbers<[1], [0], [0], [1], [0, 0, 1, 1], [], []>} : vector<128x128xf32>, vector<128x128xf32>, vector<128x128xf32> -> vector<128x128xf32>
    %104 = vector.broadcast %4 : vector<1x128xf32> to vector<128x128xf32>
    %105 = arith.addf %103, %104 : vector<128x128xf32>
    %cst_84 = arith.constant 0.000000e+00 : f32
    %106 = vector.broadcast %cst_84 : f32 to vector<128x128xf32>
    %107 = arith.cmpf ogt, %105, %106 : vector<128x128xf32>
    %108 = vector.broadcast %5 : vector<1x128xf32> to vector<128x128xf32>
    %109 = arith.mulf %108, %105 : vector<128x128xf32>
    %110 = arith.select %107, %105, %109 : vector<128x128xi1>, vector<128x128xf32>
    %c16_85 = arith.constant 16 : index
    %c0_86 = arith.constant 0 : index
    %111 = vector.load %arg11[%c16_85, %c0_86] : memref<154x128xf32, #tpu.memory_space<vmem>>, vector<128x128xf32>
    tpu.vector_store %arg11[%c16_85, %c0_86], %110 {strides = array<i32>} : memref<154x128xf32, #tpu.memory_space<vmem>>, vector<128x128xf32>,
    %c6_87 = arith.constant 6 : index
    %c0_88 = arith.constant 0 : index
    %112 = vector.load %arg11[%c6_87, %c0_88] : memref<154x128xf32, #tpu.memory_space<vmem>>, vector<128x128xf32>
    %c0_89 = arith.constant 0 : index
    %c0_90 = arith.constant 0 : index
    %c0_91 = arith.constant 0 : index
    %113 = vector.load %arg5[%c0_89, %c0_90, %c0_91] : memref<11x128x128xf32, #tpu.memory_space<vmem>>, vector<1x128x128xf32>
    %114 = vector.shape_cast %113 : vector<1x128x128xf32> to vector<128x128xf32>
    %cst_92 = arith.constant dense<0.000000e+00> : vector<128x128xf32>
    %115 = tpu.matmul %112, %114, %cst_92 {dimension_numbers = #tpu.dot_dimension_numbers<[1], [0], [0], [1], [0, 0, 1, 1], [], []>} : vector<128x128xf32>, vector<128x128xf32>, vector<128x128xf32> -> vector<128x128xf32>
    %116 = vector.broadcast %6 : vector<1x128xf32> to vector<128x128xf32>
    %117 = arith.addf %116, %115 : vector<128x128xf32>
    %c8_93 = arith.constant 8 : index
    %c0_94 = arith.constant 0 : index
    %118 = vector.load %arg11[%c8_93, %c0_94] : memref<154x128xf32, #tpu.memory_space<vmem>>, vector<128x128xf32>
    %c1_95 = arith.constant 1 : index
    %c0_96 = arith.constant 0 : index
    %c0_97 = arith.constant 0 : index
    %119 = vector.load %arg5[%c1_95, %c0_96, %c0_97] : memref<11x128x128xf32, #tpu.memory_space<vmem>>, vector<1x128x128xf32>
    %120 = vector.shape_cast %119 : vector<1x128x128xf32> to vector<128x128xf32>
    %cst_98 = arith.constant dense<0.000000e+00> : vector<128x128xf32>
    %121 = tpu.matmul %118, %120, %cst_98 {dimension_numbers = #tpu.dot_dimension_numbers<[1], [0], [0], [1], [0, 0, 1, 1], [], []>} : vector<128x128xf32>, vector<128x128xf32>, vector<128x128xf32> -> vector<128x128xf32>
    %122 = arith.addf %117, %121 : vector<128x128xf32>
    %c10_99 = arith.constant 10 : index
    %c0_100 = arith.constant 0 : index
    %123 = vector.load %arg11[%c10_99, %c0_100] : memref<154x128xf32, #tpu.memory_space<vmem>>, vector<128x128xf32>
    %c2_101 = arith.constant 2 : index
    %c0_102 = arith.constant 0 : index
    %c0_103 = arith.constant 0 : index
    %124 = vector.load %arg5[%c2_101, %c0_102, %c0_103] : memref<11x128x128xf32, #tpu.memory_space<vmem>>, vector<1x128x128xf32>
    %125 = vector.shape_cast %124 : vector<1x128x128xf32> to vector<128x128xf32>
    %cst_104 = arith.constant dense<0.000000e+00> : vector<128x128xf32>
    %126 = tpu.matmul %123, %125, %cst_104 {dimension_numbers = #tpu.dot_dimension_numbers<[1], [0], [0], [1], [0, 0, 1, 1], [], []>} : vector<128x128xf32>, vector<128x128xf32>, vector<128x128xf32> -> vector<128x128xf32>
    %127 = arith.addf %122, %126 : vector<128x128xf32>
    %c12_105 = arith.constant 12 : index
    %c0_106 = arith.constant 0 : index
    %128 = vector.load %arg11[%c12_105, %c0_106] : memref<154x128xf32, #tpu.memory_space<vmem>>, vector<128x128xf32>
    %c3_107 = arith.constant 3 : index
    %c0_108 = arith.constant 0 : index
    %c0_109 = arith.constant 0 : index
    %129 = vector.load %arg5[%c3_107, %c0_108, %c0_109] : memref<11x128x128xf32, #tpu.memory_space<vmem>>, vector<1x128x128xf32>
    %130 = vector.shape_cast %129 : vector<1x128x128xf32> to vector<128x128xf32>
    %cst_110 = arith.constant dense<0.000000e+00> : vector<128x128xf32>
    %131 = tpu.matmul %128, %130, %cst_110 {dimension_numbers = #tpu.dot_dimension_numbers<[1], [0], [0], [1], [0, 0, 1, 1], [], []>} : vector<128x128xf32>, vector<128x128xf32>, vector<128x128xf32> -> vector<128x128xf32>
    %132 = arith.addf %127, %131 : vector<128x128xf32>
    %c14_111 = arith.constant 14 : index
    %c0_112 = arith.constant 0 : index
    %133 = vector.load %arg11[%c14_111, %c0_112] : memref<154x128xf32, #tpu.memory_space<vmem>>, vector<128x128xf32>
    %c4_113 = arith.constant 4 : index
    %c0_114 = arith.constant 0 : index
    %c0_115 = arith.constant 0 : index
    %134 = vector.load %arg5[%c4_113, %c0_114, %c0_115] : memref<11x128x128xf32, #tpu.memory_space<vmem>>, vector<1x128x128xf32>
    %135 = vector.shape_cast %134 : vector<1x128x128xf32> to vector<128x128xf32>
    %cst_116 = arith.constant dense<0.000000e+00> : vector<128x128xf32>
    %136 = tpu.matmul %133, %135, %cst_116 {dimension_numbers = #tpu.dot_dimension_numbers<[1], [0], [0], [1], [0, 0, 1, 1], [], []>} : vector<128x128xf32>, vector<128x128xf32>, vector<128x128xf32> -> vector<128x128xf32>
    %137 = arith.addf %132, %136 : vector<128x128xf32>
    %c16_117 = arith.constant 16 : index
    %c0_118 = arith.constant 0 : index
    %138 = vector.load %arg11[%c16_117, %c0_118] : memref<154x128xf32, #tpu.memory_space<vmem>>, vector<128x128xf32>
    %c5_119 = arith.constant 5 : index
    %c0_120 = arith.constant 0 : index
    %c0_121 = arith.constant 0 : index
    %139 = vector.load %arg5[%c5_119, %c0_120, %c0_121] : memref<11x128x128xf32, #tpu.memory_space<vmem>>, vector<1x128x128xf32>
    %140 = vector.shape_cast %139 : vector<1x128x128xf32> to vector<128x128xf32>
    %cst_122 = arith.constant dense<0.000000e+00> : vector<128x128xf32>
    %141 = tpu.matmul %138, %140, %cst_122 {dimension_numbers = #tpu.dot_dimension_numbers<[1], [0], [0], [1], [0, 0, 1, 1], [], []>} : vector<128x128xf32>, vector<128x128xf32>, vector<128x128xf32> -> vector<128x128xf32>
    %142 = arith.addf %137, %141 : vector<128x128xf32>
    %c18_123 = arith.constant 18 : index
    %c0_124 = arith.constant 0 : index
    %143 = vector.load %arg11[%c18_123, %c0_124] : memref<154x128xf32, #tpu.memory_space<vmem>>, vector<128x128xf32>
    %c6_125 = arith.constant 6 : index
    %c0_126 = arith.constant 0 : index
    %c0_127 = arith.constant 0 : index
    %144 = vector.load %arg5[%c6_125, %c0_126, %c0_127] : memref<11x128x128xf32, #tpu.memory_space<vmem>>, vector<1x128x128xf32>
    %145 = vector.shape_cast %144 : vector<1x128x128xf32> to vector<128x128xf32>
    %cst_128 = arith.constant dense<0.000000e+00> : vector<128x128xf32>
    %146 = tpu.matmul %143, %145, %cst_128 {dimension_numbers = #tpu.dot_dimension_numbers<[1], [0], [0], [1], [0, 0, 1, 1], [], []>} : vector<128x128xf32>, vector<128x128xf32>, vector<128x128xf32> -> vector<128x128xf32>
    %147 = arith.addf %142, %146 : vector<128x128xf32>
    %c20_129 = arith.constant 20 : index
    %c0_130 = arith.constant 0 : index
    %148 = vector.load %arg11[%c20_129, %c0_130] : memref<154x128xf32, #tpu.memory_space<vmem>>, vector<128x128xf32>
    %c7_131 = arith.constant 7 : index
    %c0_132 = arith.constant 0 : index
    %c0_133 = arith.constant 0 : index
    %149 = vector.load %arg5[%c7_131, %c0_132, %c0_133] : memref<11x128x128xf32, #tpu.memory_space<vmem>>, vector<1x128x128xf32>
    %150 = vector.shape_cast %149 : vector<1x128x128xf32> to vector<128x128xf32>
    %cst_134 = arith.constant dense<0.000000e+00> : vector<128x128xf32>
    %151 = tpu.matmul %148, %150, %cst_134 {dimension_numbers = #tpu.dot_dimension_numbers<[1], [0], [0], [1], [0, 0, 1, 1], [], []>} : vector<128x128xf32>, vector<128x128xf32>, vector<128x128xf32> -> vector<128x128xf32>
    %152 = arith.addf %147, %151 : vector<128x128xf32>
    %c22_135 = arith.constant 22 : index
    %c0_136 = arith.constant 0 : index
    %153 = vector.load %arg11[%c22_135, %c0_136] : memref<154x128xf32, #tpu.memory_space<vmem>>, vector<128x128xf32>
    %c8_137 = arith.constant 8 : index
    %c0_138 = arith.constant 0 : index
    %c0_139 = arith.constant 0 : index
    %154 = vector.load %arg5[%c8_137, %c0_138, %c0_139] : memref<11x128x128xf32, #tpu.memory_space<vmem>>, vector<1x128x128xf32>
    %155 = vector.shape_cast %154 : vector<1x128x128xf32> to vector<128x128xf32>
    %cst_140 = arith.constant dense<0.000000e+00> : vector<128x128xf32>
    %156 = tpu.matmul %153, %155, %cst_140 {dimension_numbers = #tpu.dot_dimension_numbers<[1], [0], [0], [1], [0, 0, 1, 1], [], []>} : vector<128x128xf32>, vector<128x128xf32>, vector<128x128xf32> -> vector<128x128xf32>
    %157 = arith.addf %152, %156 : vector<128x128xf32>
    %c24_141 = arith.constant 24 : index
    %c0_142 = arith.constant 0 : index
    %158 = vector.load %arg11[%c24_141, %c0_142] : memref<154x128xf32, #tpu.memory_space<vmem>>, vector<128x128xf32>
    %c9_143 = arith.constant 9 : index
    %c0_144 = arith.constant 0 : index
    %c0_145 = arith.constant 0 : index
    %159 = vector.load %arg5[%c9_143, %c0_144, %c0_145] : memref<11x128x128xf32, #tpu.memory_space<vmem>>, vector<1x128x128xf32>
    %160 = vector.shape_cast %159 : vector<1x128x128xf32> to vector<128x128xf32>
    %cst_146 = arith.constant dense<0.000000e+00> : vector<128x128xf32>
    %161 = tpu.matmul %158, %160, %cst_146 {dimension_numbers = #tpu.dot_dimension_numbers<[1], [0], [0], [1], [0, 0, 1, 1], [], []>} : vector<128x128xf32>, vector<128x128xf32>, vector<128x128xf32> -> vector<128x128xf32>
    %162 = arith.addf %157, %161 : vector<128x128xf32>
    %c26_147 = arith.constant 26 : index
    %c0_148 = arith.constant 0 : index
    %163 = vector.load %arg11[%c26_147, %c0_148] : memref<154x128xf32, #tpu.memory_space<vmem>>, vector<128x128xf32>
    %c10_149 = arith.constant 10 : index
    %c0_150 = arith.constant 0 : index
    %c0_151 = arith.constant 0 : index
    %164 = vector.load %arg5[%c10_149, %c0_150, %c0_151] : memref<11x128x128xf32, #tpu.memory_space<vmem>>, vector<1x128x128xf32>
    %165 = vector.shape_cast %164 : vector<1x128x128xf32> to vector<128x128xf32>
    %cst_152 = arith.constant dense<0.000000e+00> : vector<128x128xf32>
    %166 = tpu.matmul %163, %165, %cst_152 {dimension_numbers = #tpu.dot_dimension_numbers<[1], [0], [0], [1], [0, 0, 1, 1], [], []>} : vector<128x128xf32>, vector<128x128xf32>, vector<128x128xf32> -> vector<128x128xf32>
    %167 = arith.addf %162, %166 : vector<128x128xf32>
    %168 = arith.negf %167 : vector<128x128xf32>
    %169 = math.exp %168 : vector<128x128xf32>
    %cst_153 = arith.constant 1.000000e+00 : f32
    %170 = vector.broadcast %cst_153 : f32 to vector<128x128xf32>
    %171 = arith.addf %170, %169 : vector<128x128xf32>
    %172 = arith.divf %170, %171 : vector<128x128xf32>
    %c64_i32_154 = arith.constant 64 : i32
    %173 = tpu.dynamic_rotate %172 by %c64_i32_154 dim 1 : vector<128x128xf32>, i32 -> vector<128x128xf32>
    %174 = arith.mulf %167, %173 : vector<128x128xf32>
    %c0_155 = arith.constant 0 : index
    %c0_156 = arith.constant 0 : index
    %175 = vector.load %arg7[%c0_155, %c0_156] : memref<128x128xf32, #tpu.memory_space<vmem>>, vector<128x128xf32>
    %cst_157 = arith.constant dense<0.000000e+00> : vector<128x128xf32>
    %176 = tpu.matmul %174, %175, %cst_157 {dimension_numbers = #tpu.dot_dimension_numbers<[1], [0], [0], [1], [0, 0, 1, 1], [], []>} : vector<128x128xf32>, vector<128x128xf32>, vector<128x128xf32> -> vector<128x128xf32>
    %177 = tpu.transpose %176, [1, 0] : vector<128x128xf32> -> vector<128x128xf32>
    %c0_158 = arith.constant 0 : index
    %c0_159 = arith.constant 0 : index
    %178 = vector.load %arg8[%c0_158, %c0_159] : memref<128x1xf32, #tpu.memory_space<vmem>>, vector<128x1xf32>
    %179 = vector.broadcast %178 : vector<128x1xf32> to vector<128x128xf32>
    %180 = arith.addf %177, %179 : vector<128x128xf32>
    %181 = arith.addf %180, %100 : vector<128x128xf32>
    %cst_160 = arith.constant 0.000000e+00 : f32
    %182 = vector.broadcast %cst_160 : f32 to vector<128x128xf32>
    %183 = arith.cmpf ogt, %181, %182 : vector<128x128xf32>
    %c0_161 = arith.constant 0 : index
    %c0_162 = arith.constant 0 : index
    %184 = vector.load %arg9[%c0_161, %c0_162] : memref<128x1xf32, #tpu.memory_space<vmem>>, vector<128x1xf32>
    %185 = vector.broadcast %184 : vector<128x1xf32> to vector<128x128xf32>
    %186 = arith.mulf %185, %181 : vector<128x128xf32>
    %187 = arith.select %183, %181, %186 : vector<128x128xi1>, vector<128x128xf32>
    %c1_163 = arith.constant 1 : index
    %c0_164 = arith.constant 0 : index
    %c0_165 = arith.constant 0 : index
    %188 = vector.load %arg10[%c1_163, %c0_164, %c0_165] : memref<2x128x128xf32, #tpu.memory_space<vmem>>, vector<1x128x128xf32>
    %189 = vector.shape_cast %188 : vector<1x128x128xf32> to vector<128x128xf32>
    %190 = vector.shape_cast %187 : vector<128x128xf32> to vector<1x128x128xf32>
    tpu.vector_store %arg10[%c1_163, %c0_164, %c0_165], %190 {strides = array<i32>} : memref<2x128x128xf32, #tpu.memory_space<vmem>>, vector<1x128x128xf32>,
    return
  }
  func.func @transform_0(%arg0: i32) -> (i32, i32, i32) {
    %c0_i32 = arith.constant 0 : i32
    %c0_i32_0 = arith.constant 0 : i32
    %c0_i32_1 = arith.constant 0 : i32
    return %arg0, %c0_i32, %c0_i32_0 : i32, i32, i32
  }
  func.func @transform_1(%arg0: i32) -> (i32, i32) {
    %c0_i32 = arith.constant 0 : i32
    %c0_i32_0 = arith.constant 0 : i32
    %c0_i32_1 = arith.constant 0 : i32
    return %c0_i32, %c0_i32_0 : i32, i32
  }
  func.func @transform_2(%arg0: i32) -> (i32, i32) {
    %c0_i32 = arith.constant 0 : i32
    %c0_i32_0 = arith.constant 0 : i32
    %c0_i32_1 = arith.constant 0 : i32
    return %c0_i32, %c0_i32_0 : i32, i32
  }
  func.func @transform_3(%arg0: i32) -> (i32, i32) {
    %c0_i32 = arith.constant 0 : i32
    %c0_i32_0 = arith.constant 0 : i32
    %c0_i32_1 = arith.constant 0 : i32
    return %c0_i32, %c0_i32_0 : i32, i32
  }
  func.func @transform_4(%arg0: i32) -> (i32, i32, i32) {
    %c0_i32 = arith.constant 0 : i32
    %c0_i32_0 = arith.constant 0 : i32
    %c0_i32_1 = arith.constant 0 : i32
    %c0_i32_2 = arith.constant 0 : i32
    return %c0_i32, %c0_i32_0, %c0_i32_1 : i32, i32, i32
  }
  func.func @transform_5(%arg0: i32) -> (i32, i32) {
    %c0_i32 = arith.constant 0 : i32
    %c0_i32_0 = arith.constant 0 : i32
    %c0_i32_1 = arith.constant 0 : i32
    return %c0_i32, %c0_i32_0 : i32, i32
  }
  func.func @transform_6(%arg0: i32) -> (i32, i32) {
    %c0_i32 = arith.constant 0 : i32
    %c0_i32_0 = arith.constant 0 : i32
    %c0_i32_1 = arith.constant 0 : i32
    return %c0_i32, %c0_i32_0 : i32, i32
  }
  func.func @transform_7(%arg0: i32) -> (i32, i32) {
    %c0_i32 = arith.constant 0 : i32
    %c0_i32_0 = arith.constant 0 : i32
    %c0_i32_1 = arith.constant 0 : i32
    return %c0_i32, %c0_i32_0 : i32, i32
  }
  func.func @transform_8(%arg0: i32) -> (i32, i32) {
    %c0_i32 = arith.constant 0 : i32
    %c0_i32_0 = arith.constant 0 : i32
    %c0_i32_1 = arith.constant 0 : i32
    return %c0_i32, %c0_i32_0 : i32, i32
  }
  func.func @transform_9(%arg0: i32) -> (i32, i32, i32) {
    %c0_i32 = arith.constant 0 : i32
    %c0_i32_0 = arith.constant 0 : i32
    %c0_i32_1 = arith.constant 0 : i32
    return %arg0, %c0_i32, %c0_i32_0 : i32, i32, i32
  }
}

</mosaic_0001>

<bundles_post_ra>
// kernel: tpu_custom_call.1
= control target key start
LH: loop header
LB: loop body
LE: loop exit
PB: predicated region body
PF: predicated region fallthrough
CT: control target
= control target key end

     0   :  { %s11757_s0 = inlined_call_operand.hbm [shape: f32[4,128,128], index: 0, kind: input, shape index: {}]   ;;  %s11758_s1 = inlined_call_operand.vmem [shape: f32[128,128], index: 1, kind: input, shape index: {}]   ;;  %s11759_s2 = inlined_call_operand.vmem [shape: f32[1,128], index: 2, kind: input, shape index: {}]   ;;  %s11760_s3 = inlined_call_operand.vmem [shape: f32[1,128], index: 3, kind: input, shape index: {}]   ;;  %s11761_s4 = inlined_call_operand.hbm [shape: f32[11,128,128], index: 4, kind: input, shape index: {}]   ;;  %s11762_s5 = inlined_call_operand.vmem [shape: f32[1,128], index: 5, kind: input, shape index: {}]   ;;  %s11763_s6 = inlined_call_operand.vmem [shape: f32[128,128], index: 6, kind: input, shape index: {}]   ;;  %s11764_s7 = inlined_call_operand.vmem [shape: f32[128,1], index: 7, kind: input, shape index: {}]   ;;  %s11765_s8 = inlined_call_operand.vmem [shape: f32[128,1], index: 8, kind: input, shape index: {}]   ;;  %s11766_s9 = inlined_call_operand.hbm [shape: f32[4,128,128], index: 9, kind: output, shape index: {}]  }
   0x1   :  { %11795 = sst [smem:[#allocation68_spill]] %s11761_s4 }
   0x2   :  { %14 = vsyncpa [#allocation4], 0 }
   0x3   :  { %16 = vsyncpa [#allocation4 + $0x1], 0 }
   0x4   :  { %17 = vsyncpa [#allocation7], 0 }
   0x5   :  { %18 = vsyncpa [#allocation5], 0 }
   0x6   :  { %20 = vsyncpa [#allocation5 + $0x1], 0  ;;  %s9339_s30 = smov 0   ;;  %s9341_s10 = smov 0  }
   0x7   :  { %s9343_s11 = smov 0   ;;  %s9345_s12 = smov 0  }
   0x8 LB: > { %s9360_s13 = sadd.s32 4294967295, %s9277_s12   ;;  %s6546_s14 = sadd.s32 4294967294, %s9277_s12   ;;  %s9277_s12 = sphi %s9345_s12, %s11981_s12   ;;  %s9273_s11 = sphi %s9343_s11, %s11984_s11   ;;  %s9269_s10 = sphi %s9341_s10, %s11983_s10   ;;  %s9265_s30 = sphi %s9339_s30, %s11982_s30  }
   0x9   : > { %p46_p0 = scmp.ne.s32.totalorder %s9269_s10, %s9265_s30  ;;  %p11771_p1 = scmp.eq.s32.totalorder %s9360_s13, 0 }
   0xa   : > { %p244_p3 = scmp.eq.s32.totalorder %s6546_s14, 1  ;;  %p6547_p5 = scmp.ge.s32.totalorder %s9277_s12, 1 }
   0xb   : > { %p9369_p4 = por %p11771_p1, %p46_p0  ;;  %p251_p7 = scmp.lt.s32.totalorder %s9277_s12, 3 }
   0xc   : > { %p9374_p6 = por %p244_p3, %p46_p0  ;;  %s9279_s18 = smov [#allocation6]  }
   0xd   : > { %s11796_s15 = scalar_select %p9369_p4, 1, 0 }
   0xe   : > { %s11797_s16 = scalar_select %p9374_p6, 1, 0 }
   0xf   : > { %p9379_p8 = pnand %p6547_p5, %p251_p7  ;;  %s272_s19 = sshll.u32 %s9279_s18, 4  ;;  %s273_s19 = int_to_ptr.vmem [resolvable:$true] %s272_s19 }
  0x10   : > { %11798 = sst [smem:[#allocation12_spill]] %s11797_s16  ;;  %s9393_s21 = sadd.s32 1, %s9277_s12  }
  0x11   : > { %s11799_s17 = scalar_select %p9379_p8, 1, 0 }
  0x12   : > { %p8931_p9 = pneg %p9379_p8  ;;  %11801 = sst [smem:[#allocation13_spill]] %s9393_s21 }
  0x13   : > { %s33_s22 = sadd.s32 1, %s9273_s11  ;;  %s30_s23 = ssub.s32 %s9277_s12, %s9393_s21 }
  0x14   : > { %p9388_p11 = pnand %p8931_p9, %p11771_p1  ;;  %s9166_s24 = scalar_lea.vmem %s273_s19, 22528 }
  0x15   : > { %p9167_p13 = scmp.ne.s32.totalorder %s273_s19, %s9166_s24  ;;  %p9174_p5 = scmp.lt.s32.totalorder %s273_s19, %s273_s19 }
  0x16   : > { %p9157_p12 = pneg %p9388_p11  ;;  %p9175_p7 = scmp.lt.s32.totalorder %s9166_s24, %s9166_s24 }
  0x18   : > { %p9169_p0 = pnand %p9167_p13, %p9157_p12  ;;  %p9176_p10 = por %p9175_p7, %p9174_p5 }
  0x1a   : > { %p9170_p3 = pneg %p9169_p0 }
  0x1c   : > { %p9177_p2 = pnand %p9176_p10, %p9170_p3 }
  0x1e   : > { %9180 = shalt.err (!%p9177_p2)
}
  0x1f   : > { %s11770_s25 = smov 128   ;;  %s11772_s26 = smov 8  }
  0x20   : > { %s11802_s4 = sld [smem:[#allocation68_spill]]  ;;  %p31_p2 = scmp.eq.s32.totalorder %s30_s23, 0 }
  0x21   : > { %p40_p9 = scmp.ne.s32.totalorder %s9273_s11, %s9269_s10  ;;  %p41_p10 = scmp.eq.s32.totalorder %s9277_s12, 0 }
  0x22   : > { %p8944_p12 = scmp.lt.s32.totalorder %s9277_s12, 2  ;;  %p11803_p0 = scmp.eq.s32.totalorder %s9360_s13, 1 }
  0x23   : > { %s9413_s29 = scalar_select %p31_p2, %s9273_s11, %s33_s22  }
  0x24   : > { %p42_p13 = por %p41_p10, %p40_p9  ;;  %p9417_p3 = por %p11803_p0, %p40_p9 }
  0x25   : > { %s298_s18 = sand.u32 1, %s9273_s11   ;;  %s6632_s20 = sshll.u32 %s9277_s12, 12 }
  0x26   : > { %8934 = dma.hbm_to_vmem [thread:$0]  (!%p9388_p11), %s11802_s4, 22528, %s273_s19, [#allocation7], %s11770_s25, %s11770_s25, %s11772_s26  }
  0x27   : > { %s11804_s14 = scalar_select %p9417_p3, 1, 0 }
  0x28   : > { %s6550_s24 = sshll.u32 %s298_s18, 8  ;;  %s9426_s27 = scalar_lea.hbm %s11757_s0, %s6632_s20 }
  0x29   : > { %s302_s19 = scalar_lea.vmem [#allocation3], %s6550_s24  ;;  %p9428_p11 = pnand %p8944_p12, %p42_p13 }
  0x2a   : > { %s310_s22 = sshll.u32 %s302_s19, 4  ;;  %s9434_s28 = scalar_lea.sflag [#allocation4], %s298_s18  ;;  %s9432_s22 = int_to_ptr.vmem [resolvable:$true] %s310_s22 }
  0x2b   : > { %s9181_s25 = scalar_lea.hbm %s9426_s27, 4096  ;;  %p9183_p7 = pneg %p9428_p11 }
  0x2c   : > { %p9182_p5 = scmp.ne.s32.totalorder %s9426_s27, %s9181_s25  ;;  %s9186_s20 = scalar_lea.hbm %s11757_s0, 8192 }
  0x2d   : > { %p9187_p10 = scmp.lt.s32.totalorder %s9426_s27, %s11757_s0  ;;  %p9188_p12 = scmp.lt.s32.totalorder %s9186_s20, %s9181_s25 }
  0x2e   : > { %p9184_p2 = pnand %p9183_p7, %p9182_p5 }
  0x2f   : > { %p9189_p13 = por %p9188_p12, %p9187_p10 }
  0x30   : > { %p9185_p9 = pneg %p9184_p2 }
  0x32   : > { %p9190_p0 = pnand %p9189_p13, %p9185_p9 }
  0x34   : > { %9193 = shalt.err (!%p9190_p0)
}
  0x35   : > { %s9194_s18 = scalar_lea.vmem %s9432_s22, 4096  ;;  %s9282_s26 = smov [#allocation3]  }
  0x36   : > { %p9195_p1 = scmp.ne.s32.totalorder %s9432_s22, %s9194_s18  ;;  %s9199_s4 = sshll.u32 %s9282_s26, 4  ;;  %s9200_s4 = int_to_ptr.vmem [resolvable:$false] %s9199_s4 }
  0x37   : > { %s9201_s16 = scalar_lea.vmem %s9200_s4, 8192  ;;  %p9202_p2 = scmp.lt.s32.totalorder %s9432_s22, %s9200_s4 }
  0x38   : > { %p9197_p6 = pnand %p9195_p1, %p9183_p7  ;;  %p9203_p3 = scmp.lt.s32.totalorder %s9201_s16, %s9194_s18 }
  0x3a   : > { %p9198_p5 = pneg %p9197_p6  ;;  %p9204_p4 = por %p9203_p3, %p9202_p2 }
  0x3c   : > { %p9205_p8 = pnand %p9204_p4, %p9198_p5 }
  0x3e   : > { %9208 = shalt.err (!%p9205_p8)
}
  0x3f   : > { %s11806_s25 = smov 8   ;;  %s11807_s21 = smov 128  }
  0x40   : > { %8938 = dma.hbm_to_vmem [thread:$0]  (!%p9428_p11), %s9426_s27, 4096, %s9432_s22, %s9434_s28, %s11807_s21, %s11807_s21, %s11806_s25  }
  0x41   : > { %p11808_p1 = scmp.ne.s32.totalorder %s11799_s17, 0 }
  0x43   : > { %322 = sbr.rel (%p11808_p1) target bundleno = 1986 (0x7c2), region = 56 }
  0x48   : > { %s9461_s26 = sand.u32 1, %s9269_s10   ;;  %p11809_p4 = scmp.ne.s32.totalorder %s11796_s15, 0 }
  0x49   : > { %s6555_s4 = sshll.u32 %s9461_s26, 8  ;;  %s325_s20 = scalar_lea.sflag [#allocation4], %s9461_s26 }
  0x4a   : > { %s9467_s23 = scalar_lea.vmem [#allocation3], %s6555_s4 }
  0x4b   : > { %9252 = dma.done.wait (%p11809_p4), %s325_s20, 4096  }
  0x4c   : > { %9254 = vsyncadd (%p11809_p4), %s325_s20, 4294963200  ;;  %p11810_p6 = scmp.eq.s32.totalorder %s9360_s13, 0 }
  0x4e   : > { %9256 = dma.done.wait (%p11810_p6), [#allocation7], 22528   ;;  %p11811_p8 = pmov %p11810_p6 }
  0x4f   : > { %v376_v0 = vld [vmem:[%s9467_s23] sm:$0xff]  ;;  %v377_v1 = vld [vmem:[%s9467_s23 + $0x8] sm:$0xff]  ;;  %v439_v2 = vld [vmem:[%s11758_s1 + $0x78] sm:$0xff]  ;;  %s9284_s21 = smov 64   ;;  %s11428_s20 = scalar_lea.vmem [#allocation8], %s6555_s4 }
  0x50   : > { %9258 = vsyncadd (%p11811_p8), [#allocation7], 4294944768  ;;  %392 = vxpose.xlu0.b32.start [1/16] %v376_v0, 128  ;;  %v438_v3 = vld [vmem:[%s11758_s1 + $0x70] sm:$0xff]  ;;  %7467 = vmatprep.subr.mxu0 %v439_v2  ;;  %v437_v5 = vld [vmem:[%s11758_s1 + $0x68] sm:$0xff]  ;;  %s6634_s17 = sshll.u32 %s9360_s13, 12  ;;  %s6463_s27 = sshll.u32 %s11428_s20, 4  ;;  %s11713_s27 = int_to_ptr.vmem [resolvable:$true] %s6463_s27 }
  0x51   : > { %v378_v4 = vld [vmem:[%s9467_s23 + $0x10] sm:$0xff]  ;;  %7468 = vmatpush3.msra.mxu0 %v439_v2  ;;  %v436_v6 = vld [vmem:[%s11758_s1 + $0x60] sm:$0xff]  ;;  %v379_v7 = vld [vmem:[%s9467_s23 + $0x18] sm:$0xff]  ;;  %s11711_s22 = scalar_lea.hbm %s11766_s9, %s6634_s17  ;;  %s6449_s28 = scalar_lea.sflag [#allocation5], %s9461_s26 }
  0x52   : > { %7469 = vmatprep.subr.mxu0 %v438_v3  ;;  %v435_v8 = vld [vmem:[%s11758_s1 + $0x58] sm:$0xff]  ;;  %v434_v9 = vld [vmem:[%s11758_s1 + $0x50] sm:$0xff]  ;;  %v380_v10 = vld [vmem:[%s9467_s23 + $0x20] sm:$0xff]  ;;  %p11977_p11 = scmp.ne.s32.totalorder %s11804_s14, 0  ;;  %s9286_s13 = smov [#allocation8]  }
  0x53   : > { %7470 = vmatpush3.msra.mxu0 %v438_v3  ;;  %v433_v11 = vld [vmem:[%s11758_s1 + $0x48] sm:$0xff]  ;;  %v432_v12 = vld [vmem:[%s11758_s1 + $0x40] sm:$0xff]  ;;  %v431_v14 = vld [vmem:[%s11758_s1 + $0x38] sm:$0xff] }
  0x54   : > { %393 = vxpose.xlu0.b32.cont [2/16] %v377_v1, 128  ;;  %7471 = vmatprep.subr.mxu0 %v437_v5  ;;  %v381_v13 = vld [vmem:[%s9467_s23 + $0x28] sm:$0xff]  ;;  %v430_v15 = vld [vmem:[%s11758_s1 + $0x30] sm:$0xff]  ;;  %v428_v18 = vld [vmem:[%s11758_s1 + $0x20] sm:$0xff] }
  0x55   : > { %7472 = vmatpush3.msra.mxu0 %v437_v5  ;;  %v382_v16 = vld [vmem:[%s9467_s23 + $0x30] sm:$0xff]  ;;  %v429_v17 = vld [vmem:[%s11758_s1 + $0x28] sm:$0xff]  ;;  %v383_v19 = vld [vmem:[%s9467_s23 + $0x38] sm:$0xff] }
  0x56   : > { %7473 = vmatprep.subr.mxu0 %v436_v6  ;;  %v427_v20 = vld [vmem:[%s11758_s1 + $0x18] sm:$0xff]  ;;  %v426_v21 = vld [vmem:[%s11758_s1 + $0x10] sm:$0xff]  ;;  %v384_v22 = vld [vmem:[%s9467_s23 + $0x40] sm:$0xff] }
  0x57   : > { %7474 = vmatpush3.msra.mxu0 %v436_v6  ;;  %v425_v23 = vld [vmem:[%s11758_s1 + $0x8] sm:$0xff]  ;;  %v424_v24 = vld [vmem:[%s11758_s1] sm:$0xff]  ;;  %v386_v26 = vld [vmem:[%s9467_s23 + $0x50] sm:$0xff] }
  0x58   : > { %394 = vxpose.xlu0.b32.cont [3/16] %v378_v4, 128  ;;  %7475 = vmatprep.subr.mxu0 %v435_v8  ;;  %v385_v25 = vld [vmem:[%s9467_s23 + $0x48] sm:$0xff]  ;;  %v387_v27 = vld [vmem:[%s9467_s23 + $0x58] sm:$0xff]  ;;  %v388_v28 = vld [vmem:[%s9467_s23 + $0x60] sm:$0xff] }
  0x59   : > { %7476 = vmatpush3.msra.mxu0 %v435_v8  ;;  %v389_v29 = vld [vmem:[%s9467_s23 + $0x68] sm:$0xff]  ;;  %v390_v30 = vld [vmem:[%s9467_s23 + $0x70] sm:$0xff]  ;;  %v391_v31 = vld [vmem:[%s9467_s23 + $0x78] sm:$0xff] }
  0x5a   : > { %7477 = vmatprep.subr.mxu0 %v434_v9  ;;  %v692_v32 = vld [vmem:[#allocation6 + $0x78] sm:$0xff]  ;;  %v691_v34 = vld [vmem:[#allocation6 + $0x70] sm:$0xff]  ;;  %v690_v35 = vld [vmem:[#allocation6 + $0x68] sm:$0xff] }
  0x5b   : > { %7478 = vmatpush3.msra.mxu0 %v434_v9  ;;  %v892_v33 = vld [vmem:[#allocation6 + $0xf8] sm:$0xff]  ;;  %7523 = vmatprep.subr.mxu1 %v692_v32  ;;  %v689_v36 = vld [vmem:[#allocation6 + $0x60] sm:$0xff]  ;;  %v687_v38 = vld [vmem:[#allocation6 + $0x50] sm:$0xff] }
  0x5c   : > { %395 = vxpose.xlu0.b32.cont [4/16] %v379_v7, 128  ;;  %7479 = vmatprep.subr.mxu0 %v433_v11  ;;  %v688_v37 = vld [vmem:[#allocation6 + $0x58] sm:$0xff]  ;;  %v686_v39 = vld [vmem:[#allocation6 + $0x48] sm:$0xff]  ;;  %v685_v40 = vld [vmem:[#allocation6 + $0x40] sm:$0xff] }
  0x5d   : > { %7480 = vmatpush3.msra.mxu0 %v433_v11  ;;  %7524 = vmatpush3.msra.mxu1 %v692_v32  ;;  %v891_v43 = vld [vmem:[#allocation6 + $0xf0] sm:$0xff]  ;;  %v890_v44 = vld [vmem:[#allocation6 + $0xe8] sm:$0xff]  ;;  %v889_v46 = vld [vmem:[#allocation6 + $0xe0] sm:$0xff] }
  0x5e   : > { %7481 = vmatprep.subr.mxu0 %v432_v12  ;;  %7525 = vmatprep.subr.mxu1 %v691_v34  ;;  %v888_v47 = vld [vmem:[#allocation6 + $0xd8] sm:$0xff]  ;;  %v887_v49 = vld [vmem:[#allocation6 + $0xd0] sm:$0xff]  ;;  %v886_v50 = vld [vmem:[#allocation6 + $0xc8] sm:$0xff] }
  0x5f   : > { %7482 = vmatpush3.msra.mxu0 %v432_v12  ;;  %7526 = vmatpush3.msra.mxu1 %v691_v34  ;;  %v885_v52 = vld [vmem:[#allocation6 + $0xc0] sm:$0xff]  ;;  %v884_v0 = vld [vmem:[#allocation6 + $0xb8] sm:$0xff]  ;;  %v883_v1 = vld [vmem:[#allocation6 + $0xb0] sm:$0xff] }
  0x60   : > { %396 = vxpose.xlu0.b32.cont [5/16] %v380_v10, 128  ;;  %7483 = vmatprep.subr.mxu0 %v431_v14  ;;  %v882_v2 = vld [vmem:[#allocation6 + $0xa8] sm:$0xff]  ;;  %v881_v3 = vld [vmem:[#allocation6 + $0xa0] sm:$0xff]  ;;  %v684_v4 = vld [vmem:[#allocation6 + $0x38] sm:$0xff] }
  0x61   : > { %7484 = vmatpush3.msra.mxu0 %v431_v14  ;;  %7527 = vmatprep.subr.mxu1 %v690_v35  ;;  %v880_v5 = vld [vmem:[#allocation6 + $0x98] sm:$0xff]  ;;  %v683_v6 = vld [vmem:[#allocation6 + $0x30] sm:$0xff]  ;;  %v682_v8 = vld [vmem:[#allocation6 + $0x28] sm:$0xff] }
  0x62   : > { %7485 = vmatprep.subr.mxu0 %v430_v15  ;;  %7528 = vmatpush3.msra.mxu1 %v690_v35  ;;  %v879_v7 = vld [vmem:[#allocation6 + $0x90] sm:$0xff]  ;;  %v878_v9 = vld [vmem:[#allocation6 + $0x88] sm:$0xff]  ;;  %v681_v10 = vld [vmem:[#allocation6 + $0x20] sm:$0xff] }
  0x63   : > { %7486 = vmatpush3.msra.mxu0 %v430_v15  ;;  %7529 = vmatprep.subr.mxu1 %v689_v36  ;;  %v877_v11 = vld [vmem:[#allocation6 + $0x80] sm:$0xff]  ;;  %v680_v12 = vld [vmem:[#allocation6 + $0x18] sm:$0xff]  ;;  %v679_v14 = vld [vmem:[#allocation6 + $0x10] sm:$0xff] }
  0x64   : > { %397 = vxpose.xlu0.b32.cont [6/16] %v381_v13, 128  ;;  %7487 = vmatprep.subr.mxu0 %v429_v17  ;;  %v9283_v13 = vmov 0.0   ;;  %v678_v15 = vld [vmem:[#allocation6 + $0x8] sm:$0xff] }
  0x65   : > { %7488 = vmatpush3.msra.mxu0 %v429_v17  ;;  %7530 = vmatpush3.msra.mxu1 %v689_v36  ;;  %369 = vst [vmem:[#allocation2] sm:$0xff] %v9283_v13  ;;  %370 = vst [vmem:[#allocation2 + $0x8] sm:$0xff] %v9283_v13 }
  0x66   : > { %7489 = vmatprep.subr.mxu0 %v428_v18  ;;  %7531 = vmatprep.subr.mxu1 %v688_v37  ;;  %371 = vst [vmem:[#allocation2 + $0x90] sm:$0xff] %v9283_v13  ;;  %372 = vst [vmem:[#allocation2 + $0x98] sm:$0x3] %v9283_v13 }
  0x67   : > { %7490 = vmatpush3.msra.mxu0 %v428_v18  ;;  %7532 = vmatpush3.msra.mxu1 %v688_v37  ;;  %v1280_v18 = vld [vmem:[#allocation6 + $0x1f8] sm:$0xff] }
  0x68   : > { %398 = vxpose.xlu0.b32.cont [7/16] %v382_v16, 128  ;;  %7491 = vmatprep.subr.mxu0 %v427_v20  ;;  %v677_v16 = vld [vmem:[#allocation6] sm:$0xff] }
  0x69   : > { %7492 = vmatpush3.msra.mxu0 %v427_v20  ;;  %7533 = vmatprep.subr.mxu1 %v687_v38  ;;  %v6577_v20 = vld [vmem:[%s9467_s23 + $0x80] sm:$0xff] }
  0x6a   : > { %7493 = vmatprep.subr.mxu0 %v426_v21  ;;  %7534 = vmatpush3.msra.mxu1 %v687_v38 }
  0x6b   : > { %7494 = vmatpush3.msra.mxu0 %v426_v21  ;;  %7535 = vmatprep.subr.mxu1 %v686_v39  ;;  %v6578_v21 = vld [vmem:[%s9467_s23 + $0x88] sm:$0xff] }
  0x6c   : > { %399 = vxpose.xlu0.b32.cont [8/16] %v383_v19, 128  ;;  %7495 = vmatprep.subr.mxu0 %v425_v23  ;;  %v661_v17 = vld [vmem:[#allocation2 + $0x6] sm:$0xff]  ;;  %v9541_v19 = vld [vmem:[#allocation6 + $0x178] sm:$0xff] }
  0x6d   : > { %7496 = vmatpush3.msra.mxu0 %v425_v23  ;;  %7536 = vmatpush3.msra.mxu1 %v686_v39  ;;  %v6580_v23 = vld [vmem:[%s9467_s23 + $0x98] sm:$0xff] }
  0x6e   : > { %7497 = vmatprep.subr.mxu0 %v424_v24  ;;  %7537 = vmatprep.subr.mxu1 %v685_v40 }
  0x6f   : > { %7498 = vmatpush3.msra.mxu0 %v424_v24  ;;  %7538 = vmatpush3.msra.mxu1 %v685_v40  ;;  %v6581_v24 = vld [vmem:[%s9467_s23 + $0xa0] sm:$0xff]  ;;  %v1279_v40 = vld [vmem:[#allocation6 + $0x1f0] sm:$0xff] }
  0x70   : > { %400 = vxpose.xlu0.b32.cont [9/16] %v384_v22, 128  ;;  %7579 = vmatprep.subr.mxu0 %v892_v33  ;;  %v6579_v22 = vld [vmem:[%s9467_s23 + $0x90] sm:$0xff] }
  0x71   : > { %7539 = vmatprep.subr.mxu1 %v684_v4  ;;  %7555 = vmatprep.mubr.f32.mxu1 %v661_v17  ;;  %v1080_v17 = vld [vmem:[#allocation6 + $0x148] sm:$0xff] }
  0x72   : > { %7540 = vmatpush3.msra.mxu1 %v684_v4  ;;  %3442 = vxpose.xlu1.b32.start [1/16] %v6577_v20, 128 }
  0x73   : > { %7541 = vmatprep.subr.mxu1 %v683_v6 }
  0x74   : > { %401 = vxpose.xlu0.b32.cont [10/16] %v385_v25, 128  ;;  %7542 = vmatpush3.msra.mxu1 %v683_v6  ;;  %v6582_v25 = vld [vmem:[%s9467_s23 + $0xa8] sm:$0xff] }
  0x75   : > { %7543 = vmatprep.subr.mxu1 %v682_v8 }
  0x76   : > { %7544 = vmatpush3.msra.mxu1 %v682_v8  ;;  %3443 = vxpose.xlu1.b32.cont [2/16] %v6578_v21, 128 }
  0x77   : > { %7545 = vmatprep.subr.mxu1 %v681_v10 }
  0x78   : > { %402 = vxpose.xlu0.b32.cont [11/16] %v386_v26, 128  ;;  %7546 = vmatpush3.msra.mxu1 %v681_v10  ;;  %v6583_v26 = vld [vmem:[%s9467_s23 + $0xb0] sm:$0xff] }
  0x79   : > { %7547 = vmatprep.subr.mxu1 %v680_v12 }
  0x7a   : > { %7548 = vmatpush3.msra.mxu1 %v680_v12  ;;  %3444 = vxpose.xlu1.b32.cont [3/16] %v6579_v22, 128 }
  0x7b   : > { %7549 = vmatprep.subr.mxu1 %v679_v14 }
  0x7c   : > { %403 = vxpose.xlu0.b32.cont [12/16] %v387_v27, 128  ;;  %7550 = vmatpush3.msra.mxu1 %v679_v14  ;;  %v6584_v27 = vld [vmem:[%s9467_s23 + $0xb8] sm:$0xff] }
  0x7d   : > { %7551 = vmatprep.subr.mxu1 %v678_v15 }
  0x7e   : > { %7552 = vmatpush3.msra.mxu1 %v678_v15  ;;  %3445 = vxpose.xlu1.b32.cont [4/16] %v6580_v23, 128  ;;  %v1270_v23 = vld [vmem:[#allocation6 + $0x1a8] sm:$0xff] }
  0x7f   : > { %7553 = vmatprep.subr.mxu1 %v677_v16 }
  0x80   : > { %404 = vxpose.xlu0.b32.cont [13/16] %v388_v28, 128  ;;  %7554 = vmatpush3.msra.mxu1 %v677_v16  ;;  %v6585_v28 = vld [vmem:[%s9467_s23 + $0xc0] sm:$0xff]  ;;  %v1271_v16 = vld [vmem:[#allocation6 + $0x1b0] sm:$0xff] }
  0x81   : > { %7635 = vmatprep.subr.mxu1 %v9541_v19 }
  0x82   : > { %3446 = vxpose.xlu1.b32.cont [5/16] %v6581_v24, 128 }
  0x84   : > { %405 = vxpose.xlu0.b32.cont [14/16] %v389_v29, 128  ;;  %v9556_v29 = vld [vmem:[%s11759_s2] ss:$0 sm:$0xff] }
  0x86   : > { %3447 = vxpose.xlu1.b32.cont [6/16] %v6582_v25, 128  ;;  %v1079_v25 = vld [vmem:[#allocation6 + $0x140] sm:$0xff] }
  0x88   : > { %406 = vxpose.xlu0.b32.cont [15/16] %v390_v30, 128  ;;  %v9561_v30 = vld [vmem:[%s11760_s3] ss:$0 sm:$0xff] }
  0x8a   : > { %3448 = vxpose.xlu1.b32.cont [7/16] %v6583_v26, 128 }
  0x8c   : > { %407 = vxpose.xlu0.b32.end [16/16] %v391_v31, 128 }
  0x8e   : > { %3449 = vxpose.xlu1.b32.cont [8/16] %v6584_v27, 128  ;;  %v1269_v27 = vld [vmem:[#allocation6 + $0x1a0] sm:$0xff] }
  0x92   : > { %3450 = vxpose.xlu1.b32.cont [9/16] %v6585_v28, 128 }
  0xcc   : > { %v408_v41 = vpop.trf.xlu0 }
  0xcd   : > { %7499 = vmatprep.mubr.f32.mxu0 %v408_v41  ;;  %v6587_v41 = vld [vmem:[%s9467_s23 + $0xd0] sm:$0xff] }
  0xd0   : > { %v409_v42 = vpop.trf.xlu0 }
  0xd1   : > { %7500 = vmatmul.mubr.f32.vlgmr.msra.gmra.mxu0 %v409_v42 }
  0xd2   : > { %7580 = vmatpush3.msra.mxu0 %v892_v33  ;;  %v6586_v33 = vld [vmem:[%s9467_s23 + $0xc8] sm:$0xff] }
  0xd3   : > { %7581 = vmatprep.subr.mxu0 %v891_v43  ;;  %3451 = vxpose.xlu1.b32.cont [10/16] %v6586_v33, 128 }
  0xd4   : > { %v410_v45 = vpop.trf.xlu0  ;;  %7582 = vmatpush3.msra.mxu0 %v891_v43 }
  0xd5   : > { %7502 = vmatprep.mubr.f32.mxu0 %v410_v45  ;;  %7583 = vmatprep.subr.mxu0 %v890_v44 }
  0xd6   : > { %7584 = vmatpush3.msra.mxu0 %v890_v44  ;;  %v1278_v44 = vld [vmem:[#allocation6 + $0x1e8] sm:$0xff] }
  0xd7   : > { %7585 = vmatprep.subr.mxu0 %v889_v46  ;;  %3452 = vxpose.xlu1.b32.cont [11/16] %v6587_v41, 128 }
  0xd8   : > { %v411_v48 = vpop.trf.xlu0  ;;  %7586 = vmatpush3.msra.mxu0 %v889_v46 }
  0xd9   : > { %7503 = vmatmul.mubr.f32.gmra.mxu0 %v411_v48  ;;  %7587 = vmatprep.subr.mxu0 %v888_v47  ;;  %v1277_v48 = vld [vmem:[#allocation6 + $0x1e0] sm:$0xff] }
  0xda   : > { %7588 = vmatpush3.msra.mxu0 %v888_v47 }
  0xdb   : > { %7589 = vmatprep.subr.mxu0 %v887_v49 }
  0xdc   : > { %v412_v51 = vpop.trf.xlu0  ;;  %7590 = vmatpush3.msra.mxu0 %v887_v49 }
  0xdd   : > { %7505 = vmatprep.mubr.f32.mxu0 %v412_v51  ;;  %7591 = vmatprep.subr.mxu0 %v886_v50  ;;  %v6588_v51 = vld [vmem:[%s9467_s23 + $0xd8] sm:$0xff] }
  0xde   : > { %7592 = vmatpush3.msra.mxu0 %v886_v50  ;;  %3453 = vxpose.xlu1.b32.cont [12/16] %v6588_v51, 128 }
  0xdf   : > { %7593 = vmatprep.subr.mxu0 %v885_v52 }
  0xe0   : > { %v413_v53 = vpop.trf.xlu0  ;;  %7594 = vmatpush3.msra.mxu0 %v885_v52 }
  0xe1   : > { %7506 = vmatmul.mubr.f32.gmra.mxu0 %v413_v53  ;;  %7595 = vmatprep.subr.mxu0 %v884_v0 }
  0xe2   : > { %7596 = vmatpush3.msra.mxu0 %v884_v0  ;;  %v1274_v0 = vld [vmem:[#allocation6 + $0x1c8] sm:$0xff] }
  0xe3   : > { %7597 = vmatprep.subr.mxu0 %v883_v1 }
  0xe4   : > { %v414_v54 = vpop.trf.xlu0  ;;  %7598 = vmatpush3.msra.mxu0 %v883_v1  ;;  %v1083_v1 = vld [vmem:[#allocation6 + $0x160] sm:$0xff] }
  0xe5   : > { %7508 = vmatprep.mubr.f32.mxu0 %v414_v54  ;;  %7599 = vmatprep.subr.mxu0 %v882_v2 }
  0xe6   : > { %7600 = vmatpush3.msra.mxu0 %v882_v2 }
  0xe7   : > { %7601 = vmatprep.subr.mxu0 %v881_v3 }
  0xe8   : > { %v415_v55 = vpop.trf.xlu0  ;;  %7602 = vmatpush3.msra.mxu0 %v881_v3 }
  0xe9   : > { %7509 = vmatmul.mubr.f32.gmra.mxu0 %v415_v55  ;;  %7603 = vmatprep.subr.mxu0 %v880_v5  ;;  %v1276_v55 = vld [vmem:[#allocation6 + $0x1d8] sm:$0xff] }
  0xea   : > { %7604 = vmatpush3.msra.mxu0 %v880_v5 }
  0xeb   : > { %7605 = vmatprep.subr.mxu0 %v879_v7 }
  0xec   : > { %v416_v56 = vpop.trf.xlu0  ;;  %7606 = vmatpush3.msra.mxu0 %v879_v7  ;;  %v1273_v7 = vld [vmem:[#allocation6 + $0x1c0] sm:$0xff] }
  0xed   : > { %7511 = vmatprep.mubr.f32.mxu0 %v416_v56  ;;  %7607 = vmatprep.subr.mxu0 %v878_v9 }
  0xee   : > { %7608 = vmatpush3.msra.mxu0 %v878_v9  ;;  %v1082_v9 = vld [vmem:[#allocation6 + $0x158] sm:$0xff] }
  0xef   : > { %7609 = vmatprep.subr.mxu0 %v877_v11 }
  0xf0   : > { %v417_v57 = vpop.trf.xlu0  ;;  %7610 = vmatpush3.msra.mxu0 %v877_v11  ;;  %v1272_v11 = vld [vmem:[#allocation6 + $0x1b8] sm:$0xff] }
  0xf1   : > { %7512 = vmatmul.mubr.f32.gmra.mxu0 %v417_v57  ;;  %7691 = vmatprep.subr.mxu0 %v1280_v18  ;;  %v1085_v57 = vld [vmem:[#allocation6 + $0x170] sm:$0xff] }
  0xf4   : > { %v418_v58 = vpop.trf.xlu0 }
  0xf5   : > { %7514 = vmatprep.mubr.f32.mxu0 %v418_v58 }
  0xf8   : > { %v419_v59 = vpop.trf.xlu0 }
  0xf9   : > { %7515 = vmatmul.mubr.f32.gmra.mxu0 %v419_v59  ;;  %v1275_v59 = vld [vmem:[#allocation6 + $0x1d0] sm:$0xff] }
  0xfc   : > { %v420_v60 = vpop.trf.xlu0 }
  0xfd   : > { %7517 = vmatprep.mubr.f32.mxu0 %v420_v60 }
 0x100   : > { %v421_v61 = vpop.trf.xlu0 }
 0x101   : > { %7518 = vmatmul.mubr.f32.gmra.mxu0 %v421_v61  ;;  %v1084_v61 = vld [vmem:[#allocation6 + $0x168] sm:$0xff] }
 0x104   : > { %v422_v62 = vpop.trf.xlu0 }
 0x105   : > { %7520 = vmatprep.mubr.f32.mxu0 %v422_v62 }
 0x108   : > { %v423_v63 = vpop.trf.xlu0 }
 0x109   : > { %7521 = vmatmul.mubr.f32.gmra.mxu0 %v423_v63 }
 0x10a   : > { %7611 = vmatprep.mubr.f32.mxu0 %v9283_v13  ;;  %v1081_v13 = vld [vmem:[#allocation6 + $0x150] sm:$0xff] }
 0x191   : > { %v7501_v31 = vpop.f32.mrf.mxu0 }
 0x192   : > { %v518_v32 = vadd.f32 %v7501_v31, %v9556_v29  ;;  %v1078_v31 = vld [vmem:[#allocation6 + $0x138] sm:$0xff] }
 0x193   : > { %v512_v34 = vpop.f32.mrf.mxu0 }
 0x194   : > { %vm592_vm0 = vcmp.gt.f32.partialorder %v518_v32, 0.0  ;;  %v614_v35 = vmul.f32 %v9561_v30, %v518_v32  ;;  %v513_v36 = vadd.f32 %v9556_v29, %v512_v34  ;;  %v1268_v34 = vld [vmem:[#allocation6 + $0x198] sm:$0xff] }
 0x196   : > { %v9567_v37 = vsel %vm592_vm0, %v518_v32, %v614_v35  ;;  %vm591_vm1 = vcmp.gt.f32.partialorder %v513_v36, 0.0  ;;  %v613_v38 = vmul.f32 %v9561_v30, %v513_v36  ;;  %v1077_v35 = vld [vmem:[#allocation6 + $0x130] sm:$0xff] }
 0x197   : > { %646 = vst [vmem:[#allocation2 + $0x18] sm:$0xff] %v9567_v37 }
 0x198   : > { %v9571_v39 = vsel %vm591_vm1, %v513_v36, %v613_v38 }
 0x199   : > { %645 = vst [vmem:[#allocation2 + $0x10] sm:$0xff] %v9571_v39  ;;  %v7504_v42 = vpop.f32.mrf.mxu0  ;;  %7612 = vmatmul.mubr.f32.vlgmr.msra.gmra.mxu0 %v9571_v39 }
 0x19a   : > { %v528_v43 = vadd.f32 %v7504_v42, %v9556_v29  ;;  %7614 = vmatprep.mubr.f32.mxu0 %v9567_v37  ;;  %7692 = vmatpush3.msra.mxu0 %v1280_v18 }
 0x19b   : > { %v522_v45 = vpop.f32.mrf.mxu0  ;;  %7693 = vmatprep.subr.mxu0 %v1279_v40 }
 0x19c   : > { %vm594_vm2 = vcmp.gt.f32.partialorder %v528_v43, 0.0  ;;  %v616_v46 = vmul.f32 %v9561_v30, %v528_v43  ;;  %v523_v47 = vadd.f32 %v9556_v29, %v522_v45  ;;  %7694 = vmatpush3.msra.mxu0 %v1279_v40  ;;  %v1076_v45 = vld [vmem:[#allocation6 + $0x128] sm:$0xff] }
 0x19d   : > { %7695 = vmatprep.subr.mxu0 %v1278_v44 }
 0x19e   : > { %v9580_v49 = vsel %vm594_vm2, %v528_v43, %v616_v46  ;;  %vm593_vm3 = vcmp.gt.f32.partialorder %v523_v47, 0.0  ;;  %v615_v50 = vmul.f32 %v9561_v30, %v523_v47  ;;  %7696 = vmatpush3.msra.mxu0 %v1278_v44  ;;  %v1267_v43 = vld [vmem:[#allocation6 + $0x190] sm:$0xff] }
 0x19f   : > { %648 = vst [vmem:[#allocation2 + $0x28] sm:$0xff] %v9580_v49  ;;  %7697 = vmatprep.subr.mxu0 %v1277_v48 }
 0x1a0   : > { %v9585_v52 = vsel %vm593_vm3, %v523_v47, %v615_v50  ;;  %v9587_v53 = vld [vmem:[#allocation2 + $0xe] sm:$0xff]  ;;  %v9589_v54 = vld [vmem:[#allocation2 + $0x16] sm:$0xff]  ;;  %7698 = vmatpush3.msra.mxu0 %v1277_v48  ;;  %v1075_v50 = vld [vmem:[#allocation6 + $0x120] sm:$0xff] }
 0x1a1   : > { %647 = vst [vmem:[#allocation2 + $0x20] sm:$0xff] %v9585_v52  ;;  %v7507_v56 = vpop.f32.mrf.mxu0  ;;  %7556 = vmatmul.mubr.f32.vlgmr.msra.gmra.mxu1 %v9587_v53  ;;  %7615 = vmatmul.mubr.f32.gmra.mxu0 %v9585_v52  ;;  %v1266_v47 = vld [vmem:[#allocation6 + $0x188] sm:$0xff] }
 0x1a2   : > { %v538_v58 = vadd.f32 %v7507_v56, %v9556_v29  ;;  %7558 = vmatprep.mubr.f32.mxu1 %v9589_v54  ;;  %7617 = vmatprep.mubr.f32.mxu0 %v9580_v49  ;;  %v1265_v56 = vld [vmem:[#allocation6 + $0x180] sm:$0xff] }
 0x1a3   : > { %v532_v60 = vpop.f32.mrf.mxu0  ;;  %7636 = vmatpush3.msra.mxu1 %v9541_v19  ;;  %7699 = vmatprep.subr.mxu0 %v1276_v55 }
 0x1a4   : > { %vm596_vm4 = vcmp.gt.f32.partialorder %v538_v58, 0.0  ;;  %v618_v62 = vmul.f32 %v9561_v30, %v538_v58  ;;  %v533_v63 = vadd.f32 %v9556_v29, %v532_v60  ;;  %7637 = vmatprep.subr.mxu1 %v1085_v57  ;;  %7700 = vmatpush3.msra.mxu0 %v1276_v55 }
 0x1a5   : > { %7638 = vmatpush3.msra.mxu1 %v1085_v57  ;;  %7701 = vmatprep.subr.mxu0 %v1275_v59  ;;  %v1074_v57 = vld [vmem:[#allocation6 + $0x118] sm:$0xff] }
 0x1a6   : > { %v9600_v2 = vsel %vm596_vm4, %v538_v58, %v618_v62  ;;  %vm595_vm5 = vcmp.gt.f32.partialorder %v533_v63, 0.0  ;;  %v617_v3 = vmul.f32 %v9561_v30, %v533_v63  ;;  %7639 = vmatprep.subr.mxu1 %v1084_v61  ;;  %7702 = vmatpush3.msra.mxu0 %v1275_v59 }
 0x1a7   : > { %650 = vst [vmem:[#allocation2 + $0x38] sm:$0xff] %v9600_v2  ;;  %7640 = vmatpush3.msra.mxu1 %v1084_v61  ;;  %7703 = vmatprep.subr.mxu0 %v1274_v0 }
 0x1a8   : > { %v9604_v4 = vsel %vm595_vm5, %v533_v63, %v617_v3  ;;  %v9606_v5 = vld [vmem:[#allocation2 + $0x1e] sm:$0xff]  ;;  %v9608_v6 = vld [vmem:[#allocation2 + $0x26] sm:$0xff]  ;;  %7641 = vmatprep.subr.mxu1 %v1083_v1  ;;  %7704 = vmatpush3.msra.mxu0 %v1274_v0 }
 0x1a9   : > { %649 = vst [vmem:[#allocation2 + $0x30] sm:$0xff] %v9604_v4  ;;  %v7510_v8 = vpop.f32.mrf.mxu0  ;;  %7559 = vmatmul.mubr.f32.gmra.mxu1 %v9606_v5  ;;  %7618 = vmatmul.mubr.f32.gmra.mxu0 %v9604_v4  ;;  %v9664_v63 = vld [vmem:[#allocation6 + $0x2f8] sm:$0xff]  ;;  %v6589_v3 = vld [vmem:[%s9467_s23 + $0xe0] sm:$0xff] }
 0x1aa   : > { %v548_v10 = vadd.f32 %v7510_v8, %v9556_v29  ;;  %7561 = vmatprep.mubr.f32.mxu1 %v9608_v6  ;;  %7620 = vmatprep.mubr.f32.mxu0 %v9600_v2 }
 0x1ab   : > { %v542_v12 = vpop.f32.mrf.mxu0  ;;  %7642 = vmatpush3.msra.mxu1 %v1083_v1  ;;  %7705 = vmatprep.subr.mxu0 %v1273_v7  ;;  %v1073_v1 = vld [vmem:[#allocation6 + $0x110] sm:$0xff] }
 0x1ac   : > { %vm598_vm6 = vcmp.gt.f32.partialorder %v548_v10, 0.0  ;;  %v620_v14 = vmul.f32 %v9561_v30, %v548_v10  ;;  %v543_v15 = vadd.f32 %v9556_v29, %v542_v12  ;;  %7643 = vmatprep.subr.mxu1 %v1082_v9  ;;  %7706 = vmatpush3.msra.mxu0 %v1273_v7  ;;  %v1071_v12 = vld [vmem:[#allocation6 + $0x100] sm:$0xff] }
 0x1ad   : > { %7644 = vmatpush3.msra.mxu1 %v1082_v9  ;;  %7707 = vmatprep.subr.mxu0 %v1272_v11  ;;  %v1072_v9 = vld [vmem:[#allocation6 + $0x108] sm:$0xff] }
 0x1ae   : > { %v9618_v18 = vsel %vm598_vm6, %v548_v10, %v620_v14  ;;  %vm597_vm7 = vcmp.gt.f32.partialorder %v543_v15, 0.0  ;;  %v619_v19 = vmul.f32 %v9561_v30, %v543_v15  ;;  %7645 = vmatprep.subr.mxu1 %v1081_v13  ;;  %7708 = vmatpush3.msra.mxu0 %v1272_v11 }
 0x1af   : > { %652 = vst [vmem:[#allocation2 + $0x48] sm:$0xff] %v9618_v18  ;;  %7646 = vmatpush3.msra.mxu1 %v1081_v13  ;;  %7709 = vmatprep.subr.mxu0 %v1271_v16  ;;  %v6590_v13 = vld [vmem:[%s9467_s23 + $0xe8] sm:$0xff] }
 0x1b0   : > { %v9622_v20 = vsel %vm597_vm7, %v543_v15, %v619_v19  ;;  %v9624_v21 = vld [vmem:[#allocation2 + $0x2e] sm:$0xff]  ;;  %v9626_v22 = vld [vmem:[#allocation2 + $0x36] sm:$0xff]  ;;  %7647 = vmatprep.subr.mxu1 %v1080_v17  ;;  %7710 = vmatpush3.msra.mxu0 %v1271_v16 }
 0x1b1   : > { %651 = vst [vmem:[#allocation2 + $0x40] sm:$0xff] %v9622_v20  ;;  %v7513_v24 = vpop.f32.mrf.mxu0  ;;  %7562 = vmatmul.mubr.f32.gmra.mxu1 %v9624_v21  ;;  %7621 = vmatmul.mubr.f32.gmra.mxu0 %v9622_v20 }
 0x1b2   : > { %v558_v26 = vadd.f32 %v7513_v24, %v9556_v29  ;;  %7564 = vmatprep.mubr.f32.mxu1 %v9626_v22  ;;  %7623 = vmatprep.mubr.f32.mxu0 %v9618_v18  ;;  %v1474_v24 = vld [vmem:[#allocation6 + $0x278] sm:$0xff] }
 0x1b3   : > { %v552_v28 = vpop.f32.mrf.mxu0  ;;  %7648 = vmatpush3.msra.mxu1 %v1080_v17  ;;  %7711 = vmatprep.subr.mxu0 %v1270_v23 }
 0x1b4   : > { %vm600_vm8 = vcmp.gt.f32.partialorder %v558_v26, 0.0  ;;  %v622_v32 = vmul.f32 %v9561_v30, %v558_v26  ;;  %v553_v33 = vadd.f32 %v9556_v29, %v552_v28  ;;  %7649 = vmatprep.subr.mxu1 %v1079_v25  ;;  %7712 = vmatpush3.msra.mxu0 %v1270_v23 }
 0x1b5   : > { %7650 = vmatpush3.msra.mxu1 %v1079_v25  ;;  %7713 = vmatprep.subr.mxu0 %v1269_v27  ;;  %v6591_v25 = vld [vmem:[%s9467_s23 + $0xf0] sm:$0xff] }
 0x1b6   : > { %v9636_v36 = vsel %vm600_vm8, %v558_v26, %v622_v32  ;;  %vm599_vm9 = vcmp.gt.f32.partialorder %v553_v33, 0.0  ;;  %v621_v38 = vmul.f32 %v9561_v30, %v553_v33  ;;  %7651 = vmatprep.subr.mxu1 %v1078_v31  ;;  %7714 = vmatpush3.msra.mxu0 %v1269_v27  ;;  %v6592_v32 = vld [vmem:[%s9467_s23 + $0xf8] sm:$0xff] }
 0x1b7   : > { %654 = vst [vmem:[#allocation2 + $0x58] sm:$0xff] %v9636_v36  ;;  %7652 = vmatpush3.msra.mxu1 %v1078_v31  ;;  %7715 = vmatprep.subr.mxu0 %v1268_v34 }
 0x1b8   : > { %v9640_v40 = vsel %vm599_vm9, %v553_v33, %v621_v38  ;;  %v9642_v41 = vld [vmem:[#allocation2 + $0x3e] sm:$0xff]  ;;  %v9644_v42 = vld [vmem:[#allocation2 + $0x46] sm:$0xff]  ;;  %7653 = vmatprep.subr.mxu1 %v1077_v35  ;;  %7716 = vmatpush3.msra.mxu0 %v1268_v34 }
 0x1b9   : > { %653 = vst [vmem:[#allocation2 + $0x50] sm:$0xff] %v9640_v40  ;;  %v7516_v44 = vpop.f32.mrf.mxu0  ;;  %7565 = vmatmul.mubr.f32.gmra.mxu1 %v9642_v41  ;;  %7624 = vmatmul.mubr.f32.gmra.mxu0 %v9640_v40 }
 0x1ba   : > { %v568_v46 = vadd.f32 %v7516_v44, %v9556_v29  ;;  %7567 = vmatprep.mubr.f32.mxu1 %v9644_v42  ;;  %7626 = vmatprep.mubr.f32.mxu0 %v9636_v36  ;;  %v1667_v44 = vld [vmem:[#allocation6 + $0x2f0] sm:$0xff] }
 0x1bb   : > { %v562_v48 = vpop.f32.mrf.mxu0  ;;  %7654 = vmatpush3.msra.mxu1 %v1077_v35  ;;  %7717 = vmatprep.subr.mxu0 %v1267_v43 }
 0x1bc   : > { %vm602_vm10 = vcmp.gt.f32.partialorder %v568_v46, 0.0  ;;  %v624_v51 = vmul.f32 %v9561_v30, %v568_v46  ;;  %v563_v55 = vadd.f32 %v9556_v29, %v562_v48  ;;  %7655 = vmatprep.subr.mxu1 %v1076_v45  ;;  %7718 = vmatpush3.msra.mxu0 %v1267_v43  ;;  %v9720_v48 = vld [vmem:[#allocation2 + $0x24] sm:$0xff] }
 0x1bd   : > { %7656 = vmatpush3.msra.mxu1 %v1076_v45  ;;  %7719 = vmatprep.subr.mxu0 %v1266_v47  ;;  %v9714_v45 = vld [vmem:[#allocation2 + $0x1c] sm:$0xff] }
 0x1be   : > { %v9654_v58 = vsel %vm602_vm10, %v568_v46, %v624_v51  ;;  %vm601_vm11 = vcmp.gt.f32.partialorder %v563_v55, 0.0  ;;  %v623_v59 = vmul.f32 %v9561_v30, %v563_v55  ;;  %7657 = vmatprep.subr.mxu1 %v1075_v50  ;;  %7720 = vmatpush3.msra.mxu0 %v1266_v47  ;;  %v1666_v46 = vld [vmem:[#allocation6 + $0x2e8] sm:$0xff]  ;;  %v1665_v51 = vld [vmem:[#allocation6 + $0x2e0] sm:$0xff] }
 0x1bf   : > { %656 = vst [vmem:[#allocation2 + $0x68] sm:$0xff] %v9654_v58  ;;  %7658 = vmatpush3.msra.mxu1 %v1075_v50  ;;  %7721 = vmatprep.subr.mxu0 %v1265_v56  ;;  %v1054_v50 = vld [vmem:[#allocation2 + $0xa] sm:$0xff] }
 0x1c0   : > { %v9658_v60 = vsel %vm601_vm11, %v563_v55, %v623_v59  ;;  %v9660_v61 = vld [vmem:[#allocation2 + $0x4e] sm:$0xff]  ;;  %v9662_v62 = vld [vmem:[#allocation2 + $0x56] sm:$0xff]  ;;  %7659 = vmatprep.subr.mxu1 %v1074_v57  ;;  %7722 = vmatpush3.msra.mxu0 %v1265_v56 }
 0x1c1   : > { %655 = vst [vmem:[#allocation2 + $0x60] sm:$0xff] %v9658_v60  ;;  %v7519_v0 = vpop.f32.mrf.mxu0  ;;  %7568 = vmatmul.mubr.f32.gmra.mxu1 %v9660_v61  ;;  %7627 = vmatmul.mubr.f32.gmra.mxu0 %v9658_v60  ;;  %v9724_v55 = vld [vmem:[#allocation2 + $0x2c] sm:$0xff]  ;;  %v9730_v59 = vld [vmem:[#allocation2 + $0x1a] sm:$0xff] }
 0x1c2   : > { %v578_v7 = vadd.f32 %v7519_v0, %v9556_v29  ;;  %7570 = vmatprep.mubr.f32.mxu1 %v9662_v62  ;;  %7629 = vmatprep.mubr.f32.mxu0 %v9654_v58  ;;  %v9727_v56 = vld [vmem:[#allocation2 + $0x12] sm:$0xff]  ;;  %v1472_v0 = vld [vmem:[#allocation6 + $0x268] sm:$0xff] }
 0x1c3   : > { %v572_v8 = vpop.f32.mrf.mxu0  ;;  %7660 = vmatpush3.msra.mxu1 %v1074_v57  ;;  %7803 = vmatprep.subr.mxu0 %v9664_v63  ;;  %v1473_v57 = vld [vmem:[#allocation6 + $0x270] sm:$0xff] }
 0x1c4   : > { %vm604_vm12 = vcmp.gt.f32.partialorder %v578_v7, 0.0  ;;  %v626_v10 = vmul.f32 %v9561_v30, %v578_v7  ;;  %v573_v11 = vadd.f32 %v9556_v29, %v572_v8  ;;  %7661 = vmatprep.subr.mxu1 %v1073_v1  ;;  %3454 = vxpose.xlu1.b32.cont [13/16] %v6589_v3, 128  ;;  %v9736_v3 = vld [vmem:[#allocation2 + $0x22] sm:$0xff]  ;;  %v9739_v8 = vld [vmem:[#allocation2 + $0x2a] sm:$0xff] }
 0x1c5   : > { %7662 = vmatpush3.msra.mxu1 %v1073_v1  ;;  %v9733_v1 = vld [vmem:[#allocation2 + $0x34] sm:$0xff] }
 0x1c6   : > { %v9677_v14 = vsel %vm604_vm12, %v578_v7, %v626_v10  ;;  %vm603_vm13 = vcmp.gt.f32.partialorder %v573_v11, 0.0  ;;  %v625_v15 = vmul.f32 %v9561_v30, %v573_v11  ;;  %7663 = vmatprep.subr.mxu1 %v1072_v9  ;;  %v1471_v7 = vld [vmem:[#allocation6 + $0x260] sm:$0xff] }
 0x1c7   : > { %658 = vst [vmem:[#allocation2 + $0x78] sm:$0xff] %v9677_v14  ;;  %7664 = vmatpush3.msra.mxu1 %v1072_v9  ;;  %v1470_v9 = vld [vmem:[#allocation6 + $0x258] sm:$0xff] }
 0x1c8   : > { %v9681_v16 = vsel %vm603_vm13, %v573_v11, %v625_v15  ;;  %v9683_v17 = vld [vmem:[#allocation2 + $0x5e] sm:$0xff]  ;;  %v9685_v19 = vld [vmem:[#allocation2 + $0x66] sm:$0xff]  ;;  %7665 = vmatprep.subr.mxu1 %v1071_v12  ;;  %3455 = vxpose.xlu1.b32.cont [14/16] %v6590_v13, 128  ;;  %v9745_v11 = vld [vmem:[#allocation2 + $0x32] sm:$0xff] }
 0x1c9   : > { %657 = vst [vmem:[#allocation2 + $0x70] sm:$0xff] %v9681_v16  ;;  %v7522_v23 = vpop.f32.mrf.mxu0  ;;  %7571 = vmatmul.mubr.f32.gmra.mxu1 %v9683_v17  ;;  %7630 = vmatmul.mubr.f32.gmra.mxu0 %v9681_v16  ;;  %v9742_v10 = vld [vmem:[#allocation2 + $0x3c] sm:$0xff]  ;;  %v1663_v13 = vld [vmem:[#allocation6 + $0x2d0] sm:$0xff] }
 0x1ca   : > { %v588_v26 = vadd.f32 %v7522_v23, %v9556_v29  ;;  %7573 = vmatprep.mubr.f32.mxu1 %v9685_v19  ;;  %7632 = vmatprep.mubr.f32.mxu0 %v9677_v14  ;;  %v9748_v15 = vld [vmem:[#allocation2 + $0x3a] sm:$0xff]  ;;  %v1468_v23 = vld [vmem:[#allocation6 + $0x248] sm:$0xff] }
 0x1cb   : > { %v582_v27 = vpop.f32.mrf.mxu0  ;;  %7666 = vmatpush3.msra.mxu1 %v1071_v12  ;;  %v1469_v12 = vld [vmem:[#allocation6 + $0x250] sm:$0xff] }
 0x1cc   : > { %vm606_vm14 = vcmp.gt.f32.partialorder %v588_v26, 0.0  ;;  %v628_v28 = vmul.f32 %v9561_v30, %v588_v26  ;;  %v583_v31 = vadd.f32 %v9556_v29, %v582_v27  ;;  %7747 = vmatprep.subr.mxu1 %v1474_v24  ;;  %3456 = vxpose.xlu1.b32.cont [15/16] %v6591_v25, 128  ;;  %v1248_v29 = vld [vmem:[#allocation2 + $0xc] sm:$0xff]  ;;  %v1467_v27 = vld [vmem:[#allocation6 + $0x240] sm:$0xff] }
 0x1cd   : > { %v1662_v25 = vld [vmem:[#allocation6 + $0x2c8] sm:$0xff] }
 0x1ce   : > { %v9697_v33 = vsel %vm606_vm14, %v588_v26, %v628_v28  ;;  %vm605_vm15 = vcmp.gt.f32.partialorder %v583_v31, 0.0  ;;  %v627_v34 = vmul.f32 %v9561_v30, %v583_v31  ;;  %v9711_v30 = vld [vmem:[#allocation2 + $0x14] sm:$0xff]  ;;  %v9754_v26 = vld [vmem:[#allocation2 + $0x44] sm:$0xff] }
 0x1cf   : > { %660 = vst [vmem:[#allocation2 + $0x88] sm:$0xff] %v9697_v33  ;;  %v9757_v28 = vld [vmem:[#allocation2 + $0x4a] sm:$0xff] }
 0x1d0   : > { %v9701_v35 = vsel %vm605_vm15, %v583_v31, %v627_v34  ;;  %v9703_v38 = vld [vmem:[#allocation2 + $0x6e] sm:$0xff]  ;;  %v9705_v43 = vld [vmem:[#allocation2 + $0x76] sm:$0xff]  ;;  %3457 = vxpose.xlu1.b32.end [16/16] %v6592_v32, 128  ;;  %v1661_v32 = vld [vmem:[#allocation6 + $0x2c0] sm:$0xff] }
 0x1d1   : > { %659 = vst [vmem:[#allocation2 + $0x80] sm:$0xff] %v9701_v35  ;;  %7574 = vmatmul.mubr.f32.gmra.mxu1 %v9703_v38  ;;  %7633 = vmatmul.mubr.f32.gmra.mxu0 %v9701_v35  ;;  %v9760_v31 = vld [vmem:[#allocation2 + $0x4c] sm:$0xff]  ;;  %v1466_v34 = vld [vmem:[#allocation6 + $0x238] sm:$0xff] }
 0x1d2   : > { %7576 = vmatprep.mubr.f32.mxu1 %v9705_v43  ;;  %7723 = vmatprep.mubr.f32.mxu0 %v1248_v29  ;;  %v9763_v29 = vld [vmem:[#allocation2 + $0x52] sm:$0xff] }
 0x1d5   : > { %7724 = vmatmul.mubr.f32.vlgmr.msra.gmra.mxu0 %v9711_v30 }
 0x1d6   : > { %7726 = vmatprep.mubr.f32.mxu0 %v9714_v45  ;;  %7804 = vmatpush3.msra.mxu0 %v9664_v63  ;;  %v1664_v63 = vld [vmem:[#allocation6 + $0x2d8] sm:$0xff] }
 0x1d7   : > { %7805 = vmatprep.subr.mxu0 %v1667_v44 }
 0x1d8   : > { %v9718_v47 = vld [vmem:[#allocation2 + $0x7e] sm:$0xff]  ;;  %7806 = vmatpush3.msra.mxu0 %v1667_v44 }
 0x1d9   : > { %7577 = vmatmul.mubr.f32.gmra.mxu1 %v9718_v47  ;;  %7727 = vmatmul.mubr.f32.gmra.mxu0 %v9720_v48  ;;  %v1660_v44 = vld [vmem:[#allocation6 + $0x2b8] sm:$0xff] }
 0x1da   : > { %7667 = vmatprep.mubr.f32.mxu1 %v1054_v50  ;;  %7807 = vmatprep.subr.mxu0 %v1666_v46  ;;  %v1465_v50 = vld [vmem:[#allocation6 + $0x230] sm:$0xff] }
 0x1db   : > { %7729 = vmatprep.mubr.f32.mxu0 %v9724_v55  ;;  %7808 = vmatpush3.msra.mxu0 %v1666_v46  ;;  %v9766_v46 = vld [vmem:[#allocation2 + $0x54] sm:$0xff] }
 0x1dc   : > { %7809 = vmatprep.subr.mxu0 %v1665_v51 }
 0x1dd   : > { %7668 = vmatmul.mubr.f32.vlgmr.msra.gmra.mxu1 %v9727_v56  ;;  %7810 = vmatpush3.msra.mxu0 %v1665_v51  ;;  %v9769_v51 = vld [vmem:[#allocation2 + $0x5a] sm:$0xff] }
 0x1de   : > { %7748 = vmatpush3.msra.mxu1 %v1474_v24  ;;  %7670 = vmatprep.mubr.f32.mxu1 %v9730_v59  ;;  %v9751_v24 = vld [vmem:[#allocation2 + $0x42] sm:$0xff] }
 0x1df   : > { %7749 = vmatprep.subr.mxu1 %v1473_v57  ;;  %7730 = vmatmul.mubr.f32.gmra.mxu0 %v9733_v1 }
 0x1e0   : > { %7750 = vmatpush3.msra.mxu1 %v1473_v57  ;;  %7811 = vmatprep.subr.mxu0 %v1664_v63  ;;  %v9772_v57 = vld [vmem:[#allocation2 + $0x5c] sm:$0xff] }
 0x1e1   : > { %7751 = vmatprep.subr.mxu1 %v1472_v0  ;;  %7671 = vmatmul.mubr.f32.gmra.mxu1 %v9736_v3 }
 0x1e2   : > { %7752 = vmatpush3.msra.mxu1 %v1472_v0  ;;  %7673 = vmatprep.mubr.f32.mxu1 %v9739_v8  ;;  %v1464_v0 = vld [vmem:[#allocation6 + $0x228] sm:$0xff] }
 0x1e3   : > { %7753 = vmatprep.subr.mxu1 %v1471_v7  ;;  %7732 = vmatprep.mubr.f32.mxu0 %v9742_v10 }
 0x1e4   : > { %7754 = vmatpush3.msra.mxu1 %v1471_v7  ;;  %7812 = vmatpush3.msra.mxu0 %v1664_v63  ;;  %v1659_v63 = vld [vmem:[#allocation6 + $0x2b0] sm:$0xff]  ;;  %v9775_v7 = vld [vmem:[#allocation2 + $0x62] sm:$0xff] }
 0x1e5   : > { %7755 = vmatprep.subr.mxu1 %v1470_v9  ;;  %7674 = vmatmul.mubr.f32.gmra.mxu1 %v9745_v11 }
 0x1e6   : > { %7756 = vmatpush3.msra.mxu1 %v1470_v9  ;;  %7676 = vmatprep.mubr.f32.mxu1 %v9748_v15  ;;  %v1658_v9 = vld [vmem:[#allocation6 + $0x2a8] sm:$0xff] }
 0x1e7   : > { %7757 = vmatprep.subr.mxu1 %v1469_v12  ;;  %7813 = vmatprep.subr.mxu0 %v1663_v13 }
 0x1e8   : > { %7758 = vmatpush3.msra.mxu1 %v1469_v12  ;;  %7814 = vmatpush3.msra.mxu0 %v1663_v13  ;;  %v9778_v12 = vld [vmem:[#allocation2 + $0x64] sm:$0xff] }
 0x1e9   : > { %7759 = vmatprep.subr.mxu1 %v1468_v23  ;;  %7677 = vmatmul.mubr.f32.gmra.mxu1 %v9751_v24  ;;  %v1463_v13 = vld [vmem:[#allocation6 + $0x220] sm:$0xff] }
 0x1ea   : > { %7733 = vmatmul.mubr.f32.gmra.mxu0 %v9754_v26  ;;  %7760 = vmatpush3.msra.mxu1 %v1468_v23  ;;  %v9781_v23 = vld [vmem:[#allocation2 + $0x6a] sm:$0xff] }
 0x1eb   : > { %7815 = vmatprep.subr.mxu0 %v1662_v25  ;;  %7679 = vmatprep.mubr.f32.mxu1 %v9757_v28 }
 0x1ec   : > { %7735 = vmatprep.mubr.f32.mxu0 %v9760_v31  ;;  %7761 = vmatprep.subr.mxu1 %v1467_v27 }
 0x1ed   : > { %7816 = vmatpush3.msra.mxu0 %v1662_v25  ;;  %7762 = vmatpush3.msra.mxu1 %v1467_v27  ;;  %v9784_v25 = vld [vmem:[#allocation2 + $0x6c] sm:$0xff]  ;;  %v1657_v27 = vld [vmem:[#allocation6 + $0x2a0] sm:$0xff] }
 0x1ee   : > { %7817 = vmatprep.subr.mxu0 %v1661_v32  ;;  %7763 = vmatprep.subr.mxu1 %v1466_v34  ;;  %11812 = vst [vmem:[#allocation14_spill] sm:$0xff] %v9784_v25 }
 0x1ef   : > { %7818 = vmatpush3.msra.mxu0 %v1661_v32  ;;  %7680 = vmatmul.mubr.f32.gmra.mxu1 %v9763_v29  ;;  %v1462_v32 = vld [vmem:[#allocation6 + $0x218] sm:$0xff] }
 0x1f0   : > { %7736 = vmatmul.mubr.f32.gmra.mxu0 %v9766_v46  ;;  %7764 = vmatpush3.msra.mxu1 %v1466_v34  ;;  %v9787_v34 = vld [vmem:[#allocation2 + $0x72] sm:$0xff] }
 0x1f1   : > { %7819 = vmatprep.subr.mxu0 %v1660_v44  ;;  %7682 = vmatprep.mubr.f32.mxu1 %v9769_v51  ;;  %11813 = vst [vmem:[#allocation15_spill] sm:$0xff] %v9787_v34 }
 0x1f2   : > { %7738 = vmatprep.mubr.f32.mxu0 %v9772_v57  ;;  %7765 = vmatprep.subr.mxu1 %v1465_v50 }
 0x1f3   : > { %7820 = vmatpush3.msra.mxu0 %v1660_v44  ;;  %7766 = vmatpush3.msra.mxu1 %v1465_v50  ;;  %v1656_v44 = vld [vmem:[#allocation6 + $0x298] sm:$0xff] }
 0x1f4   : > { %7821 = vmatprep.subr.mxu0 %v1659_v63  ;;  %7767 = vmatprep.subr.mxu1 %v1464_v0  ;;  %v9790_v50 = vld [vmem:[#allocation2 + $0x74] sm:$0xff] }
 0x1f5   : > { %7822 = vmatpush3.msra.mxu0 %v1659_v63  ;;  %7683 = vmatmul.mubr.f32.gmra.mxu1 %v9775_v7  ;;  %11814 = vst [vmem:[#allocation16_spill] sm:$0xff] %v9790_v50  ;;  %v1461_v63 = vld [vmem:[#allocation6 + $0x210] sm:$0xff] }
 0x1f6   : > { %7739 = vmatmul.mubr.f32.gmra.mxu0 %v9778_v12  ;;  %7768 = vmatpush3.msra.mxu1 %v1464_v0  ;;  %v9793_v0 = vld [vmem:[#allocation2 + $0x7a] sm:$0xff] }
 0x1f7   : > { %7823 = vmatprep.subr.mxu0 %v1658_v9  ;;  %7685 = vmatprep.mubr.f32.mxu1 %v9781_v23  ;;  %11815 = vst [vmem:[#allocation17_spill] sm:$0xff] %v9793_v0 }
 0x1f8   : > { %7741 = vmatprep.mubr.f32.mxu0 %v9784_v25  ;;  %7769 = vmatprep.subr.mxu1 %v1463_v13  ;;  %v1460_v25 = vld [vmem:[#allocation6 + $0x208] sm:$0xff] }
 0x1f9   : > { %7824 = vmatpush3.msra.mxu0 %v1658_v9  ;;  %7770 = vmatpush3.msra.mxu1 %v1463_v13  ;;  %v9796_v9 = vld [vmem:[#allocation2 + $0x7c] sm:$0xff]  ;;  %v1655_v13 = vld [vmem:[#allocation6 + $0x290] sm:$0xff] }
 0x1fa   : > { %7825 = vmatprep.subr.mxu0 %v1657_v27  ;;  %7771 = vmatprep.subr.mxu1 %v1462_v32  ;;  %11816 = vst [vmem:[#allocation18_spill] sm:$0xff] %v9796_v9 }
 0x1fb   : > { %7826 = vmatpush3.msra.mxu0 %v1657_v27  ;;  %7686 = vmatmul.mubr.f32.gmra.mxu1 %v9787_v34  ;;  %v9799_v27 = vld [vmem:[#allocation2 + $0x82] sm:$0xff] }
 0x1fc   : > { %7742 = vmatmul.mubr.f32.gmra.mxu0 %v9790_v50  ;;  %7772 = vmatpush3.msra.mxu1 %v1462_v32  ;;  %v1654_v50 = vld [vmem:[#allocation6 + $0x288] sm:$0xff]  ;;  %v1459_v32 = vld [vmem:[#allocation6 + $0x200] sm:$0xff] }
 0x1fd   : > { %7827 = vmatprep.subr.mxu0 %v1656_v44  ;;  %7688 = vmatprep.mubr.f32.mxu1 %v9793_v0  ;;  %v9802_v34 = vld [vmem:[#allocation2 + $0x84] sm:$0xff]  ;;  %v1862_v0 = vld [vmem:[#allocation6 + $0x378] sm:$0xff] }
 0x1fe   : > { %7744 = vmatprep.mubr.f32.mxu0 %v9796_v9  ;;  %7773 = vmatprep.subr.mxu1 %v1461_v63  ;;  %v1653_v9 = vld [vmem:[#allocation6 + $0x280] sm:$0xff] }
 0x1ff   : > { %7828 = vmatpush3.msra.mxu0 %v1656_v44  ;;  %7774 = vmatpush3.msra.mxu1 %v1461_v63  ;;  %v2056_v44 = vld [vmem:[#allocation6 + $0x3f8] sm:$0xff]  ;;  %v1861_v63 = vld [vmem:[#allocation6 + $0x370] sm:$0xff] }
 0x200   : > { %7829 = vmatprep.subr.mxu0 %v1655_v13  ;;  %7775 = vmatprep.subr.mxu1 %v1460_v25 }
 0x201   : > { %7830 = vmatpush3.msra.mxu0 %v1655_v13  ;;  %7689 = vmatmul.mubr.f32.gmra.mxu1 %v9799_v27  ;;  %v1860_v13 = vld [vmem:[#allocation6 + $0x368] sm:$0xff] }
 0x202   : > { %7745 = vmatmul.mubr.f32.gmra.mxu0 %v9802_v34  ;;  %7776 = vmatpush3.msra.mxu1 %v1460_v25  ;;  %v2055_v25 = vld [vmem:[#allocation6 + $0x3f0] sm:$0xff] }
 0x203   : > { %7831 = vmatprep.subr.mxu0 %v1654_v50  ;;  %7777 = vmatprep.subr.mxu1 %v1459_v32 }
 0x204   : > { %7779 = vmatprep.mubr.f32.mxu1 %v9587_v53  ;;  %7832 = vmatpush3.msra.mxu0 %v1654_v50  ;;  %v1859_v53 = vld [vmem:[#allocation6 + $0x360] sm:$0xff]  ;;  %v2249_v50 = vld [vmem:[#allocation6 + $0x470] sm:$0xff] }
 0x205   : > { %7835 = vmatprep.mubr.f32.mxu0 %v9571_v39  ;;  %7778 = vmatpush3.msra.mxu1 %v1459_v32  ;;  %v2054_v39 = vld [vmem:[#allocation6 + $0x3e8] sm:$0xff]  ;;  %v11819_v32 = vld [vmem:[#allocation16_spill] sm:$0xff] }
 0x206   : > { %7833 = vmatprep.subr.mxu0 %v1653_v9  ;;  %7859 = vmatprep.subr.mxu1 %v1862_v0 }
 0x207   : > { %7834 = vmatpush3.msra.mxu0 %v1653_v9  ;;  %7780 = vmatmul.mubr.f32.vlgmr.msra.gmra.mxu1 %v9589_v54  ;;  %v1858_v54 = vld [vmem:[#allocation6 + $0x358] sm:$0xff] }
 0x208   : > { %7836 = vmatmul.mubr.f32.vlgmr.msra.gmra.mxu0 %v9567_v37  ;;  %7860 = vmatpush3.msra.mxu1 %v1862_v0  ;;  %v2053_v37 = vld [vmem:[#allocation6 + $0x3e0] sm:$0xff]  ;;  %v2248_v0 = vld [vmem:[#allocation6 + $0x468] sm:$0xff]  ;;  %v2238_v9 = vld [vmem:[#allocation6 + $0x418] sm:$0xff] }
 0x209   : > { %7915 = vmatprep.subr.mxu0 %v2056_v44  ;;  %7782 = vmatprep.mubr.f32.mxu1 %v9606_v5  ;;  %v1857_v5 = vld [vmem:[#allocation6 + $0x350] sm:$0xff] }
 0x20a   : > { %7838 = vmatprep.mubr.f32.mxu0 %v9585_v52  ;;  %7861 = vmatprep.subr.mxu1 %v1861_v63  ;;  %v2052_v52 = vld [vmem:[#allocation6 + $0x3d8] sm:$0xff] }
 0x20b   : > { %7916 = vmatpush3.msra.mxu0 %v2056_v44  ;;  %7862 = vmatpush3.msra.mxu1 %v1861_v63  ;;  %v11820_v44 = vld [vmem:[#allocation17_spill] sm:$0xff]  ;;  %v11821_v63 = vld [vmem:[#allocation18_spill] sm:$0xff] }
 0x20c   : > { %7917 = vmatprep.subr.mxu0 %v2055_v25  ;;  %7863 = vmatprep.subr.mxu1 %v1860_v13 }
 0x20d   : > { %7918 = vmatpush3.msra.mxu0 %v2055_v25  ;;  %7783 = vmatmul.mubr.f32.gmra.mxu1 %v9608_v6  ;;  %v1856_v6 = vld [vmem:[#allocation6 + $0x348] sm:$0xff]  ;;  %v2431_v25 = vld [vmem:[#allocation6 + $0x490] sm:$0xff] }
 0x20e   : > { %7839 = vmatmul.mubr.f32.gmra.mxu0 %v9580_v49  ;;  %7864 = vmatpush3.msra.mxu1 %v1860_v13  ;;  %v2051_v49 = vld [vmem:[#allocation6 + $0x3d0] sm:$0xff]  ;;  %v2236_v13 = vld [vmem:[#allocation6 + $0x408] sm:$0xff] }
 0x20f   : > { %7919 = vmatprep.subr.mxu0 %v2054_v39  ;;  %7785 = vmatprep.mubr.f32.mxu1 %v9624_v21  ;;  %v1855_v21 = vld [vmem:[#allocation6 + $0x340] sm:$0xff] }
 0x210   : > { %7841 = vmatprep.mubr.f32.mxu0 %v9604_v4  ;;  %7865 = vmatprep.subr.mxu1 %v1859_v53  ;;  %v2050_v4 = vld [vmem:[#allocation6 + $0x3c8] sm:$0xff] }
 0x211   : > { %7920 = vmatpush3.msra.mxu0 %v2054_v39  ;;  %7866 = vmatpush3.msra.mxu1 %v1859_v53  ;;  %v9872_v39 = vld [vmem:[%s11762_s5] ss:$0 sm:$0xff]  ;;  %v9874_v53 = vld [vmem:[#allocation2 + $0x8a] sm:$0xff] }
 0x212   : > { %7921 = vmatprep.subr.mxu0 %v2053_v37  ;;  %7867 = vmatprep.subr.mxu1 %v1858_v54 }
 0x213   : > { %7922 = vmatpush3.msra.mxu0 %v2053_v37  ;;  %7786 = vmatmul.mubr.f32.gmra.mxu1 %v9626_v22  ;;  %v1854_v22 = vld [vmem:[#allocation6 + $0x338] sm:$0xff]  ;;  %v2430_v37 = vld [vmem:[#allocation6 + $0x488] sm:$0xff] }
 0x214   : > { %7842 = vmatmul.mubr.f32.gmra.mxu0 %v9600_v2  ;;  %7868 = vmatpush3.msra.mxu1 %v1858_v54  ;;  %v2049_v2 = vld [vmem:[#allocation6 + $0x3c0] sm:$0xff] }
 0x215   : > { %7923 = vmatprep.subr.mxu0 %v2052_v52  ;;  %7788 = vmatprep.mubr.f32.mxu1 %v9642_v41  ;;  %v1853_v41 = vld [vmem:[#allocation6 + $0x330] sm:$0xff]  ;;  %v2235_v54 = vld [vmem:[#allocation6 + $0x400] sm:$0xff] }
 0x216   : > { %7844 = vmatprep.mubr.f32.mxu0 %v9622_v20  ;;  %7869 = vmatprep.subr.mxu1 %v1857_v5  ;;  %v2048_v20 = vld [vmem:[#allocation6 + $0x3b8] sm:$0xff] }
 0x217   : > { %7924 = vmatpush3.msra.mxu0 %v2052_v52  ;;  %7870 = vmatpush3.msra.mxu1 %v1857_v5  ;;  %v2218_v5 = vld [vmem:[#allocation2 + $0x16] sm:$0xff] }
 0x218   : > { %7925 = vmatprep.subr.mxu0 %v2051_v49  ;;  %7871 = vmatprep.subr.mxu1 %v1856_v6 }
 0x219   : > { %7926 = vmatpush3.msra.mxu0 %v2051_v49  ;;  %7789 = vmatmul.mubr.f32.gmra.mxu1 %v9644_v42  ;;  %v1852_v42 = vld [vmem:[#allocation6 + $0x328] sm:$0xff]  ;;  %v2429_v49 = vld [vmem:[#allocation6 + $0x480] sm:$0xff] }
 0x21a   : > { %7845 = vmatmul.mubr.f32.gmra.mxu0 %v9618_v18  ;;  %7872 = vmatpush3.msra.mxu1 %v1856_v6  ;;  %v2047_v18 = vld [vmem:[#allocation6 + $0x3b0] sm:$0xff]  ;;  %v2638_v6 = vld [vmem:[#allocation6 + $0x578] sm:$0xff] }
 0x21b   : > { %7927 = vmatprep.subr.mxu0 %v2050_v4  ;;  %7791 = vmatprep.mubr.f32.mxu1 %v9660_v61  ;;  %v1851_v61 = vld [vmem:[#allocation6 + $0x320] sm:$0xff] }
 0x21c   : > { %7847 = vmatprep.mubr.f32.mxu0 %v9640_v40  ;;  %7873 = vmatprep.subr.mxu1 %v1855_v21  ;;  %v2046_v40 = vld [vmem:[#allocation6 + $0x3a8] sm:$0xff] }
 0x21d   : > { %7928 = vmatpush3.msra.mxu0 %v2050_v4  ;;  %7874 = vmatpush3.msra.mxu1 %v1855_v21  ;;  %v2412_v21 = vld [vmem:[#allocation2 + $0x18] sm:$0xff] }
 0x21e   : > { %7929 = vmatprep.subr.mxu0 %v2049_v2  ;;  %7875 = vmatprep.subr.mxu1 %v1854_v22 }
 0x21f   : > { %7930 = vmatpush3.msra.mxu0 %v2049_v2  ;;  %7792 = vmatmul.mubr.f32.gmra.mxu1 %v9662_v62  ;;  %v1850_v62 = vld [vmem:[#allocation6 + $0x318] sm:$0xff] }
 0x220   : > { %7848 = vmatmul.mubr.f32.gmra.mxu0 %v9636_v36  ;;  %7876 = vmatpush3.msra.mxu1 %v1854_v22  ;;  %v2045_v36 = vld [vmem:[#allocation6 + $0x3a0] sm:$0xff] }
 0x221   : > { %7931 = vmatprep.subr.mxu0 %v2048_v20  ;;  %7794 = vmatprep.mubr.f32.mxu1 %v9683_v17  ;;  %v1849_v17 = vld [vmem:[#allocation6 + $0x310] sm:$0xff]  ;;  %v2219_v22 = vld [vmem:[#allocation2 + $0x1e] sm:$0xff] }
 0x222   : > { %7850 = vmatprep.mubr.f32.mxu0 %v9658_v60  ;;  %7877 = vmatprep.subr.mxu1 %v1853_v41  ;;  %v2044_v60 = vld [vmem:[#allocation6 + $0x398] sm:$0xff] }
 0x223   : > { %7932 = vmatpush3.msra.mxu0 %v2048_v20  ;;  %7878 = vmatpush3.msra.mxu1 %v1853_v41  ;;  %v2413_v20 = vld [vmem:[#allocation2 + $0x20] sm:$0xff]  ;;  %v2637_v41 = vld [vmem:[#allocation6 + $0x570] sm:$0xff] }
 0x224   : > { %7933 = vmatprep.subr.mxu0 %v2047_v18  ;;  %7879 = vmatprep.subr.mxu1 %v1852_v42 }
 0x225   : > { %7934 = vmatpush3.msra.mxu0 %v2047_v18  ;;  %7795 = vmatmul.mubr.f32.gmra.mxu1 %v9685_v19  ;;  %v1848_v19 = vld [vmem:[#allocation6 + $0x308] sm:$0xff] }
 0x226   : > { %7851 = vmatmul.mubr.f32.gmra.mxu0 %v9654_v58  ;;  %7880 = vmatpush3.msra.mxu1 %v1852_v42  ;;  %v2043_v58 = vld [vmem:[#allocation6 + $0x390] sm:$0xff]  ;;  %v2220_v42 = vld [vmem:[#allocation2 + $0x26] sm:$0xff] }
 0x227   : > { %7935 = vmatprep.subr.mxu0 %v2046_v40  ;;  %7797 = vmatprep.mubr.f32.mxu1 %v9703_v38  ;;  %v2042_v38 = vld [vmem:[#allocation6 + $0x388] sm:$0xff] }
 0x228   : > { %7853 = vmatprep.mubr.f32.mxu0 %v9681_v16  ;;  %7881 = vmatprep.subr.mxu1 %v1851_v61  ;;  %v9835_v16 = vld [vmem:[#allocation2 + $0x86] sm:$0xff] }
 0x229   : > { %7936 = vmatpush3.msra.mxu0 %v2046_v40  ;;  %7882 = vmatpush3.msra.mxu1 %v1851_v61  ;;  %v2414_v40 = vld [vmem:[#allocation2 + $0x28] sm:$0xff] }
 0x22a   : > { %7937 = vmatprep.subr.mxu0 %v2045_v36  ;;  %7883 = vmatprep.subr.mxu1 %v1850_v62  ;;  %v2636_v61 = vld [vmem:[#allocation6 + $0x568] sm:$0xff] }
 0x22b   : > { %7938 = vmatpush3.msra.mxu0 %v2045_v36  ;;  %7798 = vmatmul.mubr.f32.gmra.mxu1 %v9705_v43  ;;  %v1847_v43 = vld [vmem:[#allocation6 + $0x300] sm:$0xff] }
 0x22c   : > { %7854 = vmatmul.mubr.f32.gmra.mxu0 %v9677_v14  ;;  %7884 = vmatpush3.msra.mxu1 %v1850_v62  ;;  %v2041_v14 = vld [vmem:[#allocation6 + $0x380] sm:$0xff] }
 0x22d   : > { %7939 = vmatprep.subr.mxu0 %v2044_v60  ;;  %7800 = vmatprep.mubr.f32.mxu1 %v9718_v47  ;;  %v2250_v47 = vld [vmem:[#allocation6 + $0x478] sm:$0xff] }
 0x22e   : > { %7856 = vmatprep.mubr.f32.mxu0 %v9701_v35  ;;  %7885 = vmatprep.subr.mxu1 %v1849_v17  ;;  %v2444_v35 = vld [vmem:[#allocation6 + $0x4f8] sm:$0xff] }
 0x22f   : > { %7940 = vmatpush3.msra.mxu0 %v2044_v60  ;;  %7886 = vmatpush3.msra.mxu1 %v1849_v17  ;;  %v2221_v17 = vld [vmem:[#allocation2 + $0x2e] sm:$0xff] }
 0x230   : > { %7941 = vmatprep.subr.mxu0 %v2043_v58  ;;  %7887 = vmatprep.subr.mxu1 %v1848_v19 }
 0x231   : > { %7942 = vmatpush3.msra.mxu0 %v2043_v58  ;;  %7801 = vmatmul.mubr.f32.gmra.mxu1 %v9835_v16 }
 0x232   : > { %7857 = vmatmul.mubr.f32.gmra.mxu0 %v9697_v33  ;;  %7888 = vmatpush3.msra.mxu1 %v1848_v19  ;;  %v2443_v33 = vld [vmem:[#allocation6 + $0x4f0] sm:$0xff] }
 0x233   : > { %7943 = vmatprep.subr.mxu0 %v2042_v38  ;;  %7889 = vmatprep.subr.mxu1 %v1847_v43  ;;  %v2415_v19 = vld [vmem:[#allocation2 + $0x30] sm:$0xff] }
 0x234   : > { %7891 = vmatprep.mubr.f32.mxu1 %v9727_v56  ;;  %7944 = vmatpush3.msra.mxu0 %v2042_v38  ;;  %v2247_v56 = vld [vmem:[#allocation6 + $0x460] sm:$0xff] }
 0x235   : > { %7947 = vmatprep.mubr.f32.mxu0 %v9711_v30  ;;  %7890 = vmatpush3.msra.mxu1 %v1847_v43  ;;  %v2442_v30 = vld [vmem:[#allocation6 + $0x4e8] sm:$0xff]  ;;  %v2635_v38 = vld [vmem:[#allocation6 + $0x560] sm:$0xff]  ;;  %v9885_v43 = vpop.trf.xlu1 }
 0x236   : > { %7945 = vmatprep.subr.mxu0 %v2041_v14  ;;  %7971 = vmatprep.subr.mxu1 %v2250_v47 }
 0x237   : > { %7946 = vmatpush3.msra.mxu0 %v2041_v14  ;;  %7892 = vmatmul.mubr.f32.vlgmr.msra.gmra.mxu1 %v9730_v59  ;;  %v2246_v59 = vld [vmem:[#allocation6 + $0x458] sm:$0xff] }
 0x238   : > { %7948 = vmatmul.mubr.f32.vlgmr.msra.gmra.mxu0 %v9714_v45  ;;  %7972 = vmatpush3.msra.mxu1 %v2250_v47  ;;  %v2441_v45 = vld [vmem:[#allocation6 + $0x4e0] sm:$0xff]  ;;  %v2222_v47 = vld [vmem:[#allocation2 + $0x36] sm:$0xff] }
 0x239   : > { %8027 = vmatprep.subr.mxu0 %v2444_v35  ;;  %7894 = vmatprep.mubr.f32.mxu1 %v9736_v3  ;;  %v2245_v3 = vld [vmem:[#allocation6 + $0x450] sm:$0xff] }
 0x23a   : > { %7950 = vmatprep.mubr.f32.mxu0 %v9720_v48  ;;  %7973 = vmatprep.subr.mxu1 %v2249_v50  ;;  %v2440_v48 = vld [vmem:[#allocation6 + $0x4d8] sm:$0xff] }
 0x23b   : > { %8028 = vmatpush3.msra.mxu0 %v2444_v35  ;;  %7974 = vmatpush3.msra.mxu1 %v2249_v50  ;;  %v2416_v35 = vld [vmem:[#allocation2 + $0x38] sm:$0xff] }
 0x23c   : > { %8029 = vmatprep.subr.mxu0 %v2443_v33  ;;  %7975 = vmatprep.subr.mxu1 %v2248_v0  ;;  %v2634_v50 = vld [vmem:[#allocation6 + $0x558] sm:$0xff] }
 0x23d   : > { %8030 = vmatpush3.msra.mxu0 %v2443_v33  ;;  %7895 = vmatmul.mubr.f32.gmra.mxu1 %v9739_v8  ;;  %v2244_v8 = vld [vmem:[#allocation6 + $0x448] sm:$0xff] }
 0x23e   : > { %7951 = vmatmul.mubr.f32.gmra.mxu0 %v9724_v55  ;;  %7976 = vmatpush3.msra.mxu1 %v2248_v0  ;;  %v2439_v55 = vld [vmem:[#allocation6 + $0x4d0] sm:$0xff]  ;;  %v2223_v0 = vld [vmem:[#allocation2 + $0x3e] sm:$0xff] }
 0x23f   : > { %8031 = vmatprep.subr.mxu0 %v2442_v30  ;;  %7897 = vmatprep.mubr.f32.mxu1 %v9745_v11  ;;  %v2243_v11 = vld [vmem:[#allocation6 + $0x440] sm:$0xff] }
 0x240   : > { %7953 = vmatprep.mubr.f32.mxu0 %v9733_v1  ;;  %7977 = vmatprep.subr.mxu1 %v2247_v56  ;;  %v2438_v1 = vld [vmem:[#allocation6 + $0x4c8] sm:$0xff] }
 0x241   : > { %8032 = vmatpush3.msra.mxu0 %v2442_v30  ;;  %7978 = vmatpush3.msra.mxu1 %v2247_v56  ;;  %v2417_v30 = vld [vmem:[#allocation2 + $0x40] sm:$0xff]  ;;  %v2633_v56 = vld [vmem:[#allocation6 + $0x550] sm:$0xff] }
 0x242   : > { %8033 = vmatprep.subr.mxu0 %v2441_v45  ;;  %7979 = vmatprep.subr.mxu1 %v2246_v59 }
 0x243   : > { %8034 = vmatpush3.msra.mxu0 %v2441_v45  ;;  %7898 = vmatmul.mubr.f32.gmra.mxu1 %v9748_v15  ;;  %v2242_v15 = vld [vmem:[#allocation6 + $0x438] sm:$0xff] }
 0x244   : > { %7954 = vmatmul.mubr.f32.gmra.mxu0 %v9742_v10  ;;  %7980 = vmatpush3.msra.mxu1 %v2246_v59  ;;  %v2437_v10 = vld [vmem:[#allocation6 + $0x4c0] sm:$0xff] }
 0x245   : > { %8035 = vmatprep.subr.mxu0 %v2440_v48  ;;  %7900 = vmatprep.mubr.f32.mxu1 %v9751_v24  ;;  %v2436_v24 = vld [vmem:[#allocation6 + $0x4b8] sm:$0xff] }
 0x246   : > { %7956 = vmatprep.mubr.f32.mxu0 %v9754_v26  ;;  %7981 = vmatprep.subr.mxu1 %v2245_v3  ;;  %v2241_v26 = vld [vmem:[#allocation6 + $0x430] sm:$0xff] }
 0x247   : > { %8036 = vmatpush3.msra.mxu0 %v2440_v48  ;;  %7982 = vmatpush3.msra.mxu1 %v2245_v3  ;;  %v2224_v48 = vld [vmem:[#allocation2 + $0x46] sm:$0xff] }
 0x248   : > { %8037 = vmatprep.subr.mxu0 %v2439_v55  ;;  %7983 = vmatprep.subr.mxu1 %v2244_v8  ;;  %v2418_v3 = vld [vmem:[#allocation2 + $0x48] sm:$0xff] }
 0x249   : > { %8038 = vmatpush3.msra.mxu0 %v2439_v55  ;;  %7901 = vmatmul.mubr.f32.gmra.mxu1 %v9757_v28  ;;  %v2435_v28 = vld [vmem:[#allocation6 + $0x4b0] sm:$0xff]  ;;  %v9893_v55 = vpop.trf.xlu1 }
 0x24a   : > { %7957 = vmatmul.mubr.f32.gmra.mxu0 %v9760_v31  ;;  %7984 = vmatpush3.msra.mxu1 %v2244_v8  ;;  %v2240_v31 = vld [vmem:[#allocation6 + $0x428] sm:$0xff] }
 0x24b   : > { %8039 = vmatprep.subr.mxu0 %v2438_v1  ;;  %7903 = vmatprep.mubr.f32.mxu1 %v9763_v29  ;;  %v2434_v29 = vld [vmem:[#allocation6 + $0x4a8] sm:$0xff] }
 0x24c   : > { %7959 = vmatprep.mubr.f32.mxu0 %v9766_v46  ;;  %7985 = vmatprep.subr.mxu1 %v2243_v11  ;;  %v2239_v46 = vld [vmem:[#allocation6 + $0x420] sm:$0xff] }
 0x24d   : > { %8040 = vmatpush3.msra.mxu0 %v2438_v1  ;;  %7986 = vmatpush3.msra.mxu1 %v2243_v11  ;;  %v2632_v1 = vld [vmem:[#allocation6 + $0x548] sm:$0xff] }
 0x24e   : > { %8041 = vmatprep.subr.mxu0 %v2437_v10  ;;  %7987 = vmatprep.subr.mxu1 %v2242_v15 }
 0x24f   : > { %8042 = vmatpush3.msra.mxu0 %v2437_v10  ;;  %7904 = vmatmul.mubr.f32.gmra.mxu1 %v9769_v51  ;;  %v11817_v51 = vld [vmem:[#allocation14_spill] sm:$0xff] }
 0x250   : > { %7960 = vmatmul.mubr.f32.gmra.mxu0 %v9772_v57  ;;  %7988 = vmatpush3.msra.mxu1 %v2242_v15  ;;  %v11818_v57 = vld [vmem:[#allocation15_spill] sm:$0xff] }
 0x251   : > { %8043 = vmatprep.subr.mxu0 %v2436_v24  ;;  %7906 = vmatprep.mubr.f32.mxu1 %v9775_v7  ;;  %v2433_v7 = vld [vmem:[#allocation6 + $0x4a0] sm:$0xff]  ;;  %v2225_v15 = vld [vmem:[#allocation2 + $0x4e] sm:$0xff] }
 0x252   : > { %7962 = vmatprep.mubr.f32.mxu0 %v9778_v12  ;;  %7989 = vmatprep.subr.mxu1 %v2241_v26  ;;  %v2432_v12 = vld [vmem:[#allocation6 + $0x498] sm:$0xff] }
 0x253   : > { %8044 = vmatpush3.msra.mxu0 %v2436_v24  ;;  %7990 = vmatpush3.msra.mxu1 %v2241_v26  ;;  %v2419_v24 = vld [vmem:[#allocation2 + $0x50] sm:$0xff]  ;;  %v2631_v26 = vld [vmem:[#allocation6 + $0x540] sm:$0xff] }
 0x254   : > { %8045 = vmatprep.subr.mxu0 %v2435_v28  ;;  %7991 = vmatprep.subr.mxu1 %v2240_v31 }
 0x255   : > { %8046 = vmatpush3.msra.mxu0 %v2435_v28  ;;  %7907 = vmatmul.mubr.f32.gmra.mxu1 %v9781_v23  ;;  %v2237_v23 = vld [vmem:[#allocation6 + $0x410] sm:$0xff] }
 0x256   : > { %7963 = vmatmul.mubr.f32.gmra.mxu0 %v11817_v51  ;;  %7992 = vmatpush3.msra.mxu1 %v2240_v31  ;;  %v2226_v28 = vld [vmem:[#allocation2 + $0x56] sm:$0xff] }
 0x257   : > { %8047 = vmatprep.subr.mxu0 %v2434_v29  ;;  %7909 = vmatprep.mubr.f32.mxu1 %v11818_v57  ;;  %v2420_v31 = vld [vmem:[#allocation2 + $0x58] sm:$0xff]  ;;  %v9902_v57 = vpop.trf.xlu1 }
 0x258   : > { %7965 = vmatprep.mubr.f32.mxu0 %v11819_v32  ;;  %7993 = vmatprep.subr.mxu1 %v2239_v46  ;;  %v2630_v51 = vld [vmem:[#allocation6 + $0x538] sm:$0xff] }
 0x259   : > { %8048 = vmatpush3.msra.mxu0 %v2434_v29  ;;  %7994 = vmatpush3.msra.mxu1 %v2239_v46  ;;  %v7613_v4 = vpop.f32.mrf.mxu0  ;;  %v2227_v32 = vld [vmem:[#allocation2 + $0x5e] sm:$0xff] }
 0x25a   : > { %8049 = vmatprep.subr.mxu0 %v2433_v7  ;;  %7995 = vmatprep.subr.mxu1 %v2238_v9 }
 0x25b   : > { %8050 = vmatpush3.msra.mxu0 %v2433_v7  ;;  %7910 = vmatmul.mubr.f32.gmra.mxu1 %v11820_v44  ;;  %v9882_v36 = vpop.f32.mrf.mxu0  ;;  %v2421_v44 = vld [vmem:[#allocation2 + $0x60] sm:$0xff] }
 0x25c   : > { %7966 = vmatmul.mubr.f32.gmra.mxu0 %v11821_v63  ;;  %7996 = vmatpush3.msra.mxu1 %v2238_v9  ;;  %v2228_v63 = vld [vmem:[#allocation2 + $0x66] sm:$0xff] }
 0x25d   : > { %8051 = vmatprep.subr.mxu0 %v2432_v12  ;;  %7912 = vmatprep.mubr.f32.mxu1 %v9799_v27  ;;  %v2039_v27 = vld [vmem:[#allocation2 + $0x8c] sm:$0xff] }
 0x25e   : > { %7968 = vmatprep.mubr.f32.mxu0 %v9802_v34  ;;  %7997 = vmatprep.subr.mxu1 %v2237_v23 }
 0x25f   : > { %8052 = vmatpush3.msra.mxu0 %v2432_v12  ;;  %7998 = vmatpush3.msra.mxu1 %v2237_v23  ;;  %v2629_v23 = vld [vmem:[#allocation6 + $0x530] sm:$0xff] }
 0x260   : > { %8053 = vmatprep.subr.mxu0 %v2431_v25  ;;  %7999 = vmatprep.subr.mxu1 %v2236_v13 }
 0x261   : > { %8054 = vmatpush3.msra.mxu0 %v2431_v25  ;;  %7913 = vmatmul.mubr.f32.gmra.mxu1 %v9874_v53  ;;  %v7557_v52 = vpop.f32.mrf.mxu1  ;;  %v7616_v58 = vpop.f32.mrf.mxu0  ;;  %v2422_v25 = vld [vmem:[#allocation2 + $0x68] sm:$0xff] }
 0x262   : > { %7969 = vmatmul.mubr.f32.gmra.mxu0 %v2039_v27  ;;  %8000 = vmatpush3.msra.mxu1 %v2236_v13  ;;  %v845_v34 = vadd.f32 %v7557_v52, %v9872_v39  ;;  %v9909_v27 = vpop.trf.xlu1  ;;  %v2229_v52 = vld [vmem:[#allocation2 + $0x6e] sm:$0xff] }
 0x263   : > { %8055 = vmatprep.subr.mxu0 %v2430_v37  ;;  %8001 = vmatprep.subr.mxu1 %v2235_v54  ;;  %v9880_v18 = vpop.f32.mrf.mxu1  ;;  %v9891_v45 = vpop.f32.mrf.mxu0 }
 0x264   : > { %8003 = vmatprep.mubr.f32.mxu1 %v2218_v5  ;;  %8056 = vmatpush3.msra.mxu0 %v2430_v37  ;;  %v9878_v2 = vadd.f32 %v7613_v4, %v845_v34  ;;  %v2628_v37 = vld [vmem:[#allocation6 + $0x528] sm:$0xff]  ;;  %v2230_v4 = vld [vmem:[#allocation2 + $0x76] sm:$0xff] }
 0x265   : > { %8059 = vmatprep.mubr.f32.mxu0 %v2412_v21  ;;  %8002 = vmatpush3.msra.mxu1 %v2235_v54  ;;  %v2424_v21 = vld [vmem:[#allocation2 + $0x78] sm:$0xff] }
 0x266   : > { %8057 = vmatprep.subr.mxu0 %v2429_v49  ;;  %8083 = vmatprep.subr.mxu1 %v2638_v6 }
 0x267   : > { %8058 = vmatpush3.msra.mxu0 %v2429_v49  ;;  %8004 = vmatmul.mubr.f32.vlgmr.msra.gmra.mxu1 %v2219_v22  ;;  %v2423_v49 = vld [vmem:[#allocation2 + $0x70] sm:$0xff] }
 0x268   : > { %8060 = vmatmul.mubr.f32.vlgmr.msra.gmra.mxu0 %v2413_v20  ;;  %8084 = vmatpush3.msra.mxu1 %v2638_v6  ;;  %v2627_v6 = vld [vmem:[#allocation6 + $0x520] sm:$0xff]  ;;  %v2626_v20 = vld [vmem:[#allocation6 + $0x518] sm:$0xff] }
 0x269   : > { %8006 = vmatprep.mubr.f32.mxu1 %v2220_v42  ;;  %8062 = vmatprep.mubr.f32.mxu0 %v2414_v40  ;;  %v7560_v62 = vpop.f32.mrf.mxu1  ;;  %v7619_v11 = vpop.f32.mrf.mxu0  ;;  %v2231_v40 = vld [vmem:[#allocation2 + $0x7e] sm:$0xff] }
 0x26a   : > { %8085 = vmatprep.subr.mxu1 %v2637_v41  ;;  %v847_v60 = vadd.f32 %v7560_v62, %v9872_v39 }
 0x26b   : > { %8086 = vmatpush3.msra.mxu1 %v2637_v41  ;;  %v9889_v33 = vpop.f32.mrf.mxu1  ;;  %v9900_v46 = vpop.f32.mrf.mxu0 }
 0x26c   : > { %8087 = vmatprep.subr.mxu1 %v2636_v61  ;;  %8007 = vmatmul.mubr.f32.gmra.mxu1 %v2221_v17  ;;  %v9887_v14 = vadd.f32 %v7616_v58, %v847_v60  ;;  %v2425_v60 = vld [vmem:[#allocation2 + $0x80] sm:$0xff]  ;;  %v2625_v17 = vld [vmem:[#allocation6 + $0x510] sm:$0xff] }
 0x26d   : > { %8063 = vmatmul.mubr.f32.gmra.mxu0 %v2415_v19  ;;  %8088 = vmatpush3.msra.mxu1 %v2636_v61  ;;  %v9916_v61 = vpop.trf.xlu1  ;;  %v2426_v19 = vld [vmem:[#allocation2 + $0x88] sm:$0xff] }
 0x26e   : > { %8009 = vmatprep.mubr.f32.mxu1 %v2222_v47  ;;  %8065 = vmatprep.mubr.f32.mxu0 %v2416_v35  ;;  %v2233_v35 = vld [vmem:[#allocation2 + $0x8e] sm:$0xff] }
 0x26f   : > { %8089 = vmatprep.subr.mxu1 %v2635_v38 }
 0x270   : > { %8090 = vmatpush3.msra.mxu1 %v2635_v38  ;;  %v2624_v38 = vld [vmem:[#allocation6 + $0x508] sm:$0xff] }
 0x271   : > { %8091 = vmatprep.subr.mxu1 %v2634_v50  ;;  %8010 = vmatmul.mubr.f32.gmra.mxu1 %v2223_v0  ;;  %v7563_v59 = vpop.f32.mrf.mxu1  ;;  %v7622_v9 = vpop.f32.mrf.mxu0 }
 0x272   : > { %8066 = vmatmul.mubr.f32.gmra.mxu0 %v2417_v30  ;;  %8092 = vmatpush3.msra.mxu1 %v2634_v50  ;;  %v849_v8 = vadd.f32 %v7563_v59, %v9872_v39  ;;  %v2623_v50 = vld [vmem:[#allocation6 + $0x500] sm:$0xff]  ;;  %v9925_v59 = vpop.trf.xlu1 }
 0x273   : > { %8012 = vmatprep.mubr.f32.mxu1 %v2224_v48  ;;  %8068 = vmatprep.mubr.f32.mxu0 %v2418_v3  ;;  %v9898_v29 = vpop.f32.mrf.mxu1  ;;  %v9907_v54 = vpop.f32.mrf.mxu0 }
 0x274   : > { %8093 = vmatprep.subr.mxu1 %v2633_v56  ;;  %v9896_v10 = vadd.f32 %v7619_v11, %v849_v8  ;;  %v9931_v8 = vld [vmem:[#allocation2] sm:$0xff] }
 0x275   : > { %8094 = vmatpush3.msra.mxu1 %v2633_v56  ;;  %v2606_v56 = vld [vmem:[#allocation2 + $0x1a] sm:$0xff]  ;;  %v2607_v11 = vld [vmem:[#allocation2 + $0x22] sm:$0xff] }
 0x276   : > { %8095 = vmatprep.subr.mxu1 %v2632_v1  ;;  %8013 = vmatmul.mubr.f32.gmra.mxu1 %v2225_v15  ;;  %v3488_v15 = vld [vmem:[%s11758_s1 + $0x70] sm:$0xff] }
 0x277   : > { %8069 = vmatmul.mubr.f32.gmra.mxu0 %v2419_v24  ;;  %8096 = vmatpush3.msra.mxu1 %v2632_v1  ;;  %v2608_v24 = vld [vmem:[#allocation2 + $0x2a] sm:$0xff] }
 0x278   : > { %8015 = vmatprep.mubr.f32.mxu1 %v2226_v28  ;;  %8071 = vmatprep.mubr.f32.mxu0 %v2420_v31 }
 0x279   : > { %8097 = vmatprep.subr.mxu1 %v2631_v26  ;;  %v7566_v7 = vpop.f32.mrf.mxu1  ;;  %v7625_v5 = vpop.f32.mrf.mxu0 }
 0x27a   : > { %8098 = vmatpush3.msra.mxu1 %v2631_v26  ;;  %v851_v12 = vadd.f32 %v7566_v7, %v9872_v39  ;;  %v3487_v26 = vld [vmem:[%s11758_s1 + $0x68] sm:$0xff]  ;;  %v2609_v7 = vld [vmem:[#allocation2 + $0x32] sm:$0xff] }
 0x27b   : > { %8099 = vmatprep.subr.mxu1 %v2630_v51  ;;  %8016 = vmatmul.mubr.f32.gmra.mxu1 %v2227_v32  ;;  %v9911_v34 = vpop.f32.mrf.mxu1  ;;  %v9914_v42 = vpop.f32.mrf.mxu0 }
 0x27c   : > { %8072 = vmatmul.mubr.f32.gmra.mxu0 %v2421_v44  ;;  %8100 = vmatpush3.msra.mxu1 %v2630_v51  ;;  %v9905_v13 = vadd.f32 %v7622_v9, %v851_v12  ;;  %v9946_v51 = vpop.trf.xlu1  ;;  %v3486_v9 = vld [vmem:[%s11758_s1 + $0x60] sm:$0xff] }
 0x27d   : > { %8018 = vmatprep.mubr.f32.mxu1 %v2228_v63  ;;  %8074 = vmatprep.mubr.f32.mxu0 %v2422_v25  ;;  %v2610_v44 = vld [vmem:[#allocation2 + $0x3a] sm:$0xff] }
 0x27e   : > { %8101 = vmatprep.subr.mxu1 %v2629_v23  ;;  %v3485_v63 = vld [vmem:[%s11758_s1 + $0x58] sm:$0xff] }
 0x27f   : > { %8102 = vmatpush3.msra.mxu1 %v2629_v23 }
 0x280   : > { %8103 = vmatprep.subr.mxu1 %v2628_v37  ;;  %8019 = vmatmul.mubr.f32.gmra.mxu1 %v2229_v52  ;;  %v2611_v52 = vld [vmem:[#allocation2 + $0x42] sm:$0xff] }
 0x281   : > { %8075 = vmatmul.mubr.f32.gmra.mxu0 %v2423_v49  ;;  %8104 = vmatpush3.msra.mxu1 %v2628_v37  ;;  %v7569_v22 = vpop.f32.mrf.mxu1  ;;  %v7628_v58 = vpop.f32.mrf.mxu0 }
 0x282   : > { %8021 = vmatprep.mubr.f32.mxu1 %v2230_v4  ;;  %8077 = vmatprep.mubr.f32.mxu0 %v2424_v21  ;;  %v853_v41 = vadd.f32 %v7569_v22, %v9872_v39  ;;  %v9962_v4 = vpop.trf.xlu1  ;;  %v3483_v21 = vld [vmem:[%s11758_s1 + $0x48] sm:$0xff] }
 0x283   : > { %8105 = vmatprep.subr.mxu1 %v2627_v6  ;;  %v9921_v47 = vpop.f32.mrf.mxu1  ;;  %v9923_v30 = vpop.f32.mrf.mxu0 }
 0x284   : > { %8106 = vmatpush3.msra.mxu1 %v2627_v6  ;;  %v9918_v62 = vadd.f32 %v7625_v5, %v853_v41  ;;  %v3484_v5 = vld [vmem:[%s11758_s1 + $0x50] sm:$0xff] }
 0x285   : > { %8107 = vmatprep.subr.mxu1 %v2626_v20  ;;  %8022 = vmatmul.mubr.f32.gmra.mxu1 %v2231_v40  ;;  %v2612_v6 = vld [vmem:[#allocation2 + $0x4a] sm:$0xff]  ;;  %v2613_v41 = vld [vmem:[#allocation2 + $0x52] sm:$0xff]  ;;  %v3482_v40 = vld [vmem:[%s11758_s1 + $0x40] sm:$0xff] }
 0x286   : > { %8078 = vmatmul.mubr.f32.gmra.mxu0 %v2425_v60  ;;  %8108 = vmatpush3.msra.mxu1 %v2626_v20 }
 0x287   : > { %8024 = vmatprep.mubr.f32.mxu1 %v9835_v16  ;;  %8080 = vmatprep.mubr.f32.mxu0 %v2426_v19  ;;  %v3489_v16 = vld [vmem:[%s11758_s1 + $0x78] sm:$0xff] }
 0x288   : > { %8109 = vmatprep.subr.mxu1 %v2625_v17 }
 0x289   : > { %8110 = vmatpush3.msra.mxu1 %v2625_v17  ;;  %v7572_v0 = vpop.f32.mrf.mxu1  ;;  %v7631_v3 = vpop.f32.mrf.mxu0  ;;  %v2614_v17 = vld [vmem:[#allocation2 + $0x5a] sm:$0xff] }
 0x28a   : > { %8111 = vmatprep.subr.mxu1 %v2624_v38  ;;  %8025 = vmatmul.mubr.f32.gmra.mxu1 %v2233_v35  ;;  %v855_v48 = vadd.f32 %v7572_v0, %v9872_v39  ;;  %v2615_v0 = vld [vmem:[#allocation2 + $0x62] sm:$0xff] }
 0x28b   : > { %8112 = vmatpush3.msra.mxu1 %v2624_v38  ;;  %8115 = vmatprep.mubr.f32.mxu1 %v2606_v56  ;;  %v9942_v28 = vpop.f32.mrf.mxu1  ;;  %v9944_v31 = vpop.f32.mrf.mxu0  ;;  %v3481_v38 = vld [vmem:[%s11758_s1 + $0x38] sm:$0xff]  ;;  %v3480_v56 = vld [vmem:[%s11758_s1 + $0x30] sm:$0xff] }
 0x28c   : > { %8113 = vmatprep.subr.mxu1 %v2623_v50  ;;  %8081 = vmatmul.mubr.f32.gmra.mxu0 %v9931_v8  ;;  %v9934_v1 = vadd.f32 %v7628_v58, %v855_v48  ;;  %v9985_v48 = vpop.trf.xlu1 }
 0x28d   : > { %8114 = vmatpush3.msra.mxu1 %v2623_v50 }
 0x28e   : > { %8116 = vmatmul.mubr.f32.vlgmr.msra.gmra.mxu1 %v2607_v11  ;;  %8195 = vmatprep.subr.mxu1 %v3489_v16 }
 0x28f   : > { %8118 = vmatprep.mubr.f32.mxu1 %v2608_v24  ;;  %8196 = vmatpush3.msra.mxu1 %v3489_v16  ;;  %v3479_v24 = vld [vmem:[%s11758_s1 + $0x28] sm:$0xff] }
 0x290   : > { %8197 = vmatprep.subr.mxu1 %v3488_v15 }
 0x291   : > { %8198 = vmatpush3.msra.mxu1 %v3488_v15  ;;  %v7575_v32 = vpop.f32.mrf.mxu1  ;;  %v7634_v12 = vpop.f32.mrf.mxu0 }
 0x292   : > { %8119 = vmatmul.mubr.f32.gmra.mxu1 %v2609_v7  ;;  %8199 = vmatprep.subr.mxu1 %v3487_v26  ;;  %v857_v23 = vadd.f32 %v7575_v32, %v9872_v39  ;;  %v3478_v32 = vld [vmem:[%s11758_s1 + $0x20] sm:$0xff] }
 0x293   : > { %8121 = vmatprep.mubr.f32.mxu1 %v2610_v44  ;;  %8200 = vmatpush3.msra.mxu1 %v3487_v26  ;;  %v9955_v25 = vpop.f32.mrf.mxu0  ;;  %v9967_v22 = vpop.f32.mrf.mxu1 }
 0x294   : > { %8201 = vmatprep.subr.mxu1 %v3486_v9  ;;  %v9957_v37 = vadd.f32 %v7631_v3, %v857_v23  ;;  %v2616_v3 = vld [vmem:[#allocation2 + $0x6a] sm:$0xff] }
 0x295   : > { %8202 = vmatpush3.msra.mxu1 %v3486_v9  ;;  %v7725_v49 = vpop.f32.mrf.mxu0  ;;  %v2617_v9 = vld [vmem:[#allocation2 + $0x72] sm:$0xff] }
 0x296   : > { %8122 = vmatmul.mubr.f32.gmra.mxu1 %v2611_v52  ;;  %8203 = vmatprep.subr.mxu1 %v3485_v63  ;;  %v3467_v52 = vpop.trf.xlu1 }
 0x297   : > { %8124 = vmatprep.mubr.f32.mxu1 %v2612_v6  ;;  %8204 = vmatpush3.msra.mxu1 %v3485_v63  ;;  %v9969_v20 = vpop.f32.mrf.mxu0  ;;  %v3477_v63 = vld [vmem:[%s11758_s1 + $0x18] sm:$0xff]  ;;  %v2619_v6 = vld [vmem:[#allocation2 + $0x82] sm:$0xff] }
 0x298   : > { %8205 = vmatprep.subr.mxu1 %v3484_v5 }
 0x299   : > { %8206 = vmatpush3.msra.mxu1 %v3484_v5  ;;  %v7578_v60 = vpop.f32.mrf.mxu1  ;;  %v7728_v19 = vpop.f32.mrf.mxu0 }
 0x29a   : > { %8125 = vmatmul.mubr.f32.gmra.mxu1 %v2613_v41  ;;  %8207 = vmatprep.subr.mxu1 %v3483_v21  ;;  %v859_v58 = vadd.f32 %v7578_v60, %v9872_v39  ;;  %v2621_v60 = vld [vmem:[#allocation2 + $0x92] sm:$0xff] }
 0x29b   : > { %8127 = vmatprep.mubr.f32.mxu1 %v2614_v17  ;;  %8208 = vmatpush3.msra.mxu1 %v3483_v21  ;;  %v9978_v35 = vpop.f32.mrf.mxu1  ;;  %v9988_v15 = vpop.f32.mrf.mxu0  ;;  %v3476_v21 = vld [vmem:[%s11758_s1 + $0x10] sm:$0xff]  ;;  %v3475_v17 = vld [vmem:[%s11758_s1 + $0x8] sm:$0xff] }
 0x29c   : > { %8209 = vmatprep.subr.mxu1 %v3482_v40  ;;  %v9980_v50 = vadd.f32 %v7634_v12, %v859_v58  ;;  %v2618_v12 = vld [vmem:[#allocation2 + $0x7a] sm:$0xff] }
 0x29d   : > { %8210 = vmatpush3.msra.mxu1 %v3482_v40  ;;  %v7669_v16 = vpop.f32.mrf.mxu1 }
 0x29e   : > { %8128 = vmatmul.mubr.f32.gmra.mxu1 %v2615_v0  ;;  %8211 = vmatprep.subr.mxu1 %v3481_v38  ;;  %v1233_v11 = vadd.f32 %v7669_v16, %v9878_v2 }
 0x29f   : > { %8130 = vmatprep.mubr.f32.mxu1 %v2616_v3  ;;  %8212 = vmatpush3.msra.mxu1 %v3481_v38  ;;  %v9993_v26 = vpop.f32.mrf.mxu1  ;;  %v7731_v23 = vpop.f32.mrf.mxu0 }
 0x2a0   : > { %8213 = vmatprep.subr.mxu1 %v3480_v56  ;;  %v9995_v7 = vadd.f32 %v7725_v49, %v1233_v11  ;;  %v3468_v38 = vpop.trf.xlu1 }
 0x2a1   : > { %8214 = vmatpush3.msra.mxu1 %v3480_v56  ;;  %v7672_v2 = vpop.f32.mrf.mxu1  ;;  %v10012_v40 = vpop.f32.mrf.mxu0 }
 0x2a2   : > { %8131 = vmatmul.mubr.f32.gmra.mxu1 %v2617_v9  ;;  %8215 = vmatprep.subr.mxu1 %v3479_v24  ;;  %v1235_v44 = vadd.f32 %v7672_v2, %v9887_v14 }
 0x2a3   : > { %8133 = vmatprep.mubr.f32.mxu1 %v2618_v12  ;;  %8216 = vmatpush3.msra.mxu1 %v3479_v24  ;;  %v10004_v5 = vpop.f32.mrf.mxu1 }
 0x2a4   : > { %8217 = vmatprep.subr.mxu1 %v3478_v32  ;;  %v10006_v49 = vadd.f32 %v7728_v19, %v1235_v44  ;;  %v3469_v24 = vpop.trf.xlu1 }
 0x2a5   : > { %8218 = vmatpush3.msra.mxu1 %v3478_v32  ;;  %v7675_v14 = vpop.f32.mrf.mxu1 }
 0x2a6   : > { %8134 = vmatmul.mubr.f32.gmra.mxu1 %v2619_v6  ;;  %8219 = vmatprep.subr.mxu1 %v3477_v63  ;;  %v1237_v41 = vadd.f32 %v7675_v14, %v9896_v10  ;;  %v3474_v10 = vld [vmem:[%s11758_s1] sm:$0xff] }
 0x2a7   : > { %8136 = vmatprep.mubr.f32.mxu1 %v9874_v53  ;;  %8220 = vmatpush3.msra.mxu1 %v3477_v63  ;;  %v10018_v58 = vpop.f32.mrf.mxu1 }
 0x2a8   : > { %8221 = vmatprep.subr.mxu1 %v3476_v21  ;;  %v10020_v19 = vadd.f32 %v7731_v23, %v1237_v41  ;;  %v3470_v44 = vpop.trf.xlu1 }
 0x2a9   : > { %8222 = vmatpush3.msra.mxu1 %v3476_v21  ;;  %v7678_v0 = vpop.f32.mrf.mxu1 }
 0x2aa   : > { %8137 = vmatmul.mubr.f32.gmra.mxu1 %v2621_v60  ;;  %8223 = vmatprep.subr.mxu1 %v3475_v17  ;;  %v1239_v53 = vadd.f32 %v7678_v0, %v9905_v13  ;;  %v7734_v56 = vpop.f32.mrf.mxu0 }
 0x2ab   : > { %8224 = vmatpush3.msra.mxu1 %v3475_v17  ;;  %8227 = vmatprep.mubr.f32.mxu1 %v9885_v43  ;;  %v10027_v16 = vpop.f32.mrf.mxu1 }
 0x2ac   : > { %8225 = vmatprep.subr.mxu1 %v3474_v10  ;;  %v10029_v3 = vadd.f32 %v7734_v56, %v1239_v53  ;;  %v10031_v11 = vpop.f32.mrf.mxu0 }
 0x2ad   : > { %8226 = vmatpush3.msra.mxu1 %v3474_v10 }
 0x2ae   : > { %8228 = vmatmul.mubr.f32.vlgmr.msra.gmra.mxu1 %v9893_v55 }
 0x2af   : > { %8230 = vmatprep.mubr.f32.mxu1 %v9902_v57  ;;  %v7681_v9 = vpop.f32.mrf.mxu1 }
 0x2b0   : > { %v1241_v13 = vadd.f32 %v7681_v9, %v9918_v62  ;;  %v7737_v32 = vpop.f32.mrf.mxu0 }
 0x2b1   : > { %v10036_v2 = vpop.f32.mrf.mxu1 }
 0x2b2   : > { %8231 = vmatmul.mubr.f32.gmra.mxu1 %v9909_v27  ;;  %v1435_v43 = vadd.f32 %v7737_v32, %v1241_v13  ;;  %v10039_v12 = vpop.f32.mrf.mxu0  ;;  %v3471_v27 = vpop.trf.xlu1 }
 0x2b3   : > { %8233 = vmatprep.mubr.f32.mxu1 %v9916_v61 }
 0x2b5   : > { %v7684_v23 = vpop.f32.mrf.mxu1 }
 0x2b6   : > { %8234 = vmatmul.mubr.f32.gmra.mxu1 %v9925_v59  ;;  %v1243_v55 = vadd.f32 %v7684_v23, %v9934_v1  ;;  %v7740_v57 = vpop.f32.mrf.mxu0  ;;  %v3472_v41 = vpop.trf.xlu1 }
 0x2b7   : > { %8236 = vmatprep.mubr.f32.mxu1 %v9946_v51  ;;  %v10045_v62 = vpop.f32.mrf.mxu1 }
 0x2b8   : > { %v10047_v63 = vadd.f32 %v7740_v57, %v1243_v55  ;;  %v10049_v6 = vpop.f32.mrf.mxu0 }
 0x2ba   : > { %8237 = vmatmul.mubr.f32.gmra.mxu1 %v9962_v4 }
 0x2bb   : > { %8239 = vmatprep.mubr.f32.mxu1 %v9985_v48  ;;  %v7687_v61 = vpop.f32.mrf.mxu1 }
 0x2bc   : > { %v1245_v21 = vadd.f32 %v7687_v61, %v9957_v37  ;;  %v7743_v59 = vpop.f32.mrf.mxu0 }
 0x2bd   : > { %v10054_v14 = vpop.f32.mrf.mxu1 }
 0x2be   : > { %8240 = vmatmul.mubr.f32.gmra.mxu1 %v3467_v52  ;;  %v10056_v1 = vadd.f32 %v7743_v59, %v1245_v21  ;;  %v10058_v51 = vpop.f32.mrf.mxu0  ;;  %v3473_v52 = vpop.trf.xlu1 }
 0x2bf   : > { %11822 = vst [vmem:[#allocation14_spill] sm:$0xff] %v10058_v51  ;;  %8242 = vmatprep.mubr.f32.mxu1 %v3468_v38 }
 0x2c1   : > { %v7690_v60 = vpop.f32.mrf.mxu1 }
 0x2c2   : > { %8243 = vmatmul.mubr.f32.gmra.mxu1 %v3469_v24  ;;  %v1247_v4 = vadd.f32 %v7690_v60, %v9980_v50  ;;  %v7746_v17 = vpop.f32.mrf.mxu0  ;;  %v3922_v60 = vld [vmem:[#allocation6 + $0xf0] sm:$0xff] }
 0x2c3   : > { %8245 = vmatprep.mubr.f32.mxu1 %v3470_v44  ;;  %v10061_v48 = vpop.f32.mrf.mxu1 }
 0x2c4   : > { %v10063_v10 = vadd.f32 %v7746_v17, %v1247_v4  ;;  %v10065_v37 = vpop.f32.mrf.mxu0 }
 0x2c5   : > { %11823 = vst [vmem:[#allocation15_spill] sm:$0xff] %v10065_v37 }
 0x2c6   : > { %8246 = vmatmul.mubr.f32.gmra.mxu1 %v3471_v27 }
 0x2c7   : > { %8248 = vmatprep.mubr.f32.mxu1 %v3472_v41  ;;  %v7781_v0 = vpop.f32.mrf.mxu1  ;;  %v3923_v41 = vld [vmem:[#allocation6 + $0xf8] sm:$0xff] }
 0x2c8   : > { %v10068_v53 = vadd.f32 %v7781_v0, %v9995_v7  ;;  %v10070_v38 = vpop.f32.mrf.mxu0  ;;  %8307 = vmatprep.subr.mxu1 %v3923_v41 }
 0x2c9   : > { %v10072_v56 = vpop.f32.mrf.mxu1  ;;  %8308 = vmatpush3.msra.mxu1 %v3923_v41 }
 0x2ca   : > { %8249 = vmatmul.mubr.f32.gmra.mxu1 %v3473_v52  ;;  %v10074_v50 = vpop.f32.mrf.mxu0  ;;  %8309 = vmatprep.subr.mxu1 %v3922_v60 }
 0x2cb   : > { %8339 = vmatprep.mubr.f32.mxu1 %v9931_v8  ;;  %8310 = vmatpush3.msra.mxu1 %v3922_v60  ;;  %v3918_v60 = vld [vmem:[#allocation6 + $0xd0] sm:$0xff] }
 0x2cd   : > { %v7784_v24 = vpop.f32.mrf.mxu1 }
 0x2ce   : > { %v10078_v9 = vadd.f32 %v7784_v24, %v10006_v49  ;;  %v10080_v13 = vpop.f32.mrf.mxu0  ;;  %v3920_v24 = vld [vmem:[#allocation6 + $0xe0] sm:$0xff] }
 0x2cf   : > { %v10082_v32 = vpop.f32.mrf.mxu1 }
 0x2d0   : > { %v10084_v44 = vpop.f32.mrf.mxu0 }
 0x2d3   : > { %v7787_v7 = vpop.f32.mrf.mxu1 }
 0x2d4   : > { %v10087_v23 = vadd.f32 %v7787_v7, %v10020_v19  ;;  %v10089_v55 = vpop.f32.mrf.mxu0 }
 0x2d5   : > { %v10091_v57 = vpop.f32.mrf.mxu1 }
 0x2d6   : > { %v10093_v27 = vpop.f32.mrf.mxu0 }
 0x2d9   : > { %v7790_v8 = vpop.f32.mrf.mxu1 }
 0x2da   : > { %v10096_v49 = vadd.f32 %v7790_v8, %v10029_v3  ;;  %v10098_v61 = vpop.f32.mrf.mxu0  ;;  %v3921_v3 = vld [vmem:[#allocation6 + $0xe8] sm:$0xff]  ;;  %v3919_v8 = vld [vmem:[#allocation6 + $0xd8] sm:$0xff] }
 0x2db   : > { %11825 = vst [vmem:[#allocation17_spill] sm:$0xff] %v10098_v61  ;;  %v10100_v21 = vpop.f32.mrf.mxu1  ;;  %8311 = vmatprep.subr.mxu1 %v3921_v3 }
 0x2dc   : > { %11824 = vst [vmem:[#allocation16_spill] sm:$0xff] %v10096_v49  ;;  %v10102_v59 = vpop.f32.mrf.mxu0  ;;  %8312 = vmatpush3.msra.mxu1 %v3921_v3  ;;  %v3917_v3 = vld [vmem:[#allocation6 + $0xc8] sm:$0xff] }
 0x2dd   : > { %11826 = vst [vmem:[#allocation18_spill] sm:$0xff] %v10102_v59  ;;  %8313 = vmatprep.subr.mxu1 %v3920_v24 }
 0x2de   : > { %8314 = vmatpush3.msra.mxu1 %v3920_v24  ;;  %v3916_v24 = vld [vmem:[#allocation6 + $0xc0] sm:$0xff] }
 0x2df   : > { %v7793_v19 = vpop.f32.mrf.mxu1  ;;  %8315 = vmatprep.subr.mxu1 %v3919_v8 }
 0x2e0   : > { %v10104_v4 = vadd.f32 %v7793_v19, %v1435_v43  ;;  %v10106_v17 = vpop.f32.mrf.mxu0  ;;  %8316 = vmatpush3.msra.mxu1 %v3919_v8  ;;  %v3915_v8 = vld [vmem:[#allocation6 + $0xb8] sm:$0xff] }
 0x2e1   : > { %11828 = vst [vmem:[#allocation20_spill] sm:$0xff] %v10106_v17  ;;  %v10108_v52 = vpop.f32.mrf.mxu1  ;;  %8317 = vmatprep.subr.mxu1 %v3918_v60 }
 0x2e2   : > { %11827 = vst [vmem:[#allocation19_spill] sm:$0xff] %v10104_v4  ;;  %11829 = vst [vmem:[#allocation21_spill] sm:$0xff] %v10108_v52  ;;  %v10110_v0 = vpop.f32.mrf.mxu0  ;;  %8318 = vmatpush3.msra.mxu1 %v3918_v60  ;;  %v3914_v60 = vld [vmem:[#allocation6 + $0xb0] sm:$0xff] }
 0x2e3   : > { %11830 = vst [vmem:[#allocation22_spill] sm:$0xff] %v10110_v0  ;;  %8319 = vmatprep.subr.mxu1 %v3917_v3 }
 0x2e4   : > { %8320 = vmatpush3.msra.mxu1 %v3917_v3  ;;  %v3913_v3 = vld [vmem:[#allocation6 + $0xa8] sm:$0xff] }
 0x2e5   : > { %v7796_v7 = vpop.f32.mrf.mxu1  ;;  %8321 = vmatprep.subr.mxu1 %v3916_v24 }
 0x2e6   : > { %v10113_v41 = vadd.f32 %v7796_v7, %v10047_v63  ;;  %v10115_v43 = vpop.f32.mrf.mxu0  ;;  %8322 = vmatpush3.msra.mxu1 %v3916_v24  ;;  %v3912_v24 = vld [vmem:[#allocation6 + $0xa0] sm:$0xff] }
 0x2e7   : > { %11832 = vst [vmem:[#allocation24_spill] sm:$0xff] %v10115_v43  ;;  %v10117_v19 = vpop.f32.mrf.mxu1  ;;  %8323 = vmatprep.subr.mxu1 %v3915_v8 }
 0x2e8   : > { %11831 = vst [vmem:[#allocation23_spill] sm:$0xff] %v10113_v41  ;;  %11833 = vst [vmem:[#allocation25_spill] sm:$0xff] %v10117_v19  ;;  %v10119_v17 = vpop.f32.mrf.mxu0  ;;  %8324 = vmatpush3.msra.mxu1 %v3915_v8  ;;  %v3911_v8 = vld [vmem:[#allocation6 + $0x98] sm:$0xff] }
 0x2e9   : > { %11834 = vst [vmem:[#allocation26_spill] sm:$0xff] %v10119_v17  ;;  %8325 = vmatprep.subr.mxu1 %v3914_v60 }
 0x2ea   : > { %8326 = vmatpush3.msra.mxu1 %v3914_v60  ;;  %v3910_v60 = vld [vmem:[#allocation6 + $0x90] sm:$0xff] }
 0x2eb   : > { %v7799_v0 = vpop.f32.mrf.mxu1  ;;  %8327 = vmatprep.subr.mxu1 %v3913_v3 }
 0x2ec   : > { %v10122_v4 = vadd.f32 %v7799_v0, %v10056_v1  ;;  %v10124_v63 = vpop.f32.mrf.mxu0  ;;  %8328 = vmatpush3.msra.mxu1 %v3913_v3  ;;  %v3908_v3 = vld [vmem:[#allocation6 + $0x80] sm:$0xff] }
 0x2ed   : > { %11836 = vst [vmem:[#allocation28_spill] sm:$0xff] %v10124_v63  ;;  %v10126_v7 = vpop.f32.mrf.mxu1  ;;  %8329 = vmatprep.subr.mxu1 %v3912_v24 }
 0x2ee   : > { %11835 = vst [vmem:[#allocation27_spill] sm:$0xff] %v10122_v4  ;;  %11837 = vst [vmem:[#allocation29_spill] sm:$0xff] %v10126_v7  ;;  %v10128_v43 = vpop.f32.mrf.mxu0  ;;  %8330 = vmatpush3.msra.mxu1 %v3912_v24 }
 0x2ef   : > { %11838 = vst [vmem:[#allocation30_spill] sm:$0xff] %v10128_v43  ;;  %8331 = vmatprep.subr.mxu1 %v3911_v8 }
 0x2f0   : > { %8332 = vmatpush3.msra.mxu1 %v3911_v8 }
 0x2f1   : > { %v7802_v17 = vpop.f32.mrf.mxu1  ;;  %8333 = vmatprep.subr.mxu1 %v3910_v60 }
 0x2f2   : > { %v10131_v41 = vadd.f32 %v7802_v17, %v10063_v10  ;;  %v10133_v1 = vpop.f32.mrf.mxu0  ;;  %8334 = vmatpush3.msra.mxu1 %v3910_v60  ;;  %v3909_v17 = vld [vmem:[#allocation6 + $0x88] sm:$0xff] }
 0x2f3   : > { %11840 = vst [vmem:[#allocation32_spill] sm:$0xff] %v10133_v1  ;;  %v10135_v0 = vpop.f32.mrf.mxu1  ;;  %8335 = vmatprep.subr.mxu1 %v3909_v17 }
 0x2f4   : > { %11839 = vst [vmem:[#allocation31_spill] sm:$0xff] %v10131_v41  ;;  %11841 = vst [vmem:[#allocation33_spill] sm:$0xff] %v10135_v0  ;;  %v10137_v63 = vpop.f32.mrf.mxu0  ;;  %8336 = vmatpush3.msra.mxu1 %v3909_v17 }
 0x2f5   : > { %11842 = vst [vmem:[#allocation34_spill] sm:$0xff] %v10137_v63  ;;  %8337 = vmatprep.subr.mxu1 %v3908_v3  ;;  %v10149_v63 = vld [vmem:[#allocation6 + $0x1f8] sm:$0xff] }
 0x2f6   : > { %8338 = vmatpush3.msra.mxu1 %v3908_v3  ;;  %11843 = vst [vmem:[#allocation35_spill] sm:$0xff] %v10149_v63 }
 0x2f7   : > { %v10139_v43 = vpop.f32.mrf.mxu1  ;;  %8419 = vmatprep.subr.mxu1 %v10149_v63 }
 0x2f8   : > { %v10141_v4 = vpop.f32.mrf.mxu0 }
 0x2f9   : > { %v10143_v10 = vpop.f32.mrf.mxu1 }
 0x2fa   : > { %v10145_v1 = vpop.f32.mrf.mxu0 }
 0x2fd   : > { %v10147_v24 = vpop.f32.mrf.mxu1 }
 0x2fe   : > { %v10151_v8 = vpop.f32.mrf.mxu0 }
 0x2ff   : > { %v10154_v41 = vpop.f32.mrf.mxu1 }
 0x300   : > { %v10156_v0 = vpop.f32.mrf.mxu0 }
 0x301   : > { %11844 = vst [vmem:[#allocation36_spill] sm:$0xff] %v10156_v0 }
 0x303   : > { %v10158_v60 = vpop.f32.mrf.mxu1 }
 0x304   : > { %v10160_v7 = vpop.f32.mrf.mxu0 }
 0x305   : > { %11845 = vst [vmem:[#allocation37_spill] sm:$0xff] %v10160_v7  ;;  %v10162_v17 = vpop.f32.mrf.mxu1 }
 0x306   : > { %11846 = vst [vmem:[#allocation38_spill] sm:$0xff] %v10162_v17  ;;  %v10164_v19 = vpop.f32.mrf.mxu0 }
 0x307   : > { %11847 = vst [vmem:[#allocation39_spill] sm:$0xff] %v10164_v19 }
 0x309   : > { %v10166_v59 = vpop.f32.mrf.mxu1 }
 0x30a   : > { %11848 = vst [vmem:[#allocation40_spill] sm:$0xff] %v10166_v59  ;;  %v10168_v3 = vpop.f32.mrf.mxu0 }
 0x30b   : > { %11849 = vst [vmem:[#allocation41_spill] sm:$0xff] %v10168_v3  ;;  %v10170_v37 = vpop.f32.mrf.mxu1 }
 0x30c   : > { %11850 = vst [vmem:[#allocation42_spill] sm:$0xff] %v10170_v37  ;;  %v10172_v51 = vpop.f32.mrf.mxu0 }
 0x30d   : > { %11851 = vst [vmem:[#allocation43_spill] sm:$0xff] %v10172_v51 }
 0x30f   : > { %v10174_v63 = vpop.f32.mrf.mxu1 }
 0x310   : > { %11852 = vst [vmem:[#allocation44_spill] sm:$0xff] %v10174_v63  ;;  %v10176_v52 = vpop.f32.mrf.mxu0 }
 0x311   : > { %11853 = vst [vmem:[#allocation45_spill] sm:$0xff] %v10176_v52  ;;  %v10178_v0 = vpop.f32.mrf.mxu1 }
 0x312   : > { %11854 = vst [vmem:[#allocation46_spill] sm:$0xff] %v10178_v0  ;;  %v10180_v61 = vpop.f32.mrf.mxu0 }
 0x313   : > { %11855 = vst [vmem:[#allocation47_spill] sm:$0xff] %v10180_v61 }
 0x315   : > { %v10182_v7 = vpop.f32.mrf.mxu1 }
 0x316   : > { %11856 = vst [vmem:[#allocation48_spill] sm:$0xff] %v10182_v7  ;;  %v10184_v17 = vpop.f32.mrf.mxu0 }
 0x317   : > { %11857 = vst [vmem:[#allocation49_spill] sm:$0xff] %v10184_v17  ;;  %v10186_v19 = vpop.f32.mrf.mxu1 }
 0x318   : > { %11858 = vst [vmem:[#allocation50_spill] sm:$0xff] %v10186_v19  ;;  %v10188_v59 = vpop.f32.mrf.mxu0 }
 0x319   : > { %11859 = vst [vmem:[#allocation51_spill] sm:$0xff] %v10188_v59 }
 0x31b   : > { %v10190_v3 = vpop.f32.mrf.mxu1 }
 0x31c   : > { %11860 = vst [vmem:[#allocation52_spill] sm:$0xff] %v10190_v3  ;;  %v10192_v37 = vpop.f32.mrf.mxu0 }
 0x31d   : > { %11861 = vst [vmem:[#allocation53_spill] sm:$0xff] %v10192_v37  ;;  %v10194_v51 = vpop.f32.mrf.mxu1 }
 0x31e   : > { %11862 = vst [vmem:[#allocation54_spill] sm:$0xff] %v10194_v51  ;;  %v10196_v63 = vpop.f32.mrf.mxu0 }
 0x31f   : > { %11863 = vst [vmem:[#allocation55_spill] sm:$0xff] %v10196_v63 }
 0x321   : > { %v10198_v52 = vpop.f32.mrf.mxu1 }
 0x322   : > { %11864 = vst [vmem:[#allocation56_spill] sm:$0xff] %v10198_v52  ;;  %v10202_v61 = vpop.f32.mrf.mxu0 }
 0x323   : > { %v10200_v0 = vpop.f32.mrf.mxu1  ;;  %11866 = vst [vmem:[#allocation58_spill] sm:$0xff] %v10202_v61 }
 0x324   : > { %11865 = vst [vmem:[#allocation57_spill] sm:$0xff] %v10200_v0  ;;  %v10206_v17 = vpop.f32.mrf.mxu0  ;;  %v844_v0 = vadd.f32 %v9872_v39, %v9880_v18  ;;  %v848_v18 = vadd.f32 %v9872_v39, %v9898_v29  ;;  %v852_v29 = vadd.f32 %v9872_v39, %v9921_v47 }
 0x325   : > { %11867 = vst [vmem:[#allocation59_spill] sm:$0xff] %v10206_v17  ;;  %v846_v17 = vadd.f32 %v9872_v39, %v9889_v33 }
 0x327   : > { %v10204_v7 = vpop.f32.mrf.mxu1 }
 0x328   : > { %v10212_v3 = vpop.f32.mrf.mxu0 }
 0x329   : > { %v10208_v19 = vpop.f32.mrf.mxu1  ;;  %11869 = vst [vmem:[#allocation61_spill] sm:$0xff] %v10212_v3 }
 0x32a   : > { %v10216_v51 = vpop.f32.mrf.mxu0 }
 0x32b   : > { %11871 = vst [vmem:[#allocation63_spill] sm:$0xff] %v10216_v51 }
 0x32c   : > { %v10210_v59 = vpop.f32.mrf.mxu1 }
 0x32d   : > { %11868 = vst [vmem:[#allocation60_spill] sm:$0xff] %v10210_v59  ;;  %v10224_v52 = vpop.f32.mrf.mxu0  ;;  %v1038_v59 = vadd.f32 %v9882_v36, %v844_v0  ;;  %v1042_v0 = vadd.f32 %v9900_v46, %v848_v18  ;;  %v1815_v46 = vadd.f32 %v10070_v38, %v10068_v53 }
 0x32e   : > { %v10214_v37 = vpop.f32.mrf.mxu1  ;;  %11874 = vst [vmem:[#allocation66_spill] sm:$0xff] %v10224_v52 }
 0x32f   : > { %11870 = vst [vmem:[#allocation62_spill] sm:$0xff] %v10214_v37  ;;  %v1232_v51 = vadd.f32 %v9993_v26, %v1038_v59  ;;  %v10234_v37 = vpop.f32.mrf.mxu0  ;;  %v850_v26 = vadd.f32 %v9872_v39, %v9911_v34  ;;  %v2009_v38 = vadd.f32 %v10139_v43, %v1815_v46  ;;  %v11880_v46 = vld [vmem:[#allocation38_spill] sm:$0xff] }
 0x331   : > { %v10218_v63 = vpop.f32.mrf.mxu1  ;;  %v1426_v33 = vadd.f32 %v9969_v20, %v1232_v51  ;;  %v854_v20 = vadd.f32 %v9872_v39, %v9942_v28  ;;  %v1044_v34 = vadd.f32 %v9907_v54, %v850_v26  ;;  %v858_v28 = vadd.f32 %v9872_v39, %v9978_v35 }
 0x332   : > { %11872 = vst [vmem:[#allocation64_spill] sm:$0xff] %v10218_v63  ;;  %v1040_v63 = vadd.f32 %v9891_v45, %v846_v17  ;;  %v1046_v54 = vadd.f32 %v9914_v42, %v852_v29 }
 0x333   : > { %v10222_v61 = vpop.f32.mrf.mxu1  ;;  %v1620_v45 = vadd.f32 %v10072_v56, %v1426_v33  ;;  %v856_v56 = vadd.f32 %v9872_v39, %v9967_v22  ;;  %v1048_v17 = vadd.f32 %v9923_v30, %v854_v20  ;;  %v1817_v39 = vadd.f32 %v10080_v13, %v10078_v9  ;;  %v2957_v30 = vld [vmem:[%s11763_s6 + $0x68] sm:$0xff] }
 0x334   : > { %11873 = vst [vmem:[#allocation65_spill] sm:$0xff] %v10222_v61  ;;  %v1234_v52 = vadd.f32 %v10004_v5, %v1040_v63  ;;  %v1236_v5 = vadd.f32 %v10018_v58, %v1042_v0  ;;  %v2959_v58 = vld [vmem:[%s11763_s6 + $0x78] sm:$0xff]  ;;  %v1052_v9 = vadd.f32 %v9955_v25, %v858_v28  ;;  %v2956_v25 = vld [vmem:[%s11763_s6 + $0x60] sm:$0xff] }
 0x335   : > { %v1814_v53 = vadd.f32 %v10074_v50, %v1620_v45  ;;  %8139 = vmatprep.subr.mxu0 %v2959_v58  ;;  %v1050_v42 = vadd.f32 %v9944_v31, %v856_v56  ;;  %v1242_v13 = vadd.f32 %v10045_v62, %v1048_v17  ;;  %v2011_v33 = vadd.f32 %v10147_v24, %v1817_v39  ;;  %v11887_v39 = vld [vmem:[#allocation40_spill] sm:$0xff] }
 0x336   : > { %v10228_v49 = vpop.f32.mrf.mxu1  ;;  %v1428_v59 = vadd.f32 %v9988_v15, %v1234_v52  ;;  %v1430_v22 = vadd.f32 %v10012_v40, %v1236_v5  ;;  %8140 = vmatpush3.msra.mxu0 %v2959_v58  ;;  %v2958_v52 = vld [vmem:[%s11763_s6 + $0x70] sm:$0xff]  ;;  %v1240_v40 = vadd.f32 %v10036_v2, %v1046_v54  ;;  %v1246_v62 = vadd.f32 %v10061_v48, %v1052_v9  ;;  %v2955_v48 = vld [vmem:[%s11763_s6 + $0x58] sm:$0xff] }
 0x337   : > { %11875 = vst [vmem:[#allocation67_spill] sm:$0xff] %v10228_v49  ;;  %v10243_v49 = vpop.f32.mrf.mxu0  ;;  %v2008_v35 = vadd.f32 %v10143_v10, %v1814_v53  ;;  %8141 = vmatprep.subr.mxu0 %v2958_v52  ;;  %v2203_v10 = vadd.f32 %v10141_v4, %v2009_v38  ;;  %v1819_v4 = vadd.f32 %v10089_v55, %v10087_v23  ;;  %v11879_v5 = vld [vmem:[#allocation36_spill] sm:$0xff]  ;;  %v11883_v58 = vld [vmem:[#allocation61_spill] sm:$0xff] }
 0x338   : > { %v10231_v3 = vpop.f32.mrf.mxu1  ;;  %v1622_v47 = vadd.f32 %v10082_v32, %v1428_v59  ;;  %v1238_v32 = vadd.f32 %v10027_v16, %v1044_v34  ;;  %v1624_v18 = vadd.f32 %v10091_v57, %v1430_v22  ;;  %8142 = vmatpush3.msra.mxu0 %v2958_v52  ;;  %v1436_v23 = vadd.f32 %v10049_v6, %v1242_v13  ;;  %v2954_v6 = vld [vmem:[%s11763_s6 + $0x50] sm:$0xff]  ;;  %v11885_v22 = vld [vmem:[#allocation18_spill] sm:$0xff]  ;;  %v11886_v52 = vld [vmem:[#allocation25_spill] sm:$0xff] }
 0x339   : > { %v10261_v51 = vpop.f32.mrf.mxu0  ;;  %8143 = vmatprep.subr.mxu0 %v2957_v30  ;;  %v2202_v24 = vadd.f32 %v10145_v1, %v2008_v35  ;;  %v2397_v0 = vadd.f32 %v10204_v7, %v2203_v10  ;;  %v2205_v55 = vadd.f32 %v10151_v8, %v2011_v33  ;;  %v2013_v7 = vadd.f32 %v10158_v60, %v1819_v4  ;;  %v11881_v8 = vld [vmem:[#allocation14_spill] sm:$0xff]  ;;  %v11884_v53 = vld [vmem:[#allocation60_spill] sm:$0xff]  ;;  %v11891_v10 = vld [vmem:[#allocation37_spill] sm:$0xff] }
 0x33a   : > { %v1816_v16 = vadd.f32 %v10084_v44, %v1622_v47  ;;  %v1432_v2 = vadd.f32 %v10031_v11, %v1238_v32  ;;  %v1244_v44 = vadd.f32 %v10054_v14, %v1050_v42  ;;  %8144 = vmatpush3.msra.mxu0 %v2957_v30  ;;  %v1434_v11 = vadd.f32 %v10039_v12, %v1240_v40  ;;  %v11876_v12 = vld [vmem:[#allocation16_spill] sm:$0xff]  ;;  %v11888_v42 = vld [vmem:[#allocation62_spill] sm:$0xff]  ;;  %v11889_v30 = vld [vmem:[#allocation19_spill] sm:$0xff] }
 0x33b   : > { %v10239_v61 = vpop.f32.mrf.mxu1  ;;  %v10286_v50 = vpop.f32.mrf.mxu0  ;;  %8145 = vmatprep.subr.mxu0 %v2956_v25  ;;  %v1818_v14 = vadd.f32 %v10093_v27, %v1624_v18  ;;  %v2396_v1 = vadd.f32 %v10208_v19, %v2202_v24  ;;  %v11877_v27 = vld [vmem:[#allocation17_spill] sm:$0xff]  ;;  %v11882_v19 = vld [vmem:[#allocation15_spill] sm:$0xff]  ;;  %v2591_v28 = vadd.f32 %v11883_v58, %v2397_v0  ;;  %v2399_v38 = vadd.f32 %v11884_v53, %v2205_v55  ;;  %v11890_v9 = vld [vmem:[#allocation20_spill] sm:$0xff] }
 0x33c   : > { %v2010_v57 = vadd.f32 %v10154_v41, %v1816_v16  ;;  %v1626_v41 = vadd.f32 %v10100_v21, %v1432_v2  ;;  %8146 = vmatpush3.msra.mxu0 %v2956_v25  ;;  %v1821_v29 = vadd.f32 %v11877_v27, %v11876_v12  ;;  %v11878_v21 = vld [vmem:[#allocation21_spill] sm:$0xff]  ;;  %v1438_v60 = vadd.f32 %v11881_v8, %v1244_v44  ;;  %v2953_v18 = vld [vmem:[%s11763_s6 + $0x48] sm:$0xff]  ;;  %v11893_v25 = vld [vmem:[#allocation22_spill] sm:$0xff] }
 0x33d   : > { %v10245_v36 = vpop.f32.mrf.mxu1  ;;  %v10314_v26 = vpop.f32.mrf.mxu0  ;;  %8147 = vmatprep.subr.mxu0 %v2955_v48  ;;  %v1628_v59 = vadd.f32 %v11878_v21, %v1434_v11  ;;  %v2012_v34 = vadd.f32 %v11880_v46, %v1818_v14  ;;  %v10340_v47 = vadd.f32 %v11882_v19, %v1246_v62  ;;  %v1630_v17 = vadd.f32 %v11886_v52, %v1436_v23  ;;  %v11892_v2 = vld [vmem:[#allocation63_spill] sm:$0xff]  ;;  %v11895_v24 = vld [vmem:[#allocation24_spill] sm:$0xff]  ;;  %v2952_v55 = vld [vmem:[%s11763_s6 + $0x40] sm:$0xff] }
 0x33e   : > { %v2204_v20 = vadd.f32 %v11879_v5, %v2010_v57  ;;  %8148 = vmatpush3.msra.mxu0 %v2955_v48  ;;  %v1820_v32 = vadd.f32 %v11885_v22, %v1626_v41  ;;  %v2015_v35 = vadd.f32 %v11887_v39, %v1821_v29  ;;  %v1823_v13 = vadd.f32 %v11890_v9, %v11889_v30  ;;  %v11894_v4 = vld [vmem:[#allocation23_spill] sm:$0xff]  ;;  %v11897_v41 = vld [vmem:[#allocation42_spill] sm:$0xff]  ;;  %v11899_v12 = vld [vmem:[#allocation64_spill] sm:$0xff] }
 0x33f   : > { %v10344_v54 = vpop.f32.mrf.mxu0  ;;  %8149 = vmatprep.subr.mxu0 %v2954_v6  ;;  %v2207_v33 = vadd.f32 %v11891_v10, %v2013_v7  ;;  %v2590_v44 = vadd.f32 %v11892_v2, %v2396_v1  ;;  %v1822_v62 = vadd.f32 %v11893_v25, %v1628_v59  ;;  %v1825_v0 = vadd.f32 %v11895_v24, %v11894_v4  ;;  %v11896_v11 = vld [vmem:[#allocation39_spill] sm:$0xff]  ;;  %v11898_v7 = vld [vmem:[#allocation66_spill] sm:$0xff]  ;;  %v11901_v46 = vld [vmem:[#allocation41_spill] sm:$0xff] }
 0x340   : > { %v10255_v63 = vpop.f32.mrf.mxu1  ;;  %v2398_v40 = vadd.f32 %v11888_v42, %v2204_v20  ;;  %8150 = vmatpush3.msra.mxu0 %v2954_v6  ;;  %v2206_v14 = vadd.f32 %v11896_v11, %v2012_v34  ;;  %v2014_v48 = vadd.f32 %v11897_v41, %v1820_v32  ;;  %v2593_v1 = vadd.f32 %v11898_v7, %v2399_v38  ;;  %v11900_v5 = vld [vmem:[#allocation26_spill] sm:$0xff]  ;;  %v11902_v6 = vld [vmem:[#allocation44_spill] sm:$0xff]  ;;  %v11903_v53 = vld [vmem:[#allocation65_spill] sm:$0xff] }
 0x341   : > { %8151 = vmatprep.subr.mxu0 %v2953_v18  ;;  %v2401_v27 = vadd.f32 %v11899_v12, %v2207_v33  ;;  %v10369_v29 = vpop.f32.mrf.mxu0  ;;  %v1824_v20 = vadd.f32 %v11900_v5, %v1630_v17  ;;  %v2209_v34 = vadd.f32 %v11901_v46, %v2015_v35  ;;  %v2017_v8 = vadd.f32 %v11902_v6, %v1823_v13  ;;  %v11904_v52 = vld [vmem:[#allocation29_spill] sm:$0xff]  ;;  %v11905_v39 = vld [vmem:[#allocation43_spill] sm:$0xff]  ;;  %v11906_v42 = vld [vmem:[#allocation46_spill] sm:$0xff] }
 0x342   : > { %v10267_v15 = vpop.f32.mrf.mxu1  ;;  %8152 = vmatpush3.msra.mxu0 %v2953_v18  ;;  %v2592_v19 = vadd.f32 %v10234_v37, %v2398_v40  ;;  %v2400_v38 = vadd.f32 %v11903_v53, %v2206_v14  ;;  %v1632_v17 = vadd.f32 %v11904_v52, %v1438_v60  ;;  %v2208_v35 = vadd.f32 %v11905_v39, %v2014_v48  ;;  %v11907_v40 = vld [vmem:[#allocation67_spill] sm:$0xff]  ;;  %v2950_v30 = vld [vmem:[%s11763_s6 + $0x30] sm:$0xff]  ;;  %v11910_v25 = vld [vmem:[#allocation45_spill] sm:$0xff] }
 0x343   : > { %8153 = vmatprep.subr.mxu0 %v2952_v55  ;;  %v2016_v37 = vadd.f32 %v11906_v42, %v1822_v62  ;;  %v2595_v9 = vadd.f32 %v10243_v49, %v2401_v27  ;;  %v10393_v13 = vpop.f32.mrf.mxu0  ;;  %v11908_v33 = vld [vmem:[#allocation27_spill] sm:$0xff]  ;;  %v11909_v2 = vld [vmem:[#allocation28_spill] sm:$0xff]  ;;  %v2211_v62 = vadd.f32 %v11910_v25, %v2017_v8  ;;  %v11914_v12 = vld [vmem:[#allocation50_spill] sm:$0xff] }
 0x344   : > { %8154 = vmatpush3.msra.mxu0 %v2952_v55  ;;  %v11911_v4 = vld [vmem:[#allocation48_spill] sm:$0xff]  ;;  %v2402_v11 = vadd.f32 %v10231_v3, %v2208_v35  ;;  %v2949_v49 = vld [vmem:[%s11763_s6 + $0x28] sm:$0xff]  ;;  %v2594_v41 = vadd.f32 %v10261_v51, %v2400_v38  ;;  %v11912_v55 = vld [vmem:[#allocation30_spill] sm:$0xff]  ;;  %v2018_v3 = vadd.f32 %v11914_v12, %v1824_v20 }
 0x345   : > { %v10288_v43 = vpop.f32.mrf.mxu1  ;;  %v2019_v24 = vadd.f32 %v11911_v4, %v1825_v0  ;;  %v1826_v7 = vadd.f32 %v11912_v55, %v1632_v17  ;;  %v2948_v51 = vld [vmem:[%s11763_s6 + $0x20] sm:$0xff]  ;;  %v2405_v5 = vadd.f32 %v10239_v61, %v2211_v62  ;;  %v2561_v46 = vpop.f32.mrf.mxu0  ;;  %v11915_v8 = vld [vmem:[#allocation33_spill] sm:$0xff]  ;;  %v11919_v39 = vld [vmem:[#allocation32_spill] sm:$0xff] }
 0x346   : > { %v1634_v20 = vadd.f32 %v11915_v8, %v10340_v47  ;;  %v2596_v53 = vadd.f32 %v10314_v26, %v2402_v11  ;;  %v2947_v61 = vld [vmem:[%s11763_s6 + $0x18] sm:$0xff]  ;;  %v11918_v47 = vld [vmem:[#allocation31_spill] sm:$0xff]  ;;  %v11921_v26 = vld [vmem:[#allocation54_spill] sm:$0xff] }
 0x347   : > { %v10301_v31 = vpop.f32.mrf.mxu1  ;;  %v1829_v35 = vadd.f32 %v11919_v39, %v11918_v47  ;;  %v11920_v42 = vld [vmem:[#allocation51_spill] sm:$0xff]  ;;  %v11923_v25 = vld [vmem:[#allocation53_spill] sm:$0xff] }
 0x34a   : > { %v10319_v45 = vpop.f32.mrf.mxu1 }
 0x34c   : > { %v10333_v56 = vpop.f32.mrf.mxu1 }
 0x34e   : > { %v8117_v16 = vpop.f32.mrf.mxu1 }
 0x34f   : > { %v10357_v57 = vadd.f32 %v8117_v16, %v2591_v28  ;;  %v2951_v28 = vld [vmem:[%s11763_s6 + $0x38] sm:$0xff]  ;;  %v2403_v16 = vadd.f32 %v11907_v40, %v2209_v34  ;;  %v2020_v40 = vadd.f32 %v11921_v26, %v1826_v7 }
 0x350   : > { %v2705_v23 = vpop.f32.mrf.mxu1  ;;  %8155 = vmatprep.subr.mxu0 %v2951_v28  ;;  %v11926_v7 = vld [vmem:[#allocation57_spill] sm:$0xff] }
 0x351   : > { %v6562_v21 = vmul.f32 -1.442695, %v10357_v57  ;;  %v10372_v59 = vadd.f32 %v2705_v23, %v2590_v44  ;;  %8156 = vmatpush3.msra.mxu0 %v2951_v28  ;;  %v1827_v44 = vadd.f32 %v11909_v2, %v11908_v33  ;;  %v2597_v27 = vadd.f32 %v10286_v50, %v2403_v16  ;;  %v11922_v2 = vld [vmem:[#allocation34_spill] sm:$0xff] }
 0x352   : > { %v8120_v58 = vpop.f32.mrf.mxu1  ;;  %8157 = vmatprep.subr.mxu0 %v2950_v30 }
 0x353   : > { %8989 = vpow2.f32 %v6562_v21  ;;  %v6561_v22 = vmul.f32 -1.442695, %v10372_v59  ;;  %v10383_v32 = vadd.f32 %v8120_v58, %v2593_v1  ;;  %8158 = vmatpush3.msra.mxu0 %v2950_v30  ;;  %v11913_v1 = vld [vmem:[#allocation47_spill] sm:$0xff]  ;;  %v11917_v58 = vld [vmem:[#allocation52_spill] sm:$0xff]  ;;  %v2599_v30 = vadd.f32 %v10344_v54, %v2405_v5  ;;  %v11927_v5 = vld [vmem:[#allocation58_spill] sm:$0xff] }
 0x354   : > { %v2715_v18 = vpop.f32.mrf.mxu1  ;;  %8159 = vmatprep.subr.mxu0 %v2949_v49  ;;  %v2210_v0 = vadd.f32 %v11913_v1, %v2016_v37  ;;  %v2021_v28 = vadd.f32 %v11917_v58, %v1827_v44  ;;  %v2212_v37 = vadd.f32 %v11920_v42, %v2018_v3  ;;  %v1828_v44 = vadd.f32 %v11922_v2, %v1634_v20 }
 0x355   : > { %8991 = vpow2.f32 %v6561_v22  ;;  %v6564_v10 = vmul.f32 -1.442695, %v10383_v32  ;;  %v10396_v60 = vadd.f32 %v2715_v18, %v2592_v19  ;;  %8160 = vmatpush3.msra.mxu0 %v2949_v49  ;;  %v11916_v19 = vld [vmem:[#allocation49_spill] sm:$0xff] }
 0x356   : > { %v8123_v14 = vpop.f32.mrf.mxu1  ;;  %8161 = vmatprep.subr.mxu0 %v2948_v51  ;;  %v2213_v50 = vadd.f32 %v11916_v19, %v2019_v24  ;;  %v2404_v22 = vadd.f32 %v10245_v36, %v2210_v0  ;;  %v2946_v36 = vld [vmem:[%s11763_s6 + $0x10] sm:$0xff]  ;;  %v2215_v62 = vadd.f32 %v11923_v25, %v2021_v28  ;;  %v2406_v24 = vadd.f32 %v10267_v15, %v2212_v37  ;;  %v10483_v25 = vld [vmem:[#allocation6 + $0x78] sm:$0xff] }
 0x357   : > { %8993 = vpow2.f32 %v6564_v10  ;;  %v6563_v48 = vmul.f32 -1.442695, %v10396_v60  ;;  %v10408_v23 = vadd.f32 %v8123_v14, %v2595_v9  ;;  %8162 = vmatpush3.msra.mxu0 %v2948_v51  ;;  %v8079_v9 = vpop.f32.mrf.mxu0  ;;  %v2022_v1 = vadd.f32 %v11926_v7, %v1828_v44 }
 0x358   : > { %v2725_v21 = vpop.f32.mrf.mxu1  ;;  %8163 = vmatprep.subr.mxu0 %v2947_v61  ;;  %v2407_v16 = vadd.f32 %v10255_v63, %v2213_v50  ;;  %v11924_v63 = vld [vmem:[#allocation56_spill] sm:$0xff]  ;;  %v2598_v14 = vadd.f32 %v10369_v29, %v2404_v22  ;;  %v2409_v12 = vadd.f32 %v10288_v43, %v2215_v62  ;;  %v2600_v8 = vadd.f32 %v2561_v46, %v2406_v24 }
 0x359   : > { %8995 = vpow2.f32 %v6563_v48  ;;  %v6566_v34 = vmul.f32 -1.442695, %v10408_v23  ;;  %v10419_v6 = vadd.f32 %v2725_v21, %v2594_v41  ;;  %8164 = vmatpush3.msra.mxu0 %v2947_v61  ;;  %v2023_v4 = vadd.f32 %v11924_v63, %v1829_v35  ;;  %v11925_v48 = vld [vmem:[#allocation55_spill] sm:$0xff]  ;;  %v2571_v15 = vpop.f32.mrf.mxu0 }
 0x35a   : > { %v8126_v38 = vpop.f32.mrf.mxu1  ;;  %8165 = vmatprep.subr.mxu0 %v2946_v36  ;;  %v2214_v55 = vadd.f32 %v11925_v48, %v2020_v40  ;;  %v2601_v0 = vadd.f32 %v10393_v13, %v2407_v16  ;;  %v2603_v61 = vadd.f32 %v8079_v9, %v2409_v12 }
 0x35b   : > { %8997 = vpow2.f32 %v6566_v34  ;;  %v6565_v52 = vmul.f32 -1.442695, %v10419_v6  ;;  %v10431_v17 = vadd.f32 %v8126_v38, %v2597_v27  ;;  %8166 = vmatpush3.msra.mxu0 %v2946_v36  ;;  %v2217_v34 = vadd.f32 %v11927_v5, %v2023_v4  ;;  %v8082_v50 = vpop.f32.mrf.mxu0 }
 0x35c   : > { %v2735_v18 = vpop.f32.mrf.mxu1  ;;  %v2408_v20 = vadd.f32 %v10301_v31, %v2214_v55  ;;  %v2945_v31 = vld [vmem:[%s11763_s6 + $0x8] sm:$0xff] }
 0x35d   : > { %8999 = vpow2.f32 %v6565_v52  ;;  %v6568_v10 = vmul.f32 -1.442695, %v10431_v17  ;;  %v10443_v33 = vadd.f32 %v2735_v18, %v2596_v53  ;;  %v11928_v53 = vld [vmem:[#allocation59_spill] sm:$0xff]  ;;  %v2411_v22 = vadd.f32 %v10319_v45, %v2217_v34  ;;  %8167 = vmatprep.subr.mxu0 %v2945_v31  ;;  %v2944_v45 = vld [vmem:[%s11763_s6] sm:$0xff]  ;;  %v2581_v40 = vpop.f32.mrf.mxu0 }
 0x35e   : > { %v8129_v11 = vpop.f32.mrf.mxu1  ;;  %v2216_v38 = vadd.f32 %v11928_v53, %v2022_v1  ;;  %v2602_v42 = vadd.f32 %v2571_v15, %v2408_v20  ;;  %8168 = vmatpush3.msra.mxu0 %v2945_v31  ;;  %v10496_v15 = vld [vmem:[%s11759_s2] ss:$0 sm:$0xff] }
 0x35f   : > { %9001 = vpow2.f32 %v6568_v10  ;;  %v6567_v54 = vmul.f32 -1.442695, %v10443_v33  ;;  %v10451_v49 = vadd.f32 %v8129_v11, %v2599_v30  ;;  %8169 = vmatprep.subr.mxu0 %v2944_v45  ;;  %v2605_v9 = vadd.f32 %v8082_v50, %v2411_v22  ;;  %v10502_v34 = vld [vmem:[%s11760_s3] ss:$0 sm:$0xff] }
 0x360   : > { %v8990_v41 = vpop.eup %8989  ;;  %v2745_v3 = vpop.f32.mrf.mxu1  ;;  %v2410_v37 = vadd.f32 %v10333_v56, %v2216_v38  ;;  %8170 = vmatpush3.msra.mxu0 %v2944_v45 }
 0x361   : > { %v2849_v27 = vadd.f32 1.0, %v8990_v41  ;;  %9003 = vpow2.f32 %v6567_v54  ;;  %v6570_v29 = vmul.f32 -1.442695, %v10451_v49  ;;  %v10458_v21 = vadd.f32 %v2745_v3, %v2598_v14  ;;  %8251 = vmatprep.subr.mxu0 %v10483_v25 }
 0x362   : > { %v8992_v51 = vpop.eup %8991  ;;  %v8132_v19 = vpop.f32.mrf.mxu1  ;;  %v2604_v63 = vadd.f32 %v2581_v40, %v2410_v37 }
 0x363   : > { %9005 = vrcp.f32 %v2849_v27  ;;  %v2848_v13 = vadd.f32 1.0, %v8992_v51  ;;  %v6569_v43 = vmul.f32 -1.442695, %v10458_v21  ;;  %v10463_v58 = vadd.f32 %v8132_v19, %v2601_v0 }
 0x364   : > { %v8994_v28 = vpop.eup %8993  ;;  %9007 = vpow2.f32 %v6570_v29  ;;  %v2755_v52 = vpop.f32.mrf.mxu1 }
 0x365   : > { %9009 = vrcp.f32 %v2848_v13  ;;  %v2851_v46 = vadd.f32 1.0, %v8994_v28  ;;  %v6572_v47 = vmul.f32 -1.442695, %v10463_v58  ;;  %v10471_v39 = vadd.f32 %v2755_v52, %v2600_v8 }
 0x366   : > { %v8996_v35 = vpop.eup %8995  ;;  %9011 = vpow2.f32 %v6569_v43  ;;  %v8135_v26 = vpop.f32.mrf.mxu1 }
 0x367   : > { %9013 = vrcp.f32 %v2851_v46  ;;  %v2850_v16 = vadd.f32 1.0, %v8996_v35  ;;  %v6571_v18 = vmul.f32 -1.442695, %v10471_v39  ;;  %v10478_v36 = vadd.f32 %v8135_v26, %v2603_v61 }
 0x368   : > { %v8998_v30 = vpop.eup %8997  ;;  %9015 = vpow2.f32 %v6572_v47  ;;  %v2765_v10 = vpop.f32.mrf.mxu1 }
 0x369   : > { %9017 = vrcp.f32 %v2850_v16  ;;  %v2853_v56 = vadd.f32 1.0, %v8998_v30  ;;  %v6574_v2 = vmul.f32 -1.442695, %v10478_v36  ;;  %v10481_v44 = vadd.f32 %v2765_v10, %v2602_v42  ;;  %v4308_v42 = vld [vmem:[#allocation6 + $0x1f0] sm:$0xff] }
 0x36a   : > { %v9000_v62 = vpop.eup %8999  ;;  %9019 = vpow2.f32 %v6571_v18  ;;  %v8138_v4 = vpop.f32.mrf.mxu1 }
 0x36b   : > { %9021 = vrcp.f32 %v2853_v56  ;;  %v2852_v24 = vadd.f32 1.0, %v9000_v62  ;;  %v6573_v11 = vmul.f32 -1.442695, %v10481_v44  ;;  %v10487_v14 = vadd.f32 %v8138_v4, %v2605_v9  ;;  %v11929_v9 = vld [vmem:[#allocation35_spill] sm:$0xff] }
 0x36c   : > { %v9002_v54 = vpop.eup %9001  ;;  %9023 = vpow2.f32 %v6574_v2  ;;  %v2775_v41 = vpop.f32.mrf.mxu1  ;;  %v4307_v62 = vld [vmem:[#allocation6 + $0x1e8] sm:$0xff] }
 0x36d   : > { %9025 = vrcp.f32 %v2852_v24  ;;  %v2855_v48 = vadd.f32 1.0, %v9002_v54  ;;  %v6576_v55 = vmul.f32 -1.442695, %v10487_v14  ;;  %v10490_v7 = vadd.f32 %v2775_v41, %v2604_v63 }
 0x36e   : > { %v9004_v1 = vpop.eup %9003  ;;  %9027 = vpow2.f32 %v6573_v11  ;;  %v8229_v0 = vpop.f32.mrf.mxu1 }
 0x36f   : > { %9029 = vrcp.f32 %v2855_v48  ;;  %v2854_v12 = vadd.f32 1.0, %v9004_v1  ;;  %v6575_v3 = vmul.f32 -1.442695, %v10490_v7  ;;  %v3562_v27 = vadd.f32 %v10496_v15, %v8229_v0 }
 0x370   : > { %v9006_v29 = vpop.eup %9005  ;;  %9031 = vpow2.f32 %v6576_v55  ;;  %v3556_v51 = vpop.f32.mrf.mxu1 }
 0x371   : > { %v9008_v5 = vpop.eup %9007  ;;  %9033 = vrcp.f32 %v2854_v12  ;;  %vm3636_vm0 = vcmp.gt.f32.partialorder %v3562_v27, 0.0  ;;  %v3652_v8 = vmul.f32 %v10502_v34, %v3562_v27  ;;  %v3557_v20 = vadd.f32 %v10496_v15, %v3556_v51  ;;  %2898 = vrot.lane.b32.xlu1 %v9006_v29, %s9284_s21 }
 0x372   : > { %v9010_v19 = vpop.eup %9009  ;;  %v2857_v50 = vadd.f32 1.0, %v9008_v5  ;;  %9035 = vpow2.f32 %v6575_v3  ;;  %v8232_v13 = vpop.f32.mrf.mxu1  ;;  %v4306_v3 = vld [vmem:[#allocation6 + $0x1e0] sm:$0xff] }
 0x373   : > { %v9012_v43 = vpop.eup %9011  ;;  %v10507_v28 = vsel %vm3636_vm0, %v3562_v27, %v3652_v8  ;;  %vm3635_vm1 = vcmp.gt.f32.partialorder %v3557_v20, 0.0  ;;  %v3651_v53 = vmul.f32 %v10502_v34, %v3557_v20  ;;  %v3572_v38 = vadd.f32 %v10496_v15, %v8232_v13  ;;  %2896 = vrot.lane.b32.xlu0 %v9010_v19, %s9284_s21 }
 0x374   : > { %v9014_v61 = vpop.eup %9013  ;;  %9037 = vrcp.f32 %v2857_v50  ;;  %v2856_v22 = vadd.f32 1.0, %v9012_v43  ;;  %3684 = vst [vmem:[#allocation2 + $0x18] sm:$0xff] %v10507_v28  ;;  %v3566_v52 = vpop.f32.mrf.mxu1  ;;  %v4305_v50 = vld [vmem:[#allocation6 + $0x1d8] sm:$0xff] }
 0x375   : > { %v9016_v31 = vpop.eup %9015  ;;  %v10513_v46 = vsel %vm3635_vm1, %v3557_v20, %v3651_v53  ;;  %vm3638_vm2 = vcmp.gt.f32.partialorder %v3572_v38, 0.0  ;;  %v3654_v47 = vmul.f32 %v10502_v34, %v3572_v38  ;;  %v3567_v35 = vadd.f32 %v10496_v15, %v3566_v52  ;;  %2902 = vrot.lane.b32.xlu1 %v9014_v61, %s9284_s21 }
 0x376   : > { %v9018_v37 = vpop.eup %9017  ;;  %9039 = vrcp.f32 %v2856_v22  ;;  %v2859_v26 = vadd.f32 1.0, %v9016_v31  ;;  %3683 = vst [vmem:[#allocation2 + $0x10] sm:$0xff] %v10513_v46  ;;  %v8235_v45 = vpop.f32.mrf.mxu1  ;;  %8340 = vmatmul.mubr.f32.vlgmr.msra.gmra.mxu1 %v10513_v46  ;;  %v4304_v31 = vld [vmem:[#allocation6 + $0x1d0] sm:$0xff] }
 0x377   : > { %v9020_v40 = vpop.eup %9019  ;;  %v10520_v16 = vsel %vm3638_vm2, %v3572_v38, %v3654_v47  ;;  %vm3637_vm3 = vcmp.gt.f32.partialorder %v3567_v35, 0.0  ;;  %v3653_v18 = vmul.f32 %v10502_v34, %v3567_v35  ;;  %v3582_v30 = vadd.f32 %v10496_v15, %v8235_v45  ;;  %8420 = vmatpush3.msra.mxu1 %v11929_v9  ;;  %8342 = vmatprep.mubr.f32.mxu1 %v10507_v28 }
 0x378   : > { %v9022_v10 = vpop.eup %9021  ;;  %9041 = vrcp.f32 %v2859_v26  ;;  %v2858_v56 = vadd.f32 1.0, %v9020_v40  ;;  %3686 = vst [vmem:[#allocation2 + $0x28] sm:$0xff] %v10520_v16  ;;  %v3576_v2 = vpop.f32.mrf.mxu1  ;;  %8421 = vmatprep.subr.mxu1 %v4308_v42  ;;  %v4303_v40 = vld [vmem:[#allocation6 + $0x1c8] sm:$0xff] }
 0x379   : > { %v9024_v63 = vpop.eup %9023  ;;  %v10527_v4 = vsel %vm3637_vm3, %v3567_v35, %v3653_v18  ;;  %vm3640_vm4 = vcmp.gt.f32.partialorder %v3582_v30, 0.0  ;;  %v3656_v24 = vmul.f32 %v10502_v34, %v3582_v30  ;;  %v3577_v11 = vadd.f32 %v10496_v15, %v3576_v2  ;;  %2900 = vrot.lane.b32.xlu1 %v9018_v37, %s9284_s21  ;;  %2906 = vrot.lane.b32.xlu0 %v9022_v10, %s9284_s21  ;;  %v4302_v2 = vld [vmem:[#allocation6 + $0x1c0] sm:$0xff] }
 0x37a   : > { %v9026_v54 = vpop.eup %9025  ;;  %9043 = vrcp.f32 %v2858_v56  ;;  %v2861_v41 = vadd.f32 1.0, %v9024_v63  ;;  %3685 = vst [vmem:[#allocation2 + $0x20] sm:$0xff] %v10527_v4  ;;  %v8238_v48 = vpop.f32.mrf.mxu1  ;;  %8422 = vmatpush3.msra.mxu1 %v4308_v42 }
 0x37b   : > { %v9028_v55 = vpop.eup %9027  ;;  %v10534_v1 = vsel %vm3640_vm4, %v3582_v30, %v3656_v24  ;;  %vm3639_vm5 = vcmp.gt.f32.partialorder %v3577_v11, 0.0  ;;  %v3655_v0 = vmul.f32 %v10502_v34, %v3577_v11  ;;  %v3592_v12 = vadd.f32 %v10496_v15, %v8238_v48  ;;  %8343 = vmatmul.mubr.f32.gmra.mxu1 %v10527_v4  ;;  %8423 = vmatprep.subr.mxu1 %v4307_v62 }
 0x37c   : > { %v9030_v27 = vpop.eup %9029  ;;  %9045 = vrcp.f32 %v2861_v41  ;;  %v2860_v29 = vadd.f32 1.0, %v9028_v55  ;;  %3688 = vst [vmem:[#allocation2 + $0x38] sm:$0xff] %v10534_v1  ;;  %v3586_v51 = vpop.f32.mrf.mxu1  ;;  %8424 = vmatpush3.msra.mxu1 %v4307_v62  ;;  %8345 = vmatprep.mubr.f32.mxu1 %v10520_v16  ;;  %v4301_v41 = vld [vmem:[#allocation6 + $0x1b8] sm:$0xff] }
 0x37d   : > { %v9032_v5 = vpop.eup %9031  ;;  %v10541_v8 = vsel %vm3639_vm5, %v3577_v11, %v3655_v0  ;;  %vm3642_vm6 = vcmp.gt.f32.partialorder %v3592_v12, 0.0  ;;  %v3658_v20 = vmul.f32 %v10502_v34, %v3592_v12  ;;  %v3587_v19 = vadd.f32 %v10496_v15, %v3586_v51  ;;  %2904 = vrot.lane.b32.xlu1 %v9026_v54, %s9284_s21  ;;  %2910 = vrot.lane.b32.xlu0 %v9030_v27, %s9284_s21  ;;  %v4300_v27 = vld [vmem:[#allocation6 + $0x1b0] sm:$0xff] }
 0x37e   : > { %v9034_v13 = vpop.eup %9033  ;;  %9047 = vrcp.f32 %v2860_v29  ;;  %v2863_v43 = vadd.f32 1.0, %v9032_v5  ;;  %3687 = vst [vmem:[#allocation2 + $0x30] sm:$0xff] %v10541_v8  ;;  %v8241_v53 = vpop.f32.mrf.mxu1  ;;  %8425 = vmatprep.subr.mxu1 %v4306_v3 }
 0x37f   : > { %v9036_v38 = vpop.eup %9035  ;;  %v10548_v61 = vsel %vm3642_vm6, %v3592_v12, %v3658_v20  ;;  %vm3641_vm7 = vcmp.gt.f32.partialorder %v3587_v19, 0.0  ;;  %v3657_v22 = vmul.f32 %v10502_v34, %v3587_v19  ;;  %v3602_v52 = vadd.f32 %v10496_v15, %v8241_v53  ;;  %8426 = vmatpush3.msra.mxu1 %v4306_v3 }
 0x380   : > { %9049 = vrcp.f32 %v2863_v43  ;;  %v2862_v47 = vadd.f32 1.0, %v9036_v38  ;;  %3690 = vst [vmem:[#allocation2 + $0x48] sm:$0xff] %v10548_v61  ;;  %v3596_v35 = vpop.f32.mrf.mxu1  ;;  %8346 = vmatmul.mubr.f32.gmra.mxu1 %v10541_v8  ;;  %8427 = vmatprep.subr.mxu1 %v4305_v50 }
 0x381   : > { %v9038_v42 = vpop.eup %9037  ;;  %v10554_v37 = vsel %vm3641_vm7, %v3587_v19, %v3657_v22  ;;  %vm3644_vm8 = vcmp.gt.f32.partialorder %v3602_v52, 0.0  ;;  %v3660_v26 = vmul.f32 %v10502_v34, %v3602_v52  ;;  %v3597_v45 = vadd.f32 %v10496_v15, %v3596_v35  ;;  %2908 = vrot.lane.b32.xlu1 %v9034_v13, %s9284_s21  ;;  %8428 = vmatpush3.msra.mxu1 %v4305_v50  ;;  %v4299_v50 = vld [vmem:[#allocation6 + $0x1a8] sm:$0xff] }
 0x382   : > { %9051 = vrcp.f32 %v2862_v47  ;;  %3689 = vst [vmem:[#allocation2 + $0x40] sm:$0xff] %v10554_v37  ;;  %2914 = vrot.lane.b32.xlu0 %v9038_v42, %s9284_s21  ;;  %v8244_v18 = vpop.f32.mrf.mxu1  ;;  %8429 = vmatprep.subr.mxu1 %v4304_v31 }
 0x383   : > { %v9040_v30 = vpop.eup %9039  ;;  %v10561_v9 = vsel %vm3644_vm8, %v3602_v52, %v3660_v26  ;;  %vm3643_vm9 = vcmp.gt.f32.partialorder %v3597_v45, 0.0  ;;  %v3659_v10 = vmul.f32 %v10502_v34, %v3597_v45  ;;  %v3612_v56 = vadd.f32 %v10496_v15, %v8244_v18  ;;  %8348 = vmatprep.mubr.f32.mxu1 %v10534_v1  ;;  %8430 = vmatpush3.msra.mxu1 %v4304_v31  ;;  %v4298_v52 = vld [vmem:[#allocation6 + $0x1a0] sm:$0xff] }
 0x384   : > { %3692 = vst [vmem:[#allocation2 + $0x58] sm:$0xff] %v10561_v9  ;;  %v3606_v62 = vpop.f32.mrf.mxu1  ;;  %8349 = vmatmul.mubr.f32.gmra.mxu1 %v10554_v37  ;;  %8431 = vmatprep.subr.mxu1 %v4303_v40 }
 0x385   : > { %v9042_v63 = vpop.eup %9041  ;;  %v10568_v24 = vsel %vm3643_vm9, %v3597_v45, %v3659_v10  ;;  %vm3646_vm10 = vcmp.gt.f32.partialorder %v3612_v56, 0.0  ;;  %v3662_v11 = vmul.f32 %v10502_v34, %v3612_v56  ;;  %v3607_v54 = vadd.f32 %v10496_v15, %v3606_v62  ;;  %2912 = vrot.lane.b32.xlu1 %v9040_v30, %s9284_s21  ;;  %8432 = vmatpush3.msra.mxu1 %v4303_v40  ;;  %v4297_v45 = vld [vmem:[#allocation6 + $0x198] sm:$0xff]  ;;  %v4296_v10 = vld [vmem:[#allocation6 + $0x190] sm:$0xff] }
 0x386   : > { %3691 = vst [vmem:[#allocation2 + $0x50] sm:$0xff] %v10568_v24  ;;  %2918 = vrot.lane.b32.xlu0 %v9042_v63, %s9284_s21  ;;  %v8247_v48 = vpop.f32.mrf.mxu1  ;;  %8433 = vmatprep.subr.mxu1 %v4302_v2  ;;  %v10615_v62 = vld [vmem:[#allocation2 + $0x14] sm:$0xff] }
 0x387   : > { %v9044_v55 = vpop.eup %9043  ;;  %v10575_v0 = vsel %vm3646_vm10, %v3612_v56, %v3662_v11  ;;  %vm3645_vm11 = vcmp.gt.f32.partialorder %v3607_v54, 0.0  ;;  %v3661_v12 = vmul.f32 %v10502_v34, %v3607_v54  ;;  %v3622_v3 = vadd.f32 %v10496_v15, %v8247_v48  ;;  %8351 = vmatprep.mubr.f32.mxu1 %v10548_v61  ;;  %8434 = vmatpush3.msra.mxu1 %v4302_v2  ;;  %v4295_v56 = vld [vmem:[#allocation6 + $0x188] sm:$0xff]  ;;  %v4294_v2 = vld [vmem:[#allocation6 + $0x180] sm:$0xff]  ;;  %v4695_v63 = vld [vmem:[#allocation6 + $0x2f8] sm:$0xff] }
 0x388   : > { %3694 = vst [vmem:[#allocation2 + $0x68] sm:$0xff] %v10575_v0  ;;  %v3616_v29 = vpop.f32.mrf.mxu1  ;;  %8352 = vmatmul.mubr.f32.gmra.mxu1 %v10568_v24  ;;  %8435 = vmatprep.subr.mxu1 %v4301_v41  ;;  %v10617_v11 = vld [vmem:[#allocation2 + $0x1c] sm:$0xff]  ;;  %v4693_v48 = vld [vmem:[#allocation6 + $0x2e8] sm:$0xff] }
 0x389   : > { %v9046_v51 = vpop.eup %9045  ;;  %v10582_v5 = vsel %vm3645_vm11, %v3607_v54, %v3661_v12  ;;  %vm3648_vm12 = vcmp.gt.f32.partialorder %v3622_v3, 0.0  ;;  %v3664_v20 = vmul.f32 %v10502_v34, %v3622_v3  ;;  %v3617_v19 = vadd.f32 %v10496_v15, %v3616_v29  ;;  %2916 = vrot.lane.b32.xlu1 %v9044_v55, %s9284_s21  ;;  %8436 = vmatpush3.msra.mxu1 %v4301_v41  ;;  %v4694_v54 = vld [vmem:[#allocation6 + $0x2f0] sm:$0xff]  ;;  %v10621_v41 = vld [vmem:[#allocation2 + $0x24] sm:$0xff]  ;;  %v10629_v29 = vld [vmem:[#allocation2 + $0x3c] sm:$0xff] }
 0x38a   : > { %3693 = vst [vmem:[#allocation2 + $0x60] sm:$0xff] %v10582_v5  ;;  %2922 = vrot.lane.b32.xlu0 %v9046_v51, %s9284_s21  ;;  %v8250_v13 = vpop.f32.mrf.mxu1  ;;  %8437 = vmatprep.subr.mxu1 %v4300_v27  ;;  %v10623_v55 = vld [vmem:[#allocation2 + $0x2c] sm:$0xff]  ;;  %v4692_v12 = vld [vmem:[#allocation6 + $0x2e0] sm:$0xff] }
 0x38b   : > { %v9048_v43 = vpop.eup %9047  ;;  %v10589_v53 = vsel %vm3648_vm12, %v3622_v3, %v3664_v20  ;;  %vm3647_vm13 = vcmp.gt.f32.partialorder %v3617_v19, 0.0  ;;  %v3663_v38 = vmul.f32 %v10502_v34, %v3617_v19  ;;  %v3632_v22 = vadd.f32 %v10496_v15, %v8250_v13  ;;  %8354 = vmatprep.mubr.f32.mxu1 %v10561_v9  ;;  %8438 = vmatpush3.msra.mxu1 %v4300_v27  ;;  %v10627_v3 = vld [vmem:[#allocation2 + $0x34] sm:$0xff]  ;;  %v10633_v20 = vld [vmem:[#allocation2 + $0x44] sm:$0xff] }
 0x38c   : > { %3696 = vst [vmem:[#allocation2 + $0x78] sm:$0xff] %v10589_v53  ;;  %v3626_v31 = vpop.f32.mrf.mxu1  ;;  %8355 = vmatmul.mubr.f32.gmra.mxu1 %v10582_v5  ;;  %8439 = vmatprep.subr.mxu1 %v4299_v50  ;;  %v4691_v27 = vld [vmem:[#allocation6 + $0x2d8] sm:$0xff]  ;;  %v4690_v51 = vld [vmem:[#allocation6 + $0x2d0] sm:$0xff]  ;;  %v4688_v13 = vld [vmem:[#allocation6 + $0x2c0] sm:$0xff] }
 0x38d   : > { %v9050_v47 = vpop.eup %9049  ;;  %v10596_v35 = vsel %vm3647_vm13, %v3617_v19, %v3663_v38  ;;  %vm3650_vm14 = vcmp.gt.f32.partialorder %v3632_v22, 0.0  ;;  %v3666_v42 = vmul.f32 %v10502_v34, %v3632_v22  ;;  %v3627_v26 = vadd.f32 %v10496_v15, %v3626_v31  ;;  %2920 = vrot.lane.b32.xlu1 %v9048_v43, %s9284_s21  ;;  %8440 = vmatpush3.msra.mxu1 %v4299_v50  ;;  %v4689_v19 = vld [vmem:[#allocation6 + $0x2c8] sm:$0xff]  ;;  %v10639_v43 = vld [vmem:[#allocation2 + $0x54] sm:$0xff] }
 0x38e   : > { %3695 = vst [vmem:[#allocation2 + $0x70] sm:$0xff] %v10596_v35  ;;  %2926 = vrot.lane.b32.xlu0 %v9050_v47, %s9284_s21  ;;  %8441 = vmatprep.subr.mxu1 %v4298_v52  ;;  %v10635_v50 = vld [vmem:[#allocation2 + $0x4c] sm:$0xff]  ;;  %v4687_v38 = vld [vmem:[#allocation6 + $0x2b8] sm:$0xff] }
 0x38f   : > { %v9052_v40 = vpop.eup %9051  ;;  %v10603_v18 = vsel %vm3650_vm14, %v3632_v22, %v3666_v42  ;;  %vm3649_vm15 = vcmp.gt.f32.partialorder %v3627_v26, 0.0  ;;  %v3665_v30 = vmul.f32 %v10502_v34, %v3627_v26  ;;  %8357 = vmatprep.mubr.f32.mxu1 %v10575_v0  ;;  %8442 = vmatpush3.msra.mxu1 %v4298_v52  ;;  %v4278_v34 = vld [vmem:[#allocation2 + $0xc] sm:$0xff] }
 0x390   : > { %3698 = vst [vmem:[#allocation2 + $0x88] sm:$0xff] %v10603_v18  ;;  %8358 = vmatmul.mubr.f32.gmra.mxu1 %v10596_v35  ;;  %8443 = vmatprep.subr.mxu1 %v4297_v45  ;;  %v4686_v52 = vld [vmem:[#allocation6 + $0x2b0] sm:$0xff]  ;;  %v4685_v47 = vld [vmem:[#allocation6 + $0x2a8] sm:$0xff] }
 0x391   : > { %v10609_v15 = vsel %vm3649_vm15, %v3627_v26, %v3665_v30  ;;  %2924 = vrot.lane.b32.xlu1 %v9052_v40, %s9284_s21  ;;  %8444 = vmatpush3.msra.mxu1 %v4297_v45  ;;  %v10641_v22 = vld [vmem:[#allocation2 + $0x5c] sm:$0xff]  ;;  %v10645_v31 = vld [vmem:[#allocation2 + $0x64] sm:$0xff] }
 0x392   : > { %3697 = vst [vmem:[#allocation2 + $0x80] sm:$0xff] %v10609_v15  ;;  %8445 = vmatprep.subr.mxu1 %v4296_v10  ;;  %8360 = vmatprep.mubr.f32.mxu1 %v10589_v53  ;;  %v4684_v26 = vld [vmem:[#allocation6 + $0x2a0] sm:$0xff]  ;;  %v4683_v40 = vld [vmem:[#allocation6 + $0x298] sm:$0xff] }
 0x393   : > { %8446 = vmatpush3.msra.mxu1 %v4296_v10  ;;  %v4682_v10 = vld [vmem:[#allocation6 + $0x290] sm:$0xff] }
 0x394   : > { %8361 = vmatmul.mubr.f32.gmra.mxu1 %v10609_v15  ;;  %8447 = vmatprep.subr.mxu1 %v4295_v56 }
 0x395   : > { %8448 = vmatpush3.msra.mxu1 %v4295_v56  ;;  %8451 = vmatprep.mubr.f32.mxu1 %v4278_v34  ;;  %v10647_v42 = vld [vmem:[#allocation2 + $0x6c] sm:$0xff]  ;;  %v10651_v45 = vld [vmem:[#allocation2 + $0x74] sm:$0xff] }
 0x396   : > { %8449 = vmatprep.subr.mxu1 %v4294_v2  ;;  %v4681_v34 = vld [vmem:[#allocation6 + $0x288] sm:$0xff] }
 0x397   : > { %8450 = vmatpush3.msra.mxu1 %v4294_v2  ;;  %v4680_v2 = vld [vmem:[#allocation6 + $0x280] sm:$0xff] }
 0x398   : > { %8452 = vmatmul.mubr.f32.vlgmr.msra.gmra.mxu1 %v10615_v62  ;;  %8531 = vmatprep.subr.mxu1 %v4695_v63 }
 0x399   : > { %8532 = vmatpush3.msra.mxu1 %v4695_v63  ;;  %8454 = vmatprep.mubr.f32.mxu1 %v10617_v11  ;;  %v10653_v30 = vld [vmem:[#allocation2 + $0x7c] sm:$0xff]  ;;  %v10657_v56 = vld [vmem:[#allocation2 + $0x84] sm:$0xff] }
 0x39a   : > { %8533 = vmatprep.subr.mxu1 %v4694_v54  ;;  %v5081_v63 = vld [vmem:[#allocation6 + $0x3f8] sm:$0xff] }
 0x39b   : > { %8534 = vmatpush3.msra.mxu1 %v4694_v54  ;;  %v5080_v54 = vld [vmem:[#allocation6 + $0x3f0] sm:$0xff] }
 0x39c   : > { %8455 = vmatmul.mubr.f32.gmra.mxu1 %v10621_v41  ;;  %8535 = vmatprep.subr.mxu1 %v4693_v48 }
 0x39d   : > { %8536 = vmatpush3.msra.mxu1 %v4693_v48  ;;  %8457 = vmatprep.mubr.f32.mxu1 %v10623_v55  ;;  %v5079_v48 = vld [vmem:[#allocation6 + $0x3e8] sm:$0xff] }
 0x39e   : > { %8537 = vmatprep.subr.mxu1 %v4692_v12 }
 0x39f   : > { %8538 = vmatpush3.msra.mxu1 %v4692_v12  ;;  %v5078_v12 = vld [vmem:[#allocation6 + $0x3e0] sm:$0xff] }
 0x3a0   : > { %8458 = vmatmul.mubr.f32.gmra.mxu1 %v10627_v3  ;;  %8539 = vmatprep.subr.mxu1 %v4691_v27 }
 0x3a1   : > { %8540 = vmatpush3.msra.mxu1 %v4691_v27  ;;  %8460 = vmatprep.mubr.f32.mxu1 %v10629_v29  ;;  %v5076_v27 = vld [vmem:[#allocation6 + $0x3d0] sm:$0xff] }
 0x3a2   : > { %8541 = vmatprep.subr.mxu1 %v4690_v51 }
 0x3a3   : > { %8542 = vmatpush3.msra.mxu1 %v4690_v51  ;;  %v5460_v51 = vld [vmem:[#allocation6 + $0x4c0] sm:$0xff] }
 0x3a4   : > { %8461 = vmatmul.mubr.f32.gmra.mxu1 %v10633_v20  ;;  %8543 = vmatprep.subr.mxu1 %v4689_v19 }
 0x3a5   : > { %8544 = vmatpush3.msra.mxu1 %v4689_v19  ;;  %8463 = vmatprep.mubr.f32.mxu1 %v10635_v50 }
 0x3a6   : > { %8545 = vmatprep.subr.mxu1 %v4688_v13 }
 0x3a7   : > { %8546 = vmatpush3.msra.mxu1 %v4688_v13 }
 0x3a8   : > { %8464 = vmatmul.mubr.f32.gmra.mxu1 %v10639_v43  ;;  %8547 = vmatprep.subr.mxu1 %v4687_v38 }
 0x3a9   : > { %8548 = vmatpush3.msra.mxu1 %v4687_v38  ;;  %8466 = vmatprep.mubr.f32.mxu1 %v10641_v22  ;;  %v5458_v38 = vld [vmem:[#allocation6 + $0x4b0] sm:$0xff] }
 0x3aa   : > { %8549 = vmatprep.subr.mxu1 %v4686_v52 }
 0x3ab   : > { %8550 = vmatpush3.msra.mxu1 %v4686_v52 }
 0x3ac   : > { %8467 = vmatmul.mubr.f32.gmra.mxu1 %v10645_v31  ;;  %8551 = vmatprep.subr.mxu1 %v4685_v47 }
 0x3ad   : > { %8552 = vmatpush3.msra.mxu1 %v4685_v47  ;;  %8469 = vmatprep.mubr.f32.mxu1 %v10647_v42 }
 0x3ae   : > { %8553 = vmatprep.subr.mxu1 %v4684_v26 }
 0x3af   : > { %8554 = vmatpush3.msra.mxu1 %v4684_v26 }
 0x3b0   : > { %8470 = vmatmul.mubr.f32.gmra.mxu1 %v10651_v45  ;;  %8555 = vmatprep.subr.mxu1 %v4683_v40 }
 0x3b1   : > { %8556 = vmatpush3.msra.mxu1 %v4683_v40  ;;  %8472 = vmatprep.mubr.f32.mxu1 %v10653_v30 }
 0x3b2   : > { %8557 = vmatprep.subr.mxu1 %v4682_v10 }
 0x3b3   : > { %8558 = vmatpush3.msra.mxu1 %v4682_v10 }
 0x3b4   : > { %8473 = vmatmul.mubr.f32.gmra.mxu1 %v10657_v56  ;;  %8559 = vmatprep.subr.mxu1 %v4681_v34 }
 0x3b5   : > { %8560 = vmatpush3.msra.mxu1 %v4681_v34  ;;  %8563 = vmatprep.mubr.f32.mxu1 %v10513_v46  ;;  %v5077_v46 = vld [vmem:[#allocation6 + $0x3d8] sm:$0xff] }
 0x3b6   : > { %8561 = vmatprep.subr.mxu1 %v4680_v2 }
 0x3b7   : > { %8562 = vmatpush3.msra.mxu1 %v4680_v2 }
 0x3b8   : > { %8564 = vmatmul.mubr.f32.vlgmr.msra.gmra.mxu1 %v10507_v28  ;;  %8643 = vmatprep.subr.mxu1 %v5081_v63  ;;  %v5075_v28 = vld [vmem:[#allocation6 + $0x3c8] sm:$0xff] }
 0x3b9   : > { %8644 = vmatpush3.msra.mxu1 %v5081_v63  ;;  %8566 = vmatprep.mubr.f32.mxu1 %v10527_v4  ;;  %v5074_v4 = vld [vmem:[#allocation6 + $0x3c0] sm:$0xff]  ;;  %v3724_v63 = vld [vmem:[#allocation6 + $0x48] sm:$0xff] }
 0x3ba   : > { %8645 = vmatprep.subr.mxu1 %v5080_v54 }
 0x3bb   : > { %8646 = vmatpush3.msra.mxu1 %v5080_v54 }
 0x3bc   : > { %8567 = vmatmul.mubr.f32.gmra.mxu1 %v10520_v16  ;;  %8647 = vmatprep.subr.mxu1 %v5079_v48  ;;  %v5073_v16 = vld [vmem:[#allocation6 + $0x3b8] sm:$0xff] }
 0x3bd   : > { %8648 = vmatpush3.msra.mxu1 %v5079_v48  ;;  %8569 = vmatprep.mubr.f32.mxu1 %v10541_v8  ;;  %v5072_v8 = vld [vmem:[#allocation6 + $0x3b0] sm:$0xff]  ;;  %v3723_v48 = vld [vmem:[#allocation6 + $0x40] sm:$0xff] }
 0x3be   : > { %8649 = vmatprep.subr.mxu1 %v5078_v12 }
 0x3bf   : > { %8650 = vmatpush3.msra.mxu1 %v5078_v12  ;;  %v5454_v12 = vld [vmem:[#allocation6 + $0x490] sm:$0xff] }
 0x3c0   : > { %8570 = vmatmul.mubr.f32.gmra.mxu1 %v10534_v1  ;;  %8651 = vmatprep.subr.mxu1 %v5077_v46  ;;  %v5071_v1 = vld [vmem:[#allocation6 + $0x3a8] sm:$0xff] }
 0x3c1   : > { %8652 = vmatpush3.msra.mxu1 %v5077_v46  ;;  %8572 = vmatprep.mubr.f32.mxu1 %v10554_v37  ;;  %v5070_v37 = vld [vmem:[#allocation6 + $0x3a0] sm:$0xff]  ;;  %v5065_v46 = vld [vmem:[#allocation2 + $0x8c] sm:$0xff] }
 0x3c2   : > { %8653 = vmatprep.subr.mxu1 %v5076_v27 }
 0x3c3   : > { %8654 = vmatpush3.msra.mxu1 %v5076_v27 }
 0x3c4   : > { %8573 = vmatmul.mubr.f32.gmra.mxu1 %v10548_v61  ;;  %8655 = vmatprep.subr.mxu1 %v5075_v28  ;;  %v5069_v61 = vld [vmem:[#allocation6 + $0x398] sm:$0xff] }
 0x3c5   : > { %8656 = vmatpush3.msra.mxu1 %v5075_v28  ;;  %8575 = vmatprep.mubr.f32.mxu1 %v10568_v24  ;;  %v5068_v24 = vld [vmem:[#allocation6 + $0x390] sm:$0xff] }
 0x3c6   : > { %8657 = vmatprep.subr.mxu1 %v5074_v4 }
 0x3c7   : > { %8658 = vmatpush3.msra.mxu1 %v5074_v4  ;;  %v3721_v4 = vld [vmem:[#allocation6 + $0x30] sm:$0xff] }
 0x3c8   : > { %8576 = vmatmul.mubr.f32.gmra.mxu1 %v10561_v9  ;;  %8659 = vmatprep.subr.mxu1 %v5073_v16  ;;  %v5067_v9 = vld [vmem:[#allocation6 + $0x388] sm:$0xff] }
 0x3c9   : > { %8660 = vmatpush3.msra.mxu1 %v5073_v16  ;;  %8578 = vmatprep.mubr.f32.mxu1 %v10582_v5  ;;  %v5066_v5 = vld [vmem:[#allocation6 + $0x380] sm:$0xff] }
 0x3ca   : > { %8661 = vmatprep.subr.mxu1 %v5072_v8  ;;  %v5452_v16 = vld [vmem:[#allocation6 + $0x480] sm:$0xff] }
 0x3cb   : > { %8662 = vmatpush3.msra.mxu1 %v5072_v8  ;;  %v5436_v8 = vld [vmem:[#allocation2 + $0x18] sm:$0xff] }
 0x3cc   : > { %8579 = vmatmul.mubr.f32.gmra.mxu1 %v10575_v0  ;;  %8663 = vmatprep.subr.mxu1 %v5071_v1  ;;  %v5467_v0 = vld [vmem:[#allocation6 + $0x4f8] sm:$0xff] }
 0x3cd   : > { %8664 = vmatpush3.msra.mxu1 %v5071_v1  ;;  %8581 = vmatprep.mubr.f32.mxu1 %v10596_v35  ;;  %v5466_v35 = vld [vmem:[#allocation6 + $0x4f0] sm:$0xff] }
 0x3ce   : > { %8665 = vmatprep.subr.mxu1 %v5070_v37 }
 0x3cf   : > { %8666 = vmatpush3.msra.mxu1 %v5070_v37 }
 0x3d0   : > { %8582 = vmatmul.mubr.f32.gmra.mxu1 %v10589_v53  ;;  %8667 = vmatprep.subr.mxu1 %v5069_v61  ;;  %v5465_v53 = vld [vmem:[#allocation6 + $0x4e8] sm:$0xff] }
 0x3d1   : > { %8668 = vmatpush3.msra.mxu1 %v5069_v61  ;;  %8584 = vmatprep.mubr.f32.mxu1 %v10609_v15  ;;  %v5464_v15 = vld [vmem:[#allocation6 + $0x4e0] sm:$0xff] }
 0x3d2   : > { %8669 = vmatprep.subr.mxu1 %v5068_v24 }
 0x3d3   : > { %8670 = vmatpush3.msra.mxu1 %v5068_v24  ;;  %v5437_v24 = vld [vmem:[#allocation2 + $0x20] sm:$0xff] }
 0x3d4   : > { %8585 = vmatmul.mubr.f32.gmra.mxu1 %v10603_v18  ;;  %8671 = vmatprep.subr.mxu1 %v5067_v9  ;;  %v5463_v18 = vld [vmem:[#allocation6 + $0x4d8] sm:$0xff] }
 0x3d5   : > { %8672 = vmatpush3.msra.mxu1 %v5067_v9  ;;  %8675 = vmatprep.mubr.f32.mxu1 %v10615_v62  ;;  %v5462_v62 = vld [vmem:[#allocation6 + $0x4d0] sm:$0xff]  ;;  %v3719_v9 = vld [vmem:[#allocation6 + $0x20] sm:$0xff] }
 0x3d6   : > { %8673 = vmatprep.subr.mxu1 %v5066_v5 }
 0x3d7   : > { %8674 = vmatpush3.msra.mxu1 %v5066_v5 }
 0x3d8   : > { %8676 = vmatmul.mubr.f32.vlgmr.msra.gmra.mxu1 %v10617_v11  ;;  %8755 = vmatprep.subr.mxu1 %v5467_v0  ;;  %v5461_v11 = vld [vmem:[#allocation6 + $0x4c8] sm:$0xff] }
 0x3d9   : > { %8756 = vmatpush3.msra.mxu1 %v5467_v0  ;;  %8678 = vmatprep.mubr.f32.mxu1 %v10621_v41  ;;  %v5439_v0 = vld [vmem:[#allocation2 + $0x30] sm:$0xff] }
 0x3da   : > { %8757 = vmatprep.subr.mxu1 %v5466_v35 }
 0x3db   : > { %8758 = vmatpush3.msra.mxu1 %v5466_v35  ;;  %v3718_v35 = vld [vmem:[#allocation6 + $0x18] sm:$0xff] }
 0x3dc   : > { %8679 = vmatmul.mubr.f32.gmra.mxu1 %v10623_v55  ;;  %8759 = vmatprep.subr.mxu1 %v5465_v53 }
 0x3dd   : > { %8760 = vmatpush3.msra.mxu1 %v5465_v53  ;;  %8681 = vmatprep.mubr.f32.mxu1 %v10627_v3 }
 0x3de   : > { %8761 = vmatprep.subr.mxu1 %v5464_v15 }
 0x3df   : > { %8762 = vmatpush3.msra.mxu1 %v5464_v15 }
 0x3e0   : > { %8682 = vmatmul.mubr.f32.gmra.mxu1 %v10629_v29  ;;  %8763 = vmatprep.subr.mxu1 %v5463_v18  ;;  %v5459_v29 = vld [vmem:[#allocation6 + $0x4b8] sm:$0xff] }
 0x3e1   : > { %8764 = vmatpush3.msra.mxu1 %v5463_v18  ;;  %8684 = vmatprep.mubr.f32.mxu1 %v10633_v20  ;;  %v3729_v20 = vld [vmem:[#allocation6 + $0x70] sm:$0xff] }
 0x3e2   : > { %8765 = vmatprep.subr.mxu1 %v5462_v62  ;;  %v3717_v18 = vld [vmem:[#allocation6 + $0x10] sm:$0xff] }
 0x3e3   : > { %v2899_v41 = vpop.permute.xlu1 %2898  ;;  %8766 = vmatpush3.msra.mxu1 %v5462_v62  ;;  %v5441_v62 = vld [vmem:[#allocation2 + $0x40] sm:$0xff] }
 0x3e4   : > { %8685 = vmatmul.mubr.f32.gmra.mxu1 %v10635_v50  ;;  %8767 = vmatprep.subr.mxu1 %v5461_v11  ;;  %v2929_v19 = vmul.f32 %v2899_v41, %v10357_v57  ;;  %v3728_v50 = vld [vmem:[#allocation6 + $0x68] sm:$0xff]  ;;  %v3727_v57 = vld [vmem:[#allocation6 + $0x60] sm:$0xff] }
 0x3e5   : > { %v2897_v55 = vpop.permute.xlu0 %2896  ;;  %8768 = vmatpush3.msra.mxu1 %v5461_v11  ;;  %8687 = vmatprep.mubr.f32.mxu1 %v10639_v43  ;;  %v3716_v11 = vld [vmem:[#allocation6 + $0x8] sm:$0xff] }
 0x3e6   : > { %v2928_v3 = vmul.f32 %v2897_v55, %v10372_v59  ;;  %8769 = vmatprep.subr.mxu1 %v5460_v51  ;;  %v3699_v55 = vld [vmem:[#allocation2 + $0x6] sm:$0xff] }
 0x3e7   : > { %v2903_v13 = vpop.permute.xlu1 %2902  ;;  %8770 = vmatpush3.msra.mxu1 %v5460_v51  ;;  %v5442_v51 = vld [vmem:[#allocation2 + $0x48] sm:$0xff] }
 0x3e8   : > { %8171 = vmatprep.mubr.f32.mxu0 %v2928_v3  ;;  %8688 = vmatmul.mubr.f32.gmra.mxu1 %v10641_v22  ;;  %v2931_v47 = vmul.f32 %v2903_v13, %v10383_v32  ;;  %v3726_v22 = vld [vmem:[#allocation6 + $0x58] sm:$0xff]  ;;  %v3725_v32 = vld [vmem:[#allocation6 + $0x50] sm:$0xff]  ;;  %v5445_v13 = vld [vmem:[#allocation2 + $0x60] sm:$0xff] }
 0x3e9   : > { %8172 = vmatmul.mubr.f32.vlgmr.msra.gmra.mxu0 %v2929_v19  ;;  %8771 = vmatprep.subr.mxu1 %v5459_v29  ;;  %v4116_v3 = vld [vmem:[#allocation6 + $0x178] sm:$0xff]  ;;  %v10708_v19 = vld [vmem:[#allocation2 + $0xe] sm:$0xff] }
 0x3ea   : > { %8252 = vmatpush3.msra.mxu0 %v10483_v25  ;;  %8772 = vmatpush3.msra.mxu1 %v5459_v29  ;;  %v5457_v25 = vld [vmem:[#allocation6 + $0x4a8] sm:$0xff]  ;;  %v5444_v29 = vld [vmem:[#allocation2 + $0x58] sm:$0xff] }
 0x3eb   : > { %v2901_v43 = vpop.permute.xlu1 %2900  ;;  %v2907_v52 = vpop.permute.xlu0 %2906  ;;  %8253 = vmatprep.subr.mxu0 %v3729_v20  ;;  %8773 = vmatprep.subr.mxu1 %v5458_v38 }
 0x3ec   : > { %v2930_v59 = vmul.f32 %v2901_v43, %v10396_v60  ;;  %8254 = vmatpush3.msra.mxu0 %v3729_v20  ;;  %8690 = vmatprep.mubr.f32.mxu1 %v10645_v31  ;;  %v2933_v60 = vmul.f32 %v2907_v52, %v10408_v23  ;;  %v5456_v31 = vld [vmem:[#allocation6 + $0x4a0] sm:$0xff]  ;;  %v10711_v20 = vld [vmem:[#allocation2 + $0x16] sm:$0xff]  ;;  %v5446_v52 = vld [vmem:[#allocation2 + $0x68] sm:$0xff] }
 0x3ed   : > { %8255 = vmatprep.subr.mxu0 %v3728_v50  ;;  %8774 = vmatpush3.msra.mxu1 %v5458_v38  ;;  %v4114_v38 = vld [vmem:[#allocation6 + $0x168] sm:$0xff]  ;;  %v4113_v43 = vld [vmem:[#allocation6 + $0x160] sm:$0xff] }
 0x3ee   : > { %8174 = vmatprep.mubr.f32.mxu0 %v2930_v59  ;;  %8256 = vmatpush3.msra.mxu0 %v3728_v50  ;;  %v10714_v50 = vld [vmem:[#allocation2 + $0x1e] sm:$0xff]  ;;  %v10717_v59 = vld [vmem:[#allocation2 + $0x26] sm:$0xff] }
 0x3ef   : > { %8175 = vmatmul.mubr.f32.gmra.mxu0 %v2931_v47  ;;  %v2905_v26 = vpop.permute.xlu1 %2904  ;;  %v2911_v40 = vpop.permute.xlu0 %2910  ;;  %8257 = vmatprep.subr.mxu0 %v3727_v57  ;;  %v4112_v47 = vld [vmem:[#allocation6 + $0x158] sm:$0xff] }
 0x3f0   : > { %v2932_v10 = vmul.f32 %v2905_v26, %v10419_v6  ;;  %8258 = vmatpush3.msra.mxu0 %v3727_v57  ;;  %8691 = vmatmul.mubr.f32.gmra.mxu1 %v10647_v42  ;;  %v5455_v42 = vld [vmem:[#allocation6 + $0x498] sm:$0xff]  ;;  %v2935_v23 = vmul.f32 %v2911_v40, %v10431_v17  ;;  %v5453_v17 = vld [vmem:[#allocation6 + $0x488] sm:$0xff]  ;;  %v5447_v57 = vld [vmem:[#allocation2 + $0x70] sm:$0xff] }
 0x3f1   : > { %8259 = vmatprep.subr.mxu0 %v3726_v22  ;;  %8775 = vmatprep.subr.mxu1 %v5457_v25  ;;  %v5448_v26 = vld [vmem:[#allocation2 + $0x78] sm:$0xff] }
 0x3f2   : > { %8177 = vmatprep.mubr.f32.mxu0 %v2932_v10  ;;  %8260 = vmatpush3.msra.mxu0 %v3726_v22  ;;  %v10720_v22 = vld [vmem:[#allocation2 + $0x2e] sm:$0xff]  ;;  %v10723_v40 = vld [vmem:[#allocation2 + $0x36] sm:$0xff]  ;;  %v5449_v10 = vld [vmem:[#allocation2 + $0x80] sm:$0xff] }
 0x3f3   : > { %8178 = vmatmul.mubr.f32.gmra.mxu0 %v2933_v60  ;;  %v2909_v34 = vpop.permute.xlu1 %2908  ;;  %8776 = vmatpush3.msra.mxu1 %v5457_v25  ;;  %v4111_v25 = vld [vmem:[#allocation6 + $0x150] sm:$0xff]  ;;  %v4110_v60 = vld [vmem:[#allocation6 + $0x148] sm:$0xff] }
 0x3f4   : > { %v2934_v2 = vmul.f32 %v2909_v34, %v10443_v33  ;;  %8261 = vmatprep.subr.mxu0 %v3725_v32  ;;  %8777 = vmatprep.subr.mxu1 %v5456_v31  ;;  %v2915_v6 = vpop.permute.xlu0 %2914  ;;  %v5450_v34 = vld [vmem:[#allocation2 + $0x88] sm:$0xff] }
 0x3f5   : > { %8262 = vmatpush3.msra.mxu0 %v3725_v32  ;;  %8693 = vmatprep.mubr.f32.mxu1 %v10651_v45  ;;  %v3722_v45 = vld [vmem:[#allocation6 + $0x38] sm:$0xff] }
 0x3f6   : > { %8778 = vmatpush3.msra.mxu1 %v5456_v31  ;;  %8180 = vmatprep.mubr.f32.mxu0 %v2934_v2  ;;  %v10726_v32 = vld [vmem:[#allocation2 + $0x3e] sm:$0xff]  ;;  %v10729_v2 = vld [vmem:[#allocation2 + $0x46] sm:$0xff] }
 0x3f7   : > { %8263 = vmatprep.subr.mxu0 %v3724_v63  ;;  %8694 = vmatmul.mubr.f32.gmra.mxu1 %v10653_v30  ;;  %v2913_v54 = vpop.permute.xlu1 %2912  ;;  %v2937_v30 = vmul.f32 %v2915_v6, %v10451_v49  ;;  %v4109_v31 = vld [vmem:[#allocation6 + $0x140] sm:$0xff]  ;;  %v10732_v6 = vld [vmem:[#allocation2 + $0x4e] sm:$0xff] }
 0x3f8   : > { %8779 = vmatprep.subr.mxu1 %v5455_v42  ;;  %8181 = vmatmul.mubr.f32.gmra.mxu0 %v2935_v23  ;;  %v2936_v33 = vmul.f32 %v2913_v54, %v10458_v21  ;;  %v2919_v27 = vpop.permute.xlu0 %2918  ;;  %v9120_v23 = vld [vmem:[#allocation2] sm:$0xff]  ;;  %v10735_v54 = vld [vmem:[#allocation2 + $0x56] sm:$0xff] }
 0x3f9   : > { %8264 = vmatpush3.msra.mxu0 %v3724_v63  ;;  %8780 = vmatpush3.msra.mxu1 %v5455_v42  ;;  %v2939_v61 = vmul.f32 %v2919_v27, %v10463_v58  ;;  %v4108_v63 = vld [vmem:[#allocation6 + $0x138] sm:$0xff]  ;;  %v4107_v42 = vld [vmem:[#allocation6 + $0x130] sm:$0xff] }
 0x3fa   : > { %8265 = vmatprep.subr.mxu0 %v3723_v48  ;;  %8781 = vmatprep.subr.mxu1 %v5454_v12  ;;  %v10744_v27 = vld [vmem:[#allocation2 + $0x6e] sm:$0xff] }
 0x3fb   : > { %8266 = vmatpush3.msra.mxu0 %v3723_v48  ;;  %8696 = vmatprep.mubr.f32.mxu1 %v10657_v56  ;;  %v2917_v28 = vpop.permute.xlu1 %2916  ;;  %v3720_v56 = vld [vmem:[#allocation6 + $0x28] sm:$0xff] }
 0x3fc   : > { %8782 = vmatpush3.msra.mxu1 %v5454_v12  ;;  %8183 = vmatprep.mubr.f32.mxu0 %v2936_v33  ;;  %v2938_v21 = vmul.f32 %v2917_v28, %v10471_v39  ;;  %v2923_v37 = vpop.permute.xlu0 %2922  ;;  %v5438_v39 = vld [vmem:[#allocation2 + $0x28] sm:$0xff]  ;;  %v10738_v12 = vld [vmem:[#allocation2 + $0x5e] sm:$0xff]  ;;  %v10747_v28 = vld [vmem:[#allocation2 + $0x76] sm:$0xff] }
 0x3fd   : > { %8267 = vmatprep.subr.mxu0 %v3722_v45  ;;  %8697 = vmatmul.mubr.f32.gmra.mxu1 %v5065_v46  ;;  %v2941_v53 = vmul.f32 %v2923_v37, %v10478_v36  ;;  %v3715_v36 = vld [vmem:[#allocation6] sm:$0xff]  ;;  %v4106_v48 = vld [vmem:[#allocation6 + $0x128] sm:$0xff]  ;;  %v4104_v46 = vld [vmem:[#allocation6 + $0x118] sm:$0xff] }
 0x3fe   : > { %8783 = vmatprep.subr.mxu1 %v5453_v17  ;;  %8184 = vmatmul.mubr.f32.gmra.mxu0 %v2937_v30  ;;  %v4105_v33 = vld [vmem:[#allocation6 + $0x120] sm:$0xff]  ;;  %v4102_v30 = vld [vmem:[#allocation6 + $0x108] sm:$0xff] }
 0x3ff   : > { %8268 = vmatpush3.msra.mxu0 %v3722_v45  ;;  %8784 = vmatpush3.msra.mxu1 %v5453_v17  ;;  %v2921_v1 = vpop.permute.xlu1 %2920  ;;  %v10741_v45 = vld [vmem:[#allocation2 + $0x66] sm:$0xff]  ;;  %v4103_v17 = vld [vmem:[#allocation6 + $0x110] sm:$0xff]  ;;  %v10756_v37 = vld [vmem:[#allocation2 + $0x1a] sm:$0xff] }
 0x400   : > { %8787 = vmatprep.mubr.f32.mxu1 %v5436_v8  ;;  %8269 = vmatprep.subr.mxu0 %v3721_v4  ;;  %v2940_v49 = vmul.f32 %v2921_v1, %v10481_v44  ;;  %v5440_v44 = vld [vmem:[#allocation2 + $0x38] sm:$0xff]  ;;  %v2927_v15 = vpop.permute.xlu0 %2926 }
 0x401   : > { %8785 = vmatprep.subr.mxu1 %v5452_v16  ;;  %8270 = vmatpush3.msra.mxu0 %v3721_v4  ;;  %v2943_v41 = vmul.f32 %v2927_v15, %v10487_v14  ;;  %v4115_v14 = vld [vmem:[#allocation6 + $0x170] sm:$0xff]  ;;  %v10750_v4 = vld [vmem:[#allocation2 + $0x7e] sm:$0xff] }
 0x402   : > { %8786 = vmatpush3.msra.mxu1 %v5452_v16  ;;  %8186 = vmatprep.mubr.f32.mxu0 %v2938_v21  ;;  %v4101_v21 = vld [vmem:[#allocation6 + $0x100] sm:$0xff]  ;;  %v4085_v16 = vld [vmem:[#allocation2 + $0xa] sm:$0xff]  ;;  %v4502_v8 = vld [vmem:[#allocation6 + $0x278] sm:$0xff] }
 0x403   : > { %8271 = vmatprep.subr.mxu0 %v3720_v56  ;;  %8788 = vmatmul.mubr.f32.vlgmr.msra.gmra.mxu1 %v5437_v24  ;;  %v2925_v5 = vpop.permute.xlu1 %2924  ;;  %v10753_v1 = vld [vmem:[#allocation2 + $0x12] sm:$0xff]  ;;  %v4499_v24 = vld [vmem:[#allocation6 + $0x260] sm:$0xff]  ;;  %v10774_v15 = vld [vmem:[#allocation2 + $0x4a] sm:$0xff] }
 0x404   : > { %8187 = vmatmul.mubr.f32.gmra.mxu0 %v2939_v61  ;;  %8790 = vmatprep.mubr.f32.mxu1 %v5438_v39  ;;  %v2942_v58 = vmul.f32 %v2925_v5, %v10490_v7  ;;  %v5443_v7 = vld [vmem:[#allocation2 + $0x50] sm:$0xff]  ;;  %v10759_v61 = vld [vmem:[#allocation2 + $0x22] sm:$0xff] }
 0x405   : > { %8272 = vmatpush3.msra.mxu0 %v3720_v56  ;;  %8189 = vmatprep.mubr.f32.mxu0 %v2940_v49  ;;  %v4501_v56 = vld [vmem:[#allocation6 + $0x270] sm:$0xff]  ;;  %v4500_v49 = vld [vmem:[#allocation6 + $0x268] sm:$0xff] }
 0x406   : > { %8273 = vmatprep.subr.mxu0 %v3719_v9  ;;  %v10762_v39 = vld [vmem:[#allocation2 + $0x2a] sm:$0xff]  ;;  %v10765_v5 = vld [vmem:[#allocation2 + $0x32] sm:$0xff] }
 0x407   : > { %8274 = vmatpush3.msra.mxu0 %v3719_v9  ;;  %8791 = vmatmul.mubr.f32.gmra.mxu1 %v5439_v0  ;;  %v4498_v9 = vld [vmem:[#allocation6 + $0x258] sm:$0xff]  ;;  %v4497_v0 = vld [vmem:[#allocation6 + $0x250] sm:$0xff] }
 0x408   : > { %8275 = vmatprep.subr.mxu0 %v3718_v35  ;;  %8190 = vmatmul.mubr.f32.gmra.mxu0 %v2941_v53  ;;  %v4496_v53 = vld [vmem:[#allocation6 + $0x248] sm:$0xff] }
 0x409   : > { %8276 = vmatpush3.msra.mxu0 %v3718_v35  ;;  %8793 = vmatprep.mubr.f32.mxu1 %v5440_v44  ;;  %v10768_v35 = vld [vmem:[#allocation2 + $0x3a] sm:$0xff]  ;;  %v10771_v44 = vld [vmem:[#allocation2 + $0x42] sm:$0xff] }
 0x40a   : > { %8277 = vmatprep.subr.mxu0 %v3717_v18  ;;  %8192 = vmatprep.mubr.f32.mxu0 %v2942_v58  ;;  %v4495_v58 = vld [vmem:[#allocation6 + $0x240] sm:$0xff] }
 0x40b   : > { %8278 = vmatpush3.msra.mxu0 %v3717_v18  ;;  %8794 = vmatmul.mubr.f32.gmra.mxu1 %v5441_v62  ;;  %v4494_v18 = vld [vmem:[#allocation6 + $0x238] sm:$0xff] }
 0x40c   : > { %8279 = vmatprep.subr.mxu0 %v3716_v11  ;;  %8193 = vmatmul.mubr.f32.gmra.mxu0 %v2943_v41  ;;  %v10777_v62 = vld [vmem:[#allocation2 + $0x52] sm:$0xff]  ;;  %v10780_v41 = vld [vmem:[#allocation2 + $0x5a] sm:$0xff] }
 0x40d   : > { %8280 = vmatpush3.msra.mxu0 %v3716_v11  ;;  %8796 = vmatprep.mubr.f32.mxu1 %v5442_v51  ;;  %v4493_v11 = vld [vmem:[#allocation6 + $0x230] sm:$0xff]  ;;  %v4492_v51 = vld [vmem:[#allocation6 + $0x228] sm:$0xff] }
 0x40e   : > { %8281 = vmatprep.subr.mxu0 %v3715_v36  ;;  %8283 = vmatprep.mubr.f32.mxu0 %v3699_v55  ;;  %v4491_v55 = vld [vmem:[#allocation6 + $0x220] sm:$0xff] }
 0x40f   : > { %8282 = vmatpush3.msra.mxu0 %v3715_v36  ;;  %8797 = vmatmul.mubr.f32.gmra.mxu1 %v5443_v7  ;;  %v10783_v36 = vld [vmem:[#allocation2 + $0x62] sm:$0xff]  ;;  %v10786_v7 = vld [vmem:[#allocation2 + $0x6a] sm:$0xff] }
 0x410   : > { %8363 = vmatprep.subr.mxu0 %v4116_v3  ;;  %8284 = vmatmul.mubr.f32.vlgmr.msra.gmra.mxu0 %v10708_v19 }
 0x411   : > { %8364 = vmatpush3.msra.mxu0 %v4116_v3  ;;  %8799 = vmatprep.mubr.f32.mxu1 %v5444_v29  ;;  %v4490_v3 = vld [vmem:[#allocation6 + $0x218] sm:$0xff] }
 0x412   : > { %8286 = vmatprep.mubr.f32.mxu0 %v10711_v20  ;;  %8365 = vmatprep.subr.mxu0 %v4115_v14  ;;  %v10789_v29 = vld [vmem:[#allocation2 + $0x72] sm:$0xff] }
 0x413   : > { %8366 = vmatpush3.msra.mxu0 %v4115_v14  ;;  %8800 = vmatmul.mubr.f32.gmra.mxu1 %v5445_v13  ;;  %v4489_v14 = vld [vmem:[#allocation6 + $0x210] sm:$0xff]  ;;  %v10792_v13 = vld [vmem:[#allocation2 + $0x7a] sm:$0xff] }
 0x414   : > { %8367 = vmatprep.subr.mxu0 %v4114_v38  ;;  %8287 = vmatmul.mubr.f32.gmra.mxu0 %v10714_v50 }
 0x415   : > { %8368 = vmatpush3.msra.mxu0 %v4114_v38  ;;  %8289 = vmatprep.mubr.f32.mxu0 %v10717_v59  ;;  %v4488_v38 = vld [vmem:[#allocation6 + $0x208] sm:$0xff] }
 0x416   : > { %8369 = vmatprep.subr.mxu0 %v4113_v43  ;;  %8802 = vmatprep.mubr.f32.mxu1 %v5446_v52  ;;  %v4487_v52 = vld [vmem:[#allocation6 + $0x200] sm:$0xff] }
 0x417   : > { %8370 = vmatpush3.msra.mxu0 %v4113_v43  ;;  %8803 = vmatmul.mubr.f32.gmra.mxu1 %v5447_v57  ;;  %v10795_v43 = vld [vmem:[#allocation2 + $0x82] sm:$0xff]  ;;  %v4888_v57 = vld [vmem:[#allocation6 + $0x378] sm:$0xff] }
 0x418   : > { %8371 = vmatprep.subr.mxu0 %v4112_v47  ;;  %8290 = vmatmul.mubr.f32.gmra.mxu0 %v10720_v22 }
 0x419   : > { %8372 = vmatpush3.msra.mxu0 %v4112_v47  ;;  %8292 = vmatprep.mubr.f32.mxu0 %v10723_v40  ;;  %v4887_v47 = vld [vmem:[#allocation6 + $0x370] sm:$0xff] }
 0x41a   : > { %8373 = vmatprep.subr.mxu0 %v4111_v25  ;;  %8805 = vmatprep.mubr.f32.mxu1 %v5448_v26  ;;  %v4885_v26 = vld [vmem:[#allocation6 + $0x360] sm:$0xff] }
 0x41b   : > { %8374 = vmatpush3.msra.mxu0 %v4111_v25  ;;  %8806 = vmatmul.mubr.f32.gmra.mxu1 %v5449_v10  ;;  %v4886_v25 = vld [vmem:[#allocation6 + $0x368] sm:$0xff]  ;;  %v4883_v10 = vld [vmem:[#allocation6 + $0x350] sm:$0xff] }
 0x41c   : > { %8375 = vmatprep.subr.mxu0 %v4110_v60  ;;  %8293 = vmatmul.mubr.f32.gmra.mxu0 %v10726_v32 }
 0x41d   : > { %8376 = vmatpush3.msra.mxu0 %v4110_v60  ;;  %8295 = vmatprep.mubr.f32.mxu0 %v10729_v2  ;;  %v4882_v60 = vld [vmem:[#allocation6 + $0x348] sm:$0xff] }
 0x41e   : > { %8377 = vmatprep.subr.mxu0 %v4109_v31  ;;  %8808 = vmatprep.mubr.f32.mxu1 %v5450_v34  ;;  %v4880_v34 = vld [vmem:[#allocation6 + $0x338] sm:$0xff] }
 0x41f   : > { %8378 = vmatpush3.msra.mxu0 %v4109_v31  ;;  %8809 = vmatmul.mubr.f32.gmra.mxu1 %v9120_v23  ;;  %v4881_v31 = vld [vmem:[#allocation6 + $0x340] sm:$0xff] }
 0x420   : > { %8379 = vmatprep.subr.mxu0 %v4108_v63  ;;  %8296 = vmatmul.mubr.f32.gmra.mxu0 %v10732_v6  ;;  %v4877_v23 = vld [vmem:[#allocation6 + $0x320] sm:$0xff] }
 0x421   : > { %8380 = vmatpush3.msra.mxu0 %v4108_v63  ;;  %8298 = vmatprep.mubr.f32.mxu0 %v10735_v54  ;;  %v4879_v63 = vld [vmem:[#allocation6 + $0x330] sm:$0xff] }
 0x422   : > { %8381 = vmatprep.subr.mxu0 %v4107_v42 }
 0x423   : > { %8382 = vmatpush3.msra.mxu0 %v4107_v42  ;;  %v4878_v42 = vld [vmem:[#allocation6 + $0x328] sm:$0xff] }
 0x424   : > { %8383 = vmatprep.subr.mxu0 %v4106_v48  ;;  %8299 = vmatmul.mubr.f32.gmra.mxu0 %v10738_v12 }
 0x425   : > { %8384 = vmatpush3.msra.mxu0 %v4106_v48  ;;  %8301 = vmatprep.mubr.f32.mxu0 %v10741_v45  ;;  %v4876_v48 = vld [vmem:[#allocation6 + $0x318] sm:$0xff] }
 0x426   : > { %8385 = vmatprep.subr.mxu0 %v4105_v33 }
 0x427   : > { %8386 = vmatpush3.msra.mxu0 %v4105_v33 }
 0x428   : > { %8387 = vmatprep.subr.mxu0 %v4104_v46  ;;  %8302 = vmatmul.mubr.f32.gmra.mxu0 %v10744_v27 }
 0x429   : > { %8388 = vmatpush3.msra.mxu0 %v4104_v46  ;;  %8304 = vmatprep.mubr.f32.mxu0 %v10747_v28  ;;  %v4875_v46 = vld [vmem:[#allocation6 + $0x310] sm:$0xff] }
 0x42a   : > { %8389 = vmatprep.subr.mxu0 %v4103_v17 }
 0x42b   : > { %8390 = vmatpush3.msra.mxu0 %v4103_v17  ;;  %v4874_v17 = vld [vmem:[#allocation6 + $0x308] sm:$0xff] }
 0x42c   : > { %8391 = vmatprep.subr.mxu0 %v4102_v30  ;;  %8305 = vmatmul.mubr.f32.gmra.mxu0 %v10750_v4 }
 0x42d   : > { %8392 = vmatpush3.msra.mxu0 %v4102_v30  ;;  %8395 = vmatprep.mubr.f32.mxu0 %v4085_v16  ;;  %v4873_v16 = vld [vmem:[#allocation6 + $0x300] sm:$0xff] }
 0x42e   : > { %8393 = vmatprep.subr.mxu0 %v4101_v21 }
 0x42f   : > { %8394 = vmatpush3.msra.mxu0 %v4101_v21  ;;  %v10817_v21 = vld [vmem:[#allocation2 + $0x86] sm:$0xff] }
 0x430   : > { %8475 = vmatprep.subr.mxu0 %v4502_v8  ;;  %8396 = vmatmul.mubr.f32.vlgmr.msra.gmra.mxu0 %v10753_v1 }
 0x431   : > { %8476 = vmatpush3.msra.mxu0 %v4502_v8  ;;  %8398 = vmatprep.mubr.f32.mxu0 %v10756_v37  ;;  %v5274_v8 = vld [vmem:[#allocation6 + $0x478] sm:$0xff] }
 0x432   : > { %8477 = vmatprep.subr.mxu0 %v4501_v56 }
 0x433   : > { %8478 = vmatpush3.msra.mxu0 %v4501_v56 }
 0x434   : > { %8479 = vmatprep.subr.mxu0 %v4500_v49  ;;  %8399 = vmatmul.mubr.f32.gmra.mxu0 %v10759_v61 }
 0x435   : > { %8480 = vmatpush3.msra.mxu0 %v4500_v49  ;;  %8401 = vmatprep.mubr.f32.mxu0 %v10762_v39  ;;  %v5273_v49 = vld [vmem:[#allocation6 + $0x470] sm:$0xff] }
 0x436   : > { %8481 = vmatprep.subr.mxu0 %v4499_v24  ;;  %v10811_v33 = vpop.f32.mrf.mxu1 }
 0x437   : > { %8482 = vmatpush3.msra.mxu0 %v4499_v24  ;;  %v5272_v24 = vld [vmem:[#allocation6 + $0x468] sm:$0xff] }
 0x438   : > { %8483 = vmatprep.subr.mxu0 %v4498_v9  ;;  %8402 = vmatmul.mubr.f32.gmra.mxu0 %v10765_v5  ;;  %v10815_v30 = vpop.f32.mrf.mxu1 }
 0x439   : > { %8484 = vmatpush3.msra.mxu0 %v4498_v9  ;;  %8404 = vmatprep.mubr.f32.mxu0 %v10768_v35 }
 0x43a   : > { %8485 = vmatprep.subr.mxu0 %v4497_v0 }
 0x43b   : > { %8486 = vmatpush3.msra.mxu0 %v4497_v0  ;;  %v10821_v56 = vpop.f32.mrf.mxu1  ;;  %v5271_v0 = vld [vmem:[#allocation6 + $0x460] sm:$0xff] }
 0x43c   : > { %8487 = vmatprep.subr.mxu0 %v4496_v53  ;;  %8405 = vmatmul.mubr.f32.gmra.mxu0 %v10771_v44 }
 0x43d   : > { %8488 = vmatpush3.msra.mxu0 %v4496_v53  ;;  %8407 = vmatprep.mubr.f32.mxu0 %v10774_v15  ;;  %v10825_v9 = vpop.f32.mrf.mxu1 }
 0x43e   : > { %8489 = vmatprep.subr.mxu0 %v4495_v58 }
 0x43f   : > { %8490 = vmatpush3.msra.mxu0 %v4495_v58  ;;  %v5269_v58 = vld [vmem:[#allocation6 + $0x450] sm:$0xff] }
 0x440   : > { %8491 = vmatprep.subr.mxu0 %v4494_v18  ;;  %8408 = vmatmul.mubr.f32.gmra.mxu0 %v10777_v62  ;;  %v10829_v53 = vpop.f32.mrf.mxu1 }
 0x441   : > { %8492 = vmatpush3.msra.mxu0 %v4494_v18  ;;  %8410 = vmatprep.mubr.f32.mxu0 %v10780_v41  ;;  %v5268_v18 = vld [vmem:[#allocation6 + $0x448] sm:$0xff] }
 0x442   : > { %8493 = vmatprep.subr.mxu0 %v4493_v11 }
 0x443   : > { %8494 = vmatpush3.msra.mxu0 %v4493_v11  ;;  %v10833_v11 = vpop.f32.mrf.mxu1 }
 0x444   : > { %8495 = vmatprep.subr.mxu0 %v4492_v51  ;;  %8411 = vmatmul.mubr.f32.gmra.mxu0 %v10783_v36 }
 0x445   : > { %8496 = vmatpush3.msra.mxu0 %v4492_v51  ;;  %8413 = vmatprep.mubr.f32.mxu0 %v10786_v7  ;;  %v5267_v51 = vld [vmem:[#allocation6 + $0x440] sm:$0xff] }
 0x446   : > { %8497 = vmatprep.subr.mxu0 %v4491_v55 }
 0x447   : > { %8498 = vmatpush3.msra.mxu0 %v4491_v55  ;;  %v5266_v55 = vld [vmem:[#allocation6 + $0x438] sm:$0xff] }
 0x448   : > { %8499 = vmatprep.subr.mxu0 %v4490_v3  ;;  %8414 = vmatmul.mubr.f32.gmra.mxu0 %v10789_v29 }
 0x449   : > { %8500 = vmatpush3.msra.mxu0 %v4490_v3  ;;  %8416 = vmatprep.mubr.f32.mxu0 %v10792_v13  ;;  %v10837_v3 = vpop.f32.mrf.mxu1 }
 0x44a   : > { %8501 = vmatprep.subr.mxu0 %v4489_v14 }
 0x44b   : > { %8502 = vmatpush3.msra.mxu0 %v4489_v14  ;;  %v5265_v14 = vld [vmem:[#allocation6 + $0x430] sm:$0xff] }
 0x44c   : > { %8503 = vmatprep.subr.mxu0 %v4488_v38  ;;  %8417 = vmatmul.mubr.f32.gmra.mxu0 %v10795_v43 }
 0x44d   : > { %8504 = vmatpush3.msra.mxu0 %v4488_v38  ;;  %8507 = vmatprep.mubr.f32.mxu0 %v10708_v19  ;;  %v4884_v19 = vld [vmem:[#allocation6 + $0x358] sm:$0xff]  ;;  %v5264_v38 = vld [vmem:[#allocation6 + $0x428] sm:$0xff] }
 0x44e   : > { %8505 = vmatprep.subr.mxu0 %v4487_v52 }
 0x44f   : > { %8506 = vmatpush3.msra.mxu0 %v4487_v52  ;;  %v10841_v52 = vpop.f32.mrf.mxu1 }
 0x450   : > { %8587 = vmatprep.subr.mxu0 %v4888_v57  ;;  %8508 = vmatmul.mubr.f32.vlgmr.msra.gmra.mxu0 %v10711_v20 }
 0x451   : > { %8588 = vmatpush3.msra.mxu0 %v4888_v57  ;;  %8510 = vmatprep.mubr.f32.mxu0 %v10714_v50  ;;  %v5263_v57 = vld [vmem:[#allocation6 + $0x420] sm:$0xff] }
 0x452   : > { %8589 = vmatprep.subr.mxu0 %v4887_v47 }
 0x453   : > { %8590 = vmatpush3.msra.mxu0 %v4887_v47  ;;  %v5262_v47 = vld [vmem:[#allocation6 + $0x418] sm:$0xff] }
 0x454   : > { %8591 = vmatprep.subr.mxu0 %v4886_v25  ;;  %8511 = vmatmul.mubr.f32.gmra.mxu0 %v10717_v59 }
 0x455   : > { %8592 = vmatpush3.msra.mxu0 %v4886_v25  ;;  %8513 = vmatprep.mubr.f32.mxu0 %v10720_v22  ;;  %v10845_v25 = vpop.f32.mrf.mxu1 }
 0x456   : > { %8593 = vmatprep.subr.mxu0 %v4885_v26 }
 0x457   : > { %8594 = vmatpush3.msra.mxu0 %v4885_v26  ;;  %v5261_v26 = vld [vmem:[#allocation6 + $0x410] sm:$0xff] }
 0x458   : > { %8595 = vmatprep.subr.mxu0 %v4884_v19  ;;  %8514 = vmatmul.mubr.f32.gmra.mxu0 %v10723_v40 }
 0x459   : > { %8596 = vmatpush3.msra.mxu0 %v4884_v19  ;;  %8516 = vmatprep.mubr.f32.mxu0 %v10726_v32  ;;  %v5260_v19 = vld [vmem:[#allocation6 + $0x408] sm:$0xff] }
 0x45a   : > { %8597 = vmatprep.subr.mxu0 %v4883_v10 }
 0x45b   : > { %8598 = vmatpush3.msra.mxu0 %v4883_v10  ;;  %v10849_v10 = vpop.f32.mrf.mxu1 }
 0x45c   : > { %8599 = vmatprep.subr.mxu0 %v4882_v60  ;;  %8517 = vmatmul.mubr.f32.gmra.mxu0 %v10729_v2 }
 0x45d   : > { %8600 = vmatpush3.msra.mxu0 %v4882_v60  ;;  %8519 = vmatprep.mubr.f32.mxu0 %v10732_v6  ;;  %v10851_v60 = vld [vmem:[#allocation2 + $0x8a] sm:$0xff] }
 0x45e   : > { %8601 = vmatprep.subr.mxu0 %v4881_v31 }
 0x45f   : > { %8602 = vmatpush3.msra.mxu0 %v4881_v31  ;;  %v5259_v31 = vld [vmem:[#allocation6 + $0x400] sm:$0xff] }
 0x460   : > { %8603 = vmatprep.subr.mxu0 %v4880_v34  ;;  %8520 = vmatmul.mubr.f32.gmra.mxu0 %v10735_v54 }
 0x461   : > { %8604 = vmatpush3.msra.mxu0 %v4880_v34  ;;  %8522 = vmatprep.mubr.f32.mxu0 %v10738_v12  ;;  %v5660_v34 = vld [vmem:[#allocation6 + $0x578] sm:$0xff] }
 0x462   : > { %8605 = vmatprep.subr.mxu0 %v4879_v63 }
 0x463   : > { %8606 = vmatpush3.msra.mxu0 %v4879_v63  ;;  %v10855_v63 = vpop.f32.mrf.mxu1 }
 0x464   : > { %8607 = vmatprep.subr.mxu0 %v4878_v42  ;;  %8523 = vmatmul.mubr.f32.gmra.mxu0 %v10741_v45 }
 0x465   : > { %8608 = vmatpush3.msra.mxu0 %v4878_v42  ;;  %8525 = vmatprep.mubr.f32.mxu0 %v10744_v27  ;;  %v5659_v42 = vld [vmem:[#allocation6 + $0x570] sm:$0xff] }
 0x466   : > { %8609 = vmatprep.subr.mxu0 %v4877_v23 }
 0x467   : > { %8610 = vmatpush3.msra.mxu0 %v4877_v23  ;;  %v5658_v23 = vld [vmem:[#allocation6 + $0x568] sm:$0xff] }
 0x468   : > { %8611 = vmatprep.subr.mxu0 %v4876_v48  ;;  %8526 = vmatmul.mubr.f32.gmra.mxu0 %v10747_v28 }
 0x469   : > { %8612 = vmatpush3.msra.mxu0 %v4876_v48  ;;  %8528 = vmatprep.mubr.f32.mxu0 %v10750_v4  ;;  %v10859_v48 = vpop.f32.mrf.mxu1 }
 0x46a   : > { %8613 = vmatprep.subr.mxu0 %v4875_v46 }
 0x46b   : > { %8614 = vmatpush3.msra.mxu0 %v4875_v46  ;;  %v5657_v46 = vld [vmem:[#allocation6 + $0x560] sm:$0xff] }
 0x46c   : > { %8615 = vmatprep.subr.mxu0 %v4874_v17  ;;  %8529 = vmatmul.mubr.f32.gmra.mxu0 %v10817_v21 }
 0x46d   : > { %8616 = vmatpush3.msra.mxu0 %v4874_v17  ;;  %8619 = vmatprep.mubr.f32.mxu0 %v10753_v1  ;;  %v5270_v1 = vld [vmem:[#allocation6 + $0x458] sm:$0xff]  ;;  %v10863_v17 = vpop.f32.mrf.mxu1 }
 0x46e   : > { %8617 = vmatprep.subr.mxu0 %v4873_v16 }
 0x46f   : > { %8618 = vmatpush3.msra.mxu0 %v4873_v16  ;;  %v10867_v16 = vpop.f32.mrf.mxu1 }
 0x470   : > { %8699 = vmatprep.subr.mxu0 %v5274_v8  ;;  %8620 = vmatmul.mubr.f32.vlgmr.msra.gmra.mxu0 %v10756_v37 }
 0x471   : > { %8700 = vmatpush3.msra.mxu0 %v5274_v8  ;;  %8622 = vmatprep.mubr.f32.mxu0 %v10759_v61  ;;  %v10871_v8 = vpop.f32.mrf.mxu1 }
 0x472   : > { %8701 = vmatprep.subr.mxu0 %v5273_v49 }
 0x473   : > { %8702 = vmatpush3.msra.mxu0 %v5273_v49  ;;  %v10875_v49 = vpop.f32.mrf.mxu1 }
 0x474   : > { %8703 = vmatprep.subr.mxu0 %v5272_v24  ;;  %8623 = vmatmul.mubr.f32.gmra.mxu0 %v10762_v39 }
 0x475   : > { %8704 = vmatpush3.msra.mxu0 %v5272_v24  ;;  %8625 = vmatprep.mubr.f32.mxu0 %v10765_v5  ;;  %v10879_v24 = vpop.f32.mrf.mxu1 }
 0x476   : > { %8705 = vmatprep.subr.mxu0 %v5271_v0 }
 0x477   : > { %8706 = vmatpush3.msra.mxu0 %v5271_v0 }
 0x478   : > { %8707 = vmatprep.subr.mxu0 %v5270_v1  ;;  %8626 = vmatmul.mubr.f32.gmra.mxu0 %v10768_v35 }
 0x479   : > { %8708 = vmatpush3.msra.mxu0 %v5270_v1  ;;  %8628 = vmatprep.mubr.f32.mxu0 %v10771_v44  ;;  %v10883_v1 = vpop.f32.mrf.mxu1 }
 0x47a   : > { %8709 = vmatprep.subr.mxu0 %v5269_v58 }
 0x47b   : > { %8710 = vmatpush3.msra.mxu0 %v5269_v58 }
 0x47c   : > { %8711 = vmatprep.subr.mxu0 %v5268_v18  ;;  %8629 = vmatmul.mubr.f32.gmra.mxu0 %v10774_v15 }
 0x47d   : > { %8712 = vmatpush3.msra.mxu0 %v5268_v18  ;;  %8631 = vmatprep.mubr.f32.mxu0 %v10777_v62 }
 0x47e   : > { %8713 = vmatprep.subr.mxu0 %v5267_v51 }
 0x47f   : > { %8714 = vmatpush3.msra.mxu0 %v5267_v51 }
 0x480   : > { %8715 = vmatprep.subr.mxu0 %v5266_v55  ;;  %8632 = vmatmul.mubr.f32.gmra.mxu0 %v10780_v41 }
 0x481   : > { %8716 = vmatpush3.msra.mxu0 %v5266_v55  ;;  %8634 = vmatprep.mubr.f32.mxu0 %v10783_v36 }
 0x482   : > { %8717 = vmatprep.subr.mxu0 %v5265_v14 }
 0x483   : > { %8718 = vmatpush3.msra.mxu0 %v5265_v14 }
 0x484   : > { %8719 = vmatprep.subr.mxu0 %v5264_v38  ;;  %8635 = vmatmul.mubr.f32.gmra.mxu0 %v10786_v7 }
 0x485   : > { %8720 = vmatpush3.msra.mxu0 %v5264_v38  ;;  %8637 = vmatprep.mubr.f32.mxu0 %v10789_v29 }
 0x486   : > { %8721 = vmatprep.subr.mxu0 %v5263_v57 }
 0x487   : > { %8722 = vmatpush3.msra.mxu0 %v5263_v57 }
 0x488   : > { %8723 = vmatprep.subr.mxu0 %v5262_v47  ;;  %8638 = vmatmul.mubr.f32.gmra.mxu0 %v10792_v13 }
 0x489   : > { %8724 = vmatpush3.msra.mxu0 %v5262_v47  ;;  %8640 = vmatprep.mubr.f32.mxu0 %v10795_v43 }
 0x48a   : > { %8725 = vmatprep.subr.mxu0 %v5261_v26 }
 0x48b   : > { %8726 = vmatpush3.msra.mxu0 %v5261_v26 }
 0x48c   : > { %8727 = vmatprep.subr.mxu0 %v5260_v19  ;;  %8641 = vmatmul.mubr.f32.gmra.mxu0 %v10851_v60 }
 0x48d   : > { %8728 = vmatpush3.msra.mxu0 %v5260_v19  ;;  %8731 = vmatprep.mubr.f32.mxu0 %v10711_v20  ;;  %v5656_v20 = vld [vmem:[#allocation6 + $0x558] sm:$0xff] }
 0x48e   : > { %8729 = vmatprep.subr.mxu0 %v5259_v31 }
 0x48f   : > { %8730 = vmatpush3.msra.mxu0 %v5259_v31 }
 0x490   : > { %8811 = vmatprep.subr.mxu0 %v5660_v34  ;;  %8732 = vmatmul.mubr.f32.vlgmr.msra.gmra.mxu0 %v10714_v50  ;;  %v5655_v50 = vld [vmem:[#allocation6 + $0x550] sm:$0xff] }
 0x491   : > { %8812 = vmatpush3.msra.mxu0 %v5660_v34  ;;  %8734 = vmatprep.mubr.f32.mxu0 %v10717_v59  ;;  %v5654_v59 = vld [vmem:[#allocation6 + $0x548] sm:$0xff] }
 0x492   : > { %8813 = vmatprep.subr.mxu0 %v5659_v42 }
 0x493   : > { %8814 = vmatpush3.msra.mxu0 %v5659_v42 }
 0x494   : > { %8815 = vmatprep.subr.mxu0 %v5658_v23  ;;  %8735 = vmatmul.mubr.f32.gmra.mxu0 %v10720_v22  ;;  %v5653_v22 = vld [vmem:[#allocation6 + $0x540] sm:$0xff] }
 0x495   : > { %8816 = vmatpush3.msra.mxu0 %v5658_v23  ;;  %8737 = vmatprep.mubr.f32.mxu0 %v10723_v40  ;;  %v5652_v40 = vld [vmem:[#allocation6 + $0x538] sm:$0xff] }
 0x496   : > { %8817 = vmatprep.subr.mxu0 %v5657_v46 }
 0x497   : > { %8818 = vmatpush3.msra.mxu0 %v5657_v46  ;;  %v11782_v46 = vmov 0  }
 0x498   : > { %8819 = vmatprep.subr.mxu0 %v5656_v20  ;;  %8738 = vmatmul.mubr.f32.gmra.mxu0 %v10726_v32  ;;  %v5651_v32 = vld [vmem:[#allocation6 + $0x530] sm:$0xff] }
 0x499   : > { %8820 = vmatpush3.msra.mxu0 %v5656_v20  ;;  %8740 = vmatprep.mubr.f32.mxu0 %v10729_v2  ;;  %v5650_v2 = vld [vmem:[#allocation6 + $0x528] sm:$0xff] }
 0x49a   : > { %8821 = vmatprep.subr.mxu0 %v5655_v50  ;;  %8987 = vset.pattern.permute.xlu0 %v11782_v46 }
 0x49b   : > { %8822 = vmatpush3.msra.mxu0 %v5655_v50 }
 0x49c   : > { %8823 = vmatprep.subr.mxu0 %v5654_v59  ;;  %8741 = vmatmul.mubr.f32.gmra.mxu0 %v10732_v6  ;;  %v5649_v6 = vld [vmem:[#allocation6 + $0x520] sm:$0xff] }
 0x49d   : > { %8824 = vmatpush3.msra.mxu0 %v5654_v59  ;;  %8743 = vmatprep.mubr.f32.mxu0 %v10735_v54  ;;  %v5648_v54 = vld [vmem:[#allocation6 + $0x518] sm:$0xff]  ;;  %v10932_v59 = vld [vmem:[%s11764_s7 + $0x8] sm:$0xff] }
 0x49e   : > { %8825 = vmatprep.subr.mxu0 %v5653_v22  ;;  %11931 = vst [vmem:[#allocation17_spill] sm:$0xff] %v10932_v59 }
 0x49f   : > { %8826 = vmatpush3.msra.mxu0 %v5653_v22 }
 0x4a0   : > { %8827 = vmatprep.subr.mxu0 %v5652_v40  ;;  %8744 = vmatmul.mubr.f32.gmra.mxu0 %v10738_v12  ;;  %v5647_v12 = vld [vmem:[#allocation6 + $0x510] sm:$0xff] }
 0x4a1   : > { %8828 = vmatpush3.msra.mxu0 %v5652_v40  ;;  %8746 = vmatprep.mubr.f32.mxu0 %v10741_v45  ;;  %v5646_v45 = vld [vmem:[#allocation6 + $0x508] sm:$0xff] }
 0x4a2   : > { %8829 = vmatprep.subr.mxu0 %v5651_v32 }
 0x4a3   : > { %8830 = vmatpush3.msra.mxu0 %v5651_v32 }
 0x4a4   : > { %8831 = vmatprep.subr.mxu0 %v5650_v2  ;;  %8747 = vmatmul.mubr.f32.gmra.mxu0 %v10744_v27  ;;  %v5258_v27 = vld [vmem:[#allocation2 + $0x8e] sm:$0xff] }
 0x4a5   : > { %8832 = vmatpush3.msra.mxu0 %v5650_v2  ;;  %8749 = vmatprep.mubr.f32.mxu0 %v10747_v28  ;;  %v5645_v28 = vld [vmem:[#allocation6 + $0x500] sm:$0xff]  ;;  %v10940_v2 = vld [vmem:[%s11764_s7 + $0x10] sm:$0xff] }
 0x4a6   : > { %8833 = vmatprep.subr.mxu0 %v5649_v6  ;;  %11932 = vst [vmem:[#allocation21_spill] sm:$0xff] %v10940_v2 }
 0x4a7   : > { %8834 = vmatpush3.msra.mxu0 %v5649_v6 }
 0x4a8   : > { %8835 = vmatprep.subr.mxu0 %v5648_v54  ;;  %8750 = vmatmul.mubr.f32.gmra.mxu0 %v10750_v4  ;;  %v10886_v4 = vpop.f32.mrf.mxu1 }
 0x4a9   : > { %8836 = vmatpush3.msra.mxu0 %v5648_v54  ;;  %8752 = vmatprep.mubr.f32.mxu0 %v10817_v21  ;;  %v8173_v0 = vpop.f32.mrf.mxu0 }
 0x4aa   : > { %8837 = vmatprep.subr.mxu0 %v5647_v12  ;;  %v10890_v51 = vpop.f32.mrf.mxu1 }
 0x4ab   : > { %8838 = vmatpush3.msra.mxu0 %v5647_v12  ;;  %v3026_v58 = vpop.f32.mrf.mxu0 }
 0x4ac   : > { %8839 = vmatprep.subr.mxu0 %v5646_v45  ;;  %8753 = vmatmul.mubr.f32.gmra.mxu0 %v5258_v27  ;;  %v10894_v14 = vpop.f32.mrf.mxu1 }
 0x4ad   : > { %8840 = vmatpush3.msra.mxu0 %v5646_v45  ;;  %8843 = vmatprep.mubr.f32.mxu0 %v10756_v37  ;;  %v10948_v45 = vld [vmem:[%s11764_s7 + $0x18] sm:$0xff] }
 0x4ae   : > { %8841 = vmatprep.subr.mxu0 %v5645_v28  ;;  %3105 = vxpose.xlu1.b32.start [1/16] %v3026_v58, 128  ;;  %11933 = vst [vmem:[#allocation36_spill] sm:$0xff] %v10948_v45  ;;  %v10956_v58 = vld [vmem:[%s11764_s7 + $0x20] sm:$0xff] }
 0x4af   : > { %8842 = vmatpush3.msra.mxu0 %v5645_v28  ;;  %v8176_v21 = vpop.f32.mrf.mxu0  ;;  %11934 = vst [vmem:[#allocation38_spill] sm:$0xff] %v10956_v58 }
 0x4b0   : > { %8844 = vmatmul.mubr.f32.vlgmr.msra.gmra.mxu0 %v10759_v61 }
 0x4b1   : > { %8846 = vmatprep.mubr.f32.mxu0 %v10762_v39  ;;  %v3036_v18 = vpop.f32.mrf.mxu0  ;;  %v10898_v39 = vpop.f32.mrf.mxu1 }
 0x4b2   : > { %3106 = vxpose.xlu1.b32.cont [2/16] %v8173_v0, 128 }
 0x4b3   : > { %v8179_v55 = vpop.f32.mrf.mxu0 }
 0x4b4   : > { %8847 = vmatmul.mubr.f32.gmra.mxu0 %v10765_v5 }
 0x4b5   : > { %8849 = vmatprep.mubr.f32.mxu0 %v10768_v35  ;;  %v3046_v37 = vpop.f32.mrf.mxu0  ;;  %v10902_v35 = vpop.f32.mrf.mxu1 }
 0x4b6   : > { %3107 = vxpose.xlu1.b32.cont [3/16] %v3036_v18, 128 }
 0x4b8   : > { %8850 = vmatmul.mubr.f32.gmra.mxu0 %v10771_v44  ;;  %v8182_v38 = vpop.f32.mrf.mxu0  ;;  %v10906_v44 = vpop.f32.mrf.mxu1 }
 0x4b9   : > { %8852 = vmatprep.mubr.f32.mxu0 %v10774_v15 }
 0x4ba   : > { %3108 = vxpose.xlu1.b32.cont [4/16] %v8176_v21, 128  ;;  %v3056_v61 = vpop.f32.mrf.mxu0 }
 0x4bc   : > { %8853 = vmatmul.mubr.f32.gmra.mxu0 %v10777_v62 }
 0x4bd   : > { %8855 = vmatprep.mubr.f32.mxu0 %v10780_v41  ;;  %v10910_v41 = vpop.f32.mrf.mxu1 }
 0x4be   : > { %v8185_v5 = vpop.f32.mrf.mxu0  ;;  %3109 = vxpose.xlu1.b32.cont [5/16] %v3046_v37, 128  ;;  %v10964_v37 = vld [vmem:[%s11764_s7 + $0x28] sm:$0xff] }
 0x4bf   : > { %11935 = vst [vmem:[#allocation14_spill] sm:$0xff] %v10964_v37 }
 0x4c0   : > { %8856 = vmatmul.mubr.f32.gmra.mxu0 %v10783_v36  ;;  %v3066_v57 = vpop.f32.mrf.mxu0  ;;  %v5644_v36 = vld [vmem:[#allocation2 + $0x92] sm:$0xff] }
 0x4c1   : > { %8858 = vmatprep.mubr.f32.mxu0 %v10786_v7  ;;  %v10914_v7 = vpop.f32.mrf.mxu1 }
 0x4c2   : > { %3110 = vxpose.xlu1.b32.cont [6/16] %v8179_v55, 128 }
 0x4c4   : > { %v8188_v15 = vpop.f32.mrf.mxu0  ;;  %8859 = vmatmul.mubr.f32.gmra.mxu0 %v10789_v29  ;;  %v10916_v29 = vpop.f32.mrf.mxu1 }
 0x4c5   : > { %8861 = vmatprep.mubr.f32.mxu0 %v10792_v13 }
 0x4c6   : > { %v3076_v62 = vpop.f32.mrf.mxu0  ;;  %3111 = vxpose.xlu1.b32.cont [7/16] %v3056_v61, 128  ;;  %v10918_v42 = vpop.f32.mrf.mxu1 }
 0x4c8   : > { %v8191_v47 = vpop.f32.mrf.mxu0  ;;  %8862 = vmatmul.mubr.f32.gmra.mxu0 %v10795_v43  ;;  %v10923_v43 = vld [vmem:[%s11764_s7] sm:$0xff]  ;;  %v10926_v20 = vpop.f32.mrf.mxu1 }
 0x4c9   : > { %8864 = vmatprep.mubr.f32.mxu0 %v10851_v60  ;;  %11930 = vst [vmem:[#allocation16_spill] sm:$0xff] %v10923_v43  ;;  %3155 = vperm.xlu0 %8987, %v10923_v43  }
 0x4ca   : > { %v3086_v26 = vpop.f32.mrf.mxu0  ;;  %3112 = vxpose.xlu1.b32.cont [8/16] %v8182_v38, 128  ;;  %v10934_v40 = vpop.f32.mrf.mxu1 }
 0x4cc   : > { %v8194_v19 = vpop.f32.mrf.mxu0  ;;  %8865 = vmatmul.mubr.f32.gmra.mxu0 %v5644_v36  ;;  %v10942_v54 = vpop.f32.mrf.mxu1 }
 0x4cd   : > { %3160 = vperm.xlu0 %8987, %v10932_v59  }
 0x4ce   : > { %v3096_v31 = vpop.f32.mrf.mxu0  ;;  %3113 = vxpose.xlu1.b32.cont [9/16] %v3066_v57, 128  ;;  %v10950_v27 = vpop.f32.mrf.mxu1 }
 0x4d0   : > { %v8285_v13 = vpop.f32.mrf.mxu0  ;;  %v10958_v18 = vpop.f32.mrf.mxu1 }
 0x4d1   : > { %3165 = vperm.xlu0 %8987, %v10940_v2  }
 0x4d2   : > { %v3797_v34 = vpop.f32.mrf.mxu0  ;;  %3114 = vxpose.xlu1.b32.cont [10/16] %v8185_v5, 128  ;;  %v10966_v61 = vpop.f32.mrf.mxu1  ;;  %v10971_v5 = vld [vmem:[%s11762_s5] ss:$0 sm:$0xff] }
 0x4d3   : > { %v3877_v57 = vadd.f32 %v10971_v5, %v8285_v13 }
 0x4d4   : > { %v8288_v23 = vpop.f32.mrf.mxu0 }
 0x4d5   : > { %3170 = vperm.xlu0 %8987, %v10948_v45  }
 0x4d6   : > { %v3807_v60 = vpop.f32.mrf.mxu0  ;;  %3115 = vxpose.xlu1.b32.cont [11/16] %v3076_v62, 128  ;;  %v3876_v62 = vadd.f32 %v10971_v5, %v3797_v34 }
 0x4d7   : > { %v3878_v46 = vadd.f32 %v10971_v5, %v3807_v60 }
 0x4d8   : > { %v8291_v50 = vpop.f32.mrf.mxu0  ;;  %v4069_v34 = vadd.f32 %v10815_v30, %v3876_v62 }
 0x4d9   : > { %3175 = vperm.xlu0 %8987, %v10956_v58   ;;  %v3881_v2 = vadd.f32 %v10971_v5, %v8291_v50  ;;  %v4071_v60 = vadd.f32 %v10825_v9, %v3878_v46 }
 0x4da   : > { %v3817_v22 = vpop.f32.mrf.mxu0  ;;  %3116 = vxpose.xlu1.b32.cont [12/16] %v8188_v15, 128 }
 0x4db   : > { %v4074_v50 = vadd.f32 %v10829_v53, %v3881_v2 }
 0x4dc   : > { %v8294_v32 = vpop.f32.mrf.mxu0 }
 0x4dd   : > { %3180 = vperm.xlu0 %8987, %v10964_v37   ;;  %v3883_v30 = vadd.f32 %v10971_v5, %v8294_v32 }
 0x4de   : > { %v3827_v6 = vpop.f32.mrf.mxu0  ;;  %3117 = vxpose.xlu1.b32.cont [13/16] %v3086_v26, 128  ;;  %v10981_v26 = vpop.f32.mrf.mxu1 }
 0x4df   : > { %v4076_v32 = vadd.f32 %v10837_v3, %v3883_v30 }
 0x4e0   : > { %v8297_v12 = vpop.f32.mrf.mxu0  ;;  %v10990_v45 = vpop.f32.mrf.mxu1 }
 0x4e1   : > { %v3885_v9 = vadd.f32 %v10971_v5, %v8297_v12 }
 0x4e2   : > { %v3837_v0 = vpop.f32.mrf.mxu0  ;;  %3118 = vxpose.xlu1.b32.cont [14/16] %v8191_v47, 128  ;;  %v10979_v47 = vld [vmem:[%s11764_s7 + $0x30] sm:$0xff] }
 0x4e3   : > { %3185 = vperm.xlu0 %8987, %v10979_v47   ;;  %v4078_v12 = vadd.f32 %v10845_v25, %v3885_v9 }
 0x4e4   : > { %v8300_v28 = vpop.f32.mrf.mxu0 }
 0x4e6   : > { %v3847_v21 = vpop.f32.mrf.mxu0  ;;  %3119 = vxpose.xlu1.b32.cont [15/16] %v3096_v31, 128  ;;  %v4070_v31 = vadd.f32 %v10811_v33, %v3877_v57  ;;  %v3880_v33 = vadd.f32 %v10971_v5, %v3817_v22 }
 0x4e8   : > { %v8303_v55 = vpop.f32.mrf.mxu0  ;;  %v4073_v22 = vadd.f32 %v10833_v11, %v3880_v33  ;;  %v3887_v11 = vadd.f32 %v10971_v5, %v8300_v28 }
 0x4ea   : > { %v3857_v38 = vpop.f32.mrf.mxu0  ;;  %3120 = vxpose.xlu1.b32.end [16/16] %v8194_v19, 128  ;;  %v3879_v19 = vadd.f32 %v10971_v5, %v8288_v23  ;;  %v4080_v28 = vadd.f32 %v10855_v63, %v3887_v11 }
 0x4ec   : > { %v8306_v15 = vpop.f32.mrf.mxu0  ;;  %v4072_v23 = vadd.f32 %v10821_v56, %v3879_v19 }
 0x4ee   : > { %v3867_v36 = vpop.f32.mrf.mxu0 }
 0x4f0   : > { %v8397_v13 = vpop.f32.mrf.mxu0 }
 0x4f1   : > { %v10987_v37 = vadd.f32 %v8397_v13, %v4070_v31  ;;  %v11000_v13 = vpop.f32.mrf.mxu1 }
 0x4f2   : > { %v4183_v58 = vpop.f32.mrf.mxu0 }
 0x4f3   : > { %v10993_v59 = vadd.f32 %v4183_v58, %v4069_v34  ;;  %v3882_v34 = vadd.f32 %v10971_v5, %v3827_v6  ;;  %v11010_v19 = vpop.f32.mrf.mxu1 }
 0x4f4   : > { %v8400_v43 = vpop.f32.mrf.mxu0 }
 0x4f5   : > { %v10997_v57 = vadd.f32 %v8400_v43, %v4072_v23  ;;  %v4075_v2 = vadd.f32 %v10841_v52, %v3882_v34  ;;  %v3889_v52 = vadd.f32 %v10971_v5, %v8303_v55  ;;  %v3891_v55 = vadd.f32 %v10971_v5, %v8306_v15 }
 0x4f6   : > { %v4193_v31 = vpop.f32.mrf.mxu0 }
 0x4f7   : > { %v11003_v62 = vadd.f32 %v4193_v31, %v4071_v60  ;;  %v3884_v60 = vadd.f32 %v10971_v5, %v3837_v0  ;;  %v11020_v31 = vpop.f32.mrf.mxu1  ;;  %v4082_v63 = vadd.f32 %v10863_v17, %v3889_v52  ;;  %v4084_v17 = vadd.f32 %v10871_v8, %v3891_v55 }
 0x4f8   : > { %v8403_v58 = vpop.f32.mrf.mxu0 }
 0x4f9   : > { %v11007_v56 = vadd.f32 %v8403_v58, %v4074_v50  ;;  %v3886_v58 = vadd.f32 %v10971_v5, %v3847_v21  ;;  %v4077_v0 = vadd.f32 %v10849_v10, %v3884_v60  ;;  %v11043_v10 = vld [vmem:[%s11764_s7 + $0x40] sm:$0xff] }
 0x4fa   : > { %v4203_v43 = vpop.f32.mrf.mxu0 }
 0x4fb   : > { %v11013_v46 = vadd.f32 %v4203_v43, %v4073_v22  ;;  %v11030_v22 = vpop.f32.mrf.mxu1  ;;  %v4079_v21 = vadd.f32 %v10859_v48, %v3886_v58 }
 0x4fc   : > { %v8406_v23 = vpop.f32.mrf.mxu0 }
 0x4fd   : > { %v11017_v53 = vadd.f32 %v8406_v23, %v4076_v32  ;;  %v3888_v32 = vadd.f32 %v10971_v5, %v3857_v38  ;;  %v11045_v23 = vpop.f32.mrf.mxu1  ;;  %v11936_v38 = vmov 0  }
 0x4fe   : > { %v4213_v6 = vpop.f32.mrf.mxu0 }
 0x4ff   : > { %v11023_v33 = vadd.f32 %v4213_v6, %v4075_v2  ;;  %v3890_v6 = vadd.f32 %v10971_v5, %v3867_v36  ;;  %v4081_v11 = vadd.f32 %v10867_v16, %v3888_v32  ;;  %v11060_v15 = vpop.f32.mrf.mxu1  ;;  %v11068_v36 = vld [vmem:[%s11765_s8 + $0x18] sm:$0xff] }
 0x500   : > { %v8409_v50 = vpop.f32.mrf.mxu0  ;;  %11938 = vst [vmem:[#allocation61_spill] sm:$0xff] %v11068_v36 }
 0x501   : > { %v11027_v3 = vadd.f32 %v8409_v50, %v4078_v12  ;;  %v11058_v50 = vld [vmem:[%s11765_s8 + $0x8] sm:$0xff]  ;;  %v4083_v5 = vadd.f32 %v10875_v49, %v3890_v6  ;;  %v11070_v52 = vpop.f32.mrf.mxu1  ;;  %v4455_v49 = vadd.f32 %v10883_v1, %v10993_v59  ;;  %v4457_v1 = vadd.f32 %v10890_v51, %v11003_v62 }
 0x502   : > { %v4223_v30 = vpop.f32.mrf.mxu0  ;;  %11937 = vst [vmem:[#allocation15_spill] sm:$0xff] %v11058_v50  ;;  %v4462_v51 = vadd.f32 %v10902_v35, %v11017_v53 }
 0x503   : > { %v11033_v34 = vadd.f32 %v4223_v30, %v4077_v0  ;;  %v11084_v55 = vpop.f32.mrf.mxu1 }
 0x504   : > { %v8412_v43 = vpop.f32.mrf.mxu0 }
 0x505   : > { %v11037_v25 = vadd.f32 %v8412_v43, %v4080_v28  ;;  %v4456_v43 = vadd.f32 %v10879_v24, %v10987_v37  ;;  %v4458_v24 = vadd.f32 %v10886_v4, %v10997_v57  ;;  %v4459_v4 = vadd.f32 %v10898_v39, %v11013_v46 }
 0x506   : > { %v4233_v9 = vpop.f32.mrf.mxu0  ;;  %v4464_v39 = vadd.f32 %v10910_v41, %v11027_v3 }
 0x507   : > { %v11048_v60 = vadd.f32 %v4233_v9, %v4079_v21  ;;  %v11082_v9 = vld [vmem:[%s11765_s8 + $0x28] sm:$0xff] }
 0x508   : > { %v8415_v2 = vpop.f32.mrf.mxu0  ;;  %8988 = vset.pattern.permute.xlu1 %v11936_v38  ;;  %11939 = vst [vmem:[#allocation60_spill] sm:$0xff] %v11082_v9  ;;  %v11095_v38 = vpop.f32.mrf.mxu1 }
 0x509   : > { %v4275_v48 = vadd.f32 %v8415_v2, %v4082_v63  ;;  %3195 = vperm.xlu1 %8988, %v11043_v10  }
 0x50a   : > { %v4243_v12 = vpop.f32.mrf.mxu0 }
 0x50b   : > { %v4274_v58 = vadd.f32 %v4243_v12, %v4081_v11  ;;  %v4460_v11 = vadd.f32 %v10894_v14, %v11007_v56  ;;  %v4468_v3 = vadd.f32 %v10926_v20, %v4275_v48 }
 0x50c   : > { %v8418_v0 = vpop.f32.mrf.mxu0 }
 0x50d   : > { %v4277_v30 = vadd.f32 %v8418_v0, %v4084_v17  ;;  %3304 = vperm.xlu1 %8988, %v11058_v50   ;;  %v11103_v0 = vpop.f32.mrf.mxu1 }
 0x50e   : > { %v4253_v16 = vpop.f32.mrf.mxu0 }
 0x50f   : > { %v4276_v28 = vadd.f32 %v4253_v16, %v4083_v5  ;;  %v11110_v56 = vpop.f32.mrf.mxu1 }
 0x510   : > { %v8509_v32 = vpop.f32.mrf.mxu0 }
 0x511   : > { %v11074_v8 = vadd.f32 %v8509_v32, %v4456_v43  ;;  %3314 = vperm.xlu1 %8988, %v11068_v36   ;;  %v4461_v32 = vadd.f32 %v10906_v44, %v11023_v33  ;;  %v11116_v53 = vpop.f32.mrf.mxu1 }
 0x512   : > { %v4569_v21 = vpop.f32.mrf.mxu0 }
 0x513   : > { %v11086_v63 = vadd.f32 %v4569_v21, %v4455_v49 }
 0x514   : > { %v8512_v37 = vpop.f32.mrf.mxu0 }
 0x515   : > { %v11090_v2 = vadd.f32 %v8512_v37, %v4458_v24  ;;  %3324 = vperm.xlu1 %8988, %v11082_v9   ;;  %v4463_v24 = vadd.f32 %v10914_v7, %v11033_v34  ;;  %v4466_v37 = vadd.f32 %v10916_v29, %v11037_v25  ;;  %v4467_v34 = vadd.f32 %v10934_v40, %v4274_v58 }
 0x516   : > { %v4579_v59 = vpop.f32.mrf.mxu0  ;;  %v4470_v25 = vadd.f32 %v10942_v54, %v4277_v30  ;;  %v4841_v9 = vadd.f32 %v10966_v61, %v11086_v63 }
 0x517   : > { %v11097_v6 = vadd.f32 %v4579_v59, %v4457_v1  ;;  %v4465_v1 = vadd.f32 %v10918_v42, %v11048_v60  ;;  %v4469_v60 = vadd.f32 %v10950_v27, %v4276_v28 }
 0x518   : > { %v8515_v12 = vpop.f32.mrf.mxu0 }
 0x519   : > { %v4653_v17 = vadd.f32 %v8515_v12, %v4460_v11  ;;  %v11122_v11 = vpop.f32.mrf.mxu1  ;;  %v4843_v63 = vadd.f32 %v10990_v45, %v11097_v6 }
 0x51a   : > { %v4589_v57 = vpop.f32.mrf.mxu0 }
 0x51b   : > { %v4652_v5 = vadd.f32 %v4589_v57, %v4459_v4  ;;  %v4846_v62 = vadd.f32 %v11000_v13, %v4653_v17  ;;  %v11128_v57 = vpop.f32.mrf.mxu1 }
 0x51c   : > { %v8518_v16 = vpop.f32.mrf.mxu0 }
 0x51d   : > { %v4655_v43 = vadd.f32 %v8518_v16, %v4462_v51  ;;  %v11134_v20 = vpop.f32.mrf.mxu1 }
 0x51e   : > { %v4599_v14 = vpop.f32.mrf.mxu0 }
 0x51f   : > { %v4654_v49 = vadd.f32 %v4599_v14, %v4461_v32 }
 0x520   : > { %v8521_v46 = vpop.f32.mrf.mxu0 }
 0x521   : > { %v4657_v21 = vadd.f32 %v8521_v46, %v4464_v39  ;;  %v11142_v39 = vpop.f32.mrf.mxu1 }
 0x522   : > { %v4609_v35 = vpop.f32.mrf.mxu0 }
 0x523   : > { %v4656_v13 = vadd.f32 %v4609_v35, %v4463_v24  ;;  %v11150_v27 = vpop.f32.mrf.mxu1  ;;  %v4845_v35 = vadd.f32 %v11010_v19, %v4652_v5  ;;  %v4850_v19 = vadd.f32 %v11045_v23, %v4657_v21 }
 0x524   : > { %v8524_v44 = vpop.f32.mrf.mxu0 }
 0x525   : > { %v4659_v33 = vadd.f32 %v8524_v44, %v4466_v37  ;;  %v11155_v44 = vpop.f32.mrf.mxu1 }
 0x526   : > { %v4619_v59 = vpop.f32.mrf.mxu0 }
 0x527   : > { %v4658_v41 = vadd.f32 %v4619_v59, %v4465_v1  ;;  %v4848_v59 = vadd.f32 %v11020_v31, %v4655_v43 }
 0x528   : > { %v8527_v12 = vpop.f32.mrf.mxu0 }
 0x529   : > { %v4661_v7 = vadd.f32 %v8527_v12, %v4468_v3 }
 0x52a   : > { %v4629_v17 = vpop.f32.mrf.mxu0  ;;  %v11126_v4 = vpop.trf.xlu1 }
 0x52b   : > { %11940 = vst [vmem:[#allocation18_spill] sm:$0xff] %v11126_v4  ;;  %v4660_v29 = vadd.f32 %v4629_v17, %v4467_v34  ;;  %v4847_v17 = vadd.f32 %v11030_v22, %v4654_v49  ;;  %v4852_v22 = vadd.f32 %v11070_v52, %v4659_v33 }
 0x52c   : > { %v8530_v51 = vpop.f32.mrf.mxu0 }
 0x52d   : > { %v4663_v42 = vadd.f32 %v8530_v51, %v4470_v25  ;;  %v11165_v51 = vpop.f32.mrf.mxu1 }
 0x52e   : > { %v4639_v16 = vpop.f32.mrf.mxu0  ;;  %v11132_v32 = vpop.trf.xlu1 }
 0x52f   : > { %v4662_v48 = vadd.f32 %v4639_v16, %v4469_v60  ;;  %v4849_v16 = vadd.f32 %v11060_v15, %v4656_v13  ;;  %v4854_v15 = vadd.f32 %v11095_v38, %v4661_v7 }
 0x530   : > { %v11136_v14 = vpop.f32.mrf.mxu0 }
 0x532   : > { %v11138_v40 = vpop.f32.mrf.mxu0  ;;  %v11140_v58 = vpop.trf.xlu1 }
 0x533   : > { %11941 = vst [vmem:[#allocation25_spill] sm:$0xff] %v11140_v58 }
 0x534   : > { %v11144_v46 = vpop.f32.mrf.mxu0 }
 0x536   : > { %v11146_v54 = vpop.f32.mrf.mxu0  ;;  %v11148_v30 = vpop.trf.xlu1 }
 0x538   : > { %v8627_v28 = vpop.f32.mrf.mxu0 }
 0x539   : > { %v11152_v24 = vadd.f32 %v8627_v28, %v4846_v62  ;;  %v11175_v28 = vpop.f32.mrf.mxu1 }
 0x53a   : > { %v4975_v37 = vpop.f32.mrf.mxu0  ;;  %v11160_v12 = vpop.trf.xlu1 }
 0x53b   : > { %v11157_v1 = vadd.f32 %v4975_v37, %v4845_v35  ;;  %11942 = vst [vmem:[#allocation40_spill] sm:$0xff] %v11160_v12  ;;  %v11183_v21 = vpop.f32.mrf.mxu1 }
 0x53c   : > { %v8630_v3 = vpop.f32.mrf.mxu0 }
 0x53d   : > { %v11162_v34 = vadd.f32 %v8630_v3, %v4848_v59  ;;  %v4851_v59 = vadd.f32 %v11084_v55, %v4658_v41  ;;  %v11193_v33 = vpop.f32.mrf.mxu1  ;;  %v4856_v55 = vadd.f32 %v11110_v56, %v4663_v42  ;;  %v3288_v56 = vld [vmem:[%s11765_s8 + $0x38] sm:$0xff] }
 0x53e   : > { %v4985_v25 = vpop.f32.mrf.mxu0  ;;  %v11173_v43 = vpop.trf.xlu1  ;;  %3334 = vperm.xlu1 %8988, %v3288_v56   ;;  %v11239_v56 = vld [vmem:[%s11765_s8 + $0x58] sm:$0xff] }
 0x53f   : > { %v11167_v62 = vadd.f32 %v4985_v25, %v4847_v17  ;;  %11948 = vst [vmem:[#allocation22_spill] sm:$0xff] %v11239_v56 }
 0x540   : > { %v8633_v5 = vpop.f32.mrf.mxu0 }
 0x541   : > { %v11170_v60 = vadd.f32 %v8633_v5, %v4850_v19  ;;  %v4853_v19 = vadd.f32 %v11103_v0, %v4660_v29 }
 0x542   : > { %v4995_v31 = vpop.f32.mrf.mxu0  ;;  %v11188_v17 = vpop.trf.xlu1 }
 0x543   : > { %v11177_v35 = vadd.f32 %v4995_v31, %v4849_v16  ;;  %11943 = vst [vmem:[#allocation62_spill] sm:$0xff] %v11188_v17  ;;  %v4855_v31 = vadd.f32 %v11116_v53, %v4662_v48 }
 0x544   : > { %v8636_v49 = vpop.f32.mrf.mxu0 }
 0x545   : > { %v11180_v37 = vadd.f32 %v8636_v49, %v4852_v22  ;;  %v11203_v22 = vpop.f32.mrf.mxu1 }
 0x546   : > { %v5005_v23 = vpop.f32.mrf.mxu0  ;;  %v11201_v7 = vpop.trf.xlu1 }
 0x547   : > { %v11185_v3 = vadd.f32 %v5005_v23, %v4851_v59  ;;  %11944 = vst [vmem:[#allocation19_spill] sm:$0xff] %v11201_v7  ;;  %v11207_v59 = vpop.f32.mrf.mxu1 }
 0x548   : > { %v8639_v13 = vpop.f32.mrf.mxu0 }
 0x549   : > { %v11190_v25 = vadd.f32 %v8639_v13, %v4854_v15  ;;  %v11214_v48 = vpop.f32.mrf.mxu1  ;;  %v11219_v15 = vld [vmem:[%s11765_s8 + $0x48] sm:$0xff] }
 0x54a   : > { %v5015_v52 = vpop.f32.mrf.mxu0  ;;  %v11212_v23 = vpop.trf.xlu1  ;;  %11945 = vst [vmem:[#allocation20_spill] sm:$0xff] %v11219_v15  ;;  %3344 = vperm.xlu1 %8988, %v11219_v15  }
 0x54b   : > { %v11195_v5 = vadd.f32 %v5015_v52, %v4853_v19 }
 0x54c   : > { %v8642_v41 = vpop.f32.mrf.mxu0 }
 0x54d   : > { %v11198_v16 = vadd.f32 %v8642_v41, %v4856_v55  ;;  %v11228_v55 = vpop.f32.mrf.mxu1 }
 0x54e   : > { %v5025_v38 = vpop.f32.mrf.mxu0  ;;  %v11226_v52 = vpop.trf.xlu1  ;;  %3354 = vperm.xlu1 %8988, %v11239_v56   ;;  %v5034_v56 = vadd.f32 %v11138_v40, %v4841_v9 }
 0x54f   : > { %v11205_v49 = vadd.f32 %v5025_v38, %v4855_v31  ;;  %11946 = vst [vmem:[#allocation37_spill] sm:$0xff] %v11226_v52  ;;  %v11234_v38 = vpop.f32.mrf.mxu1  ;;  %v4842_v52 = vadd.f32 %v10958_v18, %v11074_v8  ;;  %v11267_v18 = vld [vmem:[%s11765_s8 + $0x68] sm:$0xff] }
 0x550   : > { %v8733_v0 = vpop.f32.mrf.mxu0  ;;  %11947 = vst [vmem:[#allocation63_spill] sm:$0xff] %v11234_v38  ;;  %v4844_v38 = vadd.f32 %v10981_v26, %v11090_v2  ;;  %v5036_v2 = vadd.f32 %v11146_v54, %v4843_v63 }
 0x551   : > { %v11248_v4 = vpop.f32.mrf.mxu1  ;;  %v5035_v15 = vadd.f32 %v11136_v14, %v4842_v52  ;;  %v11271_v14 = vpop.permute.xlu0 %3155 }
 0x552   : > { %v5341_v29 = vpop.f32.mrf.mxu0  ;;  %v11243_v12 = vpop.trf.xlu1  ;;  %11951 = vst [vmem:[#allocation39_spill] sm:$0xff] %v11271_v14  ;;  %3364 = vperm.xlu1 %8988, %v11267_v18   ;;  %v5037_v61 = vadd.f32 %v11144_v46, %v4844_v38  ;;  %v5981_v14 = vld [vmem:[%s11763_s6 + $0x78] sm:$0xff]  ;;  %v5980_v46 = vld [vmem:[%s11763_s6 + $0x70] sm:$0xff] }
 0x553   : > { %11949 = vst [vmem:[#allocation23_spill] sm:$0xff] %v11243_v12  ;;  %v8789_v12 = vpop.f32.mrf.mxu1  ;;  %v5228_v9 = vadd.f32 %v11122_v11, %v5035_v15  ;;  %8867 = vmatprep.subr.mxu1 %v5981_v14 }
 0x554   : > { %v8736_v42 = vpop.f32.mrf.mxu0  ;;  %v5230_v11 = vadd.f32 %v11134_v20, %v5037_v61  ;;  %8868 = vmatpush3.msra.mxu1 %v5981_v14  ;;  %v11307_v20 = vld [vmem:[%s11765_s8 + $0x78] sm:$0xff] }
 0x555   : > { %v5534_v26 = vpop.f32.mrf.mxu1  ;;  %v5421_v52 = vadd.f32 %v8733_v0, %v5228_v9  ;;  %8869 = vmatprep.subr.mxu1 %v5980_v46  ;;  %v5979_v9 = vld [vmem:[%s11763_s6 + $0x68] sm:$0xff]  ;;  %11953 = vst [vmem:[#allocation66_spill] sm:$0xff] %v11307_v20 }
 0x556   : > { %v5351_v53 = vpop.f32.mrf.mxu0  ;;  %v11259_v50 = vpop.trf.xlu1  ;;  %v5423_v15 = vadd.f32 %v8736_v42, %v5230_v11  ;;  %8870 = vmatpush3.msra.mxu1 %v5980_v46  ;;  %3374 = vperm.xlu1 %8988, %v11307_v20  }
 0x557   : > { %11950 = vst [vmem:[#allocation24_spill] sm:$0xff] %v11259_v50  ;;  %v5227_v50 = vadd.f32 %v11128_v57, %v5034_v56  ;;  %v11295_v57 = vpop.permute.xlu0 %3160  ;;  %v8792_v0 = vpop.f32.mrf.mxu1  ;;  %v5229_v56 = vadd.f32 %v11142_v39, %v5036_v2  ;;  %v5614_v63 = vadd.f32 %v8789_v12, %v5421_v52  ;;  %8871 = vmatprep.subr.mxu1 %v5979_v9 }
 0x558   : > { %v11221_v13 = vpop.f32.mrf.mxu0  ;;  %v5232_v12 = vadd.f32 %v11150_v27, %v11152_v24  ;;  %8872 = vmatpush3.msra.mxu1 %v5979_v9  ;;  %v5616_v20 = vadd.f32 %v8792_v0, %v5423_v15  ;;  %v5977_v27 = vld [vmem:[%s11763_s6 + $0x58] sm:$0xff]  ;;  %v5976_v24 = vld [vmem:[%s11763_s6 + $0x50] sm:$0xff] }
 0x559   : > { %v5420_v6 = vadd.f32 %v5341_v29, %v5227_v50  ;;  %v5978_v50 = vld [vmem:[%s11763_s6 + $0x60] sm:$0xff]  ;;  %v5422_v39 = vadd.f32 %v5351_v53, %v5229_v56  ;;  %v5544_v52 = vpop.f32.mrf.mxu1  ;;  %v5231_v53 = vadd.f32 %v11155_v44, %v11157_v1 }
 0x55a   : > { %v11224_v19 = vpop.f32.mrf.mxu0  ;;  %v11290_v45 = vpop.trf.xlu1  ;;  %8873 = vmatprep.subr.mxu1 %v5978_v50  ;;  %v5425_v46 = vadd.f32 %v11221_v13, %v5232_v12  ;;  %v11954_v13 = vld [vmem:[#allocation16_spill] sm:$0xff]  ;;  %v5975_v12 = vld [vmem:[%s11763_s6 + $0x48] sm:$0xff] }
 0x55b   : > { %11952 = vst [vmem:[#allocation42_spill] sm:$0xff] %v11290_v45  ;;  %v5613_v14 = vadd.f32 %v5534_v26, %v5420_v6  ;;  %8874 = vmatpush3.msra.mxu1 %v5978_v50  ;;  %v11328_v6 = vpop.permute.xlu0 %3165  ;;  %6177 = vperm.xlu1 %8988, %v11954_v13   ;;  %v8795_v56 = vpop.f32.mrf.mxu1  ;;  %v5424_v9 = vadd.f32 %v11224_v19, %v5231_v53 }
 0x55c   : > { %v11230_v41 = vpop.f32.mrf.mxu0  ;;  %8875 = vmatprep.subr.mxu1 %v5977_v27  ;;  %v5234_v19 = vadd.f32 %v11165_v51, %v11162_v34  ;;  %v5973_v34 = vld [vmem:[%s11763_s6 + $0x38] sm:$0xff]  ;;  %v5972_v51 = vld [vmem:[%s11763_s6 + $0x30] sm:$0xff]  ;;  %v5233_v13 = vadd.f32 %v11175_v28, %v11167_v62  ;;  %v5971_v62 = vld [vmem:[%s11763_s6 + $0x28] sm:$0xff] }
 0x55d   : > { %8876 = vmatpush3.msra.mxu1 %v5977_v27  ;;  %v5970_v28 = vld [vmem:[%s11763_s6 + $0x20] sm:$0xff] }
 0x55e   : > { %v11232_v31 = vpop.f32.mrf.mxu0  ;;  %v11314_v2 = vpop.trf.xlu1  ;;  %8877 = vmatprep.subr.mxu1 %v5976_v24  ;;  %v5427_v27 = vadd.f32 %v11230_v41, %v5234_v19  ;;  %v11956_v41 = vld [vmem:[#allocation21_spill] sm:$0xff] }
 0x55f   : > { %8878 = vmatpush3.msra.mxu1 %v5976_v24 }
 0x560   : > { %v11241_v17 = vpop.f32.mrf.mxu0  ;;  %8879 = vmatprep.subr.mxu1 %v5975_v12 }
 0x561   : > { %8880 = vmatpush3.msra.mxu1 %v5975_v12 }
 0x562   : > { %v11246_v58 = vpop.f32.mrf.mxu0 }
 0x564   : > { %v11252_v7 = vpop.f32.mrf.mxu0 }
 0x566   : > { %v11257_v36 = vpop.f32.mrf.mxu0 }
 0x568   : > { %v11269_v8 = vpop.f32.mrf.mxu0 }
 0x56a   : > { %v11278_v40 = vpop.f32.mrf.mxu0 }
 0x56c   : > { %v11288_v38 = vpop.f32.mrf.mxu0 }
 0x56e   : > { %v11293_v54 = vpop.f32.mrf.mxu0 }
 0x570   : > { %v8845_v29 = vpop.f32.mrf.mxu0 }
 0x571   : > { %v11312_v42 = vadd.f32 %v8845_v29, %v5614_v63  ;;  %v5615_v63 = vadd.f32 %v5544_v52, %v5422_v39  ;;  %v5618_v29 = vadd.f32 %v8795_v56, %v5425_v46  ;;  %v5554_v52 = vpop.f32.mrf.mxu1 }
 0x572   : > { %v5727_v61 = vpop.f32.mrf.mxu0  ;;  %v5617_v24 = vadd.f32 %v5554_v52, %v5424_v9 }
 0x573   : > { %v6594_v11 = vmul.f32 -1.442695, %v11312_v42  ;;  %v11318_v45 = vadd.f32 %v5727_v61, %v5613_v14  ;;  %v11346_v14 = vpop.trf.xlu1  ;;  %v11955_v61 = vld [vmem:[#allocation17_spill] sm:$0xff] }
 0x574   : > { %v8848_v26 = vpop.f32.mrf.mxu0  ;;  %6182 = vperm.xlu1 %8988, %v11955_v61   ;;  %v11957_v61 = vld [vmem:[#allocation36_spill] sm:$0xff] }
 0x575   : > { %9053 = vpow2.f32 %v6594_v11  ;;  %v6593_v0 = vmul.f32 -1.442695, %v11318_v45  ;;  %v11332_v15 = vadd.f32 %v8848_v26, %v5616_v20  ;;  %v5974_v20 = vld [vmem:[%s11763_s6 + $0x40] sm:$0xff]  ;;  %v3171_v26 = vpop.permute.xlu0 %3170 }
 0x576   : > { %v5737_v50 = vpop.f32.mrf.mxu0  ;;  %8881 = vmatprep.subr.mxu1 %v5974_v20 }
 0x577   : > { %9055 = vpow2.f32 %v6593_v0  ;;  %v6596_v44 = vmul.f32 -1.442695, %v11332_v15  ;;  %v11336_v1 = vadd.f32 %v5737_v50, %v5615_v63  ;;  %8882 = vmatpush3.msra.mxu1 %v5974_v20  ;;  %v8798_v63 = vpop.f32.mrf.mxu1  ;;  %v5426_v50 = vadd.f32 %v11232_v31, %v5233_v13  ;;  %v11366_v12 = vpop.trf.xlu1 }
 0x578   : > { %v8851_v39 = vpop.f32.mrf.mxu0  ;;  %8883 = vmatprep.subr.mxu1 %v5973_v34  ;;  %6187 = vperm.xlu1 %8988, %v11956_v41   ;;  %v5236_v20 = vadd.f32 %v11183_v21, %v11170_v60  ;;  %v5235_v13 = vadd.f32 %v11193_v33, %v11177_v35 }
 0x579   : > { %9057 = vpow2.f32 %v6596_v44  ;;  %v6595_v46 = vmul.f32 -1.442695, %v11336_v1  ;;  %v11350_v11 = vadd.f32 %v8851_v39, %v5618_v29  ;;  %8884 = vmatpush3.msra.mxu1 %v5973_v34  ;;  %v5620_v44 = vadd.f32 %v8798_v63, %v5427_v27  ;;  %v11379_v39 = vpop.permute.xlu0 %3175  ;;  %v5564_v52 = vpop.f32.mrf.mxu1  ;;  %v5969_v34 = vld [vmem:[%s11763_s6 + $0x18] sm:$0xff] }
 0x57a   : > { %v5747_v53 = vpop.f32.mrf.mxu0  ;;  %8885 = vmatprep.subr.mxu1 %v5972_v51  ;;  %v3234_v27 = vadd.f32 %v11295_v57, %v11132_v32  ;;  %v5619_v60 = vadd.f32 %v5564_v52, %v5426_v50  ;;  %v9122_v50 = vld [vmem:[%s9467_s23 + $0x8] sm:$0xff]  ;;  %v5428_v35 = vadd.f32 %v11246_v58, %v5235_v13  ;;  %v5238_v58 = vadd.f32 %v11203_v22, %v11180_v37 }
 0x57b   : > { %v11361_v56 = vadd.f32 %v5747_v53, %v5617_v24  ;;  %9059 = vpow2.f32 %v6595_v46  ;;  %v6598_v9 = vmul.f32 -1.442695, %v11350_v11  ;;  %8886 = vmatpush3.msra.mxu1 %v5972_v51  ;;  %v5429_v53 = vadd.f32 %v11241_v17, %v5236_v20  ;;  %v11958_v17 = vld [vmem:[#allocation38_spill] sm:$0xff]  ;;  %v8801_v41 = vpop.f32.mrf.mxu1 }
 0x57c   : > { %v8854_v0 = vpop.f32.mrf.mxu0  ;;  %8887 = vmatprep.subr.mxu1 %v5971_v62  ;;  %6192 = vperm.xlu1 %8988, %v11957_v61   ;;  %v5431_v37 = vadd.f32 %v11252_v7, %v5238_v58 }
 0x57d   : > { %v6597_v19 = vmul.f32 -1.442695, %v11361_v56  ;;  %v11377_v31 = vadd.f32 %v8854_v0, %v5620_v44  ;;  %9061 = vpow2.f32 %v6598_v9  ;;  %8888 = vmatpush3.msra.mxu1 %v5971_v62  ;;  %v3250_v44 = vadd.f32 %v9122_v50, %v3234_v27  ;;  %v3181_v20 = vpop.permute.xlu0 %3180  ;;  %v11959_v27 = vld [vmem:[#allocation14_spill] sm:$0xff] }
 0x57e   : > { %v5757_v29 = vpop.f32.mrf.mxu0  ;;  %8889 = vmatprep.subr.mxu1 %v5970_v28  ;;  %v3236_v62 = vadd.f32 %v3171_v26, %v11148_v30  ;;  %v5622_v33 = vadd.f32 %v8801_v41, %v5429_v53  ;;  %v3238_v61 = vadd.f32 %v3181_v20, %v11173_v43  ;;  %v5967_v30 = vld [vmem:[%s11763_s6 + $0x8] sm:$0xff] }
 0x57f   : > { %8890 = vmatpush3.msra.mxu1 %v5970_v28  ;;  %9063 = vpow2.f32 %v6597_v19  ;;  %v6600_v32 = vmul.f32 -1.442695, %v11377_v31  ;;  %v11391_v57 = vadd.f32 %v5757_v29, %v5619_v60  ;;  %v5968_v19 = vld [vmem:[%s11763_s6 + $0x10] sm:$0xff]  ;;  %vm3266_vm0 = vcmp.gt.f32.partialorder %v3250_v44, 0.0  ;;  %v9123_v60 = vld [vmem:[%s9467_s23 + $0x18] sm:$0xff] }
 0x580   : > { %v8857_v46 = vpop.f32.mrf.mxu0  ;;  %8891 = vmatprep.subr.mxu1 %v5969_v34  ;;  %6197 = vperm.xlu1 %8988, %v11958_v17  }
 0x581   : > { %8892 = vmatpush3.msra.mxu1 %v5969_v34  ;;  %v11410_v26 = vadd.f32 %v8857_v46, %v5622_v33  ;;  %v5966_v46 = vld [vmem:[%s11763_s6] sm:$0xff]  ;;  %v5240_v33 = vadd.f32 %v11214_v48, %v11190_v25 }
 0x582   : > { %v9054_v24 = vpop.eup %9053  ;;  %v5767_v9 = vpop.f32.mrf.mxu0  ;;  %8893 = vmatprep.subr.mxu1 %v5968_v19 }
 0x583   : > { %v5871_v21 = vadd.f32 1.0, %v9054_v24  ;;  %8894 = vmatpush3.msra.mxu1 %v5968_v19  ;;  %v5574_v24 = vpop.f32.mrf.mxu1  ;;  %v6602_v41 = vmul.f32 -1.442695, %v11410_v26 }
 0x584   : > { %v9056_v51 = vpop.eup %9055  ;;  %v3196_v0 = vpop.permute.xlu1 %3195  ;;  %6202 = vperm.xlu1 %8988, %v11959_v27   ;;  %8895 = vmatprep.subr.mxu1 %v5967_v30  ;;  %v5621_v22 = vadd.f32 %v5574_v24, %v5428_v35  ;;  %v5433_v27 = vadd.f32 %v11269_v8, %v5240_v33 }
 0x585   : > { %9065 = vrcp.f32 %v5871_v21  ;;  %v5870_v63 = vadd.f32 1.0, %v9056_v51  ;;  %v11398_v29 = vadd.f32 %v3196_v0, %v11212_v23  ;;  %v6599_v23 = vmul.f32 -1.442695, %v11391_v57  ;;  %v8860_v53 = vpop.f32.mrf.mxu0  ;;  %8896 = vmatpush3.msra.mxu1 %v5967_v30  ;;  %v8804_v13 = vpop.f32.mrf.mxu1  ;;  %v9124_v0 = vld [vmem:[%s9467_s23 + $0x28] sm:$0xff] }
 0x586   : > { %v9058_v28 = vpop.eup %9057  ;;  %9067 = vpow2.f32 %v6600_v32  ;;  %v3252_v21 = vadd.f32 %v9123_v60, %v3236_v62  ;;  %v5237_v32 = vadd.f32 %v11207_v59, %v11185_v3  ;;  %v3254_v17 = vadd.f32 %v9124_v0, %v3238_v61  ;;  %8897 = vmatprep.subr.mxu1 %v5966_v46 }
 0x587   : > { %9069 = vrcp.f32 %v5870_v63  ;;  %v5873_v43 = vadd.f32 1.0, %v9058_v28  ;;  %v11422_v63 = vadd.f32 %v5767_v9, %v5621_v22  ;;  %8898 = vmatpush3.msra.mxu1 %v5966_v46  ;;  %v5777_v28 = vpop.f32.mrf.mxu0  ;;  %v5624_v9 = vadd.f32 %v8804_v13, %v5431_v37 }
 0x588   : > { %v3305_v52 = vpop.permute.xlu1 %3304  ;;  %v9060_v34 = vpop.eup %9059  ;;  %9071 = vpow2.f32 %v6599_v23  ;;  %6207 = vperm.xlu1 %8988, %v10979_v47   ;;  %vm3268_vm1 = vcmp.gt.f32.partialorder %v3252_v21, 0.0  ;;  %v5430_v59 = vadd.f32 %v11257_v36, %v5237_v32  ;;  %v11437_v47 = vld [vmem:[%s11764_s7 + $0x38] sm:$0xff]  ;;  %vm3270_vm2 = vcmp.gt.f32.partialorder %v3254_v17, 0.0 }
 0x589   : > { %v3378_v51 = vmul.f32 %v3305_v52, %v3250_v44  ;;  %9073 = vrcp.f32 %v5873_v43  ;;  %v5872_v62 = vadd.f32 1.0, %v9060_v34  ;;  %v6601_v20 = vmul.f32 -1.442695, %v11422_v63  ;;  %v8863_v48 = vpop.f32.mrf.mxu0 }
 0x58a   : > { %v9062_v3 = vpop.eup %9061  ;;  %9075 = vpow2.f32 %v6602_v41  ;;  %v11440_v19 = vadd.f32 %v8860_v53, %v5624_v9  ;;  %v5239_v53 = vadd.f32 %v11228_v55, %v11195_v5  ;;  %v11459_v5 = vld [vmem:[%s11764_s7 + $0x48] sm:$0xff] }
 0x58b   : > { %v3394_v7 = vsel %vm3266_vm0, %v3250_v44, %v3378_v51  ;;  %v5584_v44 = vpop.f32.mrf.mxu1  ;;  %9077 = vrcp.f32 %v5872_v62  ;;  %v5875_v25 = vadd.f32 1.0, %v9062_v3  ;;  %v5787_v22 = vpop.f32.mrf.mxu0 }
 0x58c   : > { %v3315_v50 = vpop.permute.xlu1 %3314  ;;  %3410 = vst [vmem:[%s11428_s20 + $0x8] sm:$0xff] %v3394_v7  ;;  %6212 = vperm.xlu1 %8988, %v11437_v47   ;;  %v9064_v30 = vpop.eup %9063  ;;  %v5623_v24 = vadd.f32 %v5584_v44, %v5430_v59  ;;  %9079 = vpow2.f32 %v6601_v20  ;;  %v6604_v60 = vmul.f32 -1.442695, %v11440_v19  ;;  %v5432_v46 = vadd.f32 %v11278_v40, %v5239_v53 }
 0x58d   : > { %v3380_v35 = vmul.f32 %v3315_v50, %v3252_v21  ;;  %v8807_v58 = vpop.f32.mrf.mxu1  ;;  %9081 = vrcp.f32 %v5875_v25  ;;  %v5874_v8 = vadd.f32 1.0, %v9064_v30  ;;  %v8866_v41 = vpop.f32.mrf.mxu0 }
 0x58e   : > { %v5626_v13 = vadd.f32 %v8807_v58, %v5433_v27  ;;  %9083 = vpow2.f32 %v6604_v60  ;;  %v11505_v60 = vld [vmem:[%s11764_s7 + $0x68] sm:$0xff] }
 0x58f   : > { %v3396_v61 = vsel %vm3268_vm1, %v3252_v21, %v3380_v35  ;;  %v11450_v21 = vadd.f32 %v5777_v28, %v5623_v24  ;;  %v5594_v37 = vpop.f32.mrf.mxu1  ;;  %9085 = vrcp.f32 %v5874_v8  ;;  %v5797_v44 = vpop.f32.mrf.mxu0 }
 0x590   : > { %v3325_v36 = vpop.permute.xlu1 %3324  ;;  %3412 = vst [vmem:[%s11428_s20 + $0x18] sm:$0xff] %v3396_v61  ;;  %6217 = vperm.xlu1 %8988, %v11043_v10   ;;  %v5241_v10 = vadd.f32 %v11248_v4, %v11205_v49  ;;  %v11464_v0 = vadd.f32 %v8863_v48, %v5626_v13  ;;  %v5625_v62 = vadd.f32 %v5594_v37, %v5432_v46  ;;  %v11472_v4 = vld [vmem:[%s11764_s7 + $0x50] sm:$0xff]  ;;  %v11960_v49 = vld [vmem:[#allocation63_spill] sm:$0xff] }
 0x591   : > { %v3382_v23 = vmul.f32 %v3325_v36, %v3254_v17  ;;  %v8810_v32 = vpop.f32.mrf.mxu1  ;;  %v6603_v55 = vmul.f32 -1.442695, %v11450_v21  ;;  %v5242_v3 = vadd.f32 %v11960_v49, %v11198_v16  ;;  %v11485_v16 = vld [vmem:[%s11764_s7 + $0x58] sm:$0xff] }
 0x592   : > { %v9066_v52 = vpop.eup %9065  ;;  %v5434_v50 = vadd.f32 %v11293_v54, %v5241_v10  ;;  %v6606_v59 = vmul.f32 -1.442695, %v11464_v0  ;;  %v11477_v9 = vadd.f32 %v5787_v22, %v5625_v62  ;;  %v3152_v10 = vld [vmem:[%s11764_s7 + $0x78] sm:$0xff] }
 0x593   : > { %5920 = vrot.lane.b32.xlu0 %v9066_v52, %s9284_s21  ;;  %v3398_v43 = vsel %vm3270_vm2, %v3254_v17, %v3382_v23  ;;  %v9068_v34 = vpop.eup %9067  ;;  %v5604_v28 = vpop.f32.mrf.mxu1  ;;  %9087 = vpow2.f32 %v6603_v55  ;;  %v5435_v20 = vadd.f32 %v11288_v38, %v5242_v3  ;;  %v11495_v23 = vld [vmem:[%s11764_s7 + $0x60] sm:$0xff] }
 0x594   : > { %3414 = vst [vmem:[%s11428_s20 + $0x28] sm:$0xff] %v3398_v43  ;;  %v9070_v51 = vpop.eup %9069  ;;  %6222 = vperm.xlu1 %8988, %v11459_v5   ;;  %v5877_v17 = vadd.f32 1.0, %v9068_v34  ;;  %v5627_v61 = vadd.f32 %v5604_v28, %v5434_v50  ;;  %v6605_v36 = vmul.f32 -1.442695, %v11477_v9  ;;  %v11961_v28 = vld [vmem:[#allocation15_spill] sm:$0xff] }
 0x595   : > { %v9072_v40 = vpop.eup %9071  ;;  %v5628_v38 = vadd.f32 %v8810_v32, %v5435_v20 }
 0x596   : > { %v9074_v7 = vpop.eup %9073  ;;  %9089 = vrcp.f32 %v5877_v17  ;;  %v5876_v35 = vadd.f32 1.0, %v9072_v40  ;;  %v11488_v30 = vadd.f32 %v5797_v44, %v5627_v61  ;;  %v3285_v61 = vld [vmem:[%s11765_s8 + $0x20] sm:$0xff] }
 0x597   : > { %5918 = vrot.lane.b32.xlu0 %v9070_v51, %s9284_s21  ;;  %v9076_v54 = vpop.eup %9075  ;;  %9091 = vpow2.f32 %v6606_v59  ;;  %v11497_v52 = vadd.f32 %v8866_v41, %v5628_v38  ;;  %v11513_v51 = vld [vmem:[%s11764_s7 + $0x70] sm:$0xff]  ;;  %v3281_v41 = vld [vmem:[%s11765_s8] sm:$0xff] }
 0x598   : > { %6227 = vperm.xlu1 %8988, %v11472_v4   ;;  %v9078_v33 = vpop.eup %9077  ;;  %9093 = vrcp.f32 %v5876_v35  ;;  %v5879_v25 = vadd.f32 1.0, %v9076_v54  ;;  %v6607_v27 = vmul.f32 -1.442695, %v11488_v30  ;;  %v3283_v54 = vld [vmem:[%s11765_s8 + $0x10] sm:$0xff] }
 0x599   : > { %v9080_v58 = vpop.eup %9079  ;;  %9095 = vpow2.f32 %v6605_v36  ;;  %v6608_v34 = vmul.f32 -1.442695, %v11497_v52 }
 0x59a   : > { %v9082_v48 = vpop.eup %9081  ;;  %9097 = vrcp.f32 %v5879_v25  ;;  %v5878_v43 = vadd.f32 1.0, %v9080_v58  ;;  %v11963_v58 = vld [vmem:[#allocation60_spill] sm:$0xff] }
 0x59b   : > { %5924 = vrot.lane.b32.xlu0 %v9074_v7, %s9284_s21  ;;  %v9084_v24 = vpop.eup %9083  ;;  %9099 = vpow2.f32 %v6607_v27  ;;  %v3289_v27 = vld [vmem:[%s11765_s8 + $0x40] sm:$0xff] }
 0x59c   : > { %6232 = vperm.xlu1 %8988, %v11485_v16   ;;  %v9086_v53 = vpop.eup %9085  ;;  %9101 = vrcp.f32 %v5878_v43  ;;  %v5881_v8 = vadd.f32 1.0, %v9084_v24  ;;  %v11964_v24 = vld [vmem:[#allocation20_spill] sm:$0xff] }
 0x59d   : > { %9103 = vpow2.f32 %v6608_v34  ;;  %v3291_v43 = vld [vmem:[%s11765_s8 + $0x50] sm:$0xff]  ;;  %v3293_v34 = vld [vmem:[%s11765_s8 + $0x60] sm:$0xff] }
 0x59e   : > { %9105 = vrcp.f32 %v5881_v8 }
 0x59f   : > { %5922 = vrot.lane.b32.xlu0 %v9078_v33, %s9284_s21  ;;  %v11962_v33 = vld [vmem:[#allocation61_spill] sm:$0xff] }
 0x5a0   : > { %6237 = vperm.xlu1 %8988, %v11495_v23   ;;  %v9088_v37 = vpop.eup %9087 }
 0x5a1   : > { %v5880_v13 = vadd.f32 1.0, %v9088_v37 }
 0x5a3   : > { %5928 = vrot.lane.b32.xlu0 %v9082_v48, %s9284_s21  ;;  %v9090_v22 = vpop.eup %9089  ;;  %9107 = vrcp.f32 %v5880_v13  ;;  %v3287_v48 = vld [vmem:[%s11765_s8 + $0x30] sm:$0xff] }
 0x5a4   : > { %6242 = vperm.xlu1 %8988, %v11505_v60   ;;  %v9092_v46 = vpop.eup %9091 }
 0x5a5   : > { %v9094_v32 = vpop.eup %9093  ;;  %v5883_v40 = vadd.f32 1.0, %v9092_v46 }
 0x5a6   : > { %v9096_v55 = vpop.eup %9095 }
 0x5a7   : > { %5926 = vrot.lane.b32.xlu0 %v9086_v53, %s9284_s21  ;;  %v9098_v17 = vpop.eup %9097  ;;  %9109 = vrcp.f32 %v5883_v40  ;;  %v5882_v50 = vadd.f32 1.0, %v9096_v55  ;;  %v11965_v53 = vld [vmem:[#allocation22_spill] sm:$0xff] }
 0x5a8   : > { %6247 = vperm.xlu1 %8988, %v11513_v51   ;;  %v9100_v7 = vpop.eup %9099 }
 0x5a9   : > { %v9102_v62 = vpop.eup %9101  ;;  %9111 = vrcp.f32 %v5882_v50  ;;  %v5884_v3 = vadd.f32 1.0, %v9100_v7 }
 0x5aa   : > { %v9104_v49 = vpop.eup %9103 }
 0x5ab   : > { %5932 = vrot.lane.b32.xlu0 %v9090_v22, %s9284_s21  ;;  %v9106_v59 = vpop.eup %9105  ;;  %v5885_v35 = vadd.f32 1.0, %v9104_v49  ;;  %9113 = vrcp.f32 %v5884_v3 }
 0x5ac   : > { %6252 = vperm.xlu1 %8988, %v3152_v10  }
 0x5ad   : > { %9115 = vrcp.f32 %v5885_v35 }
 0x5af   : > { %5930 = vrot.lane.b32.xlu0 %v9094_v32, %s9284_s21 }
 0x5b0   : > { %6321 = vperm.xlu1 %8988, %v3281_v41   ;;  %v9108_v44 = vpop.eup %9107 }
 0x5b3   : > { %5936 = vrot.lane.b32.xlu0 %v9098_v17, %s9284_s21 }
 0x5b4   : > { %6326 = vperm.xlu1 %8988, %v11961_v28   ;;  %v9110_v20 = vpop.eup %9109 }
 0x5b6   : > { %v9112_v36 = vpop.eup %9111 }
 0x5b7   : > { %5934 = vrot.lane.b32.xlu0 %v9102_v62, %s9284_s21 }
 0x5b8   : > { %6331 = vperm.xlu1 %8988, %v3283_v54   ;;  %v9114_v25 = vpop.eup %9113 }
 0x5b9   : > { %v3335_v3 = vpop.permute.xlu1 %3334 }
 0x5ba   : > { %v9116_v38 = vpop.eup %9115 }
 0x5bb   : > { %5940 = vrot.lane.b32.xlu0 %v9106_v59, %s9284_s21  ;;  %v11967_v59 = vld [vmem:[#allocation19_spill] sm:$0xff] }
 0x5bc   : > { %6336 = vperm.xlu1 %8988, %v11962_v33   ;;  %v11968_v33 = vld [vmem:[#allocation37_spill] sm:$0xff] }
 0x5bf   : > { %5938 = vrot.lane.b32.xlu0 %v9108_v44, %s9284_s21 }
 0x5c0   : > { %6341 = vperm.xlu1 %8988, %v3285_v61  }
 0x5c3   : > { %5944 = vrot.lane.b32.xlu0 %v9110_v20, %s9284_s21 }
 0x5c4   : > { %6346 = vperm.xlu1 %8988, %v11963_v58  }
 0x5c5   : > { %v3345_v20 = vpop.permute.xlu1 %3344 }
 0x5c7   : > { %5942 = vrot.lane.b32.xlu0 %v9112_v36, %s9284_s21  ;;  %v9126_v36 = vld [vmem:[%s9467_s23 + $0x48] sm:$0xff] }
 0x5c8   : > { %6351 = vperm.xlu1 %8988, %v3287_v48  }
 0x5cb   : > { %5946 = vrot.lane.b32.xlu0 %v9114_v25, %s9284_s21 }
 0x5cc   : > { %6361 = vperm.xlu1 %8988, %v3289_v27  }
 0x5cf   : > { %5948 = vrot.lane.b32.xlu0 %v9116_v38, %s9284_s21  ;;  %s9213_s21 = sshll.u32 %s9286_s13, 4  ;;  %s9214_s21 = int_to_ptr.vmem [resolvable:$false] %s9213_s21 }
 0x5d0   : > { %6366 = vperm.xlu1 %8988, %v11964_v24   ;;  %s9215_s24 = scalar_lea.vmem %s9214_s21, 8192  ;;  %p9216_p10 = scmp.lt.s32.totalorder %s11713_s27, %s9214_s21 }
 0x5d3   : > { %3190 = vperm.xlu0 %8987, %v11437_v47   ;;  %v3295_v47 = vld [vmem:[%s11765_s8 + $0x70] sm:$0xff] }
 0x5d4   : > { %6371 = vperm.xlu1 %8988, %v3291_v43  }
 0x5d7   : > { %3200 = vperm.xlu0 %8987, %v11459_v5   ;;  %v11966_v5 = vld [vmem:[#allocation66_spill] sm:$0xff] }
 0x5d8   : > { %6376 = vperm.xlu1 %8988, %v11965_v53   ;;  %v9127_v53 = vld [vmem:[%s9467_s23 + $0x58] sm:$0xff] }
 0x5db   : > { %3205 = vperm.xlu0 %8987, %v11472_v4   ;;  %v11566_v4 = vpop.permute.xlu0 %3185 }
 0x5dc   : > { %6381 = vperm.xlu1 %8988, %v3293_v34  }
 0x5df   : > { %3210 = vperm.xlu0 %8987, %v11485_v16  }
 0x5e0   : > { %6386 = vperm.xlu1 %8988, %v11267_v18  }
 0x5e3   : > { %3215 = vperm.xlu0 %8987, %v11495_v23  }
 0x5e4   : > { %6391 = vperm.xlu1 %8988, %v3295_v47  }
 0x5e7   : > { %3220 = vperm.xlu0 %8987, %v11505_v60  }
 0x5e8   : > { %6396 = vperm.xlu1 %8988, %v11966_v5  }
 0x5eb   : > { %3225 = vperm.xlu0 %8987, %v11513_v51  }
 0x5ef   : > { %3230 = vperm.xlu0 %8987, %v3152_v10  }
 0x5f3   : > { %3299 = vperm.xlu0 %8987, %v3281_v41  }
 0x5f7   : > { %3309 = vperm.xlu0 %8987, %v3283_v54  }
 0x5fb   : > { %3319 = vperm.xlu0 %8987, %v3285_v61  }
 0x5ff   : > { %3329 = vperm.xlu0 %8987, %v3287_v48  }
 0x603   : > { %3339 = vperm.xlu0 %8987, %v3289_v27   ;;  %v11969_v27 = vld [vmem:[#allocation24_spill] sm:$0xff] }
 0x605   : > { %v5921_v18 = vpop.permute.xlu0 %5920 }
 0x606   : > { %v5951_v60 = vmul.f32 %v5921_v18, %v11312_v42 }
 0x607   : > { %3349 = vperm.xlu0 %8987, %v3291_v43   ;;  %v3355_v43 = vpop.permute.xlu1 %3354 }
 0x609   : > { %v5919_v16 = vpop.permute.xlu0 %5918 }
 0x60a   : > { %v5950_v23 = vmul.f32 %v5919_v16, %v11318_v45 }
 0x60b   : > { %3359 = vperm.xlu0 %8987, %v3293_v34  }
 0x60c   : > { %8899 = vmatprep.mubr.f32.mxu1 %v5950_v23 }
 0x60d   : > { %8900 = vmatmul.mubr.f32.vlgmr.msra.gmra.mxu1 %v5951_v60  ;;  %v5925_v37 = vpop.permute.xlu0 %5924  ;;  %v3365_v60 = vpop.permute.xlu1 %3364 }
 0x60e   : > { %v5953_v51 = vmul.f32 %v5925_v37, %v11332_v15  ;;  %v9128_v37 = vld [vmem:[%s9467_s23 + $0x68] sm:$0xff] }
 0x60f   : > { %3369 = vperm.xlu0 %8987, %v3295_v47  }
 0x611   : > { %v5923_v8 = vpop.permute.xlu0 %5922 }
 0x612   : > { %v5952_v22 = vmul.f32 %v5923_v8, %v11336_v1 }
 0x614   : > { %8902 = vmatprep.mubr.f32.mxu1 %v5952_v22 }
 0x615   : > { %8903 = vmatmul.mubr.f32.gmra.mxu1 %v5953_v51  ;;  %v5929_v46 = vpop.permute.xlu0 %5928 }
 0x616   : > { %v5955_v45 = vmul.f32 %v5929_v46, %v11350_v11  ;;  %v11970_v46 = vld [vmem:[#allocation18_spill] sm:$0xff] }
 0x619   : > { %v5927_v13 = vpop.permute.xlu0 %5926 }
 0x61a   : > { %v5954_v32 = vmul.f32 %v5927_v13, %v11361_v56  ;;  %v11971_v13 = vld [vmem:[#allocation39_spill] sm:$0xff] }
 0x61c   : > { %8905 = vmatprep.mubr.f32.mxu1 %v5954_v32  ;;  %v3233_v32 = vadd.f32 %v11971_v13, %v11970_v46 }
 0x61d   : > { %8906 = vmatmul.mubr.f32.gmra.mxu1 %v5955_v45  ;;  %v5933_v42 = vpop.permute.xlu0 %5932 }
 0x61e   : > { %v5957_v40 = vmul.f32 %v5933_v42, %v11377_v31 }
 0x621   : > { %v5931_v10 = vpop.permute.xlu0 %5930 }
 0x622   : > { %v5956_v55 = vmul.f32 %v5931_v10, %v11391_v57 }
 0x624   : > { %8908 = vmatprep.mubr.f32.mxu1 %v5956_v55  ;;  %v9129_v55 = vld [vmem:[%s9467_s23] sm:$0xff] }
 0x625   : > { %8909 = vmatmul.mubr.f32.gmra.mxu1 %v5957_v40  ;;  %v5937_v1 = vpop.permute.xlu0 %5936  ;;  %v3249_v40 = vadd.f32 %v9129_v55, %v3233_v32 }
 0x626   : > { %v5959_v41 = vmul.f32 %v5937_v1, %v11410_v26 }
 0x627   : > { %vm3265_vm8 = vcmp.gt.f32.partialorder %v3249_v40, 0.0 }
 0x629   : > { %v5935_v15 = vpop.permute.xlu0 %5934 }
 0x62a   : > { %v5958_v17 = vmul.f32 %v5935_v15, %v11422_v63  ;;  %v3375_v15 = vpop.permute.xlu1 %3374 }
 0x62c   : > { %8911 = vmatprep.mubr.f32.mxu1 %v5958_v17  ;;  %v9130_v17 = vld [vmem:[%s9467_s23 + $0x78] sm:$0xff] }
 0x62d   : > { %8912 = vmatmul.mubr.f32.gmra.mxu1 %v5959_v41  ;;  %v5941_v56 = vpop.permute.xlu0 %5940 }
 0x62e   : > { %v5961_v50 = vmul.f32 %v5941_v56, %v11440_v19 }
 0x631   : > { %v5939_v11 = vpop.permute.xlu0 %5938 }
 0x632   : > { %v5960_v7 = vmul.f32 %v5939_v11, %v11450_v21 }
 0x634   : > { %8914 = vmatprep.mubr.f32.mxu1 %v5960_v7 }
 0x635   : > { %8915 = vmatmul.mubr.f32.gmra.mxu1 %v5961_v50  ;;  %v5945_v31 = vpop.permute.xlu0 %5944  ;;  %v9131_v50 = vld [vmem:[%s9467_s23 + $0x10] sm:$0xff] }
 0x636   : > { %v5963_v28 = vmul.f32 %v5945_v31, %v11464_v0 }
 0x639   : > { %v5943_v57 = vpop.permute.xlu0 %5942 }
 0x63a   : > { %v5962_v62 = vmul.f32 %v5943_v57, %v11477_v9  ;;  %v9125_v9 = vld [vmem:[%s9467_s23 + $0x38] sm:$0xff] }
 0x63c   : > { %8917 = vmatprep.mubr.f32.mxu1 %v5962_v62 }
 0x63d   : > { %8918 = vmatmul.mubr.f32.gmra.mxu1 %v5963_v28  ;;  %v5947_v26 = vpop.permute.xlu0 %5946 }
 0x63e   : > { %v5964_v63 = vmul.f32 %v5947_v26, %v11488_v30 }
 0x640   : > { %8920 = vmatprep.mubr.f32.mxu1 %v5964_v63  ;;  %v9132_v63 = vld [vmem:[%s9467_s23 + $0x20] sm:$0xff] }
 0x641   : > { %v5949_v49 = vpop.permute.xlu0 %5948 }
 0x642   : > { %v5965_v19 = vmul.f32 %v5949_v49, %v11497_v52 }
 0x644   : > { %8921 = vmatmul.mubr.f32.gmra.mxu1 %v5965_v19  ;;  %v11974_v19 = vld [vmem:[#allocation62_spill] sm:$0xff] }
 0x64e   : > { %v3191_v21 = vpop.permute.xlu0 %3190 }
 0x64f   : > { %v3240_v54 = vadd.f32 %v3191_v21, %v11967_v59  ;;  %v3239_v21 = vadd.f32 %v11566_v4, %v11974_v19 }
 0x651   : > { %v3256_v35 = vadd.f32 %v9125_v9, %v3240_v54  ;;  %v9133_v54 = vld [vmem:[%s9467_s23 + $0x30] sm:$0xff] }
 0x652   : > { %v3201_v0 = vpop.permute.xlu0 %3200  ;;  %v3255_v9 = vadd.f32 %v9133_v54, %v3239_v21 }
 0x653   : > { %vm3272_vm3 = vcmp.gt.f32.partialorder %v3256_v35, 0.0  ;;  %v3384_v44 = vmul.f32 %v3335_v3, %v3256_v35  ;;  %v3242_v30 = vadd.f32 %v3201_v0, %v11968_v33  ;;  %v9134_v0 = vld [vmem:[%s9467_s23 + $0x40] sm:$0xff] }
 0x654   : > { %vm3271_vm11 = vcmp.gt.f32.partialorder %v3255_v9, 0.0 }
 0x655   : > { %v3400_v61 = vsel %vm3272_vm3, %v3256_v35, %v3384_v44  ;;  %v3258_v58 = vadd.f32 %v9126_v36, %v3242_v30  ;;  %v3257_v44 = vadd.f32 %v9134_v0, %v11398_v29 }
 0x656   : > { %3416 = vst [vmem:[%s11428_s20 + $0x38] sm:$0xff] %v3400_v61  ;;  %v11589_v52 = vpop.permute.xlu0 %3205 }
 0x657   : > { %vm3274_vm4 = vcmp.gt.f32.partialorder %v3258_v58, 0.0  ;;  %v3386_v25 = vmul.f32 %v3345_v20, %v3258_v58  ;;  %v11975_v20 = vld [vmem:[#allocation23_spill] sm:$0xff]  ;;  %vm3273_vm12 = vcmp.gt.f32.partialorder %v3257_v44, 0.0 }
 0x658   : > { %v3243_v4 = vadd.f32 %v11589_v52, %v11975_v20  ;;  %v9136_v52 = vld [vmem:[%s9467_s23 + $0x60] sm:$0xff] }
 0x659   : > { %v3402_v48 = vsel %vm3274_vm4, %v3258_v58, %v3386_v25  ;;  %v9135_v25 = vld [vmem:[%s9467_s23 + $0x50] sm:$0xff] }
 0x65a   : > { %3418 = vst [vmem:[%s11428_s20 + $0x48] sm:$0xff] %v3402_v48  ;;  %v3211_v38 = vpop.permute.xlu0 %3210  ;;  %v3259_v48 = vadd.f32 %v9135_v25, %v3243_v4 }
 0x65b   : > { %v3244_v24 = vadd.f32 %v3211_v38, %v11969_v27  ;;  %v11976_v38 = vld [vmem:[#allocation42_spill] sm:$0xff] }
 0x65c   : > { %vm3275_vm13 = vcmp.gt.f32.partialorder %v3259_v48, 0.0 }
 0x65d   : > { %v3260_v34 = vadd.f32 %v9127_v53, %v3244_v24 }
 0x65e   : > { %v11594_v47 = vpop.permute.xlu0 %3215 }
 0x65f   : > { %vm3276_vm5 = vcmp.gt.f32.partialorder %v3260_v34, 0.0  ;;  %v3388_v5 = vmul.f32 %v3355_v43, %v3260_v34  ;;  %v3245_v29 = vadd.f32 %v11594_v47, %v11976_v38 }
 0x661   : > { %v3404_v18 = vsel %vm3276_vm5, %v3260_v34, %v3388_v5  ;;  %v3261_v53 = vadd.f32 %v9136_v52, %v3245_v29 }
 0x662   : > { %3420 = vst [vmem:[%s11428_s20 + $0x58] sm:$0xff] %v3404_v18  ;;  %v3221_v16 = vpop.permute.xlu0 %3220 }
 0x663   : > { %v3246_v23 = vadd.f32 %v3221_v16, %v11314_v2  ;;  %v11972_v2 = vld [vmem:[#allocation25_spill] sm:$0xff]  ;;  %vm3277_vm14 = vcmp.gt.f32.partialorder %v3261_v53, 0.0 }
 0x664   : > { %v3235_v1 = vadd.f32 %v11328_v6, %v11972_v2 }
 0x665   : > { %v3262_v8 = vadd.f32 %v9128_v37, %v3246_v23  ;;  %v9137_v23 = vld [vmem:[%s9467_s23 + $0x70] sm:$0xff] }
 0x666   : > { %v3226_v22 = vpop.permute.xlu0 %3225  ;;  %v3251_v31 = vadd.f32 %v9131_v50, %v3235_v1 }
 0x667   : > { %vm3278_vm6 = vcmp.gt.f32.partialorder %v3262_v8, 0.0  ;;  %v3390_v51 = vmul.f32 %v3365_v60, %v3262_v8  ;;  %v3247_v34 = vadd.f32 %v3226_v22, %v11346_v14  ;;  %v6178_v22 = vpop.permute.xlu1 %6177 }
 0x668   : > { %vm3267_vm9 = vcmp.gt.f32.partialorder %v3251_v31, 0.0 }
 0x669   : > { %v3406_v45 = vsel %vm3278_vm6, %v3262_v8, %v3390_v51  ;;  %v3263_v60 = vadd.f32 %v9137_v23, %v3247_v34 }
 0x66a   : > { %3422 = vst [vmem:[%s11428_s20 + $0x68] sm:$0xff] %v3406_v45  ;;  %v3231_v42 = vpop.permute.xlu0 %3230 }
 0x66b   : > { %v3248_v10 = vadd.f32 %v3231_v42, %v11366_v12  ;;  %v11973_v12 = vld [vmem:[#allocation40_spill] sm:$0xff]  ;;  %vm3279_vm15 = vcmp.gt.f32.partialorder %v3263_v60, 0.0  ;;  %v6183_v42 = vpop.permute.xlu1 %6182 }
 0x66c   : > { %v3237_v57 = vadd.f32 %v11379_v39, %v11973_v12 }
 0x66d   : > { %v3264_v41 = vadd.f32 %v9130_v17, %v3248_v10 }
 0x66e   : > { %v3300_v56 = vpop.permute.xlu0 %3299  ;;  %v3253_v49 = vadd.f32 %v9132_v63, %v3237_v57 }
 0x66f   : > { %vm3280_vm7 = vcmp.gt.f32.partialorder %v3264_v41, 0.0  ;;  %v3392_v11 = vmul.f32 %v3375_v15, %v3264_v41  ;;  %v3377_v7 = vmul.f32 %v3300_v56, %v3249_v40  ;;  %v6188_v55 = vpop.permute.xlu1 %6187 }
 0x670   : > { %vm3269_vm10 = vcmp.gt.f32.partialorder %v3253_v49, 0.0 }
 0x671   : > { %v3408_v62 = vsel %vm3280_vm7, %v3264_v41, %v3392_v11  ;;  %v3393_v28 = vsel %vm3265_vm8, %v3249_v40, %v3377_v7 }
 0x672   : > { %3424 = vst [vmem:[%s11428_s20 + $0x78] sm:$0xff] %v3408_v62  ;;  %3409 = vst [vmem:[%s11428_s20] sm:$0xff] %v3393_v28  ;;  %v3310_v6 = vpop.permute.xlu0 %3309 }
 0x673   : > { %v3379_v26 = vmul.f32 %v3310_v6, %v3251_v31  ;;  %v6193_v1 = vpop.permute.xlu1 %6192 }
 0x675   : > { %v3395_v3 = vsel %vm3267_vm9, %v3251_v31, %v3379_v26 }
 0x676   : > { %3411 = vst [vmem:[%s11428_s20 + $0x10] sm:$0xff] %v3395_v3  ;;  %v3320_v59 = vpop.permute.xlu0 %3319 }
 0x677   : > { %v3381_v39 = vmul.f32 %v3320_v59, %v3253_v49  ;;  %v11633_v41 = vpop.permute.xlu1 %6197 }
 0x679   : > { %v3397_v35 = vsel %vm3269_vm10, %v3253_v49, %v3381_v39  ;;  %v9138_v39 = vld [vmem:[%s11765_s8 + $0x38] sm:$0xff] }
 0x67a   : > { %3413 = vst [vmem:[%s11428_s20 + $0x20] sm:$0xff] %v3397_v35  ;;  %v3330_v33 = vpop.permute.xlu0 %3329 }
 0x67b   : > { %v3383_v30 = vmul.f32 %v3330_v33, %v3255_v9  ;;  %v11635_v11 = vpop.permute.xlu1 %6202 }
 0x67d   : > { %v3399_v61 = vsel %vm3271_vm11, %v3255_v9, %v3383_v30  ;;  %v9139_v30 = vld [vmem:[%s9467_s23 + $0x80] sm:$0xff] }
 0x67e   : > { %3415 = vst [vmem:[%s11428_s20 + $0x30] sm:$0xff] %v3399_v61  ;;  %v3340_v36 = vpop.permute.xlu0 %3339 }
 0x67f   : > { %v3385_v58 = vmul.f32 %v3340_v36, %v3257_v44  ;;  %v11637_v50 = vpop.permute.xlu1 %6207 }
 0x681   : > { %v3401_v27 = vsel %vm3273_vm12, %v3257_v44, %v3385_v58 }
 0x682   : > { %3417 = vst [vmem:[%s11428_s20 + $0x40] sm:$0xff] %v3401_v27  ;;  %v3350_v24 = vpop.permute.xlu0 %3349 }
 0x683   : > { %v3387_v43 = vmul.f32 %v3350_v24, %v3259_v48  ;;  %v11639_v57 = vpop.permute.xlu1 %6212 }
 0x685   : > { %v3403_v5 = vsel %vm3275_vm13, %v3259_v48, %v3387_v43  ;;  %v9140_v48 = vld [vmem:[%s9467_s23 + $0x88] sm:$0xff] }
 0x686   : > { %3419 = vst [vmem:[%s11428_s20 + $0x50] sm:$0xff] %v3403_v5  ;;  %v3360_v18 = vpop.permute.xlu0 %3359 }
 0x687   : > { %v3389_v16 = vmul.f32 %v3360_v18, %v3261_v53  ;;  %v11641_v6 = vpop.permute.xlu1 %6217 }
 0x689   : > { %v3405_v37 = vsel %vm3277_vm14, %v3261_v53, %v3389_v16  ;;  %v9141_v53 = vld [vmem:[%s9467_s23 + $0x90] sm:$0xff] }
 0x68a   : > { %3421 = vst [vmem:[%s11428_s20 + $0x60] sm:$0xff] %v3405_v37  ;;  %v3370_v47 = vpop.permute.xlu0 %3369 }
 0x68b   : > { %v3391_v8 = vmul.f32 %v3370_v47, %v3263_v60  ;;  %v11643_v26 = vpop.permute.xlu1 %6222 }
 0x68d   : > { %v3407_v51 = vsel %vm3279_vm15, %v3263_v60, %v3391_v8  ;;  %v9142_v60 = vld [vmem:[%s9467_s23 + $0x98] sm:$0xff] }
 0x68e   : > { %3423 = vst [vmem:[%s11428_s20 + $0x70] sm:$0xff] %v3407_v51 }
 0x68f   : > { %v11645_v63 = vpop.permute.xlu1 %6227 }
 0x693   : > { %v11647_v49 = vpop.permute.xlu1 %6232 }
 0x697   : > { %v11649_v19 = vpop.permute.xlu1 %6237 }
 0x69b   : > { %v11651_v21 = vpop.permute.xlu1 %6242 }
 0x69f   : > { %v11653_v3 = vpop.permute.xlu1 %6247 }
 0x6a3   : > { %v11655_v59 = vpop.permute.xlu1 %6252 }
 0x6a7   : > { %v6322_v54 = vpop.permute.xlu1 %6321 }
 0x6ab   : > { %v6327_v9 = vpop.permute.xlu1 %6326 }
 0x6af   : > { %v6332_v35 = vpop.permute.xlu1 %6331 }
 0x6b3   : > { %v6337_v0 = vpop.permute.xlu1 %6336 }
 0x6b7   : > { %v6342_v4 = vpop.permute.xlu1 %6341 }
 0x6bb   : > { %v6347_v43 = vpop.permute.xlu1 %6346 }
 0x6bf   : > { %v6352_v47 = vpop.permute.xlu1 %6351 }
 0x6cd   : > { %v8901_v46 = vpop.f32.mrf.mxu1 }
 0x6cf   : > { %v6048_v13 = vpop.f32.mrf.mxu1 }
 0x6d0   : > { %6127 = vxpose.xlu0.b32.start [1/16] %v6048_v13, 128 }
 0x6d4   : > { %6128 = vxpose.xlu0.b32.cont [2/16] %v8901_v46, 128 }
 0x6d5   : > { %v8904_v32 = vpop.f32.mrf.mxu1 }
 0x6d7   : > { %v6058_v14 = vpop.f32.mrf.mxu1 }
 0x6d8   : > { %6129 = vxpose.xlu0.b32.cont [3/16] %v6058_v14, 128 }
 0x6dc   : > { %6130 = vxpose.xlu0.b32.cont [4/16] %v8904_v32, 128  ;;  %v9143_v32 = vld [vmem:[%s9467_s23 + $0xa0] sm:$0xff] }
 0x6dd   : > { %v8907_v45 = vpop.f32.mrf.mxu1 }
 0x6df   : > { %v6068_v10 = vpop.f32.mrf.mxu1 }
 0x6e0   : > { %6131 = vxpose.xlu0.b32.cont [5/16] %v6068_v10, 128  ;;  %v6362_v10 = vpop.permute.xlu1 %6361 }
 0x6e4   : > { %6132 = vxpose.xlu0.b32.cont [6/16] %v8907_v45, 128 }
 0x6e5   : > { %v8910_v40 = vpop.f32.mrf.mxu1 }
 0x6e7   : > { %v6078_v2 = vpop.f32.mrf.mxu1 }
 0x6e8   : > { %6133 = vxpose.xlu0.b32.cont [7/16] %v6078_v2, 128 }
 0x6ec   : > { %6134 = vxpose.xlu0.b32.cont [8/16] %v8910_v40, 128  ;;  %v9144_v40 = vld [vmem:[%s9467_s23 + $0xa8] sm:$0xff] }
 0x6ed   : > { %v8913_v15 = vpop.f32.mrf.mxu1 }
 0x6ef   : > { %v6088_v17 = vpop.f32.mrf.mxu1 }
 0x6f0   : > { %6135 = vxpose.xlu0.b32.cont [9/16] %v6088_v17, 128 }
 0x6f4   : > { %6136 = vxpose.xlu0.b32.cont [10/16] %v8913_v15, 128 }
 0x6f5   : > { %v8916_v56 = vpop.f32.mrf.mxu1 }
 0x6f7   : > { %v6098_v7 = vpop.f32.mrf.mxu1 }
 0x6f8   : > { %6137 = vxpose.xlu0.b32.cont [11/16] %v6098_v7, 128 }
 0x6fc   : > { %6138 = vxpose.xlu0.b32.cont [12/16] %v8916_v56, 128  ;;  %v9145_v56 = vld [vmem:[%s9467_s23 + $0xb0] sm:$0xff] }
 0x6fd   : > { %v8919_v31 = vpop.f32.mrf.mxu1 }
 0x6ff   : > { %v6108_v12 = vpop.f32.mrf.mxu1 }
 0x700   : > { %6139 = vxpose.xlu0.b32.cont [13/16] %v6108_v12, 128 }
 0x704   : > { %6140 = vxpose.xlu0.b32.cont [14/16] %v8919_v31, 128  ;;  %v8922_v62 = vpop.f32.mrf.mxu1  ;;  %v6367_v31 = vpop.permute.xlu1 %6366 }
 0x706   : > { %v6118_v28 = vpop.f32.mrf.mxu1 }
 0x708   : > { %6141 = vxpose.xlu0.b32.cont [15/16] %v6118_v28, 128 }
 0x70c   : > { %6142 = vxpose.xlu0.b32.end [16/16] %v8922_v62, 128 }
 0x735   : > { %6356 = vperm.xlu0 %8987, %v9138_v39  }
 0x74c   : > { %v6143_v44 = vpop.trf.xlu0 }
 0x74d   : > { %v6255_v33 = vadd.f32 %v6178_v22, %v6143_v44 }
 0x74f   : > { %v6271_v20 = vadd.f32 %v9139_v30, %v6255_v33  ;;  %v9147_v30 = vld [vmem:[%s9467_s23 + $0xc8] sm:$0xff] }
 0x750   : > { %v6144_v61 = vpop.trf.xlu0 }
 0x751   : > { %vm6287_vm0 = vcmp.gt.f32.partialorder %v6271_v20, 0.0  ;;  %v6399_v36 = vmul.f32 %v6322_v54, %v6271_v20  ;;  %v6256_v58 = vadd.f32 %v6183_v42, %v6144_v61  ;;  %v6372_v54 = vpop.permute.xlu1 %6371 }
 0x753   : > { %v6415_v25 = vsel %vm6287_vm0, %v6271_v20, %v6399_v36  ;;  %v6272_v38 = vadd.f32 %v9140_v48, %v6256_v58 }
 0x754   : > { %6609 = vst [vmem:[%s11428_s20 + $0x80] sm:$0xff] %v6415_v25  ;;  %v6145_v29 = vpop.trf.xlu0  ;;  %v9148_v25 = vld [vmem:[%s9467_s23 + $0xd0] sm:$0xff] }
 0x755   : > { %vm6288_vm1 = vcmp.gt.f32.partialorder %v6272_v38, 0.0  ;;  %v6400_v27 = vmul.f32 %v6327_v9, %v6272_v38  ;;  %v6257_v24 = vadd.f32 %v6188_v55, %v6145_v29  ;;  %v9146_v9 = vld [vmem:[%s9467_s23 + $0xc0] sm:$0xff] }
 0x757   : > { %v6416_v52 = vsel %vm6288_vm1, %v6272_v38, %v6400_v27  ;;  %v6273_v34 = vadd.f32 %v9141_v53, %v6257_v24 }
 0x758   : > { %6610 = vst [vmem:[%s11428_s20 + $0x88] sm:$0xff] %v6416_v52  ;;  %v6146_v5 = vpop.trf.xlu0 }
 0x759   : > { %vm6289_vm2 = vcmp.gt.f32.partialorder %v6273_v34, 0.0  ;;  %v6401_v18 = vmul.f32 %v6332_v35, %v6273_v34  ;;  %v6258_v16 = vadd.f32 %v6193_v1, %v6146_v5 }
 0x75b   : > { %v6417_v23 = vsel %vm6289_vm2, %v6273_v34, %v6401_v18  ;;  %v6274_v37 = vadd.f32 %v9142_v60, %v6258_v16  ;;  %v9150_v18 = vld [vmem:[%s9467_s23 + $0xe0] sm:$0xff] }
 0x75c   : > { %6611 = vst [vmem:[%s11428_s20 + $0x90] sm:$0xff] %v6417_v23  ;;  %v6147_v8 = vpop.trf.xlu0 }
 0x75d   : > { %vm6290_vm3 = vcmp.gt.f32.partialorder %v6274_v37, 0.0  ;;  %v6402_v51 = vmul.f32 %v6337_v0, %v6274_v37  ;;  %v6259_v46 = vadd.f32 %v11633_v41, %v6147_v8  ;;  %v9151_v8 = vld [vmem:[%s9467_s23 + $0xe8] sm:$0xff] }
 0x75f   : > { %v6418_v13 = vsel %vm6290_vm3, %v6274_v37, %v6402_v51  ;;  %v6275_v14 = vadd.f32 %v9143_v32, %v6259_v46 }
 0x760   : > { %6612 = vst [vmem:[%s11428_s20 + $0x98] sm:$0xff] %v6418_v13  ;;  %v6148_v22 = vpop.trf.xlu0 }
 0x761   : > { %vm6291_vm4 = vcmp.gt.f32.partialorder %v6275_v14, 0.0  ;;  %v6403_v45 = vmul.f32 %v6342_v4, %v6275_v14  ;;  %v6260_v42 = vadd.f32 %v11635_v11, %v6148_v22  ;;  %v6377_v4 = vpop.permute.xlu1 %6376  ;;  %v9152_v22 = vld [vmem:[%s9467_s23 + $0xf0] sm:$0xff] }
 0x763   : > { %v6419_v55 = vsel %vm6291_vm4, %v6275_v14, %v6403_v45  ;;  %v6276_v2 = vadd.f32 %v9144_v40, %v6260_v42  ;;  %v9153_v40 = vld [vmem:[%s9467_s23 + $0xf8] sm:$0xff] }
 0x764   : > { %6613 = vst [vmem:[%s11428_s20 + $0xa0] sm:$0xff] %v6419_v55  ;;  %v6149_v1 = vpop.trf.xlu0 }
 0x765   : > { %vm6292_vm5 = vcmp.gt.f32.partialorder %v6276_v2, 0.0  ;;  %v6404_v15 = vmul.f32 %v6347_v43, %v6276_v2  ;;  %v6261_v17 = vadd.f32 %v11637_v50, %v6149_v1  ;;  %v6382_v27 = vpop.permute.xlu1 %6381  ;;  %v9149_v43 = vld [vmem:[%s9467_s23 + $0xd8] sm:$0xff] }
 0x767   : > { %v6420_v41 = vsel %vm6292_vm5, %v6276_v2, %v6404_v15  ;;  %v6277_v7 = vadd.f32 %v9145_v56, %v6261_v17 }
 0x768   : > { %6614 = vst [vmem:[%s11428_s20 + $0xa8] sm:$0xff] %v6420_v41  ;;  %v11676_v12 = vpop.trf.xlu0  ;;  %v9154_v41 = vld [vmem:[%s9467_s23 + $0xb8] sm:$0xff]  ;;  %s9209_s23 = scalar_lea.vmem %s11713_s27, 4096 }
 0x769   : > { %vm6293_vm6 = vcmp.gt.f32.partialorder %v6277_v7, 0.0  ;;  %v6405_v11 = vmul.f32 %v6352_v47, %v6277_v7  ;;  %v6387_v23 = vpop.permute.xlu1 %6386  ;;  %v6262_v17 = vadd.f32 %v11639_v57, %v11676_v12  ;;  %p9210_p3 = scmp.ne.s32.totalorder %s11713_s27, %s9209_s23  ;;  %p9217_p12 = scmp.lt.s32.totalorder %s9215_s24, %s9209_s23 }
 0x76b   : > { %v6421_v62 = vsel %vm6293_vm6, %v6277_v7, %v6405_v11  ;;  %v6278_v56 = vadd.f32 %v9154_v41, %v6262_v17  ;;  %p9211_p7 = pnand %p9210_p3, %p11977_p11  ;;  %p9218_p13 = por %p9217_p12, %p9216_p10 }
 0x76c   : > { %6615 = vst [vmem:[%s11428_s20 + $0xb0] sm:$0xff] %v6421_v62  ;;  %v6151_v28 = vpop.trf.xlu0 }
 0x76d   : > { %v6263_v39 = vadd.f32 %v11641_v6, %v6151_v28  ;;  %v6392_v32 = vpop.permute.xlu1 %6391  ;;  %vm6294_vm15 = vcmp.gt.f32.partialorder %v6278_v56, 0.0  ;;  %p9212_p9 = pneg %p9211_p7 }
 0x76f   : > { %v6279_v50 = vadd.f32 %v9146_v9, %v6263_v39  ;;  %p9219_p0 = pnand %p9218_p13, %p9212_p9 }
 0x770   : > { %v6152_v35 = vpop.trf.xlu0 }
 0x771   : > { %vm6295_vm7 = vcmp.gt.f32.partialorder %v6279_v50, 0.0  ;;  %v6407_v0 = vmul.f32 %v6362_v10, %v6279_v50  ;;  %v6264_v44 = vadd.f32 %v11643_v26, %v6152_v35  ;;  %v6397_v1 = vpop.permute.xlu1 %6396 }
 0x773   : > { %v6423_v33 = vsel %vm6295_vm7, %v6279_v50, %v6407_v0  ;;  %v6280_v20 = vadd.f32 %v9147_v30, %v6264_v44 }
 0x774   : > { %6617 = vst [vmem:[%s11428_s20 + $0xc0] sm:$0xff] %v6423_v33  ;;  %v6153_v61 = vpop.trf.xlu0 }
 0x775   : > { %vm6296_vm8 = vcmp.gt.f32.partialorder %v6280_v20, 0.0  ;;  %v6408_v6 = vmul.f32 %v6367_v31, %v6280_v20  ;;  %v6265_v36 = vadd.f32 %v11645_v63, %v6153_v61 }
 0x777   : > { %v6424_v58 = vsel %vm6296_vm8, %v6280_v20, %v6408_v6  ;;  %v6281_v48 = vadd.f32 %v9148_v25, %v6265_v36 }
 0x778   : > { %6618 = vst [vmem:[%s11428_s20 + $0xc8] sm:$0xff] %v6424_v58  ;;  %v6154_v38 = vpop.trf.xlu0 }
 0x779   : > { %vm6297_vm9 = vcmp.gt.f32.partialorder %v6281_v48, 0.0  ;;  %v6409_v26 = vmul.f32 %v6372_v54, %v6281_v48  ;;  %v6266_v29 = vadd.f32 %v11647_v49, %v6154_v38 }
 0x77b   : > { %v6425_v24 = vsel %vm6297_vm9, %v6281_v48, %v6409_v26  ;;  %v6282_v52 = vadd.f32 %v9149_v43, %v6266_v29 }
 0x77c   : > { %6619 = vst [vmem:[%s11428_s20 + $0xd0] sm:$0xff] %v6425_v24  ;;  %v6155_v53 = vpop.trf.xlu0 }
 0x77d   : > { %vm6298_vm10 = vcmp.gt.f32.partialorder %v6282_v52, 0.0  ;;  %v6410_v63 = vmul.f32 %v6377_v4, %v6282_v52  ;;  %v6267_v34 = vadd.f32 %v11649_v19, %v6155_v53 }
 0x77f   : > { %v6426_v5 = vsel %vm6298_vm10, %v6282_v52, %v6410_v63  ;;  %v6283_v16 = vadd.f32 %v9150_v18, %v6267_v34 }
 0x780   : > { %6620 = vst [vmem:[%s11428_s20 + $0xd8] sm:$0xff] %v6426_v5  ;;  %v6156_v60 = vpop.trf.xlu0 }
 0x781   : > { %vm6299_vm11 = vcmp.gt.f32.partialorder %v6283_v16, 0.0  ;;  %v6411_v49 = vmul.f32 %v6382_v27, %v6283_v16  ;;  %v6268_v37 = vadd.f32 %v11651_v21, %v6156_v60 }
 0x783   : > { %v6427_v47 = vsel %vm6299_vm11, %v6283_v16, %v6411_v49  ;;  %v6284_v51 = vadd.f32 %v9151_v8, %v6268_v37 }
 0x784   : > { %6621 = vst [vmem:[%s11428_s20 + $0xe0] sm:$0xff] %v6427_v47  ;;  %v6157_v46 = vpop.trf.xlu0 }
 0x785   : > { %vm6300_vm12 = vcmp.gt.f32.partialorder %v6284_v51, 0.0  ;;  %v6412_v19 = vmul.f32 %v6387_v23, %v6284_v51  ;;  %v6269_v13 = vadd.f32 %v11653_v3, %v6157_v46 }
 0x787   : > { %v6428_v14 = vsel %vm6300_vm12, %v6284_v51, %v6412_v19  ;;  %v6285_v45 = vadd.f32 %v9152_v22, %v6269_v13 }
 0x788   : > { %6622 = vst [vmem:[%s11428_s20 + $0xe8] sm:$0xff] %v6428_v14  ;;  %v6158_v42 = vpop.trf.xlu0 }
 0x789   : > { %vm6301_vm13 = vcmp.gt.f32.partialorder %v6285_v45, 0.0  ;;  %v6413_v21 = vmul.f32 %v6392_v32, %v6285_v45  ;;  %v6270_v10 = vadd.f32 %v11655_v59, %v6158_v42 }
 0x78b   : > { %v6429_v55 = vsel %vm6301_vm13, %v6285_v45, %v6413_v21  ;;  %v6286_v2 = vadd.f32 %v9153_v40, %v6270_v10 }
 0x78c   : > { %6623 = vst [vmem:[%s11428_s20 + $0xf0] sm:$0xff] %v6429_v55 }
 0x78d   : > { %vm6302_vm14 = vcmp.gt.f32.partialorder %v6286_v2, 0.0  ;;  %v6414_v3 = vmul.f32 %v6397_v1, %v6286_v2 }
 0x78f   : > { %v6430_v15 = vsel %vm6302_vm14, %v6286_v2, %v6414_v3 }
 0x790   : > { %6624 = vst [vmem:[%s11428_s20 + $0xf8] sm:$0xff] %v6430_v15 }
 0x7b0   : > { %v6357_v59 = vpop.permute.xlu0 %6356 }
 0x7b1   : > { %v6406_v7 = vmul.f32 %v6357_v59, %v6278_v56 }
 0x7b3   : > { %v6422_v31 = vsel %vm6294_vm15, %v6278_v56, %v6406_v7 }
 0x7b4   : > { %6616 = vst [vmem:[%s11428_s20 + $0xb8] sm:$0xff] %v6422_v31 }
 0x7b5   : > { %9222 = shalt.err (!%p9219_p0)
}
 0x7b6   : > { %s9223_s20 = scalar_lea.hbm %s11711_s22, 4096  ;;  %s9227_s16 = scalar_lea.hbm %s11766_s9, 8192 }
 0x7b7   : > { %p9224_p5 = scmp.ne.s32.totalorder %s11711_s22, %s9223_s20  ;;  %p9228_p4 = scmp.lt.s32.totalorder %s11711_s22, %s11766_s9 }
 0x7b8   : > { %p9229_p6 = scmp.lt.s32.totalorder %s9227_s16, %s9223_s20 }
 0x7b9   : > { %p9225_p2 = pnand %p9224_p5, %p11977_p11 }
 0x7ba   : > { %p9230_p8 = por %p9229_p6, %p9228_p4 }
 0x7bb   : > { %p9226_p1 = pneg %p9225_p2 }
 0x7bd   : > { %p9231_p3 = pnand %p9230_p8, %p9226_p1 }
 0x7bf   : > { %9234 = shalt.err (!%p9231_p3)
}
 0x7c0   : > { %s9287_s4 = smov 128   ;;  %s9288_s15 = smov 8  }
 0x7c1   : > { %8929 = dma.vmem_to_hbm [thread:$0]  (%p11977_p11), %s11713_s27, 4096, %s11711_s22, %s6449_s28, %s9287_s4, %s9287_s4, %s9288_s15  }
 0x7c2 PF: > { %s11978_s23 = sld [smem:[#allocation12_spill]]  ;;  %s6478_s13 = sand.u32 1, %s9265_s30  }
 0x7c3   : > { %p11980_p9 = scmp.ge.s32.totalorder %s9277_s12, 2  ;;  %s6479_s21 = scalar_lea.sflag [#allocation5], %s6478_s13 }
 0x7c8   : > { %p11979_p7 = scmp.ne.s32.totalorder %s11978_s23, 0 }
 0x7ca   : > { %p8940_p10 = pnand %p11980_p9, %p11979_p7 }
 0x7cc   : > { %p8941_p12 = pneg %p8940_p10 }
 0x7ce   : > { %9260 = dma.done.wait (%p8941_p12), %s6479_s21, 4096  }
 0x7cf   : > { %9262 = vsyncadd (%p8941_p12), %s6479_s21, 4294963200  ;;  %s11981_s12 = sld [smem:[#allocation13_spill]]  ;;  %s11982_s30 = smov %s9269_s10 }
 0x7d0   : > { %s11983_s10 = smov %s9273_s11  ;;  %s11984_s11 = smov %s9413_s29 }
 0x7d5   : > { %p23_p13 = scmp.ge.s32.totalorder %s11981_s12, 4  }
 0x7d7   :  { %25 = sbr.rel (!%p23_p13) target bundleno = 8 (0x8), region = 117 }
 0x7dc   :  { %6484 = vsyncpa [#allocation4], 1 }
 0x7dd   :  { %6486 = vsyncpa [#allocation4 + $0x1], 1 }
 0x7de   :  { %6487 = vsyncpa [#allocation7], 1 }
 0x7df   :  { %6488 = vsyncpa [#allocation5], 1 }
 0x7e0   :  { %6490 = vsyncpa [#allocation5 + $0x1], 1 }

</bundles_post_ra>
